<compile_context>
chip_gen: v5e
topology: v5e:2x2
jax: 0.10.0
libtpu: 0.0.40
codegen_flags: <defaults>
</compile_context>

<pallas_src>
import jax
import jax.numpy as jnp
from jax.experimental import pallas as pl
from jax.experimental.pallas import tpu as pltpu


def gru_kernel(x_ref, wih_ref, whh_ref, bih_ref, bhn_ref,
               wlin_ref, blin_ref, out_ref):
    """Whole-sequence GRU + final Linear, fully VMEM-resident.

    x_ref    : (T*Bp, 1)   time-major input, batch zero-padded to Bp sublanes
    wih_ref  : (1, 3*Hp)   fused input->hidden weights, gate order (r, n, z)
    whh_ref  : (Hp, 3*Hp)  fused hidden->hidden weights, bf16, zero-padded
    bih_ref  : (1, 3*Hp)   effective biases: [b_ir+b_hr, b_in, b_iz+b_hz]
    bhn_ref  : (1, Hp)     hidden bias of the n gate (kept inside r * (.))
    wlin_ref : (Hp, O)     linear weight (transposed, zero-padded rows)
    blin_ref : (1, O)      linear bias
    out_ref  : (Bp, O)     output = linear(h_T)  (caller slices [:B])
    """
    Bp = out_ref.shape[0]
    TB = x_ref.shape[0]
    T = TB // Bp
    Hp = whh_ref.shape[0]

    # Input projection for every timestep: K == 1, so this is a pure VPU
    # broadcast-multiply (no MXU). Constant biases folded in here.
    gi_all = x_ref[...] * wih_ref[...] + bih_ref[...]          # (T*Bp, 3*Hp)

    # Load the fused recurrent weight slab (bf16) and broadcast the n-gate
    # hidden bias once, outside the loop (JAX does not CSE broadcasts).
    whh = whh_ref[...]                                         # (Hp, 3*Hp) bf16
    bhn = jnp.broadcast_to(bhn_ref[...], (Bp, Hp))             # (Bp, Hp)

    def sig(a):
        # single-EUP sigmoid: sigmoid(a) == 0.5 * tanh(0.5 * a) + 0.5
        return 0.5 * jnp.tanh(0.5 * a) + 0.5

    # Serial recurrence, fully unrolled (T is a small static constant).
    # Exactly one fused bf16 MXU matmul per timestep on the critical path.
    h = jnp.zeros((Bp, Hp), dtype=jnp.float32)
    for t in range(T):
        gi = gi_all[t * Bp:(t + 1) * Bp, :]                    # aligned free view
        gh = jnp.dot(h.astype(jnp.bfloat16), whh,
                     preferred_element_type=jnp.float32)       # (Bp, 3*Hp)
        # Gate column order (r, n, z): r/n feed the dependent EUP chain first,
        # z (only needed for the final blend) is popped from the MXU last.
        r = sig(gi[:, 0:Hp] + gh[:, 0:Hp])
        n = jnp.tanh(gi[:, Hp:2 * Hp] + r * (gh[:, Hp:2 * Hp] + bhn))
        z = sig(gi[:, 2 * Hp:3 * Hp] + gh[:, 2 * Hp:3 * Hp])
        h = (1.0 - z) * n + z * h

    # Final Linear on the last hidden state (padded rows of wlin are zero).
    out_ref[...] = (jnp.dot(h, wlin_ref[...],
                            preferred_element_type=jnp.float32)
                    + blin_ref[...])


@jax.jit
def model_gru_forward(x, wih, whh, bih, bhn, wlin, blin):
    """x: (B, T, I) batch-first, same as PyTorch. Returns (B, O)."""
    B, T, I = x.shape
    O = wlin.shape[1]
    Bp = max(8, ((B + 7) // 8) * 8)        # pad batch to a sublane multiple

    # Time-major, batch zero-padded to Bp, flattened: row index = t*Bp + b.
    xp = jnp.zeros((T, Bp, I), x.dtype).at[:, :B, :].set(
        jnp.transpose(x, (1, 0, 2)))
    x2d = xp.reshape(T * Bp, I)

    vmem = pl.BlockSpec(memory_space=pltpu.MemorySpace.VMEM)
    out = pl.pallas_call(
        gru_kernel,
        out_shape=jax.ShapeDtypeStruct((Bp, O), jnp.float32),
        in_specs=[vmem] * 7,
        out_specs=vmem,
    )(x2d, wih, whh, bih, bhn, wlin, blin)
    return out[:B]


def pack_params(torch_params):
    """Repack PyTorch-layout GRU/Linear params into fused, padded kernel slabs."""
    weight_ih, weight_hh, bias_ih, bias_hh, lin_w, lin_b = torch_params
    H = weight_hh.shape[1]
    O = lin_w.shape[0]
    Hp = ((H + 127) // 128) * 128          # zero-pad hidden dim to lane multiple

    W_ir, W_iz, W_in = jnp.split(weight_ih, 3, axis=0)   # (H, I) each
    W_hr, W_hz, W_hn = jnp.split(weight_hh, 3, axis=0)   # (H, H) each
    b_ir, b_iz, b_in = jnp.split(bias_ih, 3)
    b_hr, b_hz, b_hn = jnp.split(bias_hh, 3)

    def pad_cols(a):     # (rows, H) -> (rows, Hp)
        return jnp.pad(a, ((0, 0), (0, Hp - H)))

    def pad_vec(b):      # (H,) -> (Hp,)
        return jnp.pad(b, (0, Hp - H))

    def pad_hh(W):       # (H, H) torch layout -> transposed (Hp, Hp), zero-padded
        return jnp.pad(W.T, ((0, Hp - H), (0, Hp - H)))

    # Fused weights, gate order (r, n, z) along lanes (z last -> popped last).
    wih = jnp.concatenate(
        [pad_cols(W_ir.T), pad_cols(W_in.T), pad_cols(W_iz.T)], axis=1)      # (I, 3*Hp)
    whh = jnp.concatenate(
        [pad_hh(W_hr), pad_hh(W_hn), pad_hh(W_hz)], axis=1
    ).astype(jnp.bfloat16)                                                   # (Hp, 3*Hp) bf16
    # Effective biases: fold b_hr / b_hz into the hoisted input projection.
    bih = jnp.concatenate(
        [pad_vec(b_ir + b_hr), pad_vec(b_in), pad_vec(b_iz + b_hz)]
    ).reshape(1, 3 * Hp)
    bhn = pad_vec(b_hn).reshape(1, Hp)
    # Linear layer (padded contraction dim; padded rows are zero), kept f32.
    wlin = jnp.pad(lin_w.T, ((0, Hp - H), (0, 0)))       # (Hp, O)
    blin = lin_b.reshape(1, O)
    return wih, whh, bih, bhn, wlin, blin


def init_params(key, input_size, hidden_size, output_size):
    """Deterministic init matching PyTorch shapes (uniform(-1/sqrt(H), 1/sqrt(H)))."""
    ks = jax.random.split(key, 6)
    H, I, O = hidden_size, input_size, output_size
    bound = 1.0 / jnp.sqrt(jnp.float32(H))

    def u(k, shape):
        return jax.random.uniform(k, shape, jnp.float32, -bound, bound)

    weight_ih = u(ks[0], (3 * H, I))   # rows: [r; z; n], PyTorch layout
    weight_hh = u(ks[1], (3 * H, H))
    bias_ih = u(ks[2], (3 * H,))
    bias_hh = u(ks[3], (3 * H,))
    lin_w = u(ks[4], (O, H))
    lin_b = u(ks[5], (O,))

    torch_params = (weight_ih, weight_hh, bias_ih, bias_hh, lin_w, lin_b)
    kernel_params = pack_params(torch_params)
    return torch_params, kernel_params


def reference_forward(x, torch_params):
    """Pure-JAX f32 reference replicating PyTorch nn.GRU + nn.Linear semantics."""
    weight_ih, weight_hh, bias_ih, bias_hh, lin_w, lin_b = torch_params
    B, T, I = x.shape
    H = weight_hh.shape[1]
    W_ir, W_iz, W_in = jnp.split(weight_ih, 3, axis=0)
    W_hr, W_hz, W_hn = jnp.split(weight_hh, 3, axis=0)
    b_ir, b_iz, b_in = jnp.split(bias_ih, 3)
    b_hr, b_hz, b_hn = jnp.split(bias_hh, 3)

    def cell(h, x_t):
        r = jax.nn.sigmoid(x_t @ W_ir.T + b_ir + h @ W_hr.T + b_hr)
        z = jax.nn.sigmoid(x_t @ W_iz.T + b_iz + h @ W_hz.T + b_hz)
        n = jnp.tanh(x_t @ W_in.T + b_in + r * (h @ W_hn.T + b_hn))
        h_new = (1.0 - z) * n + z * h
        return h_new, None

    h0 = jnp.zeros((B, H), jnp.float32)
    hT, _ = jax.lax.scan(cell, h0, jnp.transpose(x, (1, 0, 2)))
    return hT @ lin_w.T + lin_b


if __name__ == "__main__":
    # Shapes implied by the module: inputs (batch, seq, input_size=1),
    # hidden_size=300 (module default), output_size=4.
    B, T, I, H, O = 2, 8, 1, 300, 4

    key = jax.random.PRNGKey(0)
    k_x, k_p = jax.random.split(key)
    x = jax.random.normal(k_x, (B, T, I), jnp.float32)

    torch_params, kernel_params = init_params(k_p, I, H, O)

    out = model_gru_forward(x, *kernel_params)
    out = jax.block_until_ready(out)
    assert out.shape == (B, O), out.shape

    ref = reference_forward(x, torch_params)
    # Tolerance accounts for the bf16 recurrent matmul (f32 accumulation);
    # observed/expected deviation is ~1e-4 absolute on outputs of O(0.1).
    assert jnp.allclose(out, ref, rtol=2e-3, atol=2e-3), (out, ref)

    print("KERNEL_OK")
</pallas_src>

<mosaic_0001>
module attributes {stable_mosaic.version = 11 : i64} {
  func.func @gru_kernel(%arg0: memref<64x1xf32, #tpu.memory_space<vmem>>, %arg1: memref<1x1152xf32, #tpu.memory_space<vmem>>, %arg2: memref<384x1152xbf16, #tpu.memory_space<vmem>>, %arg3: memref<1x1152xf32, #tpu.memory_space<vmem>>, %arg4: memref<1x384xf32, #tpu.memory_space<vmem>>, %arg5: memref<384x4xf32, #tpu.memory_space<vmem>>, %arg6: memref<1x4xf32, #tpu.memory_space<vmem>>, %arg7: memref<8x4xf32, #tpu.memory_space<vmem>>) attributes {dimension_semantics = [], scalar_prefetch = 0 : i64, scratch_operands = 0 : i64, tpu.core_type = #tpu.core_type<tc>} {
    %c0 = arith.constant 0 : index
    %c0_0 = arith.constant 0 : index
    %0 = vector.load %arg0[%c0, %c0_0] : memref<64x1xf32, #tpu.memory_space<vmem>>, vector<64x1xf32>
    %c0_1 = arith.constant 0 : index
    %c0_2 = arith.constant 0 : index
    %1 = vector.load %arg1[%c0_1, %c0_2] : memref<1x1152xf32, #tpu.memory_space<vmem>>, vector<1x1152xf32>
    %2 = vector.broadcast %0 : vector<64x1xf32> to vector<64x1152xf32>
    %3 = vector.broadcast %1 : vector<1x1152xf32> to vector<64x1152xf32>
    %4 = arith.mulf %2, %3 : vector<64x1152xf32>
    %c0_3 = arith.constant 0 : index
    %c0_4 = arith.constant 0 : index
    %5 = vector.load %arg3[%c0_3, %c0_4] : memref<1x1152xf32, #tpu.memory_space<vmem>>, vector<1x1152xf32>
    %6 = vector.broadcast %5 : vector<1x1152xf32> to vector<64x1152xf32>
    %7 = arith.addf %4, %6 : vector<64x1152xf32>
    %c0_5 = arith.constant 0 : index
    %c0_6 = arith.constant 0 : index
    %8 = vector.load %arg2[%c0_5, %c0_6] : memref<384x1152xbf16, #tpu.memory_space<vmem>>, vector<384x1152xbf16>
    %c0_7 = arith.constant 0 : index
    %c0_8 = arith.constant 0 : index
    %9 = vector.load %arg4[%c0_7, %c0_8] : memref<1x384xf32, #tpu.memory_space<vmem>>, vector<1x384xf32>
    %10 = vector.shape_cast %9 : vector<1x384xf32> to vector<1x384xf32>
    %11 = vector.broadcast %10 : vector<1x384xf32> to vector<8x384xf32>
    %cst = arith.constant 0.000000e+00 : f32
    %12 = vector.broadcast %cst : f32 to vector<8x384xf32>
    %13 = vector.extract_strided_slice %7 {offsets = [0, 0], sizes = [8, 1152], strides = [1, 1]} : vector<64x1152xf32> to vector<8x1152xf32>
    %14 = arith.truncf %12 : vector<8x384xf32> to vector<8x384xbf16>
    %cst_9 = arith.constant dense<0.000000e+00> : vector<8x1152xf32>
    %15 = tpu.matmul %14, %8, %cst_9 {dimension_numbers = #tpu.dot_dimension_numbers<[1], [0], [0], [1], [0, 0, 1, 1], [], []>} : vector<8x384xbf16>, vector<384x1152xbf16>, vector<8x1152xf32> -> vector<8x1152xf32>
    %16 = vector.extract_strided_slice %13 {offsets = [0, 0], sizes = [8, 384], strides = [1, 1]} : vector<8x1152xf32> to vector<8x384xf32>
    %17 = vector.extract_strided_slice %15 {offsets = [0, 0], sizes = [8, 384], strides = [1, 1]} : vector<8x1152xf32> to vector<8x384xf32>
    %18 = arith.addf %16, %17 : vector<8x384xf32>
    %cst_10 = arith.constant 5.000000e-01 : f32
    %19 = vector.broadcast %cst_10 : f32 to vector<8x384xf32>
    %20 = arith.mulf %19, %18 : vector<8x384xf32>
    %21 = math.tanh %20 : vector<8x384xf32>
    %cst_11 = arith.constant 5.000000e-01 : f32
    %22 = vector.broadcast %cst_11 : f32 to vector<8x384xf32>
    %23 = arith.mulf %22, %21 : vector<8x384xf32>
    %cst_12 = arith.constant 5.000000e-01 : f32
    %24 = vector.broadcast %cst_12 : f32 to vector<8x384xf32>
    %25 = arith.addf %23, %24 : vector<8x384xf32>
    %26 = vector.extract_strided_slice %13 {offsets = [0, 384], sizes = [8, 384], strides = [1, 1]} : vector<8x1152xf32> to vector<8x384xf32>
    %27 = vector.extract_strided_slice %15 {offsets = [0, 384], sizes = [8, 384], strides = [1, 1]} : vector<8x1152xf32> to vector<8x384xf32>
    %28 = arith.addf %27, %11 : vector<8x384xf32>
    %29 = arith.mulf %25, %28 : vector<8x384xf32>
    %30 = arith.addf %26, %29 : vector<8x384xf32>
    %31 = math.tanh %30 : vector<8x384xf32>
    %32 = vector.extract_strided_slice %13 {offsets = [0, 768], sizes = [8, 384], strides = [1, 1]} : vector<8x1152xf32> to vector<8x384xf32>
    %33 = vector.extract_strided_slice %15 {offsets = [0, 768], sizes = [8, 384], strides = [1, 1]} : vector<8x1152xf32> to vector<8x384xf32>
    %34 = arith.addf %32, %33 : vector<8x384xf32>
    %cst_13 = arith.constant 5.000000e-01 : f32
    %35 = vector.broadcast %cst_13 : f32 to vector<8x384xf32>
    %36 = arith.mulf %35, %34 : vector<8x384xf32>
    %37 = math.tanh %36 : vector<8x384xf32>
    %cst_14 = arith.constant 5.000000e-01 : f32
    %38 = vector.broadcast %cst_14 : f32 to vector<8x384xf32>
    %39 = arith.mulf %38, %37 : vector<8x384xf32>
    %cst_15 = arith.constant 5.000000e-01 : f32
    %40 = vector.broadcast %cst_15 : f32 to vector<8x384xf32>
    %41 = arith.addf %39, %40 : vector<8x384xf32>
    %cst_16 = arith.constant 1.000000e+00 : f32
    %42 = vector.broadcast %cst_16 : f32 to vector<8x384xf32>
    %43 = arith.subf %42, %41 : vector<8x384xf32>
    %44 = arith.mulf %43, %31 : vector<8x384xf32>
    %45 = arith.mulf %41, %12 : vector<8x384xf32>
    %46 = arith.addf %44, %45 : vector<8x384xf32>
    %47 = vector.extract_strided_slice %7 {offsets = [8, 0], sizes = [8, 1152], strides = [1, 1]} : vector<64x1152xf32> to vector<8x1152xf32>
    %48 = arith.truncf %46 : vector<8x384xf32> to vector<8x384xbf16>
    %cst_17 = arith.constant dense<0.000000e+00> : vector<8x1152xf32>
    %49 = tpu.matmul %48, %8, %cst_17 {dimension_numbers = #tpu.dot_dimension_numbers<[1], [0], [0], [1], [0, 0, 1, 1], [], []>} : vector<8x384xbf16>, vector<384x1152xbf16>, vector<8x1152xf32> -> vector<8x1152xf32>
    %50 = vector.extract_strided_slice %47 {offsets = [0, 0], sizes = [8, 384], strides = [1, 1]} : vector<8x1152xf32> to vector<8x384xf32>
    %51 = vector.extract_strided_slice %49 {offsets = [0, 0], sizes = [8, 384], strides = [1, 1]} : vector<8x1152xf32> to vector<8x384xf32>
    %52 = arith.addf %50, %51 : vector<8x384xf32>
    %cst_18 = arith.constant 5.000000e-01 : f32
    %53 = vector.broadcast %cst_18 : f32 to vector<8x384xf32>
    %54 = arith.mulf %53, %52 : vector<8x384xf32>
    %55 = math.tanh %54 : vector<8x384xf32>
    %cst_19 = arith.constant 5.000000e-01 : f32
    %56 = vector.broadcast %cst_19 : f32 to vector<8x384xf32>
    %57 = arith.mulf %56, %55 : vector<8x384xf32>
    %cst_20 = arith.constant 5.000000e-01 : f32
    %58 = vector.broadcast %cst_20 : f32 to vector<8x384xf32>
    %59 = arith.addf %57, %58 : vector<8x384xf32>
    %60 = vector.extract_strided_slice %47 {offsets = [0, 384], sizes = [8, 384], strides = [1, 1]} : vector<8x1152xf32> to vector<8x384xf32>
    %61 = vector.extract_strided_slice %49 {offsets = [0, 384], sizes = [8, 384], strides = [1, 1]} : vector<8x1152xf32> to vector<8x384xf32>
    %62 = arith.addf %61, %11 : vector<8x384xf32>
    %63 = arith.mulf %59, %62 : vector<8x384xf32>
    %64 = arith.addf %60, %63 : vector<8x384xf32>
    %65 = math.tanh %64 : vector<8x384xf32>
    %66 = vector.extract_strided_slice %47 {offsets = [0, 768], sizes = [8, 384], strides = [1, 1]} : vector<8x1152xf32> to vector<8x384xf32>
    %67 = vector.extract_strided_slice %49 {offsets = [0, 768], sizes = [8, 384], strides = [1, 1]} : vector<8x1152xf32> to vector<8x384xf32>
    %68 = arith.addf %66, %67 : vector<8x384xf32>
    %cst_21 = arith.constant 5.000000e-01 : f32
    %69 = vector.broadcast %cst_21 : f32 to vector<8x384xf32>
    %70 = arith.mulf %69, %68 : vector<8x384xf32>
    %71 = math.tanh %70 : vector<8x384xf32>
    %cst_22 = arith.constant 5.000000e-01 : f32
    %72 = vector.broadcast %cst_22 : f32 to vector<8x384xf32>
    %73 = arith.mulf %72, %71 : vector<8x384xf32>
    %cst_23 = arith.constant 5.000000e-01 : f32
    %74 = vector.broadcast %cst_23 : f32 to vector<8x384xf32>
    %75 = arith.addf %73, %74 : vector<8x384xf32>
    %cst_24 = arith.constant 1.000000e+00 : f32
    %76 = vector.broadcast %cst_24 : f32 to vector<8x384xf32>
    %77 = arith.subf %76, %75 : vector<8x384xf32>
    %78 = arith.mulf %77, %65 : vector<8x384xf32>
    %79 = arith.mulf %75, %46 : vector<8x384xf32>
    %80 = arith.addf %78, %79 : vector<8x384xf32>
    %81 = vector.extract_strided_slice %7 {offsets = [16, 0], sizes = [8, 1152], strides = [1, 1]} : vector<64x1152xf32> to vector<8x1152xf32>
    %82 = arith.truncf %80 : vector<8x384xf32> to vector<8x384xbf16>
    %cst_25 = arith.constant dense<0.000000e+00> : vector<8x1152xf32>
    %83 = tpu.matmul %82, %8, %cst_25 {dimension_numbers = #tpu.dot_dimension_numbers<[1], [0], [0], [1], [0, 0, 1, 1], [], []>} : vector<8x384xbf16>, vector<384x1152xbf16>, vector<8x1152xf32> -> vector<8x1152xf32>
    %84 = vector.extract_strided_slice %81 {offsets = [0, 0], sizes = [8, 384], strides = [1, 1]} : vector<8x1152xf32> to vector<8x384xf32>
    %85 = vector.extract_strided_slice %83 {offsets = [0, 0], sizes = [8, 384], strides = [1, 1]} : vector<8x1152xf32> to vector<8x384xf32>
    %86 = arith.addf %84, %85 : vector<8x384xf32>
    %cst_26 = arith.constant 5.000000e-01 : f32
    %87 = vector.broadcast %cst_26 : f32 to vector<8x384xf32>
    %88 = arith.mulf %87, %86 : vector<8x384xf32>
    %89 = math.tanh %88 : vector<8x384xf32>
    %cst_27 = arith.constant 5.000000e-01 : f32
    %90 = vector.broadcast %cst_27 : f32 to vector<8x384xf32>
    %91 = arith.mulf %90, %89 : vector<8x384xf32>
    %cst_28 = arith.constant 5.000000e-01 : f32
    %92 = vector.broadcast %cst_28 : f32 to vector<8x384xf32>
    %93 = arith.addf %91, %92 : vector<8x384xf32>
    %94 = vector.extract_strided_slice %81 {offsets = [0, 384], sizes = [8, 384], strides = [1, 1]} : vector<8x1152xf32> to vector<8x384xf32>
    %95 = vector.extract_strided_slice %83 {offsets = [0, 384], sizes = [8, 384], strides = [1, 1]} : vector<8x1152xf32> to vector<8x384xf32>
    %96 = arith.addf %95, %11 : vector<8x384xf32>
    %97 = arith.mulf %93, %96 : vector<8x384xf32>
    %98 = arith.addf %94, %97 : vector<8x384xf32>
    %99 = math.tanh %98 : vector<8x384xf32>
    %100 = vector.extract_strided_slice %81 {offsets = [0, 768], sizes = [8, 384], strides = [1, 1]} : vector<8x1152xf32> to vector<8x384xf32>
    %101 = vector.extract_strided_slice %83 {offsets = [0, 768], sizes = [8, 384], strides = [1, 1]} : vector<8x1152xf32> to vector<8x384xf32>
    %102 = arith.addf %100, %101 : vector<8x384xf32>
    %cst_29 = arith.constant 5.000000e-01 : f32
    %103 = vector.broadcast %cst_29 : f32 to vector<8x384xf32>
    %104 = arith.mulf %103, %102 : vector<8x384xf32>
    %105 = math.tanh %104 : vector<8x384xf32>
    %cst_30 = arith.constant 5.000000e-01 : f32
    %106 = vector.broadcast %cst_30 : f32 to vector<8x384xf32>
    %107 = arith.mulf %106, %105 : vector<8x384xf32>
    %cst_31 = arith.constant 5.000000e-01 : f32
    %108 = vector.broadcast %cst_31 : f32 to vector<8x384xf32>
    %109 = arith.addf %107, %108 : vector<8x384xf32>
    %cst_32 = arith.constant 1.000000e+00 : f32
    %110 = vector.broadcast %cst_32 : f32 to vector<8x384xf32>
    %111 = arith.subf %110, %109 : vector<8x384xf32>
    %112 = arith.mulf %111, %99 : vector<8x384xf32>
    %113 = arith.mulf %109, %80 : vector<8x384xf32>
    %114 = arith.addf %112, %113 : vector<8x384xf32>
    %115 = vector.extract_strided_slice %7 {offsets = [24, 0], sizes = [8, 1152], strides = [1, 1]} : vector<64x1152xf32> to vector<8x1152xf32>
    %116 = arith.truncf %114 : vector<8x384xf32> to vector<8x384xbf16>
    %cst_33 = arith.constant dense<0.000000e+00> : vector<8x1152xf32>
    %117 = tpu.matmul %116, %8, %cst_33 {dimension_numbers = #tpu.dot_dimension_numbers<[1], [0], [0], [1], [0, 0, 1, 1], [], []>} : vector<8x384xbf16>, vector<384x1152xbf16>, vector<8x1152xf32> -> vector<8x1152xf32>
    %118 = vector.extract_strided_slice %115 {offsets = [0, 0], sizes = [8, 384], strides = [1, 1]} : vector<8x1152xf32> to vector<8x384xf32>
    %119 = vector.extract_strided_slice %117 {offsets = [0, 0], sizes = [8, 384], strides = [1, 1]} : vector<8x1152xf32> to vector<8x384xf32>
    %120 = arith.addf %118, %119 : vector<8x384xf32>
    %cst_34 = arith.constant 5.000000e-01 : f32
    %121 = vector.broadcast %cst_34 : f32 to vector<8x384xf32>
    %122 = arith.mulf %121, %120 : vector<8x384xf32>
    %123 = math.tanh %122 : vector<8x384xf32>
    %cst_35 = arith.constant 5.000000e-01 : f32
    %124 = vector.broadcast %cst_35 : f32 to vector<8x384xf32>
    %125 = arith.mulf %124, %123 : vector<8x384xf32>
    %cst_36 = arith.constant 5.000000e-01 : f32
    %126 = vector.broadcast %cst_36 : f32 to vector<8x384xf32>
    %127 = arith.addf %125, %126 : vector<8x384xf32>
    %128 = vector.extract_strided_slice %115 {offsets = [0, 384], sizes = [8, 384], strides = [1, 1]} : vector<8x1152xf32> to vector<8x384xf32>
    %129 = vector.extract_strided_slice %117 {offsets = [0, 384], sizes = [8, 384], strides = [1, 1]} : vector<8x1152xf32> to vector<8x384xf32>
    %130 = arith.addf %129, %11 : vector<8x384xf32>
    %131 = arith.mulf %127, %130 : vector<8x384xf32>
    %132 = arith.addf %128, %131 : vector<8x384xf32>
    %133 = math.tanh %132 : vector<8x384xf32>
    %134 = vector.extract_strided_slice %115 {offsets = [0, 768], sizes = [8, 384], strides = [1, 1]} : vector<8x1152xf32> to vector<8x384xf32>
    %135 = vector.extract_strided_slice %117 {offsets = [0, 768], sizes = [8, 384], strides = [1, 1]} : vector<8x1152xf32> to vector<8x384xf32>
    %136 = arith.addf %134, %135 : vector<8x384xf32>
    %cst_37 = arith.constant 5.000000e-01 : f32
    %137 = vector.broadcast %cst_37 : f32 to vector<8x384xf32>
    %138 = arith.mulf %137, %136 : vector<8x384xf32>
    %139 = math.tanh %138 : vector<8x384xf32>
    %cst_38 = arith.constant 5.000000e-01 : f32
    %140 = vector.broadcast %cst_38 : f32 to vector<8x384xf32>
    %141 = arith.mulf %140, %139 : vector<8x384xf32>
    %cst_39 = arith.constant 5.000000e-01 : f32
    %142 = vector.broadcast %cst_39 : f32 to vector<8x384xf32>
    %143 = arith.addf %141, %142 : vector<8x384xf32>
    %cst_40 = arith.constant 1.000000e+00 : f32
    %144 = vector.broadcast %cst_40 : f32 to vector<8x384xf32>
    %145 = arith.subf %144, %143 : vector<8x384xf32>
    %146 = arith.mulf %145, %133 : vector<8x384xf32>
    %147 = arith.mulf %143, %114 : vector<8x384xf32>
    %148 = arith.addf %146, %147 : vector<8x384xf32>
    %149 = vector.extract_strided_slice %7 {offsets = [32, 0], sizes = [8, 1152], strides = [1, 1]} : vector<64x1152xf32> to vector<8x1152xf32>
    %150 = arith.truncf %148 : vector<8x384xf32> to vector<8x384xbf16>
    %cst_41 = arith.constant dense<0.000000e+00> : vector<8x1152xf32>
    %151 = tpu.matmul %150, %8, %cst_41 {dimension_numbers = #tpu.dot_dimension_numbers<[1], [0], [0], [1], [0, 0, 1, 1], [], []>} : vector<8x384xbf16>, vector<384x1152xbf16>, vector<8x1152xf32> -> vector<8x1152xf32>
    %152 = vector.extract_strided_slice %149 {offsets = [0, 0], sizes = [8, 384], strides = [1, 1]} : vector<8x1152xf32> to vector<8x384xf32>
    %153 = vector.extract_strided_slice %151 {offsets = [0, 0], sizes = [8, 384], strides = [1, 1]} : vector<8x1152xf32> to vector<8x384xf32>
    %154 = arith.addf %152, %153 : vector<8x384xf32>
    %cst_42 = arith.constant 5.000000e-01 : f32
    %155 = vector.broadcast %cst_42 : f32 to vector<8x384xf32>
    %156 = arith.mulf %155, %154 : vector<8x384xf32>
    %157 = math.tanh %156 : vector<8x384xf32>
    %cst_43 = arith.constant 5.000000e-01 : f32
    %158 = vector.broadcast %cst_43 : f32 to vector<8x384xf32>
    %159 = arith.mulf %158, %157 : vector<8x384xf32>
    %cst_44 = arith.constant 5.000000e-01 : f32
    %160 = vector.broadcast %cst_44 : f32 to vector<8x384xf32>
    %161 = arith.addf %159, %160 : vector<8x384xf32>
    %162 = vector.extract_strided_slice %149 {offsets = [0, 384], sizes = [8, 384], strides = [1, 1]} : vector<8x1152xf32> to vector<8x384xf32>
    %163 = vector.extract_strided_slice %151 {offsets = [0, 384], sizes = [8, 384], strides = [1, 1]} : vector<8x1152xf32> to vector<8x384xf32>
    %164 = arith.addf %163, %11 : vector<8x384xf32>
    %165 = arith.mulf %161, %164 : vector<8x384xf32>
    %166 = arith.addf %162, %165 : vector<8x384xf32>
    %167 = math.tanh %166 : vector<8x384xf32>
    %168 = vector.extract_strided_slice %149 {offsets = [0, 768], sizes = [8, 384], strides = [1, 1]} : vector<8x1152xf32> to vector<8x384xf32>
    %169 = vector.extract_strided_slice %151 {offsets = [0, 768], sizes = [8, 384], strides = [1, 1]} : vector<8x1152xf32> to vector<8x384xf32>
    %170 = arith.addf %168, %169 : vector<8x384xf32>
    %cst_45 = arith.constant 5.000000e-01 : f32
    %171 = vector.broadcast %cst_45 : f32 to vector<8x384xf32>
    %172 = arith.mulf %171, %170 : vector<8x384xf32>
    %173 = math.tanh %172 : vector<8x384xf32>
    %cst_46 = arith.constant 5.000000e-01 : f32
    %174 = vector.broadcast %cst_46 : f32 to vector<8x384xf32>
    %175 = arith.mulf %174, %173 : vector<8x384xf32>
    %cst_47 = arith.constant 5.000000e-01 : f32
    %176 = vector.broadcast %cst_47 : f32 to vector<8x384xf32>
    %177 = arith.addf %175, %176 : vector<8x384xf32>
    %cst_48 = arith.constant 1.000000e+00 : f32
    %178 = vector.broadcast %cst_48 : f32 to vector<8x384xf32>
    %179 = arith.subf %178, %177 : vector<8x384xf32>
    %180 = arith.mulf %179, %167 : vector<8x384xf32>
    %181 = arith.mulf %177, %148 : vector<8x384xf32>
    %182 = arith.addf %180, %181 : vector<8x384xf32>
    %183 = vector.extract_strided_slice %7 {offsets = [40, 0], sizes = [8, 1152], strides = [1, 1]} : vector<64x1152xf32> to vector<8x1152xf32>
    %184 = arith.truncf %182 : vector<8x384xf32> to vector<8x384xbf16>
    %cst_49 = arith.constant dense<0.000000e+00> : vector<8x1152xf32>
    %185 = tpu.matmul %184, %8, %cst_49 {dimension_numbers = #tpu.dot_dimension_numbers<[1], [0], [0], [1], [0, 0, 1, 1], [], []>} : vector<8x384xbf16>, vector<384x1152xbf16>, vector<8x1152xf32> -> vector<8x1152xf32>
    %186 = vector.extract_strided_slice %183 {offsets = [0, 0], sizes = [8, 384], strides = [1, 1]} : vector<8x1152xf32> to vector<8x384xf32>
    %187 = vector.extract_strided_slice %185 {offsets = [0, 0], sizes = [8, 384], strides = [1, 1]} : vector<8x1152xf32> to vector<8x384xf32>
    %188 = arith.addf %186, %187 : vector<8x384xf32>
    %cst_50 = arith.constant 5.000000e-01 : f32
    %189 = vector.broadcast %cst_50 : f32 to vector<8x384xf32>
    %190 = arith.mulf %189, %188 : vector<8x384xf32>
    %191 = math.tanh %190 : vector<8x384xf32>
    %cst_51 = arith.constant 5.000000e-01 : f32
    %192 = vector.broadcast %cst_51 : f32 to vector<8x384xf32>
    %193 = arith.mulf %192, %191 : vector<8x384xf32>
    %cst_52 = arith.constant 5.000000e-01 : f32
    %194 = vector.broadcast %cst_52 : f32 to vector<8x384xf32>
    %195 = arith.addf %193, %194 : vector<8x384xf32>
    %196 = vector.extract_strided_slice %183 {offsets = [0, 384], sizes = [8, 384], strides = [1, 1]} : vector<8x1152xf32> to vector<8x384xf32>
    %197 = vector.extract_strided_slice %185 {offsets = [0, 384], sizes = [8, 384], strides = [1, 1]} : vector<8x1152xf32> to vector<8x384xf32>
    %198 = arith.addf %197, %11 : vector<8x384xf32>
    %199 = arith.mulf %195, %198 : vector<8x384xf32>
    %200 = arith.addf %196, %199 : vector<8x384xf32>
    %201 = math.tanh %200 : vector<8x384xf32>
    %202 = vector.extract_strided_slice %183 {offsets = [0, 768], sizes = [8, 384], strides = [1, 1]} : vector<8x1152xf32> to vector<8x384xf32>
    %203 = vector.extract_strided_slice %185 {offsets = [0, 768], sizes = [8, 384], strides = [1, 1]} : vector<8x1152xf32> to vector<8x384xf32>
    %204 = arith.addf %202, %203 : vector<8x384xf32>
    %cst_53 = arith.constant 5.000000e-01 : f32
    %205 = vector.broadcast %cst_53 : f32 to vector<8x384xf32>
    %206 = arith.mulf %205, %204 : vector<8x384xf32>
    %207 = math.tanh %206 : vector<8x384xf32>
    %cst_54 = arith.constant 5.000000e-01 : f32
    %208 = vector.broadcast %cst_54 : f32 to vector<8x384xf32>
    %209 = arith.mulf %208, %207 : vector<8x384xf32>
    %cst_55 = arith.constant 5.000000e-01 : f32
    %210 = vector.broadcast %cst_55 : f32 to vector<8x384xf32>
    %211 = arith.addf %209, %210 : vector<8x384xf32>
    %cst_56 = arith.constant 1.000000e+00 : f32
    %212 = vector.broadcast %cst_56 : f32 to vector<8x384xf32>
    %213 = arith.subf %212, %211 : vector<8x384xf32>
    %214 = arith.mulf %213, %201 : vector<8x384xf32>
    %215 = arith.mulf %211, %182 : vector<8x384xf32>
    %216 = arith.addf %214, %215 : vector<8x384xf32>
    %217 = vector.extract_strided_slice %7 {offsets = [48, 0], sizes = [8, 1152], strides = [1, 1]} : vector<64x1152xf32> to vector<8x1152xf32>
    %218 = arith.truncf %216 : vector<8x384xf32> to vector<8x384xbf16>
    %cst_57 = arith.constant dense<0.000000e+00> : vector<8x1152xf32>
    %219 = tpu.matmul %218, %8, %cst_57 {dimension_numbers = #tpu.dot_dimension_numbers<[1], [0], [0], [1], [0, 0, 1, 1], [], []>} : vector<8x384xbf16>, vector<384x1152xbf16>, vector<8x1152xf32> -> vector<8x1152xf32>
    %220 = vector.extract_strided_slice %217 {offsets = [0, 0], sizes = [8, 384], strides = [1, 1]} : vector<8x1152xf32> to vector<8x384xf32>
    %221 = vector.extract_strided_slice %219 {offsets = [0, 0], sizes = [8, 384], strides = [1, 1]} : vector<8x1152xf32> to vector<8x384xf32>
    %222 = arith.addf %220, %221 : vector<8x384xf32>
    %cst_58 = arith.constant 5.000000e-01 : f32
    %223 = vector.broadcast %cst_58 : f32 to vector<8x384xf32>
    %224 = arith.mulf %223, %222 : vector<8x384xf32>
    %225 = math.tanh %224 : vector<8x384xf32>
    %cst_59 = arith.constant 5.000000e-01 : f32
    %226 = vector.broadcast %cst_59 : f32 to vector<8x384xf32>
    %227 = arith.mulf %226, %225 : vector<8x384xf32>
    %cst_60 = arith.constant 5.000000e-01 : f32
    %228 = vector.broadcast %cst_60 : f32 to vector<8x384xf32>
    %229 = arith.addf %227, %228 : vector<8x384xf32>
    %230 = vector.extract_strided_slice %217 {offsets = [0, 384], sizes = [8, 384], strides = [1, 1]} : vector<8x1152xf32> to vector<8x384xf32>
    %231 = vector.extract_strided_slice %219 {offsets = [0, 384], sizes = [8, 384], strides = [1, 1]} : vector<8x1152xf32> to vector<8x384xf32>
    %232 = arith.addf %231, %11 : vector<8x384xf32>
    %233 = arith.mulf %229, %232 : vector<8x384xf32>
    %234 = arith.addf %230, %233 : vector<8x384xf32>
    %235 = math.tanh %234 : vector<8x384xf32>
    %236 = vector.extract_strided_slice %217 {offsets = [0, 768], sizes = [8, 384], strides = [1, 1]} : vector<8x1152xf32> to vector<8x384xf32>
    %237 = vector.extract_strided_slice %219 {offsets = [0, 768], sizes = [8, 384], strides = [1, 1]} : vector<8x1152xf32> to vector<8x384xf32>
    %238 = arith.addf %236, %237 : vector<8x384xf32>
    %cst_61 = arith.constant 5.000000e-01 : f32
    %239 = vector.broadcast %cst_61 : f32 to vector<8x384xf32>
    %240 = arith.mulf %239, %238 : vector<8x384xf32>
    %241 = math.tanh %240 : vector<8x384xf32>
    %cst_62 = arith.constant 5.000000e-01 : f32
    %242 = vector.broadcast %cst_62 : f32 to vector<8x384xf32>
    %243 = arith.mulf %242, %241 : vector<8x384xf32>
    %cst_63 = arith.constant 5.000000e-01 : f32
    %244 = vector.broadcast %cst_63 : f32 to vector<8x384xf32>
    %245 = arith.addf %243, %244 : vector<8x384xf32>
    %cst_64 = arith.constant 1.000000e+00 : f32
    %246 = vector.broadcast %cst_64 : f32 to vector<8x384xf32>
    %247 = arith.subf %246, %245 : vector<8x384xf32>
    %248 = arith.mulf %247, %235 : vector<8x384xf32>
    %249 = arith.mulf %245, %216 : vector<8x384xf32>
    %250 = arith.addf %248, %249 : vector<8x384xf32>
    %251 = vector.extract_strided_slice %7 {offsets = [56, 0], sizes = [8, 1152], strides = [1, 1]} : vector<64x1152xf32> to vector<8x1152xf32>
    %252 = arith.truncf %250 : vector<8x384xf32> to vector<8x384xbf16>
    %cst_65 = arith.constant dense<0.000000e+00> : vector<8x1152xf32>
    %253 = tpu.matmul %252, %8, %cst_65 {dimension_numbers = #tpu.dot_dimension_numbers<[1], [0], [0], [1], [0, 0, 1, 1], [], []>} : vector<8x384xbf16>, vector<384x1152xbf16>, vector<8x1152xf32> -> vector<8x1152xf32>
    %254 = vector.extract_strided_slice %251 {offsets = [0, 0], sizes = [8, 384], strides = [1, 1]} : vector<8x1152xf32> to vector<8x384xf32>
    %255 = vector.extract_strided_slice %253 {offsets = [0, 0], sizes = [8, 384], strides = [1, 1]} : vector<8x1152xf32> to vector<8x384xf32>
    %256 = arith.addf %254, %255 : vector<8x384xf32>
    %cst_66 = arith.constant 5.000000e-01 : f32
    %257 = vector.broadcast %cst_66 : f32 to vector<8x384xf32>
    %258 = arith.mulf %257, %256 : vector<8x384xf32>
    %259 = math.tanh %258 : vector<8x384xf32>
    %cst_67 = arith.constant 5.000000e-01 : f32
    %260 = vector.broadcast %cst_67 : f32 to vector<8x384xf32>
    %261 = arith.mulf %260, %259 : vector<8x384xf32>
    %cst_68 = arith.constant 5.000000e-01 : f32
    %262 = vector.broadcast %cst_68 : f32 to vector<8x384xf32>
    %263 = arith.addf %261, %262 : vector<8x384xf32>
    %264 = vector.extract_strided_slice %251 {offsets = [0, 384], sizes = [8, 384], strides = [1, 1]} : vector<8x1152xf32> to vector<8x384xf32>
    %265 = vector.extract_strided_slice %253 {offsets = [0, 384], sizes = [8, 384], strides = [1, 1]} : vector<8x1152xf32> to vector<8x384xf32>
    %266 = arith.addf %265, %11 : vector<8x384xf32>
    %267 = arith.mulf %263, %266 : vector<8x384xf32>
    %268 = arith.addf %264, %267 : vector<8x384xf32>
    %269 = math.tanh %268 : vector<8x384xf32>
    %270 = vector.extract_strided_slice %251 {offsets = [0, 768], sizes = [8, 384], strides = [1, 1]} : vector<8x1152xf32> to vector<8x384xf32>
    %271 = vector.extract_strided_slice %253 {offsets = [0, 768], sizes = [8, 384], strides = [1, 1]} : vector<8x1152xf32> to vector<8x384xf32>
    %272 = arith.addf %270, %271 : vector<8x384xf32>
    %cst_69 = arith.constant 5.000000e-01 : f32
    %273 = vector.broadcast %cst_69 : f32 to vector<8x384xf32>
    %274 = arith.mulf %273, %272 : vector<8x384xf32>
    %275 = math.tanh %274 : vector<8x384xf32>
    %cst_70 = arith.constant 5.000000e-01 : f32
    %276 = vector.broadcast %cst_70 : f32 to vector<8x384xf32>
    %277 = arith.mulf %276, %275 : vector<8x384xf32>
    %cst_71 = arith.constant 5.000000e-01 : f32
    %278 = vector.broadcast %cst_71 : f32 to vector<8x384xf32>
    %279 = arith.addf %277, %278 : vector<8x384xf32>
    %cst_72 = arith.constant 1.000000e+00 : f32
    %280 = vector.broadcast %cst_72 : f32 to vector<8x384xf32>
    %281 = arith.subf %280, %279 : vector<8x384xf32>
    %282 = arith.mulf %281, %269 : vector<8x384xf32>
    %283 = arith.mulf %279, %250 : vector<8x384xf32>
    %284 = arith.addf %282, %283 : vector<8x384xf32>
    %c0_73 = arith.constant 0 : index
    %c0_74 = arith.constant 0 : index
    %285 = vector.load %arg5[%c0_73, %c0_74] : memref<384x4xf32, #tpu.memory_space<vmem>>, vector<384x4xf32>
    %cst_75 = arith.constant dense<0.000000e+00> : vector<8x4xf32>
    %286 = tpu.matmul %284, %285, %cst_75 {dimension_numbers = #tpu.dot_dimension_numbers<[1], [0], [0], [1], [0, 0, 1, 1], [], []>} : vector<8x384xf32>, vector<384x4xf32>, vector<8x4xf32> -> vector<8x4xf32>
    %c0_76 = arith.constant 0 : index
    %c0_77 = arith.constant 0 : index
    %287 = vector.load %arg6[%c0_76, %c0_77] : memref<1x4xf32, #tpu.memory_space<vmem>>, vector<1x4xf32>
    %288 = vector.broadcast %287 : vector<1x4xf32> to vector<8x4xf32>
    %289 = arith.addf %286, %288 : vector<8x4xf32>
    %c0_78 = arith.constant 0 : index
    %c0_79 = arith.constant 0 : index
    %290 = vector.load %arg7[%c0_78, %c0_79] : memref<8x4xf32, #tpu.memory_space<vmem>>, vector<8x4xf32>
    tpu.vector_store %arg7[%c0_78, %c0_79], %289 {strides = array<i32>} : memref<8x4xf32, #tpu.memory_space<vmem>>, vector<8x4xf32>,
    return
  }
}

</mosaic_0001>

<bundles_post_ra>
// kernel: model_gru_forward.1
= control target key start
LH: loop header
LB: loop body
LE: loop exit
PB: predicated region body
PF: predicated region fallthrough
CT: control target
= control target key end

     0   :  { %12 = vsyncpa [#allocation3], 0  ;;  %s6277_s27 = smov [#allocation2]   ;;  %s6278_s29 = smov 576   ;;  %s9518_s0 = inlined_call_operand.vmem [shape: f32[64,1], index: 0, kind: input, shape index: {}]   ;;  %s9519_s1 = inlined_call_operand.vmem [shape: f32[1,1152], index: 1, kind: input, shape index: {}]   ;;  %s9520_s2 = inlined_call_operand.hbm [shape: bf16[384,1152], index: 2, kind: input, shape index: {}]   ;;  %s9521_s3 = inlined_call_operand.vmem [shape: f32[1,1152], index: 3, kind: input, shape index: {}]   ;;  %s9522_s4 = inlined_call_operand.vmem [shape: f32[1,384], index: 4, kind: input, shape index: {}]   ;;  %s9523_s5 = inlined_call_operand.vmem [shape: f32[384,4], index: 5, kind: input, shape index: {}]   ;;  %s9524_s6 = inlined_call_operand.vmem [shape: f32[1,4], index: 6, kind: input, shape index: {}]   ;;  %s9525_s7 = inlined_call_operand.vmem [shape: f32[8,4], index: 7, kind: output, shape index: {}]  }
   0x1   :  { %s21_s26 = sshll.u32 %s9520_s2, 4  ;;  %s23_s28 = sshll.u32 %s6277_s27, 4  ;;  %s22_s26 = int_to_ptr.hbm [resolvable:$true] %s21_s26  ;;  %s24_s28 = int_to_ptr.vmem [resolvable:$true] %s23_s28 }
   0x2   :  { %s6279_s30 = smov 36  }
   0x3   :  { %29 = dma.hbm_to_vmem [thread:$0]  %s22_s26, 27648, %s24_s28, [#allocation3], %s6278_s29, %s6278_s29, %s6279_s30  }
   0x4   :  { %6275 = dma.done.wait [#allocation3], 27648  }
   0x5   :  { %6276 = vsyncadd [#allocation3], 4294939648  ;;  %v5265_v0 = vld [vmem:[#allocation2 + $0x1f8] sm:$0xf]  ;;  %v5942_v1 = vld [vmem:[#allocation2 + $0x218] sm:$0xf0] }
   0x6   :  { %v5553_v2 = vld [vmem:[#allocation2 + $0x438] sm:$0xf]  ;;  %v6324_v3 = vor.u32 %v5942_v1, %v5265_v0  ;;  %v6014_v4 = vld [vmem:[#allocation2 + $0x458] sm:$0xf0]  ;;  %v5267_v10 = vld [vmem:[#allocation2 + $0x21c] sm:$0xf0] }
   0x7   :  { %v5841_v5 = vld [vmem:[#allocation2 + $0x678] sm:$0xf]  ;;  %v6086_v6 = vld [vmem:[#allocation2 + $0x698] sm:$0xf0]  ;;  %v6326_v7 = vor.u32 %v6014_v4, %v5553_v2  ;;  %v5229_v11 = vld [vmem:[#allocation2 + $0x1b0] sm:$0xf] }
   0x8   :  { %10050 = vst [vmem:[#allocation5_spill] sm:$0xff] %v6324_v3  ;;  %v6328_v8 = vor.u32 %v6086_v6, %v5841_v5  ;;  %v5938_v9 = vld [vmem:[#allocation2 + $0x1fc] sm:$0xf]  ;;  %1631 = vmatpush.bf16.msra.mxu0 %v6324_v3  ;;  %v5933_v13 = vld [vmem:[#allocation2 + $0x1d0] sm:$0xf0]  ;;  %vm5004_vm0 = vcmask 31744  }
   0x9   :  { %10051 = vst [vmem:[#allocation6_spill] sm:$0xff] %v6326_v7  ;;  %v6331_v12 = vor.u32 %v5938_v9, %v5267_v10  ;;  %v5517_v14 = vld [vmem:[#allocation2 + $0x3f0] sm:$0xf]  ;;  %v6005_v15 = vld [vmem:[#allocation2 + $0x410] sm:$0xf0]  ;;  %1644 = vmatpush.bf16.msra.mxu1 %v6326_v7  ;;  %v6335_v16 = vor.u32 %v5933_v13, %v5229_v11 }
   0xa   :  { %10052 = vst [vmem:[#allocation7_spill] sm:$0xff] %v6328_v8  ;;  %1657 = vmatpush.bf16.msra.mxu2 %v6328_v8  ;;  %v6337_v17 = vor.u32 %v6005_v15, %v5517_v14  ;;  %v5805_v18 = vld [vmem:[#allocation2 + $0x630] sm:$0xf]  ;;  %v6077_v19 = vld [vmem:[#allocation2 + $0x650] sm:$0xf0] }
   0xb   :  { %10053 = vst [vmem:[#allocation8_spill] sm:$0xff] %v6331_v12  ;;  %v5929_v20 = vld [vmem:[#allocation2 + $0x1b4] sm:$0xf]  ;;  %1670 = vmatpush.bf16.msra.mxu3 %v6331_v12  ;;  %v6340_v21 = vor.u32 %v6077_v19, %v5805_v18  ;;  %v5231_v22 = vld [vmem:[#allocation2 + $0x1d4] sm:$0xf0] }
   0xc   :  { %10054 = vst [vmem:[#allocation9_spill] sm:$0xff] %v6335_v16  ;;  %v5193_v23 = vld [vmem:[#allocation2 + $0x168] sm:$0xf]  ;;  %v5924_v24 = vld [vmem:[#allocation2 + $0x188] sm:$0xf0]  ;;  %v6342_v25 = vor.u32 %v5929_v20, %v5231_v22  ;;  %1632 = vmatpush.bf16.msra.mxu0 %v6335_v16 }
   0xd   :  { %10055 = vst [vmem:[#allocation10_spill] sm:$0xff] %v6337_v17  ;;  %v5481_v26 = vld [vmem:[#allocation2 + $0x3a8] sm:$0xf]  ;;  %v5996_v27 = vld [vmem:[#allocation2 + $0x3c8] sm:$0xf0]  ;;  %v6345_v29 = vor.u32 %v5924_v24, %v5193_v23  ;;  %1645 = vmatpush.bf16.msra.mxu1 %v6337_v17 }
   0xe   :  { %10056 = vst [vmem:[#allocation11_spill] sm:$0xff] %v6340_v21  ;;  %v5769_v28 = vld [vmem:[#allocation2 + $0x5e8] sm:$0xf]  ;;  %v6068_v30 = vld [vmem:[#allocation2 + $0x608] sm:$0xf0]  ;;  %1658 = vmatpush.bf16.msra.mxu2 %v6340_v21  ;;  %v6349_v33 = vor.u32 %v5996_v27, %v5481_v26 }
   0xf   :  { %10057 = vst [vmem:[#allocation12_spill] sm:$0xff] %v6342_v25  ;;  %v5920_v31 = vld [vmem:[#allocation2 + $0x16c] sm:$0xf]  ;;  %v5195_v32 = vld [vmem:[#allocation2 + $0x18c] sm:$0xf0]  ;;  %v6351_v34 = vor.u32 %v6068_v30, %v5769_v28  ;;  %1671 = vmatpush.bf16.msra.mxu3 %v6342_v25 }
  0x10   :  { %10058 = vst [vmem:[#allocation13_spill] sm:$0xff] %v6345_v29  ;;  %v5157_v35 = vld [vmem:[#allocation2 + $0x120] sm:$0xf]  ;;  %v5915_v36 = vld [vmem:[#allocation2 + $0x140] sm:$0xf0]  ;;  %v6354_v38 = vor.u32 %v5920_v31, %v5195_v32  ;;  %1633 = vmatpush.bf16.msra.mxu0 %v6345_v29 }
  0x11   :  { %10059 = vst [vmem:[#allocation14_spill] sm:$0xff] %v6349_v33  ;;  %v5445_v37 = vld [vmem:[#allocation2 + $0x360] sm:$0xf]  ;;  %v5987_v39 = vld [vmem:[#allocation2 + $0x380] sm:$0xf0]  ;;  %v6357_v44 = vor.u32 %v5915_v36, %v5157_v35  ;;  %1646 = vmatpush.bf16.msra.mxu1 %v6349_v33 }
  0x12   :  { %10060 = vst [vmem:[#allocation15_spill] sm:$0xff] %v6351_v34  ;;  %v5733_v40 = vld [vmem:[#allocation2 + $0x5a0] sm:$0xf]  ;;  %v6059_v41 = vld [vmem:[#allocation2 + $0x5c0] sm:$0xf0]  ;;  %1659 = vmatpush.bf16.msra.mxu2 %v6351_v34  ;;  %v6361_v45 = vor.u32 %v5987_v39, %v5445_v37 }
  0x13   :  { %10061 = vst [vmem:[#allocation16_spill] sm:$0xff] %v6354_v38  ;;  %v5911_v42 = vld [vmem:[#allocation2 + $0x124] sm:$0xf]  ;;  %v5159_v43 = vld [vmem:[#allocation2 + $0x144] sm:$0xf0]  ;;  %v6363_v46 = vor.u32 %v6059_v41, %v5733_v40  ;;  %1672 = vmatpush.bf16.msra.mxu3 %v6354_v38 }
  0x14   :  { %10062 = vst [vmem:[#allocation17_spill] sm:$0xff] %v6357_v44  ;;  %v5121_v47 = vld [vmem:[#allocation2 + $0xd8] sm:$0xf]  ;;  %v5906_v48 = vld [vmem:[#allocation2 + $0xf8] sm:$0xf0]  ;;  %v6366_v50 = vor.u32 %v5911_v42, %v5159_v43  ;;  %1634 = vmatpush.bf16.msra.mxu0 %v6357_v44 }
  0x15   :  { %10063 = vst [vmem:[#allocation18_spill] sm:$0xff] %v6361_v45  ;;  %v5409_v49 = vld [vmem:[#allocation2 + $0x318] sm:$0xf]  ;;  %v5978_v51 = vld [vmem:[#allocation2 + $0x338] sm:$0xf0]  ;;  %v6369_v56 = vor.u32 %v5906_v48, %v5121_v47  ;;  %1647 = vmatpush.bf16.msra.mxu1 %v6361_v45 }
  0x16   :  { %10064 = vst [vmem:[#allocation19_spill] sm:$0xff] %v6363_v46  ;;  %v5697_v52 = vld [vmem:[#allocation2 + $0x558] sm:$0xf]  ;;  %v6050_v53 = vld [vmem:[#allocation2 + $0x578] sm:$0xf0]  ;;  %1660 = vmatpush.bf16.msra.mxu2 %v6363_v46  ;;  %v6373_v57 = vor.u32 %v5978_v51, %v5409_v49 }
  0x17   :  { %10065 = vst [vmem:[#allocation20_spill] sm:$0xff] %v6366_v50  ;;  %v5902_v54 = vld [vmem:[#allocation2 + $0xdc] sm:$0xf]  ;;  %v5123_v55 = vld [vmem:[#allocation2 + $0xfc] sm:$0xf0]  ;;  %v6375_v58 = vor.u32 %v6050_v53, %v5697_v52  ;;  %1673 = vmatpush.bf16.msra.mxu3 %v6366_v50 }
  0x18   :  { %10066 = vst [vmem:[#allocation21_spill] sm:$0xff] %v6369_v56  ;;  %v5085_v59 = vld [vmem:[#allocation2 + $0x90] sm:$0xf]  ;;  %v5897_v60 = vld [vmem:[#allocation2 + $0xb0] sm:$0xf0]  ;;  %v6378_v62 = vor.u32 %v5902_v54, %v5123_v55  ;;  %1635 = vmatpush.bf16.msra.mxu0 %v6369_v56 }
  0x19   :  { %10067 = vst [vmem:[#allocation22_spill] sm:$0xff] %v6373_v57  ;;  %v5373_v61 = vld [vmem:[#allocation2 + $0x2d0] sm:$0xf]  ;;  %v5969_v63 = vld [vmem:[#allocation2 + $0x2f0] sm:$0xf0]  ;;  %v6381_v5 = vor.u32 %v5897_v60, %v5085_v59  ;;  %1648 = vmatpush.bf16.msra.mxu1 %v6373_v57 }
  0x1a   :  { %10068 = vst [vmem:[#allocation23_spill] sm:$0xff] %v6375_v58  ;;  %v5661_v0 = vld [vmem:[#allocation2 + $0x510] sm:$0xf]  ;;  %v6041_v1 = vld [vmem:[#allocation2 + $0x530] sm:$0xf0]  ;;  %1661 = vmatpush.bf16.msra.mxu2 %v6375_v58  ;;  %v6385_v6 = vor.u32 %v5969_v63, %v5373_v61 }
  0x1b   :  { %10069 = vst [vmem:[#allocation24_spill] sm:$0xff] %v6378_v62  ;;  %v5893_v2 = vld [vmem:[#allocation2 + $0x94] sm:$0xf]  ;;  %v5087_v4 = vld [vmem:[#allocation2 + $0xb4] sm:$0xf0]  ;;  %v6387_v9 = vor.u32 %v6041_v1, %v5661_v0  ;;  %1674 = vmatpush.bf16.msra.mxu3 %v6378_v62 }
  0x1c   :  { %10070 = vst [vmem:[#allocation25_spill] sm:$0xff] %v6381_v5  ;;  %v5049_v10 = vld [vmem:[#allocation2 + $0x48] sm:$0xf]  ;;  %v5888_v11 = vld [vmem:[#allocation2 + $0x68] sm:$0xf0]  ;;  %v6390_v14 = vor.u32 %v5893_v2, %v5087_v4  ;;  %1636 = vmatpush.bf16.msra.mxu0 %v6381_v5 }
  0x1d   :  { %10071 = vst [vmem:[#allocation26_spill] sm:$0xff] %v6385_v6  ;;  %v5337_v13 = vld [vmem:[#allocation2 + $0x288] sm:$0xf]  ;;  %v5960_v15 = vld [vmem:[#allocation2 + $0x2a8] sm:$0xf0]  ;;  %v6393_v23 = vor.u32 %v5888_v11, %v5049_v10  ;;  %1649 = vmatpush.bf16.msra.mxu1 %v6385_v6 }
  0x1e   :  { %10072 = vst [vmem:[#allocation27_spill] sm:$0xff] %v6387_v9  ;;  %v5625_v18 = vld [vmem:[#allocation2 + $0x4c8] sm:$0xf]  ;;  %v6032_v19 = vld [vmem:[#allocation2 + $0x4e8] sm:$0xf0]  ;;  %1662 = vmatpush.bf16.msra.mxu2 %v6387_v9  ;;  %v6397_v27 = vor.u32 %v5960_v15, %v5337_v13 }
  0x1f   :  { %10073 = vst [vmem:[#allocation28_spill] sm:$0xff] %v6390_v14  ;;  %v5884_v20 = vld [vmem:[#allocation2 + $0x4c] sm:$0xf]  ;;  %v5051_v22 = vld [vmem:[#allocation2 + $0x6c] sm:$0xf0]  ;;  %v6399_v28 = vor.u32 %v6032_v19, %v5625_v18  ;;  %1675 = vmatpush.bf16.msra.mxu3 %v6390_v14 }
  0x20   :  { %10074 = vst [vmem:[#allocation29_spill] sm:$0xff] %v6393_v23  ;;  %v5013_v24 = vld [vmem:[#allocation2] sm:$0xf]  ;;  %v5879_v26 = vld [vmem:[#allocation2 + $0x20] sm:$0xf0]  ;;  %v6402_v35 = vor.u32 %v5884_v20, %v5051_v22  ;;  %1637 = vmatpush.bf16.msra.mxu0 %v6393_v23 }
  0x21   :  { %10075 = vst [vmem:[#allocation30_spill] sm:$0xff] %v6397_v27  ;;  %v5301_v30 = vld [vmem:[#allocation2 + $0x240] sm:$0xf]  ;;  %v5951_v31 = vld [vmem:[#allocation2 + $0x260] sm:$0xf0]  ;;  %v6405_v43 = vor.u32 %v5879_v26, %v5013_v24  ;;  %1650 = vmatpush.bf16.msra.mxu1 %v6397_v27 }
  0x22   :  { %10076 = vst [vmem:[#allocation31_spill] sm:$0xff] %v6399_v28  ;;  %v5589_v32 = vld [vmem:[#allocation2 + $0x480] sm:$0xf]  ;;  %v6023_v36 = vld [vmem:[#allocation2 + $0x4a0] sm:$0xf0]  ;;  %1663 = vmatpush.bf16.msra.mxu2 %v6399_v28  ;;  %v6409_v51 = vor.u32 %v5951_v31, %v5301_v30 }
  0x23   :  { %10077 = vst [vmem:[#allocation32_spill] sm:$0xff] %v6402_v35  ;;  %v6010_v37 = vld [vmem:[#allocation2 + $0x43c] sm:$0xf]  ;;  %v5555_v39 = vld [vmem:[#allocation2 + $0x45c] sm:$0xf0]  ;;  %v6411_v52 = vor.u32 %v6023_v36, %v5589_v32  ;;  %1676 = vmatpush.bf16.msra.mxu3 %v6402_v35 }
  0x24   :  { %v6082_v40 = vld [vmem:[#allocation2 + $0x67c] sm:$0xf]  ;;  %v5843_v41 = vld [vmem:[#allocation2 + $0x69c] sm:$0xf0]  ;;  %10078 = vst [vmem:[#allocation33_spill] sm:$0xff] %v6405_v43  ;;  %v6414_v55 = vor.u32 %v6010_v37, %v5555_v39  ;;  %1638 = vmatpush.bf16.msra.mxu0 %v6405_v43 }
  0x25   :  { %v5273_v42 = vld [vmem:[#allocation2 + $0x200] sm:$0xf]  ;;  %v5943_v47 = vld [vmem:[#allocation2 + $0x220] sm:$0xf0]  ;;  %v5015_v49 = vld [vmem:[#allocation2 + $0x24] sm:$0xf0]  ;;  %v6416_v59 = vor.u32 %v6082_v40, %v5843_v41  ;;  %1651 = vmatpush.bf16.msra.mxu1 %v6409_v51 }
  0x26   :  { %v5875_v48 = vld [vmem:[#allocation2 + $0x4] sm:$0xf]  ;;  %10079 = vst [vmem:[#allocation34_spill] sm:$0xff] %v6409_v51  ;;  %v5561_v53 = vld [vmem:[#allocation2 + $0x440] sm:$0xf]  ;;  %v6418_v61 = vor.u32 %v5943_v47, %v5273_v42  ;;  %1664 = vmatpush.bf16.msra.mxu2 %v6411_v52 }
  0x27   :  { %10080 = vst [vmem:[#allocation35_spill] sm:$0xff] %v6411_v52  ;;  %v6015_v54 = vld [vmem:[#allocation2 + $0x460] sm:$0xf0]  ;;  %v6001_v60 = vld [vmem:[#allocation2 + $0x3f4] sm:$0xf]  ;;  %v6420_v63 = vor.u32 %v5875_v48, %v5015_v49 }
  0x28   :  { %10081 = vst [vmem:[#allocation36_spill] sm:$0xff] %v6414_v55  ;;  %v5519_v0 = vld [vmem:[#allocation2 + $0x414] sm:$0xf0]  ;;  %v6073_v1 = vld [vmem:[#allocation2 + $0x634] sm:$0xf]  ;;  %v6423_v4 = vor.u32 %v6015_v54, %v5561_v53  ;;  %1683 = vmatpush.bf16.msrb.mxu0 %v6414_v55  ;;  %v9528_v54 = vmov 0  }
  0x29   :  { %10082 = vst [vmem:[#allocation37_spill] sm:$0xff] %v6416_v59  ;;  %v5807_v2 = vld [vmem:[#allocation2 + $0x654] sm:$0xf0]  ;;  %v5934_v11 = vld [vmem:[#allocation2 + $0x1d8] sm:$0xf0]  ;;  %1696 = vmatpush.bf16.msrb.mxu1 %v6416_v59  ;;  %v6429_v18 = vor.u32 %v6001_v60, %v5519_v0  ;;  %1677 = vmatpush.bf16.msra.mxu3 %v6420_v63 }
  0x2a   :  { %10083 = vst [vmem:[#allocation38_spill] sm:$0xff] %v6418_v61  ;;  %v5237_v10 = vld [vmem:[#allocation2 + $0x1b8] sm:$0xf]  ;;  %v6006_v15 = vld [vmem:[#allocation2 + $0x418] sm:$0xf0]  ;;  %v6431_v19 = vor.u32 %v6073_v1, %v5807_v2  ;;  %1709 = vmatpush.bf16.msrb.mxu2 %v6418_v61  ;;  %1639 = vmatmul.bf16.vlgmr.msra.gmra.mxu0 %v9528_v54 }
  0x2b   :  { %10084 = vst [vmem:[#allocation39_spill] sm:$0xff] %v6420_v63  ;;  %v5525_v13 = vld [vmem:[#allocation2 + $0x3f8] sm:$0xf]  ;;  %v5992_v20 = vld [vmem:[#allocation2 + $0x3ac] sm:$0xf]  ;;  %v6435_v22 = vor.u32 %v5934_v11, %v5237_v10  ;;  %1665 = vmatmul.bf16.vlgmr.msra.gmra.mxu2 %v9528_v54  ;;  %1652 = vmatmul.bf16.vlgmr.msra.gmra.mxu1 %v9528_v54 }
  0x2c   :  { %10085 = vst [vmem:[#allocation40_spill] sm:$0xff] %v6423_v4  ;;  %v5483_v24 = vld [vmem:[#allocation2 + $0x3cc] sm:$0xf0]  ;;  %v6064_v26 = vld [vmem:[#allocation2 + $0x5ec] sm:$0xf]  ;;  %v6438_v31 = vor.u32 %v6006_v15, %v5525_v13  ;;  %1684 = vmatpush.bf16.msrb.mxu0 %v6429_v18  ;;  %1678 = vmatmul.bf16.vlgmr.msra.gmra.mxu3 %v9528_v54 }
  0x2d   :  { %10086 = vst [vmem:[#allocation41_spill] sm:$0xff] %v6429_v18  ;;  %v5771_v30 = vld [vmem:[#allocation2 + $0x60c] sm:$0xf0]  ;;  %1722 = vmatpush.bf16.msrb.mxu3 %v6423_v4  ;;  %v5925_v36 = vld [vmem:[#allocation2 + $0x190] sm:$0xf0]  ;;  %1697 = vmatpush.bf16.msrb.mxu1 %v6431_v19  ;;  %v6442_v40 = vor.u32 %v5992_v20, %v5483_v24 }
  0x2e   :  { %10087 = vst [vmem:[#allocation42_spill] sm:$0xff] %v6431_v19  ;;  %v5201_v32 = vld [vmem:[#allocation2 + $0x170] sm:$0xf]  ;;  %v5997_v39 = vld [vmem:[#allocation2 + $0x3d0] sm:$0xf0]  ;;  %v6444_v41 = vor.u32 %v6064_v26, %v5771_v30  ;;  %1710 = vmatpush.bf16.msrb.mxu2 %v6435_v22  ;;  %6095 = vset.pattern.permute.xlu0 %v9528_v54 }
  0x2f   :  { %10088 = vst [vmem:[#allocation43_spill] sm:$0xff] %v6435_v22  ;;  %v5489_v37 = vld [vmem:[#allocation2 + $0x3b0] sm:$0xf]  ;;  %v5983_v42 = vld [vmem:[#allocation2 + $0x364] sm:$0xf]  ;;  %v6447_v47 = vor.u32 %v5925_v36, %v5201_v32  ;;  %6096 = vset.pattern.permute.xlu1 %v9528_v54  ;;  %6097 = vset.pattern.permute.xlu2 %v9528_v54 }
  0x30   :  { %10089 = vst [vmem:[#allocation44_spill] sm:$0xff] %v6438_v31  ;;  %v5447_v48 = vld [vmem:[#allocation2 + $0x384] sm:$0xf0]  ;;  %v6055_v49 = vld [vmem:[#allocation2 + $0x5a4] sm:$0xf]  ;;  %v6451_v60 = vor.u32 %v5997_v39, %v5489_v37  ;;  %1685 = vmatpush.bf16.msrb.mxu0 %v6442_v40 }
  0x31   :  { %10090 = vst [vmem:[#allocation45_spill] sm:$0xff] %v6442_v40  ;;  %v5735_v53 = vld [vmem:[#allocation2 + $0x5c4] sm:$0xf0]  ;;  %1723 = vmatpush.bf16.msrb.mxu3 %v6438_v31  ;;  %v5916_v1 = vld [vmem:[#allocation2 + $0x148] sm:$0xf0]  ;;  %1698 = vmatpush.bf16.msrb.mxu1 %v6444_v41  ;;  %v6458_v11 = vor.u32 %v5983_v42, %v5447_v48 }
  0x32   :  { %10091 = vst [vmem:[#allocation46_spill] sm:$0xff] %v6444_v41  ;;  %v5165_v0 = vld [vmem:[#allocation2 + $0x128] sm:$0xf]  ;;  %v5988_v10 = vld [vmem:[#allocation2 + $0x388] sm:$0xf0]  ;;  %v6460_v13 = vor.u32 %v6055_v49, %v5735_v53  ;;  %1711 = vmatpush.bf16.msrb.mxu2 %v6447_v47 }
  0x33   :  { %10092 = vst [vmem:[#allocation47_spill] sm:$0xff] %v6447_v47  ;;  %v5453_v2 = vld [vmem:[#allocation2 + $0x368] sm:$0xf]  ;;  %v5974_v15 = vld [vmem:[#allocation2 + $0x31c] sm:$0xf]  ;;  %v6463_v20 = vor.u32 %v5916_v1, %v5165_v0 }
  0x34   :  { %10093 = vst [vmem:[#allocation48_spill] sm:$0xff] %v6451_v60  ;;  %v5411_v24 = vld [vmem:[#allocation2 + $0x33c] sm:$0xf0]  ;;  %v6046_v26 = vld [vmem:[#allocation2 + $0x55c] sm:$0xf]  ;;  %v6467_v32 = vor.u32 %v5988_v10, %v5453_v2  ;;  %1686 = vmatpush.bf16.msrb.mxu0 %v6458_v11 }
  0x35   :  { %10094 = vst [vmem:[#allocation49_spill] sm:$0xff] %v6458_v11  ;;  %v5699_v30 = vld [vmem:[#allocation2 + $0x57c] sm:$0xf0]  ;;  %1724 = vmatpush.bf16.msrb.mxu3 %v6451_v60  ;;  %v5907_v37 = vld [vmem:[#allocation2 + $0x100] sm:$0xf0]  ;;  %1699 = vmatpush.bf16.msrb.mxu1 %v6460_v13  ;;  %v6473_v48 = vor.u32 %v5974_v15, %v5411_v24 }
  0x36   :  { %10095 = vst [vmem:[#allocation50_spill] sm:$0xff] %v6460_v13  ;;  %v5129_v36 = vld [vmem:[#allocation2 + $0xe0] sm:$0xf]  ;;  %v5979_v42 = vld [vmem:[#allocation2 + $0x340] sm:$0xf0]  ;;  %v6475_v49 = vor.u32 %v6046_v26, %v5699_v30  ;;  %1712 = vmatpush.bf16.msrb.mxu2 %v6463_v20 }
  0x37   :  { %10096 = vst [vmem:[#allocation51_spill] sm:$0xff] %v6463_v20  ;;  %v5417_v39 = vld [vmem:[#allocation2 + $0x320] sm:$0xf]  ;;  %v5965_v53 = vld [vmem:[#allocation2 + $0x2d4] sm:$0xf]  ;;  %v6478_v0 = vor.u32 %v5907_v37, %v5129_v36 }
  0x38   :  { %10097 = vst [vmem:[#allocation52_spill] sm:$0xff] %v6467_v32  ;;  %v5375_v1 = vld [vmem:[#allocation2 + $0x2f4] sm:$0xf0]  ;;  %v6037_v2 = vld [vmem:[#allocation2 + $0x514] sm:$0xf]  ;;  %v6481_v47 = vor.u32 %v5979_v42, %v5417_v39  ;;  %1687 = vmatpush.bf16.msrb.mxu0 %v6473_v48 }
  0x39   :  { %10098 = vst [vmem:[#allocation53_spill] sm:$0xff] %v6473_v48  ;;  %v5663_v10 = vld [vmem:[#allocation2 + $0x534] sm:$0xf0]  ;;  %1725 = vmatpush.bf16.msrb.mxu3 %v6467_v32  ;;  %v5898_v41 = vld [vmem:[#allocation2 + $0xb8] sm:$0xf0]  ;;  %1700 = vmatpush.bf16.msrb.mxu1 %v6475_v49  ;;  %v6485_v15 = vor.u32 %v5965_v53, %v5375_v1 }
  0x3a   :  { %10099 = vst [vmem:[#allocation54_spill] sm:$0xff] %v6475_v49  ;;  %v5093_v54 = vld [vmem:[#allocation2 + $0x98] sm:$0xf]  ;;  %v5970_v13 = vld [vmem:[#allocation2 + $0x2f8] sm:$0xf0]  ;;  %v6487_v24 = vor.u32 %v6037_v2, %v5663_v10  ;;  %1713 = vmatpush.bf16.msrb.mxu2 %v6478_v0 }
  0x3b   :  { %10100 = vst [vmem:[#allocation55_spill] sm:$0xff] %v6478_v0  ;;  %v5381_v60 = vld [vmem:[#allocation2 + $0x2d8] sm:$0xf]  ;;  %v5956_v26 = vld [vmem:[#allocation2 + $0x28c] sm:$0xf]  ;;  %v6490_v30 = vor.u32 %v5898_v41, %v5093_v54 }
  0x3c   :  { %10101 = vst [vmem:[#allocation56_spill] sm:$0xff] %v6481_v47  ;;  %v5339_v36 = vld [vmem:[#allocation2 + $0x2ac] sm:$0xf0]  ;;  %v6028_v37 = vld [vmem:[#allocation2 + $0x4cc] sm:$0xf]  ;;  %v6493_v42 = vor.u32 %v5970_v13, %v5381_v60  ;;  %1688 = vmatpush.bf16.msrb.mxu0 %v6485_v15  ;;  %v43_v60 = vld [vmem:[%s9518_s0] sm:$0xff] }
  0x3d   :  { %10102 = vst [vmem:[#allocation57_spill] sm:$0xff] %v6485_v15  ;;  %v5627_v39 = vld [vmem:[#allocation2 + $0x4ec] sm:$0xf0]  ;;  %1726 = vmatpush.bf16.msrb.mxu3 %v6481_v47  ;;  %v5889_v32 = vld [vmem:[#allocation2 + $0x70] sm:$0xf0]  ;;  %1701 = vmatpush.bf16.msrb.mxu1 %v6487_v24  ;;  %v6497_v1 = vor.u32 %v5956_v26, %v5339_v36 }
  0x3e   :  { %10103 = vst [vmem:[#allocation58_spill] sm:$0xff] %v6487_v24  ;;  %v5057_v20 = vld [vmem:[#allocation2 + $0x50] sm:$0xf]  ;;  %v5961_v49 = vld [vmem:[#allocation2 + $0x2b0] sm:$0xf0]  ;;  %v6499_v41 = vor.u32 %v6028_v37, %v5627_v39  ;;  %1714 = vmatpush.bf16.msrb.mxu2 %v6490_v30  ;;  %55 = vperm.xlu0 %6095, %v43_v60  }
  0x3f   :  { %10104 = vst [vmem:[#allocation59_spill] sm:$0xff] %v6490_v30  ;;  %v5345_v22 = vld [vmem:[#allocation2 + $0x290] sm:$0xf]  ;;  %v5947_v53 = vld [vmem:[#allocation2 + $0x244] sm:$0xf]  ;;  %v6505_v13 = vor.u32 %v5889_v32, %v5057_v20 }
  0x40   :  { %10105 = vst [vmem:[#allocation60_spill] sm:$0xff] %v6493_v42  ;;  %v5303_v54 = vld [vmem:[#allocation2 + $0x264] sm:$0xf0]  ;;  %v6019_v2 = vld [vmem:[#allocation2 + $0x484] sm:$0xf]  ;;  %v6508_v26 = vor.u32 %v5961_v49, %v5345_v22  ;;  %1689 = vmatpush.bf16.msrb.mxu0 %v6497_v1 }
  0x41   :  { %10106 = vst [vmem:[#allocation61_spill] sm:$0xff] %v6497_v1  ;;  %v5591_v10 = vld [vmem:[#allocation2 + $0x4a4] sm:$0xf0]  ;;  %v5880_v47 = vld [vmem:[#allocation2 + $0x28] sm:$0xf0]  ;;  %1727 = vmatpush.bf16.msrb.mxu3 %v6493_v42  ;;  %1702 = vmatpush.bf16.msrb.mxu1 %v6499_v41  ;;  %v6512_v20 = vor.u32 %v5947_v53, %v5303_v54 }
  0x42   :  { %10107 = vst [vmem:[#allocation62_spill] sm:$0xff] %v6499_v41  ;;  %v5021_v0 = vld [vmem:[#allocation2 + $0x8] sm:$0xf]  ;;  %v5849_v36 = vld [vmem:[#allocation2 + $0x680] sm:$0xf]  ;;  %v6514_v32 = vor.u32 %v6019_v2, %v5591_v10  ;;  %1715 = vmatpush.bf16.msrb.mxu2 %v6505_v13 }
  0x43   :  { %10108 = vst [vmem:[#allocation63_spill] sm:$0xff] %v6505_v13  ;;  %v6087_v37 = vld [vmem:[#allocation2 + $0x6a0] sm:$0xf0]  ;;  %v5275_v24 = vld [vmem:[#allocation2 + $0x224] sm:$0xf0]  ;;  %v6517_v22 = vor.u32 %v5880_v47, %v5021_v0 }
  0x44   :  { %10109 = vst [vmem:[#allocation64_spill] sm:$0xff] %v6508_v26  ;;  %v5939_v39 = vld [vmem:[#allocation2 + $0x204] sm:$0xf]  ;;  %v5563_v31 = vld [vmem:[#allocation2 + $0x464] sm:$0xf0]  ;;  %v6519_v49 = vor.u32 %v6087_v37, %v5849_v36  ;;  %1690 = vmatpush.bf16.msrb.mxu0 %v6512_v20 }
  0x45   :  { %v6011_v19 = vld [vmem:[#allocation2 + $0x444] sm:$0xf]  ;;  %10110 = vst [vmem:[#allocation65_spill] sm:$0xff] %v6512_v20  ;;  %v5309_v30 = vld [vmem:[#allocation2 + $0x248] sm:$0xf]  ;;  %1728 = vmatpush.bf16.msrb.mxu3 %v6508_v26  ;;  %v6522_v52 = vor.u32 %v5939_v39, %v5275_v24  ;;  %1703 = vmatpush.bf16.msrb.mxu1 %v6514_v32 }
  0x46   :  { %10111 = vst [vmem:[#allocation66_spill] sm:$0xff] %v6514_v32  ;;  %v5952_v60 = vld [vmem:[#allocation2 + $0x268] sm:$0xf0]  ;;  %v6083_v42 = vld [vmem:[#allocation2 + $0x684] sm:$0xf]  ;;  %v6524_v59 = vor.u32 %v6011_v19, %v5563_v31  ;;  %1716 = vmatpush.bf16.msrb.mxu2 %v6517_v22 }
  0x47   :  { %10112 = vst [vmem:[#allocation67_spill] sm:$0xff] %v6517_v22  ;;  %v5851_v61 = vld [vmem:[#allocation2 + $0x6a4] sm:$0xf0]  ;;  %v5813_v53 = vld [vmem:[#allocation2 + $0x638] sm:$0xf]  ;;  %v6526_v10 = vor.u32 %v5952_v60, %v5309_v30 }
  0x48   :  { %10113 = vst [vmem:[#allocation68_spill] sm:$0xff] %v6519_v49  ;;  %v6078_v54 = vld [vmem:[#allocation2 + $0x658] sm:$0xf0]  ;;  %v5239_v41 = vld [vmem:[#allocation2 + $0x1dc] sm:$0xf0]  ;;  %v6530_v47 = vor.u32 %v6083_v42, %v5851_v61  ;;  %1735 = vmatpush.bf16.msra.mxu0 %v6519_v49 }
  0x49   :  { %10114 = vst [vmem:[#allocation69_spill] sm:$0xff] %v6522_v52  ;;  %v5930_v2 = vld [vmem:[#allocation2 + $0x1bc] sm:$0xf]  ;;  %v5527_v13 = vld [vmem:[#allocation2 + $0x41c] sm:$0xf0]  ;;  %v6534_v19 = vor.u32 %v6078_v54, %v5813_v53  ;;  %1748 = vmatpush.bf16.msra.mxu1 %v6522_v52  ;;  %1729 = vmatpush.bf16.msrb.mxu3 %v6526_v10  ;;  %v10121_v53 = vmov 0  }
  0x4a   :  { %10115 = vst [vmem:[#allocation70_spill] sm:$0xff] %v6524_v59  ;;  %v6002_v4 = vld [vmem:[#allocation2 + $0x3fc] sm:$0xf]  ;;  %v5815_v0 = vld [vmem:[#allocation2 + $0x65c] sm:$0xf0]  ;;  %1761 = vmatpush.bf16.msra.mxu2 %v6524_v59  ;;  %v6538_v24 = vor.u32 %v5930_v2, %v5239_v41  ;;  %1691 = vmatmul.bf16.vlgmr.msrb.gmra.mxu0 %v10121_v53 }
  0x4b   :  { %10116 = vst [vmem:[#allocation71_spill] sm:$0xff] %v6526_v10  ;;  %v6074_v31 = vld [vmem:[#allocation2 + $0x63c] sm:$0xf]  ;;  %v6540_v30 = vor.u32 %v6002_v4, %v5527_v13  ;;  %v5777_v36 = vld [vmem:[#allocation2 + $0x5f0] sm:$0xf]  ;;  %1717 = vmatmul.bf16.vlgmr.msrb.gmra.mxu2 %v10121_v53  ;;  %1704 = vmatmul.bf16.vlgmr.msrb.gmra.mxu1 %v10121_v53 }
  0x4c   :  { %10117 = vst [vmem:[#allocation72_spill] sm:$0xff] %v6530_v47  ;;  %v6069_v37 = vld [vmem:[#allocation2 + $0x610] sm:$0xf0]  ;;  %v5203_v42 = vld [vmem:[#allocation2 + $0x194] sm:$0xf0]  ;;  %v6545_v54 = vor.u32 %v6074_v31, %v5815_v0  ;;  %1736 = vmatpush.bf16.msra.mxu0 %v6534_v19  ;;  %1730 = vmatmul.bf16.vlgmr.msrb.gmra.mxu3 %v10121_v53 }
  0x4d   :  { %10118 = vst [vmem:[#allocation73_spill] sm:$0xff] %v6534_v19  ;;  %v5921_v61 = vld [vmem:[#allocation2 + $0x174] sm:$0xf]  ;;  %v5491_v60 = vld [vmem:[#allocation2 + $0x3d4] sm:$0xf0]  ;;  %1774 = vmatpush.bf16.msra.mxu3 %v6530_v47  ;;  %v6549_v4 = vor.u32 %v6069_v37, %v5777_v36  ;;  %1749 = vmatpush.bf16.msra.mxu1 %v6538_v24 }
  0x4e   :  { %10119 = vst [vmem:[#allocation74_spill] sm:$0xff] %v6538_v24  ;;  %v5993_v39 = vld [vmem:[#allocation2 + $0x3b4] sm:$0xf]  ;;  %v5779_v13 = vld [vmem:[#allocation2 + $0x614] sm:$0xf0]  ;;  %1762 = vmatpush.bf16.msra.mxu2 %v6540_v30  ;;  %v6554_v2 = vor.u32 %v5921_v61, %v5203_v42 }
  0x4f   :  { %10120 = vst [vmem:[#allocation75_spill] sm:$0xff] %v6540_v30  ;;  %v6065_v41 = vld [vmem:[#allocation2 + $0x5f4] sm:$0xf]  ;;  %v6556_v59 = vor.u32 %v5993_v39, %v5491_v60  ;;  %v5741_v31 = vld [vmem:[#allocation2 + $0x5a8] sm:$0xf] }
  0x50   :  { %10122 = vst [vmem:[#allocation76_spill] sm:$0xff] %v6545_v54  ;;  %v6060_v0 = vld [vmem:[#allocation2 + $0x5c8] sm:$0xf0]  ;;  %v5167_v47 = vld [vmem:[#allocation2 + $0x14c] sm:$0xf0]  ;;  %v6560_v36 = vor.u32 %v6065_v41, %v5779_v13  ;;  %1737 = vmatpush.bf16.msra.mxu0 %v6549_v4 }
  0x51   :  { %10123 = vst [vmem:[#allocation77_spill] sm:$0xff] %v6549_v4  ;;  %v5912_v52 = vld [vmem:[#allocation2 + $0x12c] sm:$0xf]  ;;  %v5455_v19 = vld [vmem:[#allocation2 + $0x38c] sm:$0xf0]  ;;  %1775 = vmatpush.bf16.msra.mxu3 %v6545_v54  ;;  %v6563_v37 = vor.u32 %v6060_v0, %v5741_v31  ;;  %1750 = vmatpush.bf16.msra.mxu1 %v6554_v2 }
  0x52   :  { %10124 = vst [vmem:[#allocation78_spill] sm:$0xff] %v6554_v2  ;;  %v5984_v49 = vld [vmem:[#allocation2 + $0x36c] sm:$0xf]  ;;  %v5743_v42 = vld [vmem:[#allocation2 + $0x5cc] sm:$0xf0]  ;;  %1763 = vmatpush.bf16.msra.mxu2 %v6556_v59  ;;  %v6567_v39 = vor.u32 %v5912_v52, %v5167_v47 }
  0x53   :  { %10125 = vst [vmem:[#allocation79_spill] sm:$0xff] %v6556_v59  ;;  %v6056_v61 = vld [vmem:[#allocation2 + $0x5ac] sm:$0xf]  ;;  %v6569_v60 = vor.u32 %v5984_v49, %v5455_v19  ;;  %v5705_v30 = vld [vmem:[#allocation2 + $0x560] sm:$0xf] }
  0x54   :  { %10126 = vst [vmem:[#allocation80_spill] sm:$0xff] %v6560_v36  ;;  %v6051_v24 = vld [vmem:[#allocation2 + $0x580] sm:$0xf0]  ;;  %v5131_v54 = vld [vmem:[#allocation2 + $0x104] sm:$0xf0]  ;;  %v6572_v31 = vor.u32 %v6056_v61, %v5743_v42  ;;  %1738 = vmatpush.bf16.msra.mxu0 %v6563_v37 }
  0x55   :  { %10127 = vst [vmem:[#allocation81_spill] sm:$0xff] %v6563_v37  ;;  %v5903_v22 = vld [vmem:[#allocation2 + $0xe4] sm:$0xf]  ;;  %v5419_v13 = vld [vmem:[#allocation2 + $0x344] sm:$0xf0]  ;;  %1776 = vmatpush.bf16.msra.mxu3 %v6560_v36  ;;  %v6575_v0 = vor.u32 %v6051_v24, %v5705_v30  ;;  %1751 = vmatpush.bf16.msra.mxu1 %v6567_v39 }
  0x56   :  { %10128 = vst [vmem:[#allocation82_spill] sm:$0xff] %v6567_v39  ;;  %v5975_v41 = vld [vmem:[#allocation2 + $0x324] sm:$0xf]  ;;  %v5707_v59 = vld [vmem:[#allocation2 + $0x584] sm:$0xf0]  ;;  %1764 = vmatpush.bf16.msra.mxu2 %v6569_v60  ;;  %v6579_v52 = vor.u32 %v5903_v22, %v5131_v54 }
  0x57   :  { %10129 = vst [vmem:[#allocation83_spill] sm:$0xff] %v6569_v60  ;;  %v6047_v2 = vld [vmem:[#allocation2 + $0x564] sm:$0xf]  ;;  %v6581_v49 = vor.u32 %v5975_v41, %v5419_v13  ;;  %v5669_v47 = vld [vmem:[#allocation2 + $0x518] sm:$0xf] }
  0x58   :  { %10130 = vst [vmem:[#allocation84_spill] sm:$0xff] %v6572_v31  ;;  %v6042_v19 = vld [vmem:[#allocation2 + $0x538] sm:$0xf0]  ;;  %v5095_v36 = vld [vmem:[#allocation2 + $0xbc] sm:$0xf0]  ;;  %v6584_v24 = vor.u32 %v6047_v2, %v5707_v59  ;;  %1739 = vmatpush.bf16.msra.mxu0 %v6575_v0 }
  0x59   :  { %10131 = vst [vmem:[#allocation85_spill] sm:$0xff] %v6575_v0  ;;  %v5894_v4 = vld [vmem:[#allocation2 + $0x9c] sm:$0xf]  ;;  %v5383_v42 = vld [vmem:[#allocation2 + $0x2fc] sm:$0xf0]  ;;  %1777 = vmatpush.bf16.msra.mxu3 %v6572_v31  ;;  %v6587_v30 = vor.u32 %v6042_v19, %v5669_v47  ;;  %1752 = vmatpush.bf16.msra.mxu1 %v6579_v52 }
  0x5a   :  { %10132 = vst [vmem:[#allocation86_spill] sm:$0xff] %v6579_v52  ;;  %v5966_v61 = vld [vmem:[#allocation2 + $0x2dc] sm:$0xf]  ;;  %v5671_v60 = vld [vmem:[#allocation2 + $0x53c] sm:$0xf0]  ;;  %1765 = vmatpush.bf16.msra.mxu2 %v6581_v49  ;;  %v6591_v54 = vor.u32 %v5894_v4, %v5095_v36 }
  0x5b   :  { %10133 = vst [vmem:[#allocation87_spill] sm:$0xff] %v6581_v49  ;;  %v6038_v39 = vld [vmem:[#allocation2 + $0x51c] sm:$0xf]  ;;  %v5633_v22 = vld [vmem:[#allocation2 + $0x4d0] sm:$0xf]  ;;  %v6593_v41 = vor.u32 %v5966_v61, %v5383_v42 }
  0x5c   :  { %10134 = vst [vmem:[#allocation88_spill] sm:$0xff] %v6584_v24  ;;  %v6033_v13 = vld [vmem:[#allocation2 + $0x4f0] sm:$0xf0]  ;;  %v5059_v31 = vld [vmem:[#allocation2 + $0x74] sm:$0xf0]  ;;  %v6596_v47 = vor.u32 %v6038_v39, %v5671_v60  ;;  %1740 = vmatpush.bf16.msra.mxu0 %v6587_v30 }
  0x5d   :  { %10135 = vst [vmem:[#allocation89_spill] sm:$0xff] %v6587_v30  ;;  %v5885_v37 = vld [vmem:[#allocation2 + $0x54] sm:$0xf]  ;;  %v5347_v2 = vld [vmem:[#allocation2 + $0x2b4] sm:$0xf0]  ;;  %1778 = vmatpush.bf16.msra.mxu3 %v6584_v24  ;;  %v6599_v0 = vor.u32 %v6033_v13, %v5633_v22  ;;  %1753 = vmatpush.bf16.msra.mxu1 %v6591_v54 }
  0x5e   :  { %10136 = vst [vmem:[#allocation90_spill] sm:$0xff] %v6591_v54  ;;  %v5957_v59 = vld [vmem:[#allocation2 + $0x294] sm:$0xf]  ;;  %v5635_v52 = vld [vmem:[#allocation2 + $0x4f4] sm:$0xf0]  ;;  %1766 = vmatpush.bf16.msra.mxu2 %v6593_v41  ;;  %v6603_v36 = vor.u32 %v5885_v37, %v5059_v31 }
  0x5f   :  { %10137 = vst [vmem:[#allocation91_spill] sm:$0xff] %v6593_v41  ;;  %v6029_v19 = vld [vmem:[#allocation2 + $0x4d4] sm:$0xf]  ;;  %v5597_v49 = vld [vmem:[#allocation2 + $0x488] sm:$0xf]  ;;  %v6605_v61 = vor.u32 %v5957_v59, %v5347_v2 }
  0x60   :  { %10138 = vst [vmem:[#allocation92_spill] sm:$0xff] %v6596_v47  ;;  %v6024_v4 = vld [vmem:[#allocation2 + $0x4a8] sm:$0xf0]  ;;  %v5023_v24 = vld [vmem:[#allocation2 + $0x2c] sm:$0xf0]  ;;  %v6608_v22 = vor.u32 %v6029_v19, %v5635_v52  ;;  %1741 = vmatpush.bf16.msra.mxu0 %v6599_v0 }
  0x61   :  { %10139 = vst [vmem:[#allocation93_spill] sm:$0xff] %v6599_v0  ;;  %v5876_v42 = vld [vmem:[#allocation2 + $0xc] sm:$0xf]  ;;  %v5311_v60 = vld [vmem:[#allocation2 + $0x26c] sm:$0xf0]  ;;  %1779 = vmatpush.bf16.msra.mxu3 %v6596_v47  ;;  %v6611_v41 = vor.u32 %v6024_v4, %v5597_v49  ;;  %1754 = vmatpush.bf16.msra.mxu1 %v6603_v36 }
  0x62   :  { %10140 = vst [vmem:[#allocation94_spill] sm:$0xff] %v6603_v36  ;;  %v5948_v39 = vld [vmem:[#allocation2 + $0x24c] sm:$0xf]  ;;  %v5281_v32 = vld [vmem:[#allocation2 + $0x208] sm:$0xf]  ;;  %1767 = vmatpush.bf16.msra.mxu2 %v6605_v61  ;;  %v6615_v2 = vor.u32 %v5876_v42, %v5023_v24 }
  0x63   :  { %10141 = vst [vmem:[#allocation95_spill] sm:$0xff] %v6605_v61  ;;  %v5944_v10 = vld [vmem:[#allocation2 + $0x228] sm:$0xf0]  ;;  %v5569_v13 = vld [vmem:[#allocation2 + $0x448] sm:$0xf]  ;;  %v6617_v54 = vor.u32 %v5948_v39, %v5311_v60 }
  0x64   :  { %10142 = vst [vmem:[#allocation96_spill] sm:$0xff] %v6608_v22  ;;  %v6016_v30 = vld [vmem:[#allocation2 + $0x468] sm:$0xf0]  ;;  %v5857_v26 = vld [vmem:[#allocation2 + $0x688] sm:$0xf]  ;;  %v6619_v47 = vor.u32 %v5944_v10, %v5281_v32  ;;  %1742 = vmatpush.bf16.msra.mxu0 %v6611_v41 }
  0x65   :  { %10143 = vst [vmem:[#allocation97_spill] sm:$0xff] %v6611_v41  ;;  %v6088_v37 = vld [vmem:[#allocation2 + $0x6a8] sm:$0xf0]  ;;  %v5599_v59 = vld [vmem:[#allocation2 + $0x4ac] sm:$0xf0]  ;;  %v6621_v20 = vor.u32 %v6016_v30, %v5569_v13  ;;  %1780 = vmatpush.bf16.msra.mxu3 %v6608_v22  ;;  %1755 = vmatpush.bf16.msra.mxu1 %v6615_v2 }
  0x66   :  { %v6020_v31 = vld [vmem:[#allocation2 + $0x48c] sm:$0xf]  ;;  %10144 = vst [vmem:[#allocation98_spill] sm:$0xff] %v6615_v2  ;;  %v5283_v19 = vld [vmem:[#allocation2 + $0x22c] sm:$0xf0]  ;;  %v6624_v49 = vor.u32 %v6088_v37, %v5857_v26  ;;  %1768 = vmatpush.bf16.msra.mxu2 %v6617_v54 }
  0x67   :  { %10145 = vst [vmem:[#allocation99_spill] sm:$0xff] %v6617_v54  ;;  %v5940_v52 = vld [vmem:[#allocation2 + $0x20c] sm:$0xf]  ;;  %v6626_v4 = vor.u32 %v6020_v31, %v5599_v59  ;;  %v5245_v0 = vld [vmem:[#allocation2 + $0x1c0] sm:$0xf]  ;;  %1743 = vmatmul.bf16.vlgmr.msra.gmra.mxu0 %v10121_v53 }
  0x68   :  { %10146 = vst [vmem:[#allocation100_spill] sm:$0xff] %v6619_v47  ;;  %v5935_v36 = vld [vmem:[#allocation2 + $0x1e0] sm:$0xf0]  ;;  %v5533_v51 = vld [vmem:[#allocation2 + $0x400] sm:$0xf]  ;;  %v6629_v24 = vor.u32 %v5940_v52, %v5283_v19  ;;  %1787 = vmatpush.bf16.msrb.mxu0 %v6619_v47  ;;  %1756 = vmatmul.bf16.vlgmr.msra.gmra.mxu1 %v10121_v53 }
  0x69   :  { %10147 = vst [vmem:[#allocation101_spill] sm:$0xff] %v6621_v20  ;;  %v6007_v42 = vld [vmem:[#allocation2 + $0x420] sm:$0xf0]  ;;  %v5821_v39 = vld [vmem:[#allocation2 + $0x640] sm:$0xf]  ;;  %1800 = vmatpush.bf16.msrb.mxu1 %v6621_v20  ;;  %v6635_v26 = vor.u32 %v5935_v36, %v5245_v0  ;;  %1781 = vmatpush.bf16.msra.mxu3 %v6626_v4 }
  0x6a   :  { %10148 = vst [vmem:[#allocation102_spill] sm:$0xff] %v6624_v49  ;;  %v6079_v60 = vld [vmem:[#allocation2 + $0x660] sm:$0xf0]  ;;  %v5247_v10 = vld [vmem:[#allocation2 + $0x1e4] sm:$0xf0]  ;;  %1813 = vmatpush.bf16.msrb.mxu2 %v6624_v49  ;;  %v6639_v30 = vor.u32 %v6007_v42, %v5533_v51 }
  0x6b   :  { %10149 = vst [vmem:[#allocation103_spill] sm:$0xff] %v6626_v4  ;;  %v5931_v32 = vld [vmem:[#allocation2 + $0x1c4] sm:$0xf]  ;;  %v6641_v13 = vor.u32 %v6079_v60, %v5821_v39  ;;  %v5209_v37 = vld [vmem:[#allocation2 + $0x178] sm:$0xf]  ;;  %1769 = vmatmul.bf16.vlgmr.msra.gmra.mxu2 %v10121_v53 }
  0x6c   :  { %10150 = vst [vmem:[#allocation104_spill] sm:$0xff] %v6629_v24  ;;  %v5926_v31 = vld [vmem:[#allocation2 + $0x198] sm:$0xf0]  ;;  %v5497_v59 = vld [vmem:[#allocation2 + $0x3b8] sm:$0xf]  ;;  %v6645_v52 = vor.u32 %v5931_v32, %v5247_v10  ;;  %1782 = vmatmul.bf16.vlgmr.msra.gmra.mxu3 %v10121_v53  ;;  %1788 = vmatpush.bf16.msrb.mxu0 %v6635_v26 }
  0x6d   :  { %10151 = vst [vmem:[#allocation105_spill] sm:$0xff] %v6635_v26  ;;  %1826 = vmatpush.bf16.msrb.mxu3 %v6629_v24  ;;  %v5998_v19 = vld [vmem:[#allocation2 + $0x3d8] sm:$0xf0]  ;;  %v5785_v0 = vld [vmem:[#allocation2 + $0x5f8] sm:$0xf]  ;;  %v6651_v39 = vor.u32 %v5926_v31, %v5209_v37  ;;  %1801 = vmatpush.bf16.msrb.mxu1 %v6639_v30 }
  0x6e   :  { %10152 = vst [vmem:[#allocation106_spill] sm:$0xff] %v6639_v30  ;;  %v6070_v36 = vld [vmem:[#allocation2 + $0x618] sm:$0xf0]  ;;  %v5211_v42 = vld [vmem:[#allocation2 + $0x19c] sm:$0xf0]  ;;  %1814 = vmatpush.bf16.msrb.mxu2 %v6641_v13  ;;  %v6655_v60 = vor.u32 %v5998_v19, %v5497_v59 }
  0x6f   :  { %10153 = vst [vmem:[#allocation107_spill] sm:$0xff] %v6641_v13  ;;  %v5922_v51 = vld [vmem:[#allocation2 + $0x17c] sm:$0xf]  ;;  %v6657_v32 = vor.u32 %v6070_v36, %v5785_v0  ;;  %v5173_v10 = vld [vmem:[#allocation2 + $0x130] sm:$0xf] }
  0x70   :  { %10154 = vst [vmem:[#allocation108_spill] sm:$0xff] %v6645_v52  ;;  %v5917_v49 = vld [vmem:[#allocation2 + $0x150] sm:$0xf0]  ;;  %v5461_v54 = vld [vmem:[#allocation2 + $0x370] sm:$0xf]  ;;  %v6660_v61 = vor.u32 %v5922_v51, %v5211_v42  ;;  %1789 = vmatpush.bf16.msrb.mxu0 %v6651_v39 }
  0x71   :  { %10155 = vst [vmem:[#allocation109_spill] sm:$0xff] %v6651_v39  ;;  %1827 = vmatpush.bf16.msrb.mxu3 %v6645_v52  ;;  %v5989_v20 = vld [vmem:[#allocation2 + $0x390] sm:$0xf0]  ;;  %v5749_v2 = vld [vmem:[#allocation2 + $0x5b0] sm:$0xf]  ;;  %v6663_v30 = vor.u32 %v5917_v49, %v5173_v10  ;;  %1802 = vmatpush.bf16.msrb.mxu1 %v6655_v60 }
  0x72   :  { %10156 = vst [vmem:[#allocation110_spill] sm:$0xff] %v6655_v60  ;;  %v6061_v26 = vld [vmem:[#allocation2 + $0x5d0] sm:$0xf0]  ;;  %v5175_v31 = vld [vmem:[#allocation2 + $0x154] sm:$0xf0]  ;;  %1815 = vmatpush.bf16.msrb.mxu2 %v6657_v32  ;;  %v6667_v59 = vor.u32 %v5989_v20, %v5461_v54 }
  0x73   :  { %10157 = vst [vmem:[#allocation111_spill] sm:$0xff] %v6657_v32  ;;  %v5913_v37 = vld [vmem:[#allocation2 + $0x134] sm:$0xf]  ;;  %v6669_v19 = vor.u32 %v6061_v26, %v5749_v2  ;;  %v5137_v0 = vld [vmem:[#allocation2 + $0xe8] sm:$0xf] }
  0x74   :  { %10158 = vst [vmem:[#allocation112_spill] sm:$0xff] %v6660_v61  ;;  %v5908_v36 = vld [vmem:[#allocation2 + $0x108] sm:$0xf0]  ;;  %v5425_v51 = vld [vmem:[#allocation2 + $0x328] sm:$0xf]  ;;  %v6672_v42 = vor.u32 %v5913_v37, %v5175_v31  ;;  %1790 = vmatpush.bf16.msrb.mxu0 %v6663_v30 }
  0x75   :  { %10159 = vst [vmem:[#allocation113_spill] sm:$0xff] %v6663_v30  ;;  %1828 = vmatpush.bf16.msrb.mxu3 %v6660_v61  ;;  %v5980_v13 = vld [vmem:[#allocation2 + $0x348] sm:$0xf0]  ;;  %v5713_v52 = vld [vmem:[#allocation2 + $0x568] sm:$0xf]  ;;  %v6675_v60 = vor.u32 %v5908_v36, %v5137_v0  ;;  %1803 = vmatpush.bf16.msrb.mxu1 %v6667_v59 }
  0x76   :  { %10160 = vst [vmem:[#allocation114_spill] sm:$0xff] %v6667_v59  ;;  %v6052_v39 = vld [vmem:[#allocation2 + $0x588] sm:$0xf0]  ;;  %v5139_v10 = vld [vmem:[#allocation2 + $0x10c] sm:$0xf0]  ;;  %1816 = vmatpush.bf16.msrb.mxu2 %v6669_v19  ;;  %v6679_v20 = vor.u32 %v5980_v13, %v5425_v51 }
  0x77   :  { %10161 = vst [vmem:[#allocation115_spill] sm:$0xff] %v6669_v19  ;;  %v5904_v49 = vld [vmem:[#allocation2 + $0xec] sm:$0xf]  ;;  %v6681_v54 = vor.u32 %v6052_v39, %v5713_v52  ;;  %v5101_v2 = vld [vmem:[#allocation2 + $0xa0] sm:$0xf] }
  0x78   :  { %10162 = vst [vmem:[#allocation116_spill] sm:$0xff] %v6672_v42  ;;  %v5899_v26 = vld [vmem:[#allocation2 + $0xc0] sm:$0xf0]  ;;  %v5389_v37 = vld [vmem:[#allocation2 + $0x2e0] sm:$0xf]  ;;  %v6684_v31 = vor.u32 %v5904_v49, %v5139_v10  ;;  %1791 = vmatpush.bf16.msrb.mxu0 %v6675_v60 }
  0x79   :  { %10163 = vst [vmem:[#allocation117_spill] sm:$0xff] %v6675_v60  ;;  %1829 = vmatpush.bf16.msrb.mxu3 %v6672_v42  ;;  %v5971_v32 = vld [vmem:[#allocation2 + $0x300] sm:$0xf0]  ;;  %v5677_v61 = vld [vmem:[#allocation2 + $0x520] sm:$0xf]  ;;  %v6687_v59 = vor.u32 %v5899_v26, %v5101_v2  ;;  %1804 = vmatpush.bf16.msrb.mxu1 %v6679_v20 }
  0x7a   :  { %10164 = vst [vmem:[#allocation118_spill] sm:$0xff] %v6679_v20  ;;  %v6043_v30 = vld [vmem:[#allocation2 + $0x540] sm:$0xf0]  ;;  %v5103_v36 = vld [vmem:[#allocation2 + $0xc4] sm:$0xf0]  ;;  %1817 = vmatpush.bf16.msrb.mxu2 %v6681_v54  ;;  %v6691_v13 = vor.u32 %v5971_v32, %v5389_v37 }
  0x7b   :  { %10165 = vst [vmem:[#allocation119_spill] sm:$0xff] %v6681_v54  ;;  %v5895_v0 = vld [vmem:[#allocation2 + $0xa4] sm:$0xf]  ;;  %v6693_v52 = vor.u32 %v6043_v30, %v5677_v61  ;;  %v5065_v39 = vld [vmem:[#allocation2 + $0x58] sm:$0xf] }
  0x7c   :  { %10166 = vst [vmem:[#allocation120_spill] sm:$0xff] %v6684_v31  ;;  %v5890_v51 = vld [vmem:[#allocation2 + $0x78] sm:$0xf0]  ;;  %v5353_v49 = vld [vmem:[#allocation2 + $0x298] sm:$0xf]  ;;  %v6696_v10 = vor.u32 %v5895_v0, %v5103_v36  ;;  %1792 = vmatpush.bf16.msrb.mxu0 %v6687_v59 }
  0x7d   :  { %10167 = vst [vmem:[#allocation121_spill] sm:$0xff] %v6687_v59  ;;  %1830 = vmatpush.bf16.msrb.mxu3 %v6684_v31  ;;  %v5962_v19 = vld [vmem:[#allocation2 + $0x2b8] sm:$0xf0]  ;;  %v5641_v42 = vld [vmem:[#allocation2 + $0x4d8] sm:$0xf]  ;;  %v6699_v20 = vor.u32 %v5890_v51, %v5065_v39  ;;  %1805 = vmatpush.bf16.msrb.mxu1 %v6691_v13 }
  0x7e   :  { %10168 = vst [vmem:[#allocation122_spill] sm:$0xff] %v6691_v13  ;;  %v6034_v60 = vld [vmem:[#allocation2 + $0x4f8] sm:$0xf0]  ;;  %v5067_v26 = vld [vmem:[#allocation2 + $0x7c] sm:$0xf0]  ;;  %1818 = vmatpush.bf16.msrb.mxu2 %v6693_v52  ;;  %v6703_v61 = vor.u32 %v5962_v19, %v5353_v49 }
  0x7f   :  { %10169 = vst [vmem:[#allocation123_spill] sm:$0xff] %v6693_v52  ;;  %v5886_v2 = vld [vmem:[#allocation2 + $0x5c] sm:$0xf]  ;;  %v5029_v32 = vld [vmem:[#allocation2 + $0x10] sm:$0xf]  ;;  %v6705_v30 = vor.u32 %v6034_v60, %v5641_v42 }
  0x80   :  { %10170 = vst [vmem:[#allocation124_spill] sm:$0xff] %v6696_v10  ;;  %v5881_v37 = vld [vmem:[#allocation2 + $0x30] sm:$0xf0]  ;;  %v5317_v0 = vld [vmem:[#allocation2 + $0x250] sm:$0xf]  ;;  %v6708_v31 = vor.u32 %v5886_v2, %v5067_v26  ;;  %1793 = vmatpush.bf16.msrb.mxu0 %v6699_v20 }
  0x81   :  { %10171 = vst [vmem:[#allocation125_spill] sm:$0xff] %v6699_v20  ;;  %v5953_v36 = vld [vmem:[#allocation2 + $0x270] sm:$0xf0]  ;;  %v5605_v54 = vld [vmem:[#allocation2 + $0x490] sm:$0xf]  ;;  %1831 = vmatpush.bf16.msrb.mxu3 %v6696_v10  ;;  %v6711_v52 = vor.u32 %v5881_v37, %v5029_v32  ;;  %1806 = vmatpush.bf16.msrb.mxu1 %v6703_v61 }
  0x82   :  { %10172 = vst [vmem:[#allocation126_spill] sm:$0xff] %v6703_v61  ;;  %v6025_v59 = vld [vmem:[#allocation2 + $0x4b0] sm:$0xf0]  ;;  %v6012_v39 = vld [vmem:[#allocation2 + $0x44c] sm:$0xf]  ;;  %1819 = vmatpush.bf16.msrb.mxu2 %v6705_v30  ;;  %v6715_v49 = vor.u32 %v5953_v36, %v5317_v0 }
  0x83   :  { %10173 = vst [vmem:[#allocation127_spill] sm:$0xff] %v6705_v30  ;;  %v5571_v51 = vld [vmem:[#allocation2 + $0x46c] sm:$0xf0]  ;;  %v6084_v24 = vld [vmem:[#allocation2 + $0x68c] sm:$0xf]  ;;  %v6717_v2 = vor.u32 %v6025_v59, %v5605_v54 }
  0x84   :  { %10174 = vst [vmem:[#allocation128_spill] sm:$0xff] %v6708_v31  ;;  %v5859_v47 = vld [vmem:[#allocation2 + $0x6ac] sm:$0xf0]  ;;  %v5945_v19 = vld [vmem:[#allocation2 + $0x230] sm:$0xf0]  ;;  %v6720_v10 = vor.u32 %v6012_v39, %v5571_v51  ;;  %1794 = vmatpush.bf16.msrb.mxu0 %v6711_v52 }
  0x85   :  { %v5289_v4 = vld [vmem:[#allocation2 + $0x210] sm:$0xf]  ;;  %10175 = vst [vmem:[#allocation129_spill] sm:$0xff] %v6711_v52  ;;  %v5877_v60 = vld [vmem:[#allocation2 + $0x14] sm:$0xf]  ;;  %1832 = vmatpush.bf16.msrb.mxu3 %v6708_v31  ;;  %v6722_v20 = vor.u32 %v6084_v24, %v5859_v47  ;;  %1807 = vmatpush.bf16.msrb.mxu1 %v6715_v49 }
  0x86   :  { %v5031_v42 = vld [vmem:[#allocation2 + $0x34] sm:$0xf0]  ;;  %10176 = vst [vmem:[#allocation130_spill] sm:$0xff] %v6715_v49  ;;  %v5577_v26 = vld [vmem:[#allocation2 + $0x450] sm:$0xf]  ;;  %v6724_v37 = vor.u32 %v5945_v19, %v5289_v4  ;;  %1820 = vmatpush.bf16.msrb.mxu2 %v6717_v2 }
  0x87   :  { %10177 = vst [vmem:[#allocation131_spill] sm:$0xff] %v6717_v2  ;;  %v6017_v13 = vld [vmem:[#allocation2 + $0x470] sm:$0xf0]  ;;  %v6003_v32 = vld [vmem:[#allocation2 + $0x404] sm:$0xf]  ;;  %v6726_v41 = vor.u32 %v5877_v60, %v5031_v42  ;;  %1795 = vmatmul.bf16.vlgmr.msrb.gmra.mxu0 %v10121_v53 }
  0x88   :  { %10178 = vst [vmem:[#allocation132_spill] sm:$0xff] %v6720_v10  ;;  %v5535_v61 = vld [vmem:[#allocation2 + $0x424] sm:$0xf0]  ;;  %v6075_v22 = vld [vmem:[#allocation2 + $0x644] sm:$0xf]  ;;  %v6729_v59 = vor.u32 %v6017_v13, %v5577_v26  ;;  %1839 = vmatpush.bf16.msra.mxu0 %v6720_v10  ;;  %1808 = vmatmul.bf16.vlgmr.msrb.gmra.mxu1 %v10121_v53 }
  0x89   :  { %10179 = vst [vmem:[#allocation133_spill] sm:$0xff] %v6722_v20  ;;  %v5823_v30 = vld [vmem:[#allocation2 + $0x664] sm:$0xf0]  ;;  %v5936_v0 = vld [vmem:[#allocation2 + $0x1e8] sm:$0xf0]  ;;  %1852 = vmatpush.bf16.msra.mxu1 %v6722_v20  ;;  %v6735_v4 = vor.u32 %v6003_v32, %v5535_v61  ;;  %1833 = vmatpush.bf16.msrb.mxu3 %v6726_v41 }
  0x8a   :  { %10180 = vst [vmem:[#allocation134_spill] sm:$0xff] %v6724_v37  ;;  %v5253_v54 = vld [vmem:[#allocation2 + $0x1c8] sm:$0xf]  ;;  %v6008_v24 = vld [vmem:[#allocation2 + $0x428] sm:$0xf0]  ;;  %v6737_v36 = vor.u32 %v6075_v22, %v5823_v30  ;;  %1865 = vmatpush.bf16.msra.mxu2 %v6724_v37 }
  0x8b   :  { %10181 = vst [vmem:[#allocation135_spill] sm:$0xff] %v6726_v41  ;;  %v5541_v47 = vld [vmem:[#allocation2 + $0x408] sm:$0xf]  ;;  %v5994_v39 = vld [vmem:[#allocation2 + $0x3bc] sm:$0xf]  ;;  %v6741_v13 = vor.u32 %v5936_v0, %v5253_v54  ;;  %1821 = vmatmul.bf16.vlgmr.msrb.gmra.mxu2 %v10121_v53 }
  0x8c   :  { %10182 = vst [vmem:[#allocation136_spill] sm:$0xff] %v6729_v59  ;;  %v5499_v51 = vld [vmem:[#allocation2 + $0x3dc] sm:$0xf0]  ;;  %v6066_v19 = vld [vmem:[#allocation2 + $0x5fc] sm:$0xf]  ;;  %v6745_v42 = vor.u32 %v6008_v24, %v5541_v47  ;;  %1840 = vmatpush.bf16.msra.mxu0 %v6735_v4  ;;  %1834 = vmatmul.bf16.vlgmr.msrb.gmra.mxu3 %v10121_v53 }
  0x8d   :  { %10183 = vst [vmem:[#allocation137_spill] sm:$0xff] %v6735_v4  ;;  %v5787_v60 = vld [vmem:[#allocation2 + $0x61c] sm:$0xf0]  ;;  %1878 = vmatpush.bf16.msra.mxu3 %v6729_v59  ;;  %v5927_v26 = vld [vmem:[#allocation2 + $0x1a0] sm:$0xf0]  ;;  %1853 = vmatpush.bf16.msra.mxu1 %v6737_v36  ;;  %v6751_v32 = vor.u32 %v5994_v39, %v5499_v51 }
  0x8e   :  { %10184 = vst [vmem:[#allocation138_spill] sm:$0xff] %v6737_v36  ;;  %v5217_v61 = vld [vmem:[#allocation2 + $0x180] sm:$0xf]  ;;  %v5999_v30 = vld [vmem:[#allocation2 + $0x3e0] sm:$0xf0]  ;;  %v6753_v54 = vor.u32 %v6066_v19, %v5787_v60  ;;  %1866 = vmatpush.bf16.msra.mxu2 %v6741_v13 }
  0x8f   :  { %10185 = vst [vmem:[#allocation139_spill] sm:$0xff] %v6741_v13  ;;  %v5505_v22 = vld [vmem:[#allocation2 + $0x3c0] sm:$0xf]  ;;  %v5985_v0 = vld [vmem:[#allocation2 + $0x374] sm:$0xf]  ;;  %v6756_v47 = vor.u32 %v5927_v26, %v5217_v61 }
  0x90   :  { %10186 = vst [vmem:[#allocation140_spill] sm:$0xff] %v6745_v42  ;;  %v5463_v24 = vld [vmem:[#allocation2 + $0x394] sm:$0xf0]  ;;  %v6057_v37 = vld [vmem:[#allocation2 + $0x5b4] sm:$0xf]  ;;  %v6760_v20 = vor.u32 %v5999_v30, %v5505_v22  ;;  %1841 = vmatpush.bf16.msra.mxu0 %v6751_v32 }
  0x91   :  { %10187 = vst [vmem:[#allocation141_spill] sm:$0xff] %v6751_v32  ;;  %v5751_v2 = vld [vmem:[#allocation2 + $0x5d4] sm:$0xf0]  ;;  %1879 = vmatpush.bf16.msra.mxu3 %v6745_v42  ;;  %v5918_v36 = vld [vmem:[#allocation2 + $0x158] sm:$0xf0]  ;;  %1854 = vmatpush.bf16.msra.mxu1 %v6753_v54  ;;  %v6764_v19 = vor.u32 %v5985_v0, %v5463_v24 }
  0x92   :  { %10188 = vst [vmem:[#allocation142_spill] sm:$0xff] %v6753_v54  ;;  %v5181_v49 = vld [vmem:[#allocation2 + $0x138] sm:$0xf]  ;;  %v5990_v51 = vld [vmem:[#allocation2 + $0x398] sm:$0xf0]  ;;  %v6766_v60 = vor.u32 %v6057_v37, %v5751_v2  ;;  %1867 = vmatpush.bf16.msra.mxu2 %v6756_v47 }
  0x93   :  { %10189 = vst [vmem:[#allocation143_spill] sm:$0xff] %v6756_v47  ;;  %v5469_v39 = vld [vmem:[#allocation2 + $0x378] sm:$0xf]  ;;  %v5976_v61 = vld [vmem:[#allocation2 + $0x32c] sm:$0xf]  ;;  %v6769_v26 = vor.u32 %v5918_v36, %v5181_v49 }
  0x94   :  { %10190 = vst [vmem:[#allocation144_spill] sm:$0xff] %v6760_v20  ;;  %v5427_v13 = vld [vmem:[#allocation2 + $0x34c] sm:$0xf0]  ;;  %v6048_v22 = vld [vmem:[#allocation2 + $0x56c] sm:$0xf]  ;;  %v6772_v42 = vor.u32 %v5990_v51, %v5469_v39  ;;  %1842 = vmatpush.bf16.msra.mxu0 %v6764_v19 }
  0x95   :  { %10191 = vst [vmem:[#allocation145_spill] sm:$0xff] %v6764_v19  ;;  %v5715_v30 = vld [vmem:[#allocation2 + $0x58c] sm:$0xf0]  ;;  %1880 = vmatpush.bf16.msra.mxu3 %v6760_v20  ;;  %v5909_v32 = vld [vmem:[#allocation2 + $0x110] sm:$0xf0]  ;;  %1855 = vmatpush.bf16.msra.mxu1 %v6766_v60  ;;  %v6776_v2 = vor.u32 %v5976_v61, %v5427_v13 }
  0x96   :  { %10192 = vst [vmem:[#allocation146_spill] sm:$0xff] %v6766_v60  ;;  %v5145_v4 = vld [vmem:[#allocation2 + $0xf0] sm:$0xf]  ;;  %v5981_v54 = vld [vmem:[#allocation2 + $0x350] sm:$0xf0]  ;;  %v6778_v37 = vor.u32 %v6048_v22, %v5715_v30  ;;  %1868 = vmatpush.bf16.msra.mxu2 %v6769_v26 }
  0x97   :  { %10193 = vst [vmem:[#allocation147_spill] sm:$0xff] %v6769_v26  ;;  %v5433_v59 = vld [vmem:[#allocation2 + $0x330] sm:$0xf]  ;;  %v5967_v49 = vld [vmem:[#allocation2 + $0x2e4] sm:$0xf]  ;;  %v6781_v36 = vor.u32 %v5909_v32, %v5145_v4 }
  0x98   :  { %10194 = vst [vmem:[#allocation148_spill] sm:$0xff] %v6772_v42  ;;  %v5391_v0 = vld [vmem:[#allocation2 + $0x304] sm:$0xf0]  ;;  %v6039_v24 = vld [vmem:[#allocation2 + $0x524] sm:$0xf]  ;;  %v6784_v51 = vor.u32 %v5981_v54, %v5433_v59  ;;  %1843 = vmatpush.bf16.msra.mxu0 %v6776_v2 }
  0x99   :  { %10195 = vst [vmem:[#allocation149_spill] sm:$0xff] %v6776_v2  ;;  %v5679_v39 = vld [vmem:[#allocation2 + $0x544] sm:$0xf0]  ;;  %1881 = vmatpush.bf16.msra.mxu3 %v6772_v42  ;;  %v5900_v19 = vld [vmem:[#allocation2 + $0xc8] sm:$0xf0]  ;;  %1856 = vmatpush.bf16.msra.mxu1 %v6778_v37  ;;  %v6788_v13 = vor.u32 %v5967_v49, %v5391_v0 }
  0x9a   :  { %10196 = vst [vmem:[#allocation150_spill] sm:$0xff] %v6778_v37  ;;  %v5109_v47 = vld [vmem:[#allocation2 + $0xa8] sm:$0xf]  ;;  %v5972_v60 = vld [vmem:[#allocation2 + $0x308] sm:$0xf0]  ;;  %v6790_v61 = vor.u32 %v6039_v24, %v5679_v39  ;;  %1869 = vmatpush.bf16.msra.mxu2 %v6781_v36 }
  0x9b   :  { %10197 = vst [vmem:[#allocation151_spill] sm:$0xff] %v6781_v36  ;;  %v5397_v20 = vld [vmem:[#allocation2 + $0x2e8] sm:$0xf]  ;;  %v5958_v4 = vld [vmem:[#allocation2 + $0x29c] sm:$0xf]  ;;  %v6793_v32 = vor.u32 %v5900_v19, %v5109_v47 }
  0x9c   :  { %10198 = vst [vmem:[#allocation152_spill] sm:$0xff] %v6784_v51  ;;  %v5355_v22 = vld [vmem:[#allocation2 + $0x2bc] sm:$0xf0]  ;;  %v6030_v59 = vld [vmem:[#allocation2 + $0x4dc] sm:$0xf]  ;;  %v6796_v30 = vor.u32 %v5972_v60, %v5397_v20  ;;  %1844 = vmatpush.bf16.msra.mxu0 %v6788_v13 }
  0x9d   :  { %10199 = vst [vmem:[#allocation153_spill] sm:$0xff] %v6788_v13  ;;  %v5643_v54 = vld [vmem:[#allocation2 + $0x4fc] sm:$0xf0]  ;;  %1882 = vmatpush.bf16.msra.mxu3 %v6784_v51  ;;  %v5891_v2 = vld [vmem:[#allocation2 + $0x80] sm:$0xf0]  ;;  %1857 = vmatpush.bf16.msra.mxu1 %v6790_v61  ;;  %v6800_v49 = vor.u32 %v5958_v4, %v5355_v22 }
  0x9e   :  { %10200 = vst [vmem:[#allocation154_spill] sm:$0xff] %v6790_v61  ;;  %v5073_v26 = vld [vmem:[#allocation2 + $0x60] sm:$0xf]  ;;  %v5963_v37 = vld [vmem:[#allocation2 + $0x2c0] sm:$0xf0]  ;;  %v6802_v0 = vor.u32 %v6030_v59, %v5643_v54  ;;  %1870 = vmatpush.bf16.msra.mxu2 %v6793_v32 }
  0x9f   :  { %10201 = vst [vmem:[#allocation155_spill] sm:$0xff] %v6793_v32  ;;  %v5361_v42 = vld [vmem:[#allocation2 + $0x2a0] sm:$0xf]  ;;  %v5949_v47 = vld [vmem:[#allocation2 + $0x254] sm:$0xf]  ;;  %v6805_v39 = vor.u32 %v5891_v2, %v5073_v26 }
  0xa0   :  { %10202 = vst [vmem:[#allocation156_spill] sm:$0xff] %v6796_v30  ;;  %v5319_v19 = vld [vmem:[#allocation2 + $0x274] sm:$0xf0]  ;;  %v6021_v24 = vld [vmem:[#allocation2 + $0x494] sm:$0xf]  ;;  %v6808_v51 = vor.u32 %v5963_v37, %v5361_v42  ;;  %1845 = vmatpush.bf16.msra.mxu0 %v6800_v49 }
  0xa1   :  { %10203 = vst [vmem:[#allocation157_spill] sm:$0xff] %v6800_v49  ;;  %v5607_v20 = vld [vmem:[#allocation2 + $0x4b4] sm:$0xf0]  ;;  %v5882_v36 = vld [vmem:[#allocation2 + $0x38] sm:$0xf0]  ;;  %1883 = vmatpush.bf16.msra.mxu3 %v6796_v30  ;;  %1858 = vmatpush.bf16.msra.mxu1 %v6802_v0  ;;  %v6812_v32 = vor.u32 %v5949_v47, %v5319_v19 }
  0xa2   :  { %10204 = vst [vmem:[#allocation158_spill] sm:$0xff] %v6802_v0  ;;  %v5037_v60 = vld [vmem:[#allocation2 + $0x18] sm:$0xf]  ;;  %v5865_v13 = vld [vmem:[#allocation2 + $0x690] sm:$0xf]  ;;  %v6814_v26 = vor.u32 %v6021_v24, %v5607_v20  ;;  %1871 = vmatpush.bf16.msra.mxu2 %v6805_v39 }
  0xa3   :  { %10205 = vst [vmem:[#allocation159_spill] sm:$0xff] %v6805_v39  ;;  %v6089_v61 = vld [vmem:[#allocation2 + $0x6b0] sm:$0xf0]  ;;  %v5291_v22 = vld [vmem:[#allocation2 + $0x234] sm:$0xf0]  ;;  %v6817_v42 = vor.u32 %v5882_v36, %v5037_v60 }
  0xa4   :  { %10206 = vst [vmem:[#allocation160_spill] sm:$0xff] %v6808_v51  ;;  %v5941_v4 = vld [vmem:[#allocation2 + $0x214] sm:$0xf]  ;;  %v5579_v54 = vld [vmem:[#allocation2 + $0x474] sm:$0xf0]  ;;  %v6819_v37 = vor.u32 %v6089_v61, %v5865_v13  ;;  %1846 = vmatpush.bf16.msra.mxu0 %v6812_v32 }
  0xa5   :  { %v6013_v59 = vld [vmem:[#allocation2 + $0x454] sm:$0xf]  ;;  %10207 = vst [vmem:[#allocation161_spill] sm:$0xff] %v6812_v32  ;;  %v5325_v2 = vld [vmem:[#allocation2 + $0x258] sm:$0xf]  ;;  %1884 = vmatpush.bf16.msra.mxu3 %v6808_v51  ;;  %v6822_v52 = vor.u32 %v5941_v4, %v5291_v22  ;;  %1859 = vmatpush.bf16.msra.mxu1 %v6814_v26 }
  0xa6   :  { %10208 = vst [vmem:[#allocation162_spill] sm:$0xff] %v6814_v26  ;;  %v5954_v10 = vld [vmem:[#allocation2 + $0x278] sm:$0xf0]  ;;  %v6085_v30 = vld [vmem:[#allocation2 + $0x694] sm:$0xf]  ;;  %v6824_v49 = vor.u32 %v6013_v59, %v5579_v54  ;;  %1872 = vmatpush.bf16.msra.mxu2 %v6817_v42 }
  0xa7   :  { %10209 = vst [vmem:[#allocation163_spill] sm:$0xff] %v6817_v42  ;;  %v5867_v41 = vld [vmem:[#allocation2 + $0x6b4] sm:$0xf0]  ;;  %v5829_v47 = vld [vmem:[#allocation2 + $0x648] sm:$0xf]  ;;  %v6826_v20 = vor.u32 %v5954_v10, %v5325_v2  ;;  %1847 = vmatmul.bf16.vlgmr.msra.gmra.mxu0 %v10121_v53 }
  0xa8   :  { %10210 = vst [vmem:[#allocation164_spill] sm:$0xff] %v6819_v37  ;;  %v6080_v19 = vld [vmem:[#allocation2 + $0x668] sm:$0xf0]  ;;  %v5255_v0 = vld [vmem:[#allocation2 + $0x1ec] sm:$0xf0]  ;;  %v6830_v36 = vor.u32 %v6085_v30, %v5867_v41  ;;  %1891 = vmatpush.bf16.msrb.mxu0 %v6819_v37  ;;  %1860 = vmatmul.bf16.vlgmr.msra.gmra.mxu1 %v10121_v53 }
  0xa9   :  { %10211 = vst [vmem:[#allocation165_spill] sm:$0xff] %v6822_v52  ;;  %v5932_v24 = vld [vmem:[#allocation2 + $0x1cc] sm:$0xf]  ;;  %v5543_v39 = vld [vmem:[#allocation2 + $0x42c] sm:$0xf0]  ;;  %v6834_v13 = vor.u32 %v6080_v19, %v5829_v47  ;;  %1904 = vmatpush.bf16.msrb.mxu1 %v6822_v52  ;;  %1885 = vmatpush.bf16.msra.mxu3 %v6826_v20 }
  0xaa   :  { %10212 = vst [vmem:[#allocation166_spill] sm:$0xff] %v6824_v49  ;;  %v6004_v31 = vld [vmem:[#allocation2 + $0x40c] sm:$0xf]  ;;  %v5831_v60 = vld [vmem:[#allocation2 + $0x66c] sm:$0xf0]  ;;  %1917 = vmatpush.bf16.msrb.mxu2 %v6824_v49  ;;  %v6838_v10 = vor.u32 %v5932_v24, %v5255_v0 }
  0xab   :  { %10213 = vst [vmem:[#allocation167_spill] sm:$0xff] %v6826_v20  ;;  %v6076_v61 = vld [vmem:[#allocation2 + $0x64c] sm:$0xf]  ;;  %v6840_v4 = vor.u32 %v6004_v31, %v5543_v39  ;;  %v5793_v22 = vld [vmem:[#allocation2 + $0x600] sm:$0xf]  ;;  %1873 = vmatmul.bf16.vlgmr.msra.gmra.mxu2 %v10121_v53 }
  0xac   :  { %10214 = vst [vmem:[#allocation168_spill] sm:$0xff] %v6830_v36  ;;  %v6071_v59 = vld [vmem:[#allocation2 + $0x620] sm:$0xf0]  ;;  %v5219_v30 = vld [vmem:[#allocation2 + $0x1a4] sm:$0xf0]  ;;  %v6846_v47 = vor.u32 %v6076_v61, %v5831_v60  ;;  %1892 = vmatpush.bf16.msrb.mxu0 %v6834_v13  ;;  %1886 = vmatmul.bf16.vlgmr.msra.gmra.mxu3 %v10121_v53 }
  0xad   :  { %10215 = vst [vmem:[#allocation169_spill] sm:$0xff] %v6834_v13  ;;  %v5923_v41 = vld [vmem:[#allocation2 + $0x184] sm:$0xf]  ;;  %v5507_v2 = vld [vmem:[#allocation2 + $0x3e4] sm:$0xf0]  ;;  %1930 = vmatpush.bf16.msrb.mxu3 %v6830_v36  ;;  %v6849_v31 = vor.u32 %v6071_v59, %v5793_v22  ;;  %1905 = vmatpush.bf16.msrb.mxu1 %v6838_v10 }
  0xae   :  { %10216 = vst [vmem:[#allocation170_spill] sm:$0xff] %v6838_v10  ;;  %v5995_v54 = vld [vmem:[#allocation2 + $0x3c4] sm:$0xf]  ;;  %v5795_v39 = vld [vmem:[#allocation2 + $0x624] sm:$0xf0]  ;;  %1918 = vmatpush.bf16.msrb.mxu2 %v6840_v4  ;;  %v6854_v19 = vor.u32 %v5923_v41, %v5219_v30 }
  0xaf   :  { %10217 = vst [vmem:[#allocation171_spill] sm:$0xff] %v6840_v4  ;;  %v6067_v0 = vld [vmem:[#allocation2 + $0x604] sm:$0xf]  ;;  %v6856_v24 = vor.u32 %v5995_v54, %v5507_v2  ;;  %v5757_v49 = vld [vmem:[#allocation2 + $0x5b8] sm:$0xf]  ;;  %v6906_v20 = vpop.f32.mrf.mxu3 }
  0xb0   :  { %10218 = vst [vmem:[#allocation172_spill] sm:$0xff] %v6846_v47  ;;  %v6062_v42 = vld [vmem:[#allocation2 + $0x5d8] sm:$0xf0]  ;;  %v5183_v60 = vld [vmem:[#allocation2 + $0x15c] sm:$0xf0]  ;;  %v6860_v22 = vor.u32 %v6067_v0, %v5795_v39  ;;  %1893 = vmatpush.bf16.msrb.mxu0 %v6849_v31 }
  0xb1   :  { %10219 = vst [vmem:[#allocation173_spill] sm:$0xff] %v6849_v31  ;;  %v5914_v61 = vld [vmem:[#allocation2 + $0x13c] sm:$0xf]  ;;  %v5471_v26 = vld [vmem:[#allocation2 + $0x39c] sm:$0xf0]  ;;  %1931 = vmatpush.bf16.msrb.mxu3 %v6846_v47  ;;  %v6863_v59 = vor.u32 %v6062_v42, %v5757_v49  ;;  %1906 = vmatpush.bf16.msrb.mxu1 %v6854_v19 }
  0xb2   :  { %10220 = vst [vmem:[#allocation174_spill] sm:$0xff] %v6854_v19  ;;  %v5986_v52 = vld [vmem:[#allocation2 + $0x37c] sm:$0xf]  ;;  %v5759_v30 = vld [vmem:[#allocation2 + $0x5dc] sm:$0xf0]  ;;  %1919 = vmatpush.bf16.msrb.mxu2 %v6856_v24  ;;  %v6867_v54 = vor.u32 %v5914_v61, %v5183_v60  ;;  %v1640_v61 = vpop.f32.mrf.mxu0 }
  0xb3   :  { %10221 = vst [vmem:[#allocation175_spill] sm:$0xff] %v6856_v24  ;;  %v6058_v41 = vld [vmem:[#allocation2 + $0x5bc] sm:$0xf]  ;;  %v6869_v2 = vor.u32 %v5986_v52, %v5471_v26  ;;  %v5721_v4 = vld [vmem:[#allocation2 + $0x570] sm:$0xf] }
  0xb4   :  { %10222 = vst [vmem:[#allocation176_spill] sm:$0xff] %v6860_v22  ;;  %v6053_v10 = vld [vmem:[#allocation2 + $0x590] sm:$0xf0]  ;;  %v5147_v47 = vld [vmem:[#allocation2 + $0x114] sm:$0xf0]  ;;  %v6872_v49 = vor.u32 %v6058_v41, %v5759_v30  ;;  %1894 = vmatpush.bf16.msrb.mxu0 %v6863_v59 }
  0xb5   :  { %10223 = vst [vmem:[#allocation177_spill] sm:$0xff] %v6863_v59  ;;  %v5905_v13 = vld [vmem:[#allocation2 + $0xf4] sm:$0xf]  ;;  %v5435_v39 = vld [vmem:[#allocation2 + $0x354] sm:$0xf0]  ;;  %1932 = vmatpush.bf16.msrb.mxu3 %v6860_v22  ;;  %v6875_v42 = vor.u32 %v6053_v10, %v5721_v4  ;;  %1907 = vmatpush.bf16.msrb.mxu1 %v6867_v54  ;;  %v1653_v59 = vpop.f32.mrf.mxu1 }
  0xb6   :  { %10224 = vst [vmem:[#allocation178_spill] sm:$0xff] %v6867_v54  ;;  %v5977_v0 = vld [vmem:[#allocation2 + $0x334] sm:$0xf]  ;;  %v5723_v24 = vld [vmem:[#allocation2 + $0x594] sm:$0xf0]  ;;  %1920 = vmatpush.bf16.msrb.mxu2 %v6869_v2  ;;  %v6879_v52 = vor.u32 %v5905_v13, %v5147_v47  ;;  %v1654_v4 = vadd.f32 %v1653_v59, %v1640_v61 }
  0xb7   :  { %10225 = vst [vmem:[#allocation179_spill] sm:$0xff] %v6869_v2  ;;  %v6049_v19 = vld [vmem:[#allocation2 + $0x574] sm:$0xf]  ;;  %v6881_v26 = vor.u32 %v5977_v0, %v5435_v39  ;;  %v5685_v60 = vld [vmem:[#allocation2 + $0x528] sm:$0xf] }
  0xb8   :  { %10226 = vst [vmem:[#allocation180_spill] sm:$0xff] %v6872_v49  ;;  %v6044_v31 = vld [vmem:[#allocation2 + $0x548] sm:$0xf0]  ;;  %v5111_v41 = vld [vmem:[#allocation2 + $0xcc] sm:$0xf0]  ;;  %v6884_v10 = vor.u32 %v6049_v19, %v5723_v24  ;;  %1895 = vmatpush.bf16.msrb.mxu0 %v6875_v42 }
  0xb9   :  { %10227 = vst [vmem:[#allocation181_spill] sm:$0xff] %v6875_v42  ;;  %v5896_v22 = vld [vmem:[#allocation2 + $0xac] sm:$0xf]  ;;  %v5399_v36 = vld [vmem:[#allocation2 + $0x30c] sm:$0xf0]  ;;  %1933 = vmatpush.bf16.msrb.mxu3 %v6872_v49  ;;  %v6887_v54 = vor.u32 %v6044_v31, %v5685_v60  ;;  %1908 = vmatpush.bf16.msrb.mxu1 %v6879_v52  ;;  %v1666_v60 = vpop.f32.mrf.mxu2 }
  0xba   :  { %10228 = vst [vmem:[#allocation182_spill] sm:$0xff] %v6879_v52  ;;  %v5968_v30 = vld [vmem:[#allocation2 + $0x2ec] sm:$0xf]  ;;  %v5687_v47 = vld [vmem:[#allocation2 + $0x54c] sm:$0xf0]  ;;  %1921 = vmatpush.bf16.msrb.mxu2 %v6881_v26  ;;  %v6891_v0 = vor.u32 %v5896_v22, %v5111_v41  ;;  %v6904_v52 = vadd.f32 %v1666_v60, %v1654_v4  ;;  %v1642_v42 = vpop.f32.mrf.mxu0 }
  0xbb   :  { %10229 = vst [vmem:[#allocation183_spill] sm:$0xff] %v6881_v26  ;;  %v6040_v13 = vld [vmem:[#allocation2 + $0x52c] sm:$0xf]  ;;  %v6893_v39 = vor.u32 %v5968_v30, %v5399_v36  ;;  %v5649_v2 = vld [vmem:[#allocation2 + $0x4e0] sm:$0xf] }
  0xbc   :  { %10230 = vst [vmem:[#allocation184_spill] sm:$0xff] %v6884_v10  ;;  %v6035_v37 = vld [vmem:[#allocation2 + $0x500] sm:$0xf0]  ;;  %v5075_v19 = vld [vmem:[#allocation2 + $0x84] sm:$0xf0]  ;;  %v6896_v31 = vor.u32 %v6040_v13, %v5687_v47  ;;  %1896 = vmatpush.bf16.msrb.mxu0 %v6887_v54 }
  0xbd   :  { %10231 = vst [vmem:[#allocation185_spill] sm:$0xff] %v6887_v54  ;;  %v5887_v49 = vld [vmem:[#allocation2 + $0x64] sm:$0xf]  ;;  %v5363_v59 = vld [vmem:[#allocation2 + $0x2c4] sm:$0xf0]  ;;  %1934 = vmatpush.bf16.msrb.mxu3 %v6884_v10  ;;  %v6902_v36 = vor.u32 %v6035_v37, %v5649_v2  ;;  %1909 = vmatpush.bf16.msrb.mxu1 %v6891_v0  ;;  %v1655_v4 = vpop.f32.mrf.mxu1 }
  0xbe   :  { %10232 = vst [vmem:[#allocation186_spill] sm:$0xff] %v6891_v0  ;;  %v5959_v24 = vld [vmem:[#allocation2 + $0x2a4] sm:$0xf]  ;;  %v44_v26 = vld [vmem:[%s9518_s0 + $0x8] sm:$0xff]  ;;  %v5613_v41 = vld [vmem:[#allocation2 + $0x498] sm:$0xf]  ;;  %1922 = vmatpush.bf16.msrb.mxu2 %v6893_v39  ;;  %v6910_v13 = vor.u32 %v5887_v49, %v5075_v19 }
  0xbf   :  { %10233 = vst [vmem:[#allocation187_spill] sm:$0xff] %v6893_v39  ;;  %v6031_v61 = vld [vmem:[#allocation2 + $0x4e4] sm:$0xf]  ;;  %v5651_v22 = vld [vmem:[#allocation2 + $0x504] sm:$0xf0]  ;;  %60 = vperm.xlu0 %6095, %v44_v26   ;;  %v6912_v47 = vor.u32 %v5959_v24, %v5363_v59 }
  0xc0   :  { %10234 = vst [vmem:[#allocation188_spill] sm:$0xff] %v6896_v31  ;;  %v6026_v30 = vld [vmem:[#allocation2 + $0x4b8] sm:$0xf0]  ;;  %v5039_v37 = vld [vmem:[#allocation2 + $0x3c] sm:$0xf0]  ;;  %v6915_v42 = vor.u32 %v6031_v61, %v5651_v22  ;;  %1897 = vmatpush.bf16.msrb.mxu0 %v6902_v36 }
  0xc1   :  { %10235 = vst [vmem:[#allocation189_spill] sm:$0xff] %v6902_v36  ;;  %v5878_v54 = vld [vmem:[#allocation2 + $0x1c] sm:$0xf]  ;;  %v5327_v10 = vld [vmem:[#allocation2 + $0x27c] sm:$0xf0]  ;;  %1935 = vmatpush.bf16.msrb.mxu3 %v6896_v31  ;;  %v6918_v49 = vor.u32 %v6026_v30, %v5613_v41  ;;  %1910 = vmatpush.bf16.msrb.mxu1 %v6910_v13 }
  0xc2   :  { %10236 = vst [vmem:[#allocation190_spill] sm:$0xff] %v6910_v13  ;;  %v5950_v2 = vld [vmem:[#allocation2 + $0x25c] sm:$0xf]  ;;  %v5297_v32 = vld [vmem:[#allocation2 + $0x218] sm:$0xf]  ;;  %1923 = vmatpush.bf16.msrb.mxu2 %v6912_v47  ;;  %v6922_v39 = vor.u32 %v5878_v54, %v5039_v37  ;;  %v1668_v13 = vpop.f32.mrf.mxu2  ;;  %v49_v54 = vld [vmem:[%s9518_s0 + $0x30] sm:$0xff]  ;;  %v1681_v37 = vpop.f32.mrf.mxu3 }
  0xc3   :  { %10237 = vst [vmem:[#allocation191_spill] sm:$0xff] %v6912_v47  ;;  %v5946_v51 = vld [vmem:[#allocation2 + $0x238] sm:$0xf0]  ;;  %v5585_v26 = vld [vmem:[#allocation2 + $0x458] sm:$0xf]  ;;  %v6924_v4 = vor.u32 %v5950_v2, %v5327_v10 }
  0xc4   :  { %10238 = vst [vmem:[#allocation192_spill] sm:$0xff] %v6915_v42  ;;  %v6018_v60 = vld [vmem:[#allocation2 + $0x478] sm:$0xf0]  ;;  %v5873_v0 = vld [vmem:[#allocation2 + $0x698] sm:$0xf]  ;;  %v6926_v61 = vor.u32 %v5946_v51, %v5297_v32  ;;  %1898 = vmatpush.bf16.msrb.mxu0 %v6918_v49 }
  0xc5   :  { %10239 = vst [vmem:[#allocation193_spill] sm:$0xff] %v6918_v49  ;;  %v6090_v19 = vld [vmem:[#allocation2 + $0x6b8] sm:$0xf0]  ;;  %v5615_v59 = vld [vmem:[#allocation2 + $0x4bc] sm:$0xf0]  ;;  %v6928_v22 = vor.u32 %v6018_v60, %v5585_v26  ;;  %1936 = vmatpush.bf16.msrb.mxu3 %v6915_v42  ;;  %1911 = vmatpush.bf16.msrb.mxu1 %v6922_v39 }
  0xc6   :  { %v6022_v24 = vld [vmem:[#allocation2 + $0x49c] sm:$0xf]  ;;  %10240 = vst [vmem:[#allocation194_spill] sm:$0xff] %v6922_v39  ;;  %v5261_v31 = vld [vmem:[#allocation2 + $0x1d0] sm:$0xf]  ;;  %v6931_v41 = vor.u32 %v6090_v19, %v5873_v0  ;;  %1924 = vmatpush.bf16.msrb.mxu2 %v6924_v4 }
  0xc7   :  { %10241 = vst [vmem:[#allocation195_spill] sm:$0xff] %v6924_v4  ;;  %v6933_v30 = vor.u32 %v6022_v24, %v5615_v59  ;;  %v5937_v36 = vld [vmem:[#allocation2 + $0x1f0] sm:$0xf0]  ;;  %v5549_v63 = vld [vmem:[#allocation2 + $0x410] sm:$0xf]  ;;  %85 = vperm.xlu0 %6095, %v49_v54   ;;  %1899 = vmatmul.bf16.vlgmr.msrb.gmra.mxu0 %v10121_v53 }
  0xc8   :  { %10242 = vst [vmem:[#allocation196_spill] sm:$0xff] %v6926_v61  ;;  %v6009_v51 = vld [vmem:[#allocation2 + $0x430] sm:$0xf0]  ;;  %v5837_v32 = vld [vmem:[#allocation2 + $0x650] sm:$0xf]  ;;  %1943 = vmatpush.bf16.msra.mxu0 %v6926_v61  ;;  %v6943_v0 = vor.u32 %v5937_v36, %v5261_v31  ;;  %1912 = vmatmul.bf16.vlgmr.msrb.gmra.mxu1 %v10121_v53 }
  0xc9   :  { %10243 = vst [vmem:[#allocation197_spill] sm:$0xff] %v6928_v22  ;;  %v6081_v10 = vld [vmem:[#allocation2 + $0x670] sm:$0xf0]  ;;  %1956 = vmatpush.bf16.msra.mxu1 %v6928_v22  ;;  %1937 = vmatpush.bf16.msrb.mxu3 %v6933_v30  ;;  %v6947_v13 = vor.u32 %v6009_v51, %v5549_v63  ;;  %v5225_v26 = vld [vmem:[#allocation2 + $0x188] sm:$0xf] }
  0xca   :  { %10244 = vst [vmem:[#allocation198_spill] sm:$0xff] %v6931_v41  ;;  %1969 = vmatpush.bf16.msra.mxu2 %v6931_v41  ;;  %v6949_v2 = vor.u32 %v6081_v10, %v5837_v32  ;;  %v5928_v60 = vld [vmem:[#allocation2 + $0x1a8] sm:$0xf0]  ;;  %v5513_v19 = vld [vmem:[#allocation2 + $0x3c8] sm:$0xf] }
  0xcb   :  { %10245 = vst [vmem:[#allocation199_spill] sm:$0xff] %v6933_v30  ;;  %1925 = vmatmul.bf16.vlgmr.msrb.gmra.mxu2 %v10121_v53  ;;  %v6000_v24 = vld [vmem:[#allocation2 + $0x3e8] sm:$0xf0]  ;;  %v5801_v59 = vld [vmem:[#allocation2 + $0x608] sm:$0xf]  ;;  %v6957_v63 = vor.u32 %v5928_v60, %v5225_v26  ;;  %v1692_v60 = vpop.f32.mrf.mxu0 }
  0xcc   :  { %10246 = vst [vmem:[#allocation200_spill] sm:$0xff] %v6943_v0  ;;  %v6072_v54 = vld [vmem:[#allocation2 + $0x628] sm:$0xf0]  ;;  %1938 = vmatmul.bf16.vlgmr.msrb.gmra.mxu3 %v10121_v53  ;;  %1944 = vmatpush.bf16.msra.mxu0 %v6943_v0  ;;  %v6961_v31 = vor.u32 %v6000_v24, %v5513_v19  ;;  %v5189_v51 = vld [vmem:[#allocation2 + $0x140] sm:$0xf]  ;;  %v1693_v47 = vadd.f32 %v1692_v60, %v6906_v20 }
  0xcd   :  { %10247 = vst [vmem:[#allocation201_spill] sm:$0xff] %v6947_v13  ;;  %2039 = vmatpush.bf16.msra.mxu3 %v6324_v3  ;;  %1957 = vmatpush.bf16.msra.mxu1 %v6947_v13  ;;  %v6963_v36 = vor.u32 %v6072_v54, %v5801_v59  ;;  %v5919_v32 = vld [vmem:[#allocation2 + $0x160] sm:$0xf0]  ;;  %v5477_v10 = vld [vmem:[#allocation2 + $0x380] sm:$0xf] }
  0xce   :  { %10248 = vst [vmem:[#allocation202_spill] sm:$0xff] %v6949_v2  ;;  %1970 = vmatpush.bf16.msra.mxu2 %v6949_v2  ;;  %v5991_v37 = vld [vmem:[#allocation2 + $0x3a0] sm:$0xf0]  ;;  %v5765_v41 = vld [vmem:[#allocation2 + $0x5c0] sm:$0xf]  ;;  %v6967_v26 = vor.u32 %v5919_v32, %v5189_v51 }
  0xcf   :  { %10249 = vst [vmem:[#allocation203_spill] sm:$0xff] %v6957_v63  ;;  %v6063_v4 = vld [vmem:[#allocation2 + $0x5e0] sm:$0xf0]  ;;  %v6971_v19 = vor.u32 %v5991_v37, %v5477_v10  ;;  %v5153_v59 = vld [vmem:[#allocation2 + $0xf8] sm:$0xf] }
  0xd0   :  { %10250 = vst [vmem:[#allocation204_spill] sm:$0xff] %v6961_v31  ;;  %1945 = vmatpush.bf16.msra.mxu0 %v6957_v63  ;;  %v6973_v24 = vor.u32 %v6063_v4, %v5765_v41  ;;  %v5910_v54 = vld [vmem:[#allocation2 + $0x118] sm:$0xf0]  ;;  %v5441_v2 = vld [vmem:[#allocation2 + $0x338] sm:$0xf]  ;;  %v1705_v63 = vpop.f32.mrf.mxu1  ;;  %v6985_v4 = vld [vmem:[%s9519_s1] sm:$0xff] }
  0xd1   :  { %10251 = vst [vmem:[#allocation205_spill] sm:$0xff] %v6963_v36  ;;  %2040 = vmatpush.bf16.msra.mxu3 %v6335_v16  ;;  %1958 = vmatpush.bf16.msra.mxu1 %v6961_v31  ;;  %v5982_v13 = vld [vmem:[#allocation2 + $0x358] sm:$0xf0]  ;;  %v5729_v22 = vld [vmem:[#allocation2 + $0x578] sm:$0xf]  ;;  %v6976_v51 = vadd.f32 %v1705_v63, %v1693_v47  ;;  %v6980_v32 = vor.u32 %v5910_v54, %v5153_v59  ;;  %v1718_v54 = vpop.f32.mrf.mxu2 }
  0xd2   :  { %10252 = vst [vmem:[#allocation206_spill] sm:$0xff] %v6967_v26  ;;  %1971 = vmatpush.bf16.msra.mxu2 %v6963_v36  ;;  %v6054_v39 = vld [vmem:[#allocation2 + $0x598] sm:$0xf0]  ;;  %v6989_v20 = vor.u32 %v5982_v13, %v5441_v2  ;;  %v5117_v47 = vld [vmem:[#allocation2 + $0xb0] sm:$0xf]  ;;  %v7000_v13 = vld [vmem:[%s9521_s3] sm:$0xff]  ;;  %v7005_v2 = vpop.permute.xlu0 %55 }
  0xd3   :  { %10253 = vst [vmem:[#allocation207_spill] sm:$0xff] %v6971_v19  ;;  %v6991_v41 = vor.u32 %v6054_v39, %v5729_v22  ;;  %v5901_v63 = vld [vmem:[#allocation2 + $0xd0] sm:$0xf0]  ;;  %v5405_v10 = vld [vmem:[#allocation2 + $0x2f0] sm:$0xf]  ;;  %v1694_v39 = vpop.f32.mrf.mxu0  ;;  %v7003_v22 = vperm.slane %v6985_v4, 0 }
  0xd4   :  { %10254 = vst [vmem:[#allocation208_spill] sm:$0xff] %v6973_v24  ;;  %1946 = vmatpush.bf16.msra.mxu0 %v6967_v26  ;;  %v5973_v37 = vld [vmem:[#allocation2 + $0x310] sm:$0xf0]  ;;  %v5693_v60 = vld [vmem:[#allocation2 + $0x530] sm:$0xf]  ;;  %v6995_v36 = vor.u32 %v5901_v63, %v5117_v47  ;;  %v1731_v39 = vpop.f32.mrf.mxu3 }
  0xd5   :  { %2041 = vmatpush.bf16.msra.mxu3 %v6345_v29  ;;  %10255 = vst [vmem:[#allocation209_spill] sm:$0xff] %v6980_v32  ;;  %1959 = vmatpush.bf16.msra.mxu1 %v6971_v19  ;;  %v6045_v59 = vld [vmem:[#allocation2 + $0x550] sm:$0xf0]  ;;  %v5081_v47 = vld [vmem:[#allocation2 + $0x68] sm:$0xf]  ;;  %v1732_v16 = vadd.f32 %v1731_v39, %v1718_v54 }
  0xd6   :  { %1972 = vmatpush.bf16.msra.mxu2 %v6973_v24  ;;  %10256 = vst [vmem:[#allocation210_spill] sm:$0xff] %v6989_v20  ;;  %v7009_v24 = vor.u32 %v5973_v37, %v5405_v10  ;;  %v7011_v19 = vor.u32 %v6045_v59, %v5693_v60  ;;  %v5892_v63 = vld [vmem:[#allocation2 + $0x88] sm:$0xf0]  ;;  %v5369_v31 = vld [vmem:[#allocation2 + $0x2a8] sm:$0xf]  ;;  %v113_v10 = vmul.f32 %v7003_v22, %v7005_v2  ;;  %v7020_v37 = vperm.slane %v7000_v13, 0 }
  0xd7   :  { %10257 = vst [vmem:[#allocation211_spill] sm:$0xff] %v6991_v41  ;;  %v6036_v26 = vld [vmem:[#allocation2 + $0x508] sm:$0xf0]  ;;  %v5045_v59 = vld [vmem:[#allocation2 + $0x20] sm:$0xf] }
  0xd8   :  { %1947 = vmatpush.bf16.msra.mxu0 %v6980_v32  ;;  %10258 = vst [vmem:[#allocation212_spill] sm:$0xff] %v6995_v36  ;;  %v5964_v32 = vld [vmem:[#allocation2 + $0x2c8] sm:$0xf0]  ;;  %v1707_v29 = vpop.f32.mrf.mxu1  ;;  %v5883_v54 = vld [vmem:[#allocation2 + $0x40] sm:$0xf0] }
  0xd9   :  { %2042 = vmatpush.bf16.msra.mxu3 %v6357_v44  ;;  %10259 = vst [vmem:[#allocation213_spill] sm:$0xff] %v7003_v22  ;;  %1960 = vmatpush.bf16.msra.mxu1 %v6989_v20  ;;  %v5657_v44 = vld [vmem:[#allocation2 + $0x4e8] sm:$0xf]  ;;  %v7015_v20 = vor.u32 %v5892_v63, %v5081_v47  ;;  %v7024_v60 = vor.u32 %v5964_v32, %v5369_v31  ;;  %v5333_v39 = vld [vmem:[#allocation2 + $0x260] sm:$0xf] }
  0xda   :  { %1973 = vmatpush.bf16.msra.mxu2 %v6991_v41  ;;  %10260 = vst [vmem:[#allocation214_spill] sm:$0xff] %v7009_v24  ;;  %v7026_v29 = vor.u32 %v6036_v26, %v5657_v44  ;;  %v5955_v41 = vld [vmem:[#allocation2 + $0x280] sm:$0xf0]  ;;  %v5621_v47 = vld [vmem:[#allocation2 + $0x4a0] sm:$0xf]  ;;  %v7030_v22 = vor.u32 %v5883_v54, %v5045_v59  ;;  %v7070_v59 = vperm.slane %v6985_v4, 1 }
  0xdb   :  { %10261 = vst [vmem:[#allocation215_spill] sm:$0xff] %v7011_v19  ;;  %v6027_v63 = vld [vmem:[#allocation2 + $0x4c0] sm:$0xf0]  ;;  %v7035_v44 = vor.u32 %v5955_v41, %v5333_v39 }
  0xdc   :  { %1948 = vmatpush.bf16.msra.mxu0 %v6995_v36  ;;  %10262 = vst [vmem:[#allocation216_spill] sm:$0xff] %v7015_v20  ;;  %v1720_v36 = vpop.f32.mrf.mxu2  ;;  %v7037_v31 = vor.u32 %v6027_v63, %v5621_v47  ;;  %v1733_v26 = vpop.f32.mrf.mxu3 }
  0xdd   :  { %2043 = vmatpush.bf16.msra.mxu3 %v6369_v56  ;;  %10263 = vst [vmem:[#allocation217_spill] sm:$0xff] %v7020_v37  ;;  %1961 = vmatpush.bf16.msra.mxu1 %v7009_v24  ;;  %v207_v24 = vadd.f32 %v7020_v37, %v113_v10  ;;  %v7065_v10 = vld [vmem:[%s9522_s4] sm:$0x7] }
  0xde   :  { %1974 = vmatpush.bf16.msra.mxu2 %v7011_v19  ;;  %10264 = vst [vmem:[#allocation218_spill] sm:$0xff] %v7024_v60  ;;  %v7073_v39 = vperm.slane %v7065_v10, 0 }
  0xdf   :  { %10265 = vst [vmem:[#allocation219_spill] sm:$0xff] %v7026_v29  ;;  %v1982_v36 = vadd.f32 %v6904_v52, %v207_v24 }
  0xe0   :  { %1949 = vmatpush.bf16.msra.mxu0 %v7015_v20  ;;  %10266 = vst [vmem:[#allocation220_spill] sm:$0xff] %v7030_v22 }
  0xe1   :  { %2044 = vmatpush.bf16.msra.mxu3 %v6381_v5  ;;  %1962 = vmatpush.bf16.msra.mxu1 %v7024_v60  ;;  %10267 = vst [vmem:[#allocation221_spill] sm:$0xff] %v7035_v44  ;;  %v1985_v32 = vmul.f32 0.5, %v1982_v36 }
  0xe2   :  { %1975 = vmatpush.bf16.msra.mxu2 %v7026_v29  ;;  %10268 = vst [vmem:[#allocation222_spill] sm:$0xff] %v7037_v31 }
  0xe3   :  { %6101 = vtanh.f32 %v1985_v32  ;;  %10269 = vst [vmem:[#allocation223_spill] sm:$0xff] %v7070_v59 }
  0xe4   :  { %1950 = vmatpush.bf16.msra.mxu0 %v7030_v22  ;;  %v1744_v52 = vpop.f32.mrf.mxu0  ;;  %10270 = vst [vmem:[#allocation224_spill] sm:$0xff] %v7073_v39 }
  0xe5   :  { %2045 = vmatpush.bf16.msra.mxu3 %v6393_v23  ;;  %1963 = vmatpush.bf16.msra.mxu1 %v7035_v44  ;;  %v7058_v24 = vadd.f32 %v1744_v52, %v1732_v16  ;;  %v114_v52 = vmul.f32 %v7070_v59, %v7005_v2 }
  0xe6   :  { %1976 = vmatpush.bf16.msra.mxu2 %v7037_v31  ;;  %v10293_v31 = vld [vmem:[#allocation55_spill] sm:$0xff] }
  0xe7   :  { %1951 = vmatmul.bf16.vlgmr.msra.gmra.mxu0 %v10121_v53 }
  0xe8   :  { %2052 = vmatpush.bf16.msrb.mxu0 %v6326_v7  ;;  %1964 = vmatmul.bf16.vlgmr.msra.gmra.mxu1 %v10121_v53 }
  0xe9   :  { %2046 = vmatpush.bf16.msra.mxu3 %v6405_v43  ;;  %1977 = vmatmul.bf16.vlgmr.msra.gmra.mxu2 %v10121_v53  ;;  %v1757_v53 = vpop.f32.mrf.mxu1  ;;  %v6102_v41 = vpop.eup %6101 }
  0xea   :  { %2078 = vmatpush.bf16.msrb.mxu2 %v6331_v12  ;;  %2065 = vmatpush.bf16.msrb.mxu1 %v6328_v8  ;;  %v1991_v47 = vmul.f32 0.5, %v6102_v41 }
  0xec   :  { %2053 = vmatpush.bf16.msrb.mxu0 %v6337_v17  ;;  %v1746_v36 = vpop.f32.mrf.mxu0 }
  0xed   :  { %2091 = vmatpush.bf16.msrb.mxu3 %v6414_v55 }
  0xee   :  { %2079 = vmatpush.bf16.msrb.mxu2 %v6342_v25  ;;  %2066 = vmatpush.bf16.msrb.mxu1 %v6340_v21  ;;  %v1770_v54 = vpop.f32.mrf.mxu2  ;;  %v10286_v25 = vld [vmem:[#allocation52_spill] sm:$0xff] }
  0xef   :  { %v1771_v16 = vadd.f32 %v1770_v54, %v1757_v53  ;;  %v1783_v63 = vpop.f32.mrf.mxu3  ;;  %v7082_v53 = vperm.slane %v7000_v13, 1  ;;  %v1994_v54 = vadd.f32 0.5, %v1991_v47 }
  0xf0   :  { %2054 = vmatpush.bf16.msrb.mxu0 %v6349_v33 }
  0xf1   :  { %2092 = vmatpush.bf16.msrb.mxu3 %v6429_v18  ;;  %v1784_v26 = vadd.f32 %v1783_v63, %v1771_v16  ;;  %v1759_v32 = vpop.f32.mrf.mxu1  ;;  %10271 = vst [vmem:[#allocation225_spill] sm:$0xff] %v7082_v53  ;;  %v208_v63 = vadd.f32 %v7082_v53, %v114_v52  ;;  %v10274_v52 = vld [vmem:[#allocation40_spill] sm:$0xff]  ;;  %v10281_v53 = vld [vmem:[#allocation43_spill] sm:$0xff] }
  0xf2   :  { %2080 = vmatpush.bf16.msrb.mxu2 %v6354_v38  ;;  %2067 = vmatpush.bf16.msrb.mxu1 %v6351_v34  ;;  %v10272_v32 = vld [vmem:[#allocation39_spill] sm:$0xff] }
  0xf3   :  { %v1997_v41 = vadd.f32 %v1784_v26, %v7073_v39  ;;  %v1983_v26 = vadd.f32 %v6976_v51, %v208_v63  ;;  %v10279_v51 = vld [vmem:[#allocation44_spill] sm:$0xff]  ;;  %v10280_v63 = vld [vmem:[#allocation42_spill] sm:$0xff]  ;;  %v10285_v38 = vld [vmem:[#allocation47_spill] sm:$0xff] }
  0xf4   :  { %2055 = vmatpush.bf16.msrb.mxu0 %v6361_v45  ;;  %v10283_v39 = vld [vmem:[#allocation46_spill] sm:$0xff] }
  0xf5   :  { %2093 = vmatpush.bf16.msrb.mxu3 %v6442_v40  ;;  %v7089_v16 = vmul.f32 %v1997_v41, %v1994_v54  ;;  %v10273_v54 = vld [vmem:[#allocation34_spill] sm:$0xff]  ;;  %v10275_v41 = vld [vmem:[#allocation37_spill] sm:$0xff] }
  0xf6   :  { %2081 = vmatpush.bf16.msrb.mxu2 %v6366_v50  ;;  %2068 = vmatpush.bf16.msrb.mxu1 %v6363_v46  ;;  %v1772_v36 = vpop.f32.mrf.mxu2 }
  0xf7   :  { %v1785_v47 = vpop.f32.mrf.mxu3  ;;  %v1986_v36 = vmul.f32 0.5, %v1983_v26 }
  0xf8   :  { %2056 = vmatpush.bf16.msrb.mxu0 %v6373_v57  ;;  %v10276_v47 = vld [vmem:[#allocation65_spill] sm:$0xff] }
  0xf9   :  { %2094 = vmatpush.bf16.msrb.mxu3 %v6458_v11  ;;  %6103 = vtanh.f32 %v1986_v36 }
  0xfa   :  { %2082 = vmatpush.bf16.msrb.mxu2 %v6378_v62  ;;  %2069 = vmatpush.bf16.msrb.mxu1 %v6375_v58 }
  0xfc   :  { %2057 = vmatpush.bf16.msrb.mxu0 %v6385_v6 }
  0xfd   :  { %2095 = vmatpush.bf16.msrb.mxu3 %v6473_v48 }
  0xfe   :  { %2083 = vmatpush.bf16.msrb.mxu2 %v6390_v14  ;;  %2070 = vmatpush.bf16.msrb.mxu1 %v6387_v9  ;;  %v10278_v14 = vld [vmem:[#allocation38_spill] sm:$0xff] }
  0xff   :  { %v6104_v59 = vpop.eup %6103 }
 0x100   :  { %2058 = vmatpush.bf16.msrb.mxu0 %v6397_v27  ;;  %v1992_v36 = vmul.f32 0.5, %v6104_v59 }
 0x101   :  { %2096 = vmatpush.bf16.msrb.mxu3 %v6485_v15 }
 0x102   :  { %2084 = vmatpush.bf16.msrb.mxu2 %v6402_v35  ;;  %2071 = vmatpush.bf16.msrb.mxu1 %v6399_v28  ;;  %v10277_v35 = vld [vmem:[#allocation35_spill] sm:$0xff] }
 0x104   :  { %2059 = vmatpush.bf16.msrb.mxu0 %v10273_v54  ;;  %v1796_v26 = vpop.f32.mrf.mxu0 }
 0x105   :  { %2097 = vmatpush.bf16.msrb.mxu3 %v6497_v1  ;;  %v1809_v62 = vpop.f32.mrf.mxu1 }
 0x106   :  { %2085 = vmatpush.bf16.msrb.mxu2 %v10272_v32  ;;  %2072 = vmatpush.bf16.msrb.mxu1 %v10277_v35  ;;  %v10282_v32 = vld [vmem:[#allocation48_spill] sm:$0xff]  ;;  %v1810_v50 = vadd.f32 %v1809_v62, %v1796_v26  ;;  %v10290_v35 = vld [vmem:[#allocation51_spill] sm:$0xff] }
 0x107   :  { %v10291_v26 = vld [vmem:[#allocation56_spill] sm:$0xff] }
 0x108   :  { %2104 = vmatpush.bf16.msra.mxu0 %v10275_v41  ;;  %v10294_v41 = vld [vmem:[#allocation60_spill] sm:$0xff] }
 0x109   :  { %2098 = vmatpush.bf16.msrb.mxu3 %v10276_v47 }
 0x10a   :  { %2130 = vmatpush.bf16.msra.mxu2 %v10274_v52  ;;  %2117 = vmatpush.bf16.msra.mxu1 %v10278_v14  ;;  %v7112_v52 = vperm.slane %v6985_v4, 2 }
 0x10c   :  { %2105 = vmatpush.bf16.msra.mxu0 %v10280_v63  ;;  %10284 = vst [vmem:[#allocation226_spill] sm:$0xff] %v7112_v52 }
 0x10d   :  { %v1811_v63 = vpop.f32.mrf.mxu1 }
 0x10e   :  { %2131 = vmatpush.bf16.msra.mxu2 %v10279_v51  ;;  %2118 = vmatpush.bf16.msra.mxu1 %v10281_v53  ;;  %v10287_v51 = vld [vmem:[#allocation50_spill] sm:$0xff]  ;;  %v115_v53 = vmul.f32 %v7112_v52, %v7005_v2  ;;  %v1822_v14 = vpop.f32.mrf.mxu2  ;;  %v1798_v52 = vpop.f32.mrf.mxu0 }
 0x10f   :  { %v1823_v62 = vadd.f32 %v1822_v14, %v1810_v50  ;;  %v1835_v12 = vpop.f32.mrf.mxu3 }
 0x110   :  { %2106 = vmatpush.bf16.msra.mxu0 %v10283_v39  ;;  %v7123_v39 = vperm.slane %v7065_v10, 1 }
 0x112   :  { %2132 = vmatpush.bf16.msra.mxu2 %v10282_v32  ;;  %2119 = vmatpush.bf16.msra.mxu1 %v10285_v38  ;;  %v7120_v32 = vperm.slane %v7000_v13, 2  ;;  %10289 = vst [vmem:[#allocation228_spill] sm:$0xff] %v7123_v39  ;;  %v10292_v38 = vld [vmem:[#allocation54_spill] sm:$0xff] }
 0x114   :  { %2107 = vmatpush.bf16.msra.mxu0 %v10287_v51  ;;  %10288 = vst [vmem:[#allocation227_spill] sm:$0xff] %v7120_v32  ;;  %v209_v59 = vadd.f32 %v7120_v32, %v115_v53  ;;  %v1998_v51 = vadd.f32 %v1823_v62, %v7123_v39  ;;  %v10298_v53 = vld [vmem:[#allocation62_spill] sm:$0xff]  ;;  %v10299_v62 = vld [vmem:[#allocation63_spill] sm:$0xff] }
 0x115   :  { %v10300_v39 = vld [vmem:[#allocation71_spill] sm:$0xff] }
 0x116   :  { %2133 = vmatpush.bf16.msra.mxu2 %v10286_v25  ;;  %2120 = vmatpush.bf16.msra.mxu1 %v10290_v35  ;;  %v1995_v25 = vadd.f32 0.5, %v1992_v36  ;;  %v10295_v35 = vld [vmem:[#allocation58_spill] sm:$0xff]  ;;  %v1984_v50 = vadd.f32 %v7058_v24, %v209_v59  ;;  %v1824_v14 = vpop.f32.mrf.mxu2  ;;  %v10297_v36 = vld [vmem:[#allocation64_spill] sm:$0xff] }
 0x117   :  { %v1837_v63 = vpop.f32.mrf.mxu3 }
 0x118   :  { %2108 = vmatpush.bf16.msra.mxu0 %v10292_v38  ;;  %v7131_v28 = vmul.f32 %v1998_v51, %v1995_v25  ;;  %v1987_v52 = vmul.f32 0.5, %v1984_v50  ;;  %v10301_v25 = vld [vmem:[#allocation66_spill] sm:$0xff]  ;;  %v10302_v51 = vld [vmem:[#allocation67_spill] sm:$0xff] }
 0x11a   :  { %2134 = vmatpush.bf16.msra.mxu2 %v10291_v26  ;;  %2121 = vmatpush.bf16.msra.mxu1 %v10293_v31  ;;  %v10296_v26 = vld [vmem:[#allocation59_spill] sm:$0xff]  ;;  %6105 = vtanh.f32 %v1987_v52 }
 0x11c   :  { %2109 = vmatpush.bf16.msra.mxu0 %v10295_v35  ;;  %v7150_v35 = vperm.slane %v6985_v4, 6 }
 0x11e   :  { %2135 = vmatpush.bf16.msra.mxu2 %v10294_v41  ;;  %2122 = vmatpush.bf16.msra.mxu1 %v10296_v26  ;;  %v7144_v26 = vperm.slane %v7065_v10, 2  ;;  %10304 = vst [vmem:[#allocation230_spill] sm:$0xff] %v7150_v35  ;;  %v7155_v10 = vperm.slane %v7000_v13, 6 }
 0x120   :  { %2110 = vmatpush.bf16.msra.mxu0 %v10298_v53  ;;  %v6106_v41 = vpop.eup %6105  ;;  %10303 = vst [vmem:[#allocation229_spill] sm:$0xff] %v7144_v26 }
 0x121   :  { %v1993_v59 = vmul.f32 0.5, %v6106_v41  ;;  %10305 = vst [vmem:[#allocation231_spill] sm:$0xff] %v7155_v10  ;;  %v7158_v41 = vperm.slane %v6985_v4, 3 }
 0x122   :  { %2136 = vmatpush.bf16.msra.mxu2 %v10297_v36  ;;  %2123 = vmatpush.bf16.msra.mxu1 %v10299_v62 }
 0x123   :  { %v1996_v50 = vadd.f32 0.5, %v1993_v59  ;;  %10306 = vst [vmem:[#allocation232_spill] sm:$0xff] %v7158_v41 }
 0x124   :  { %2111 = vmatpush.bf16.msra.mxu0 %v10301_v25  ;;  %v1848_v24 = vpop.f32.mrf.mxu0 }
 0x125   :  { %v1849_v14 = vadd.f32 %v1848_v24, %v1835_v12  ;;  %v1861_v36 = vpop.f32.mrf.mxu1  ;;  %v119_v12 = vmul.f32 %v7150_v35, %v7005_v2 }
 0x126   :  { %2137 = vmatpush.bf16.msra.mxu2 %v10300_v39  ;;  %2124 = vmatpush.bf16.msra.mxu1 %v10302_v51 }
 0x127   :  { %v1862_v32 = vadd.f32 %v1861_v36, %v1849_v14  ;;  %v213_v36 = vadd.f32 %v7155_v10, %v119_v12 }
 0x129   :  { %v1999_v63 = vadd.f32 %v1862_v32, %v7144_v26 }
 0x12b   :  { %v7147_v62 = vmul.f32 %v1999_v63, %v1996_v50 }
 0x12c   :  { %v1850_v53 = vpop.f32.mrf.mxu0 }
 0x12d   :  { %v1863_v25 = vpop.f32.mrf.mxu1  ;;  %v7162_v53 = vperm.slane %v6985_v4, 7 }
 0x12e   :  { %v1874_v39 = vpop.f32.mrf.mxu2  ;;  %v116_v25 = vmul.f32 %v7158_v41, %v7005_v2 }
 0x12f   :  { %v1887_v52 = vpop.f32.mrf.mxu3  ;;  %10307 = vst [vmem:[#allocation233_spill] sm:$0xff] %v7162_v53  ;;  %v120_v50 = vmul.f32 %v7162_v53, %v7005_v2  ;;  %v7183_v53 = vperm.slane %v7000_v13, 4 }
 0x130   :  { %v1888_v32 = vadd.f32 %v1887_v52, %v1874_v39  ;;  %v7172_v39 = vperm.slane %v7000_v13, 7  ;;  %v7176_v52 = vperm.slane %v6985_v4, 4 }
 0x131   :  { %10311 = vst [vmem:[#allocation237_spill] sm:$0xff] %v7183_v53 }
 0x132   :  { %10309 = vst [vmem:[#allocation235_spill] sm:$0xff] %v7172_v39  ;;  %v214_v35 = vadd.f32 %v7172_v39, %v120_v50 }
 0x133   :  { %10310 = vst [vmem:[#allocation236_spill] sm:$0xff] %v7176_v52 }
 0x136   :  { %v1876_v31 = vpop.f32.mrf.mxu2 }
 0x137   :  { %v1889_v51 = vpop.f32.mrf.mxu3 }
 0x138   :  { %v7167_v51 = vperm.slane %v7000_v13, 3 }
 0x13a   :  { %10308 = vst [vmem:[#allocation234_spill] sm:$0xff] %v7167_v51  ;;  %v210_v63 = vadd.f32 %v7167_v51, %v116_v25 }
 0x144   :  { %v1900_v31 = vpop.f32.mrf.mxu0 }
 0x145   :  { %v1901_v24 = vadd.f32 %v1900_v31, %v1888_v32  ;;  %v1913_v59 = vpop.f32.mrf.mxu1 }
 0x147   :  { %v2009_v14 = vadd.f32 %v1901_v24, %v213_v36  ;;  %v2003_v36 = vadd.f32 %v7089_v16, %v210_v63  ;;  %v117_v24 = vmul.f32 %v7176_v52, %v7005_v2 }
 0x149   :  { %v2012_v12 = vmul.f32 0.5, %v2009_v14  ;;  %v211_v14 = vadd.f32 %v7183_v53, %v117_v24  ;;  %v10325_v53 = vld [vmem:[#allocation74_spill] sm:$0xff] }
 0x14b   :  { %6107 = vtanh.f32 %v2012_v12  ;;  %v2004_v16 = vadd.f32 %v7131_v28, %v211_v14  ;;  %v10316_v14 = vld [vmem:[#allocation73_spill] sm:$0xff] }
 0x14c   :  { %v1902_v31 = vpop.f32.mrf.mxu0  ;;  %6109 = vtanh.f32 %v2003_v36  ;;  %v10312_v36 = vld [vmem:[#allocation68_spill] sm:$0xff] }
 0x14d   :  { %v1915_v51 = vpop.f32.mrf.mxu1 }
 0x14e   :  { %v1926_v10 = vpop.f32.mrf.mxu2 }
 0x14f   :  { %v1927_v41 = vadd.f32 %v1926_v10, %v1913_v59  ;;  %v1939_v32 = vpop.f32.mrf.mxu3 }
 0x151   :  { %v1940_v25 = vadd.f32 %v1939_v32, %v1927_v41  ;;  %v6108_v38 = vpop.eup %6107 }
 0x152   :  { %v2018_v59 = vmul.f32 0.5, %v6108_v38  ;;  %v6110_v39 = vpop.eup %6109 }
 0x153   :  { %v2010_v26 = vadd.f32 %v1940_v25, %v214_v35 }
 0x154   :  { %v2021_v12 = vadd.f32 0.5, %v2018_v59 }
 0x155   :  { %v2013_v10 = vmul.f32 0.5, %v2010_v26 }
 0x156   :  { %v1928_v50 = vpop.f32.mrf.mxu2  ;;  %v2024_v63 = vsub.f32 1.0, %v2021_v12  ;;  %v2030_v52 = vmul.f32 0.0, %v2021_v12 }
 0x157   :  { %6111 = vtanh.f32 %v2013_v10  ;;  %v1941_v31 = vpop.f32.mrf.mxu3  ;;  %v10317_v10 = vld [vmem:[#allocation76_spill] sm:$0xff]  ;;  %v7211_v50 = vperm.slane %v6985_v4, 5 }
 0x158   :  { %v2027_v47 = vmul.f32 %v6110_v39, %v2024_v63  ;;  %6113 = vtanh.f32 %v2004_v16  ;;  %v10313_v39 = vld [vmem:[#allocation72_spill] sm:$0xff]  ;;  %v7218_v16 = vld [vmem:[%s9521_s3 + $0x8] ss:$0 sm:$0xff]  ;;  %v10320_v63 = vld [vmem:[#allocation77_spill] sm:$0xff] }
 0x159   :  { %10318 = vst [vmem:[#allocation73_spill] sm:$0xff] %v7211_v50  ;;  %v118_v4 = vmul.f32 %v7211_v50, %v7005_v2 }
 0x15a   :  { %v7187_v41 = vadd.f32 %v2030_v52, %v2027_v47  ;;  %10319 = vst [vmem:[#allocation76_spill] sm:$0xff] %v7218_v16 }
 0x15c   :  { %v7191_v51 = vpack.c.bf16 %v7187_v41, %v7187_v41 }
 0x15d   :  { %v6112_v54 = vpop.eup %6111 }
 0x15e   :  { %v2019_v35 = vmul.f32 0.5, %v6112_v54  ;;  %2047 = vmatmul.bf16.vlgmr.msra.gmra.mxu3 %v7191_v51  ;;  %2086 = vmatmul.bf16.vlgmr.msrb.gmra.mxu2 %v7191_v51  ;;  %v6114_v28 = vpop.eup %6113  ;;  %v7200_v54 = vld [vmem:[%s9519_s1 + $0x8] ss:$0 sm:$0xff] }
 0x15f   :  { %2143 = vmatpush.bf16.msra.mxu3 %v10312_v36  ;;  %2182 = vmatpush.bf16.msrb.mxu2 %v10313_v39  ;;  %10314 = vst [vmem:[#allocation68_spill] sm:$0xff] %v7200_v54  ;;  %v121_v31 = vmul.f32 %v7200_v54, %v7005_v2  ;;  %v10328_v2 = vld [vmem:[#allocation78_spill] sm:$0xff] }
 0x160   :  { %v2022_v38 = vadd.f32 0.5, %v2019_v35  ;;  %v10321_v35 = vld [vmem:[#allocation69_spill] sm:$0xff] }
 0x162   :  { %v2025_v26 = vsub.f32 1.0, %v2022_v38  ;;  %v2031_v32 = vmul.f32 0.0, %v2022_v38  ;;  %v10322_v38 = vld [vmem:[#allocation80_spill] sm:$0xff] }
 0x163   :  { %2144 = vmatpush.bf16.msra.mxu3 %v10316_v14  ;;  %2183 = vmatpush.bf16.msrb.mxu2 %v10317_v10 }
 0x164   :  { %v2028_v24 = vmul.f32 %v6114_v28, %v2025_v26  ;;  %v1952_v47 = vpop.f32.mrf.mxu0  ;;  %v215_v28 = vadd.f32 %v7218_v16, %v121_v31 }
 0x165   :  { %v1965_v25 = vpop.f32.mrf.mxu1 }
 0x166   :  { %v7202_v52 = vadd.f32 %v2031_v32, %v2028_v24  ;;  %v1966_v12 = vadd.f32 %v1965_v25, %v1952_v47  ;;  %v7227_v32 = vperm.slane %v7000_v13, 5  ;;  %v10327_v13 = vld [vmem:[#allocation85_spill] sm:$0xff] }
 0x167   :  { %2145 = vmatpush.bf16.msra.mxu3 %v10320_v63  ;;  %2184 = vmatpush.bf16.msrb.mxu2 %v10322_v38 }
 0x168   :  { %10315 = vst [vmem:[#allocation72_spill] sm:$0xff] %v7202_v52  ;;  %v7208_v59 = vpack.c.bf16 %v7202_v52, %v7202_v52  ;;  %v10324_v52 = vld [vmem:[#allocation81_spill] sm:$0xff]  ;;  %v212_v38 = vadd.f32 %v7227_v32, %v118_v4  ;;  %v10332_v4 = vld [vmem:[#allocation92_spill] sm:$0xff] }
 0x169   :  { %10323 = vst [vmem:[#allocation238_spill] sm:$0xff] %v7227_v32 }
 0x16a   :  { %2060 = vmatmul.bf16.vlgmr.msrb.gmra.mxu0 %v7208_v59 }
 0x16b   :  { %2156 = vmatpush.bf16.msrb.mxu0 %v10321_v35  ;;  %2146 = vmatpush.bf16.msra.mxu3 %v10324_v52  ;;  %v10326_v35 = vld [vmem:[#allocation84_spill] sm:$0xff] }
 0x16c   :  { %v1978_v26 = vpop.f32.mrf.mxu2  ;;  %v1954_v47 = vpop.f32.mrf.mxu0  ;;  %2185 = vmatpush.bf16.msrb.mxu2 %v10326_v35 }
 0x16d   :  { %v1979_v24 = vadd.f32 %v1978_v26, %v1966_v12  ;;  %v1967_v25 = vpop.f32.mrf.mxu1  ;;  %v10329_v12 = vld [vmem:[#allocation88_spill] sm:$0xff]  ;;  %v2005_v26 = vadd.f32 %v7147_v62, %v212_v38  ;;  %v10337_v62 = vld [vmem:[#allocation90_spill] sm:$0xff] }
 0x16e   :  { %2099 = vmatmul.bf16.vlgmr.msrb.gmra.mxu3 %v7208_v59  ;;  %2138 = vmatmul.bf16.vlgmr.msra.gmra.mxu2 %v7208_v59  ;;  %v10333_v25 = vld [vmem:[#allocation93_spill] sm:$0xff] }
 0x16f   :  { %v2011_v54 = vadd.f32 %v1979_v24, %v215_v28  ;;  %2157 = vmatpush.bf16.msrb.mxu0 %v10325_v53  ;;  %2147 = vmatpush.bf16.msra.mxu3 %v10327_v13  ;;  %v10330_v28 = vld [vmem:[#allocation89_spill] sm:$0xff]  ;;  %v10331_v24 = vld [vmem:[#allocation82_spill] sm:$0xff] }
 0x170   :  { %2186 = vmatpush.bf16.msrb.mxu2 %v10329_v12  ;;  %v10336_v12 = vld [vmem:[#allocation97_spill] sm:$0xff] }
 0x171   :  { %v2014_v63 = vmul.f32 0.5, %v2011_v54 }
 0x173   :  { %6115 = vtanh.f32 %v2014_v63  ;;  %2158 = vmatpush.bf16.msrb.mxu0 %v10328_v2  ;;  %2148 = vmatpush.bf16.msra.mxu3 %v10330_v28  ;;  %v10334_v63 = vld [vmem:[#allocation86_spill] sm:$0xff]  ;;  %v10335_v2 = vld [vmem:[#allocation96_spill] sm:$0xff]  ;;  %v10338_v28 = vld [vmem:[#allocation103_spill] sm:$0xff] }
 0x174   :  { %v1980_v31 = vpop.f32.mrf.mxu2  ;;  %2187 = vmatpush.bf16.msrb.mxu2 %v10332_v4  ;;  %6117 = vtanh.f32 %v2005_v26  ;;  %v10339_v4 = vld [vmem:[#allocation100_spill] sm:$0xff] }
 0x175   :  { %v10340_v26 = vld [vmem:[#allocation104_spill] sm:$0xff] }
 0x177   :  { %2159 = vmatpush.bf16.msrb.mxu0 %v10331_v24  ;;  %2149 = vmatpush.bf16.msra.mxu3 %v10333_v25 }
 0x178   :  { %2188 = vmatpush.bf16.msrb.mxu2 %v10335_v2  ;;  %v10343_v2 = vld [vmem:[#allocation105_spill] sm:$0xff] }
 0x179   :  { %v6116_v54 = vpop.eup %6115 }
 0x17a   :  { %v2020_v47 = vmul.f32 0.5, %v6116_v54  ;;  %v6118_v31 = vpop.eup %6117 }
 0x17b   :  { %2160 = vmatpush.bf16.msrb.mxu0 %v10334_v63  ;;  %2150 = vmatpush.bf16.msra.mxu3 %v10336_v12  ;;  %v10342_v63 = vld [vmem:[#allocation94_spill] sm:$0xff]  ;;  %v10344_v12 = vld [vmem:[#allocation108_spill] sm:$0xff] }
 0x17c   :  { %v2023_v53 = vadd.f32 0.5, %v2020_v47  ;;  %2189 = vmatpush.bf16.msrb.mxu2 %v10338_v28 }
 0x17e   :  { %v2026_v16 = vsub.f32 1.0, %v2023_v53  ;;  %v2032_v24 = vmul.f32 0.0, %v2023_v53  ;;  %v10345_v53 = vld [vmem:[#allocation70_spill] sm:$0xff] }
 0x17f   :  { %2161 = vmatpush.bf16.msrb.mxu0 %v10337_v62  ;;  %2195 = vmatpush.bf16.msrb.mxu3 %v10339_v4  ;;  %v10351_v62 = vld [vmem:[#allocation113_spill] sm:$0xff] }
 0x180   :  { %v2029_v38 = vmul.f32 %v6118_v31, %v2026_v16  ;;  %2234 = vmatpush.bf16.msra.mxu2 %v10340_v26  ;;  %v10346_v16 = vld [vmem:[#allocation98_spill] sm:$0xff]  ;;  %v10348_v31 = vld [vmem:[#allocation101_spill] sm:$0xff] }
 0x181   :  { %v10356_v26 = vld [vmem:[#allocation110_spill] sm:$0xff] }
 0x182   :  { %v7251_v54 = vadd.f32 %v2032_v24, %v2029_v38  ;;  %v10347_v24 = vld [vmem:[#allocation109_spill] sm:$0xff]  ;;  %v10349_v38 = vld [vmem:[#allocation112_spill] sm:$0xff] }
 0x183   :  { %2162 = vmatpush.bf16.msrb.mxu0 %v10342_v63  ;;  %2196 = vmatpush.bf16.msrb.mxu3 %v10343_v2  ;;  %v10350_v63 = vld [vmem:[#allocation75_spill] sm:$0xff] }
 0x184   :  { %10341 = vst [vmem:[#allocation81_spill] sm:$0xff] %v7251_v54  ;;  %v7256_v47 = vpack.c.bf16 %v7251_v54, %v7251_v54  ;;  %2235 = vmatpush.bf16.msra.mxu2 %v10344_v12  ;;  %v10352_v54 = vld [vmem:[#allocation106_spill] sm:$0xff]  ;;  %v10353_v12 = vld [vmem:[#allocation116_spill] sm:$0xff]  ;;  %v10354_v2 = vld [vmem:[#allocation79_spill] sm:$0xff] }
 0x186   :  { %2073 = vmatmul.bf16.vlgmr.msrb.gmra.mxu1 %v7256_v47  ;;  %2112 = vmatmul.bf16.vlgmr.msra.gmra.mxu0 %v7256_v47 }
 0x187   :  { %2151 = vmatmul.bf16.vlgmr.msra.gmra.mxu3 %v7256_v47  ;;  %2169 = vmatpush.bf16.msrb.mxu1 %v10345_v53  ;;  %v10355_v53 = vld [vmem:[#allocation117_spill] sm:$0xff] }
 0x188   :  { %2190 = vmatmul.bf16.vlgmr.msrb.gmra.mxu2 %v7256_v47  ;;  %2163 = vmatpush.bf16.msrb.mxu0 %v10346_v16  ;;  %v10357_v16 = vld [vmem:[#allocation120_spill] sm:$0xff] }
 0x189   :  { %2197 = vmatpush.bf16.msrb.mxu3 %v10347_v24  ;;  %2236 = vmatpush.bf16.msra.mxu2 %v10349_v38  ;;  %v10358_v24 = vld [vmem:[#allocation83_spill] sm:$0xff]  ;;  %v10360_v38 = vld [vmem:[#allocation114_spill] sm:$0xff] }
 0x18b   :  { %2170 = vmatpush.bf16.msrb.mxu1 %v10350_v63  ;;  %v10361_v63 = vld [vmem:[#allocation124_spill] sm:$0xff] }
 0x18c   :  { %2208 = vmatpush.bf16.msra.mxu0 %v10348_v31  ;;  %v10359_v31 = vld [vmem:[#allocation121_spill] sm:$0xff] }
 0x18d   :  { %2198 = vmatpush.bf16.msrb.mxu3 %v10351_v62  ;;  %2237 = vmatpush.bf16.msra.mxu2 %v10353_v12  ;;  %v10371_v12 = vld [vmem:[#allocation136_spill] sm:$0xff]  ;;  %v10372_v62 = vld [vmem:[#allocation95_spill] sm:$0xff] }
 0x18f   :  { %2171 = vmatpush.bf16.msrb.mxu1 %v10354_v2  ;;  %v10363_v2 = vld [vmem:[#allocation125_spill] sm:$0xff] }
 0x190   :  { %2209 = vmatpush.bf16.msra.mxu0 %v10352_v54  ;;  %v10362_v54 = vld [vmem:[#allocation87_spill] sm:$0xff] }
 0x191   :  { %2199 = vmatpush.bf16.msrb.mxu3 %v10355_v53  ;;  %2238 = vmatpush.bf16.msra.mxu2 %v10357_v16  ;;  %v10364_v53 = vld [vmem:[#allocation118_spill] sm:$0xff]  ;;  %v10366_v16 = vld [vmem:[#allocation91_spill] sm:$0xff] }
 0x193   :  { %2172 = vmatpush.bf16.msrb.mxu1 %v10358_v24  ;;  %v10367_v24 = vld [vmem:[#allocation129_spill] sm:$0xff] }
 0x194   :  { %2210 = vmatpush.bf16.msra.mxu0 %v10356_v26  ;;  %v10365_v26 = vld [vmem:[#allocation128_spill] sm:$0xff] }
 0x195   :  { %2200 = vmatpush.bf16.msrb.mxu3 %v10359_v31  ;;  %2239 = vmatpush.bf16.msra.mxu2 %v10361_v63  ;;  %v10368_v31 = vld [vmem:[#allocation122_spill] sm:$0xff]  ;;  %v10370_v63 = vld [vmem:[#allocation132_spill] sm:$0xff] }
 0x196   :  { %2125 = vmatmul.bf16.vlgmr.msra.gmra.mxu1 %v7191_v51  ;;  %2164 = vmatmul.bf16.vlgmr.msrb.gmra.mxu0 %v7191_v51 }
 0x197   :  { %2173 = vmatpush.bf16.msrb.mxu1 %v10362_v54  ;;  %v10374_v54 = vld [vmem:[#allocation137_spill] sm:$0xff] }
 0x198   :  { %2211 = vmatpush.bf16.msra.mxu0 %v10360_v38  ;;  %v10369_v38 = vld [vmem:[#allocation135_spill] sm:$0xff] }
 0x199   :  { %2201 = vmatpush.bf16.msrb.mxu3 %v10363_v2  ;;  %2240 = vmatpush.bf16.msra.mxu2 %v10365_v26  ;;  %v10391_v26 = vld [vmem:[#allocation153_spill] sm:$0xff]  ;;  %v10392_v2 = vld [vmem:[#allocation146_spill] sm:$0xff] }
 0x19b   :  { %2174 = vmatpush.bf16.msrb.mxu1 %v10366_v16  ;;  %v10375_v16 = vld [vmem:[#allocation140_spill] sm:$0xff] }
 0x19c   :  { %2212 = vmatpush.bf16.msra.mxu0 %v10364_v53  ;;  %v10373_v53 = vld [vmem:[#allocation126_spill] sm:$0xff] }
 0x19d   :  { %2202 = vmatpush.bf16.msrb.mxu3 %v10367_v24  ;;  %2241 = vmatpush.bf16.msra.mxu2 %v10369_v38  ;;  %v10376_v24 = vld [vmem:[#allocation99_spill] sm:$0xff]  ;;  %v10378_v38 = vld [vmem:[#allocation130_spill] sm:$0xff] }
 0x19f   :  { %2175 = vmatpush.bf16.msrb.mxu1 %v10372_v62  ;;  %v10381_v62 = vld [vmem:[#allocation144_spill] sm:$0xff] }
 0x1a0   :  { %2213 = vmatpush.bf16.msra.mxu0 %v10368_v31  ;;  %2203 = vmatmul.bf16.vlgmr.msrb.gmra.mxu3 %v7191_v51  ;;  %v10377_v31 = vld [vmem:[#allocation102_spill] sm:$0xff] }
 0x1a1   :  { %2247 = vmatpush.bf16.msra.mxu3 %v10370_v63  ;;  %2286 = vmatpush.bf16.msrb.mxu2 %v10371_v12  ;;  %v10379_v63 = vld [vmem:[#allocation141_spill] sm:$0xff] }
 0x1a2   :  { %2242 = vmatmul.bf16.vlgmr.msra.gmra.mxu2 %v7191_v51  ;;  %v10380_v12 = vld [vmem:[#allocation133_spill] sm:$0xff] }
 0x1a3   :  { %2176 = vmatpush.bf16.msrb.mxu1 %v10376_v24  ;;  %v10385_v24 = vld [vmem:[#allocation148_spill] sm:$0xff] }
 0x1a4   :  { %2214 = vmatpush.bf16.msra.mxu0 %v10373_v53  ;;  %v10382_v53 = vld [vmem:[#allocation107_spill] sm:$0xff] }
 0x1a5   :  { %2248 = vmatpush.bf16.msra.mxu3 %v10374_v54  ;;  %2287 = vmatpush.bf16.msrb.mxu2 %v10375_v16  ;;  %v10383_v54 = vld [vmem:[#allocation145_spill] sm:$0xff]  ;;  %v10384_v16 = vld [vmem:[#allocation138_spill] sm:$0xff] }
 0x1a6   :  { %2177 = vmatmul.bf16.vlgmr.msrb.gmra.mxu1 %v7208_v59 }
 0x1a7   :  { %2221 = vmatpush.bf16.msra.mxu1 %v10377_v31  ;;  %v10386_v31 = vld [vmem:[#allocation111_spill] sm:$0xff] }
 0x1a8   :  { %2215 = vmatpush.bf16.msra.mxu0 %v10378_v38  ;;  %v10387_v38 = vld [vmem:[#allocation149_spill] sm:$0xff] }
 0x1a9   :  { %2249 = vmatpush.bf16.msra.mxu3 %v10379_v63  ;;  %2288 = vmatpush.bf16.msrb.mxu2 %v10381_v62  ;;  %v10388_v63 = vld [vmem:[#allocation142_spill] sm:$0xff]  ;;  %v10390_v62 = vld [vmem:[#allocation115_spill] sm:$0xff] }
 0x1ab   :  { %2216 = vmatmul.bf16.vlgmr.msra.gmra.mxu0 %v7208_v59  ;;  %2222 = vmatpush.bf16.msra.mxu1 %v10382_v53  ;;  %v10393_v53 = vld [vmem:[#allocation156_spill] sm:$0xff] }
 0x1ac   :  { %2260 = vmatpush.bf16.msrb.mxu0 %v10380_v12  ;;  %v10389_v12 = vld [vmem:[#allocation152_spill] sm:$0xff] }
 0x1ad   :  { %2250 = vmatpush.bf16.msra.mxu3 %v10383_v54  ;;  %2289 = vmatpush.bf16.msrb.mxu2 %v10385_v24  ;;  %v10394_v54 = vld [vmem:[#allocation119_spill] sm:$0xff]  ;;  %v10396_v24 = vld [vmem:[#allocation150_spill] sm:$0xff] }
 0x1af   :  { %2223 = vmatpush.bf16.msra.mxu1 %v10386_v31  ;;  %v10397_v31 = vld [vmem:[#allocation160_spill] sm:$0xff] }
 0x1b0   :  { %2261 = vmatpush.bf16.msrb.mxu0 %v10384_v16  ;;  %v10395_v16 = vld [vmem:[#allocation157_spill] sm:$0xff] }
 0x1b1   :  { %2251 = vmatpush.bf16.msra.mxu3 %v10387_v38  ;;  %2290 = vmatpush.bf16.msrb.mxu2 %v10389_v12  ;;  %v10398_v38 = vld [vmem:[#allocation123_spill] sm:$0xff]  ;;  %v10400_v12 = vld [vmem:[#allocation154_spill] sm:$0xff] }
 0x1b3   :  { %2224 = vmatpush.bf16.msra.mxu1 %v10390_v62  ;;  %v10401_v62 = vld [vmem:[#allocation167_spill] sm:$0xff] }
 0x1b4   :  { %2262 = vmatpush.bf16.msrb.mxu0 %v10388_v63  ;;  %v10399_v63 = vld [vmem:[#allocation161_spill] sm:$0xff] }
 0x1b5   :  { %2252 = vmatpush.bf16.msra.mxu3 %v10391_v26  ;;  %2291 = vmatpush.bf16.msrb.mxu2 %v10393_v53  ;;  %v10402_v26 = vld [vmem:[#allocation164_spill] sm:$0xff]  ;;  %v10404_v53 = vld [vmem:[#allocation127_spill] sm:$0xff] }
 0x1b7   :  { %2225 = vmatpush.bf16.msra.mxu1 %v10394_v54  ;;  %v10406_v54 = vld [vmem:[#allocation169_spill] sm:$0xff] }
 0x1b8   :  { %2263 = vmatpush.bf16.msrb.mxu0 %v10392_v2  ;;  %v10403_v2 = vld [vmem:[#allocation168_spill] sm:$0xff] }
 0x1b9   :  { %2253 = vmatpush.bf16.msra.mxu3 %v10395_v16  ;;  %2292 = vmatpush.bf16.msrb.mxu2 %v10397_v31  ;;  %v10420_v31 = vld [vmem:[#allocation174_spill] sm:$0xff] }
 0x1ba   :  { %v10424_v16 = vld [vmem:[#allocation178_spill] sm:$0xff] }
 0x1bb   :  { %2226 = vmatpush.bf16.msra.mxu1 %v10398_v38  ;;  %v10407_v38 = vld [vmem:[#allocation172_spill] sm:$0xff] }
 0x1bc   :  { %2264 = vmatpush.bf16.msrb.mxu0 %v10396_v24  ;;  %v10405_v24 = vld [vmem:[#allocation158_spill] sm:$0xff] }
 0x1bd   :  { %2254 = vmatpush.bf16.msra.mxu3 %v10399_v63  ;;  %2293 = vmatpush.bf16.msrb.mxu2 %v10401_v62  ;;  %v10408_v63 = vld [vmem:[#allocation131_spill] sm:$0xff]  ;;  %v10410_v62 = vld [vmem:[#allocation162_spill] sm:$0xff] }
 0x1bf   :  { %2227 = vmatpush.bf16.msra.mxu1 %v10404_v53  ;;  %v10412_v53 = vld [vmem:[#allocation165_spill] sm:$0xff] }
 0x1c0   :  { %2265 = vmatpush.bf16.msrb.mxu0 %v10400_v12  ;;  %2255 = vmatmul.bf16.vlgmr.msra.gmra.mxu3 %v7208_v59  ;;  %v10409_v12 = vld [vmem:[#allocation134_spill] sm:$0xff] }
 0x1c1   :  { %2299 = vmatpush.bf16.msrb.mxu3 %v10402_v26  ;;  %2338 = vmatpush.bf16.msra.mxu2 %v10403_v2  ;;  %v10411_v2 = vld [vmem:[#allocation173_spill] sm:$0xff]  ;;  %v10413_v26 = vld [vmem:[#allocation176_spill] sm:$0xff] }
 0x1c2   :  { %2294 = vmatmul.bf16.vlgmr.msrb.gmra.mxu2 %v7208_v59 }
 0x1c3   :  { %2228 = vmatpush.bf16.msra.mxu1 %v10408_v63  ;;  %v10417_v63 = vld [vmem:[#allocation180_spill] sm:$0xff] }
 0x1c4   :  { %2266 = vmatpush.bf16.msrb.mxu0 %v10405_v24  ;;  %v10414_v24 = vld [vmem:[#allocation139_spill] sm:$0xff] }
 0x1c5   :  { %2300 = vmatpush.bf16.msrb.mxu3 %v10406_v54  ;;  %2339 = vmatpush.bf16.msra.mxu2 %v10407_v38  ;;  %v10415_v54 = vld [vmem:[#allocation177_spill] sm:$0xff]  ;;  %v10416_v38 = vld [vmem:[#allocation170_spill] sm:$0xff] }
 0x1c6   :  { %2229 = vmatmul.bf16.vlgmr.msra.gmra.mxu1 %v7256_v47 }
 0x1c7   :  { %2273 = vmatpush.bf16.msrb.mxu1 %v10409_v12  ;;  %v10418_v12 = vld [vmem:[#allocation143_spill] sm:$0xff] }
 0x1c8   :  { %2267 = vmatpush.bf16.msrb.mxu0 %v10410_v62  ;;  %v10419_v62 = vld [vmem:[#allocation181_spill] sm:$0xff] }
 0x1c9   :  { %2301 = vmatpush.bf16.msrb.mxu3 %v10411_v2  ;;  %2340 = vmatpush.bf16.msra.mxu2 %v10413_v26  ;;  %v10421_v2 = vld [vmem:[#allocation184_spill] sm:$0xff]  ;;  %v10423_v26 = vld [vmem:[#allocation185_spill] sm:$0xff] }
 0x1cb   :  { %2268 = vmatmul.bf16.vlgmr.msrb.gmra.mxu0 %v7256_v47  ;;  %2274 = vmatpush.bf16.msrb.mxu1 %v10414_v24  ;;  %v10425_v24 = vld [vmem:[#allocation188_spill] sm:$0xff] }
 0x1cc   :  { %2312 = vmatpush.bf16.msra.mxu0 %v10412_v53  ;;  %v10422_v53 = vld [vmem:[#allocation147_spill] sm:$0xff] }
 0x1cd   :  { %2302 = vmatpush.bf16.msrb.mxu3 %v10415_v54  ;;  %2341 = vmatpush.bf16.msra.mxu2 %v10417_v63  ;;  %v10426_v54 = vld [vmem:[#allocation151_spill] sm:$0xff]  ;;  %v10428_v63 = vld [vmem:[#allocation182_spill] sm:$0xff] }
 0x1cf   :  { %2275 = vmatpush.bf16.msrb.mxu1 %v10418_v12  ;;  %v10429_v12 = vld [vmem:[#allocation155_spill] sm:$0xff] }
 0x1d0   :  { %2313 = vmatpush.bf16.msra.mxu0 %v10416_v38  ;;  %v10427_v38 = vld [vmem:[#allocation189_spill] sm:$0xff] }
 0x1d1   :  { %2303 = vmatpush.bf16.msrb.mxu3 %v10419_v62  ;;  %2342 = vmatpush.bf16.msra.mxu2 %v10421_v2 }
 0x1d3   :  { %2276 = vmatpush.bf16.msrb.mxu1 %v10422_v53  ;;  %v10436_v53 = vld [vmem:[#allocation194_spill] sm:$0xff] }
 0x1d4   :  { %2314 = vmatpush.bf16.msra.mxu0 %v10420_v31  ;;  %v10430_v31 = vld [vmem:[#allocation186_spill] sm:$0xff] }
 0x1d5   :  { %2304 = vmatpush.bf16.msrb.mxu3 %v10423_v26  ;;  %2343 = vmatpush.bf16.msra.mxu2 %v10425_v24  ;;  %v10450_v24 = vld [vmem:[#allocation183_spill] sm:$0xff] }
 0x1d7   :  { %2277 = vmatpush.bf16.msrb.mxu1 %v10426_v54  ;;  %v10434_v54 = vld [vmem:[#allocation166_spill] sm:$0xff] }
 0x1d8   :  { %2315 = vmatpush.bf16.msra.mxu0 %v10424_v16  ;;  %v10431_v16 = vld [vmem:[#allocation159_spill] sm:$0xff] }
 0x1d9   :  { %2305 = vmatpush.bf16.msrb.mxu3 %v10427_v38  ;;  %2344 = vmatpush.bf16.msra.mxu2 %v6915_v42  ;;  %v10445_v42 = vld [vmem:[#allocation209_spill] sm:$0xff] }
 0x1db   :  { %2278 = vmatpush.bf16.msrb.mxu1 %v10429_v12  ;;  %v10433_v12 = vld [vmem:[#allocation163_spill] sm:$0xff] }
 0x1dc   :  { %2316 = vmatpush.bf16.msra.mxu0 %v10428_v63  ;;  %v10432_v63 = vld [vmem:[#allocation190_spill] sm:$0xff] }
 0x1dd   :  { %2306 = vmatpush.bf16.msrb.mxu3 %v6918_v49  ;;  %2345 = vmatpush.bf16.msra.mxu2 %v6933_v30  ;;  %v10440_v30 = vld [vmem:[#allocation13_spill] sm:$0xff] }
 0x1df   :  { %2279 = vmatpush.bf16.msrb.mxu1 %v10431_v16  ;;  %v10437_v16 = vld [vmem:[#allocation203_spill] sm:$0xff] }
 0x1e0   :  { %2317 = vmatpush.bf16.msra.mxu0 %v10430_v31  ;;  %2307 = vmatmul.bf16.vlgmr.msrb.gmra.mxu3 %v7256_v47  ;;  %v10435_v31 = vld [vmem:[#allocation9_spill] sm:$0xff] }
 0x1e1   :  { %2351 = vmatpush.bf16.msra.mxu3 %v6926_v61  ;;  %2447 = vmatpush.bf16.msrb.mxu2 %v6324_v3  ;;  %v10438_v61 = vld [vmem:[#allocation197_spill] sm:$0xff]  ;;  %v10439_v3 = vld [vmem:[#allocation171_spill] sm:$0xff] }
 0x1e2   :  { %2346 = vmatmul.bf16.vlgmr.msra.gmra.mxu2 %v7256_v47 }
 0x1e3   :  { %2280 = vmatpush.bf16.msrb.mxu1 %v10433_v12  ;;  %v10442_v12 = vld [vmem:[#allocation201_spill] sm:$0xff] }
 0x1e4   :  { %2318 = vmatpush.bf16.msra.mxu0 %v10432_v63  ;;  %v10441_v63 = vld [vmem:[#allocation206_spill] sm:$0xff] }
 0x1e5   :  { %2352 = vmatpush.bf16.msra.mxu3 %v6943_v0  ;;  %2448 = vmatpush.bf16.msrb.mxu2 %v10435_v31  ;;  %v2087_v31 = vpop.f32.mrf.mxu2  ;;  %v10443_v0 = vld [vmem:[#allocation175_spill] sm:$0xff] }
 0x1e6   :  { %2281 = vmatmul.bf16.vlgmr.msrb.gmra.mxu1 %v7191_v51 }
 0x1e7   :  { %2325 = vmatpush.bf16.msra.mxu1 %v10434_v54  ;;  %v2048_v54 = vpop.f32.mrf.mxu3  ;;  %v2061_v49 = vpop.f32.mrf.mxu0 }
 0x1e8   :  { %2319 = vmatpush.bf16.msra.mxu0 %v10436_v53  ;;  %v10444_v53 = vld [vmem:[#allocation17_spill] sm:$0xff] }
 0x1e9   :  { %2353 = vmatpush.bf16.msra.mxu3 %v10437_v16  ;;  %2449 = vmatpush.bf16.msrb.mxu2 %v10440_v30  ;;  %v2062_v16 = vadd.f32 %v2061_v49, %v2048_v54  ;;  %v10448_v30 = vld [vmem:[#allocation212_spill] sm:$0xff]  ;;  %v10451_v49 = vld [vmem:[#allocation210_spill] sm:$0xff]  ;;  %v10452_v54 = vld [vmem:[#allocation187_spill] sm:$0xff] }
 0x1eb   :  { %2326 = vmatpush.bf16.msra.mxu1 %v10439_v3  ;;  %2320 = vmatmul.bf16.vlgmr.msra.gmra.mxu0 %v7191_v51  ;;  %v10447_v3 = vld [vmem:[#allocation179_spill] sm:$0xff] }
 0x1ec   :  { %2364 = vmatpush.bf16.msrb.mxu0 %v10438_v61  ;;  %v10446_v61 = vld [vmem:[#allocation204_spill] sm:$0xff] }
 0x1ed   :  { %2354 = vmatpush.bf16.msra.mxu3 %v10441_v63  ;;  %2450 = vmatpush.bf16.msrb.mxu2 %v10444_v53  ;;  %v10449_v63 = vld [vmem:[#allocation207_spill] sm:$0xff]  ;;  %v2089_v38 = vpop.f32.mrf.mxu2 }
 0x1ee   :  { %v10454_v38 = vld [vmem:[#allocation191_spill] sm:$0xff] }
 0x1ef   :  { %2327 = vmatpush.bf16.msra.mxu1 %v10443_v0  ;;  %v2063_v0 = vpop.f32.mrf.mxu0 }
 0x1f0   :  { %2365 = vmatpush.bf16.msrb.mxu0 %v10442_v12  ;;  %v2050_v12 = vpop.f32.mrf.mxu3  ;;  %v10455_v0 = vld [vmem:[#allocation195_spill] sm:$0xff] }
 0x1f1   :  { %2355 = vmatpush.bf16.msra.mxu3 %v10445_v42  ;;  %2451 = vmatpush.bf16.msrb.mxu2 %v6369_v56 }
 0x1f3   :  { %2328 = vmatpush.bf16.msra.mxu1 %v10447_v3  ;;  %v10453_v3 = vld [vmem:[#allocation214_spill] sm:$0xff] }
 0x1f4   :  { %2366 = vmatpush.bf16.msrb.mxu0 %v10446_v61 }
 0x1f5   :  { %2356 = vmatpush.bf16.msra.mxu3 %v10448_v30  ;;  %2452 = vmatpush.bf16.msrb.mxu2 %v6381_v5  ;;  %v2139_v12 = vpop.f32.mrf.mxu2 }
 0x1f7   :  { %2329 = vmatpush.bf16.msra.mxu1 %v10450_v24 }
 0x1f8   :  { %2367 = vmatpush.bf16.msrb.mxu0 %v10449_v63  ;;  %v2100_v63 = vpop.f32.mrf.mxu3 }
 0x1f9   :  { %2357 = vmatpush.bf16.msra.mxu3 %v7015_v20  ;;  %2453 = vmatpush.bf16.msrb.mxu2 %v6393_v23  ;;  %v2101_v24 = vadd.f32 %v2100_v63, %v2087_v31 }
 0x1fb   :  { %2330 = vmatpush.bf16.msra.mxu1 %v10452_v54  ;;  %v10456_v54 = vld [vmem:[#allocation198_spill] sm:$0xff] }
 0x1fc   :  { %2368 = vmatpush.bf16.msrb.mxu0 %v10451_v49 }
 0x1fd   :  { %2358 = vmatpush.bf16.msra.mxu3 %v7030_v22  ;;  %2454 = vmatpush.bf16.msrb.mxu2 %v6405_v43  ;;  %v2141_v31 = vpop.f32.mrf.mxu2 }
 0x1ff   :  { %2331 = vmatpush.bf16.msra.mxu1 %v10454_v38  ;;  %v10457_v38 = vld [vmem:[#allocation202_spill] sm:$0xff] }
 0x200   :  { %2369 = vmatpush.bf16.msrb.mxu0 %v10453_v3  ;;  %2359 = vmatmul.bf16.vlgmr.msra.gmra.mxu3 %v7191_v51  ;;  %v2102_v63 = vpop.f32.mrf.mxu3  ;;  %v10458_v51 = vld [vmem:[#allocation205_spill] sm:$0xff] }
 0x201   :  { %2460 = vmatpush.bf16.msrb.mxu3 %v6326_v7  ;;  %2499 = vmatpush.bf16.msra.mxu2 %v6414_v55 }
 0x203   :  { %2332 = vmatpush.bf16.msra.mxu1 %v10455_v0  ;;  %v10463_v0 = vld [vmem:[#allocation65_spill] sm:$0xff] }
 0x204   :  { %2370 = vmatpush.bf16.msrb.mxu0 %v7024_v60 }
 0x205   :  { %2461 = vmatpush.bf16.msrb.mxu3 %v6337_v17  ;;  %2500 = vmatpush.bf16.msra.mxu2 %v6429_v18 }
 0x206   :  { %2333 = vmatmul.bf16.vlgmr.msra.gmra.mxu1 %v7208_v59 }
 0x207   :  { %2377 = vmatpush.bf16.msrb.mxu1 %v10456_v54  ;;  %v2074_v54 = vpop.f32.mrf.mxu1 }
 0x208   :  { %2371 = vmatpush.bf16.msrb.mxu0 %v7035_v44  ;;  %v2113_v44 = vpop.f32.mrf.mxu0  ;;  %v2075_v63 = vadd.f32 %v2074_v54, %v2062_v16  ;;  %v7429_v16 = vpop.permute.xlu0 %60 }
 0x209   :  { %2462 = vmatpush.bf16.msrb.mxu3 %v6349_v33  ;;  %2501 = vmatpush.bf16.msra.mxu2 %v6442_v40  ;;  %v7418_v31 = vadd.f32 %v2113_v44, %v2101_v24  ;;  %v10461_v24 = vld [vmem:[#allocation213_spill] sm:$0xff] }
 0x20a   :  { %v122_v54 = vmul.f32 %v10461_v24, %v7429_v16 }
 0x20b   :  { %2378 = vmatpush.bf16.msrb.mxu1 %v10457_v38  ;;  %2372 = vmatmul.bf16.vlgmr.msrb.gmra.mxu0 %v7208_v59  ;;  %v10459_v38 = vld [vmem:[#allocation208_spill] sm:$0xff]  ;;  %v2152_v59 = vpop.f32.mrf.mxu3 }
 0x20c   :  { %2473 = vmatpush.bf16.msra.mxu0 %v6328_v8 }
 0x20d   :  { %2463 = vmatpush.bf16.msrb.mxu3 %v6361_v45  ;;  %2502 = vmatpush.bf16.msra.mxu2 %v6458_v11 }
 0x20f   :  { %2379 = vmatpush.bf16.msrb.mxu1 %v10458_v51  ;;  %v2191_v51 = vpop.f32.mrf.mxu2  ;;  %v2076_v8 = vpop.f32.mrf.mxu1 }
 0x210   :  { %2474 = vmatpush.bf16.msra.mxu0 %v6340_v21  ;;  %v10460_v21 = vld [vmem:[#allocation211_spill] sm:$0xff]  ;;  %v2115_v44 = vpop.f32.mrf.mxu0  ;;  %v216_v8 = vadd.f32 %v7020_v37, %v122_v54  ;;  %v10466_v54 = vld [vmem:[#allocation222_spill] sm:$0xff]  ;;  %v10477_v37 = vld [vmem:[#allocation20_spill] sm:$0xff] }
 0x211   :  { %2464 = vmatpush.bf16.msrb.mxu3 %v6373_v57  ;;  %2503 = vmatpush.bf16.msra.mxu2 %v6473_v48 }
 0x212   :  { %v2390_v24 = vadd.f32 %v2075_v63, %v216_v8  ;;  %v10471_v8 = vld [vmem:[#allocation12_spill] sm:$0xff] }
 0x213   :  { %2380 = vmatpush.bf16.msrb.mxu1 %v10459_v38  ;;  %v10462_v38 = vld [vmem:[#allocation34_spill] sm:$0xff] }
 0x214   :  { %2475 = vmatpush.bf16.msra.mxu0 %v6351_v34 }
 0x215   :  { %2465 = vmatpush.bf16.msrb.mxu3 %v6385_v6  ;;  %2504 = vmatpush.bf16.msra.mxu2 %v6485_v15 }
 0x217   :  { %2381 = vmatpush.bf16.msrb.mxu1 %v10460_v21  ;;  %v2154_v21 = vpop.f32.mrf.mxu3  ;;  %v2193_v44 = vpop.f32.mrf.mxu2 }
 0x218   :  { %2476 = vmatpush.bf16.msra.mxu0 %v6363_v46  ;;  %v2126_v46 = vpop.f32.mrf.mxu1  ;;  %v2393_v21 = vmul.f32 0.5, %v2390_v24  ;;  %v10468_v44 = vld [vmem:[#allocation42_spill] sm:$0xff]  ;;  %v10474_v24 = vld [vmem:[#allocation16_spill] sm:$0xff] }
 0x219   :  { %2466 = vmatpush.bf16.msrb.mxu3 %v6397_v27  ;;  %2505 = vmatpush.bf16.msra.mxu2 %v6497_v1  ;;  %v2140_v34 = vadd.f32 %v2139_v12, %v2126_v46  ;;  %v10465_v1 = vld [vmem:[#allocation31_spill] sm:$0xff]  ;;  %v10470_v12 = vld [vmem:[#allocation38_spill] sm:$0xff] }
 0x21a   :  { %6119 = vtanh.f32 %v2393_v21  ;;  %v10478_v21 = vld [vmem:[#allocation54_spill] sm:$0xff] }
 0x21b   :  { %2382 = vmatpush.bf16.msrb.mxu1 %v7011_v19  ;;  %v10464_v19 = vld [vmem:[#allocation37_spill] sm:$0xff]  ;;  %v2153_v27 = vadd.f32 %v2152_v59, %v2140_v34  ;;  %v10472_v34 = vld [vmem:[#allocation46_spill] sm:$0xff]  ;;  %v10473_v59 = vld [vmem:[#allocation43_spill] sm:$0xff] }
 0x21c   :  { %2477 = vmatpush.bf16.msra.mxu0 %v6375_v58  ;;  %v2165_v58 = vpop.f32.mrf.mxu0 }
 0x21d   :  { %2467 = vmatpush.bf16.msrb.mxu3 %v10462_v38  ;;  %2506 = vmatpush.bf16.msra.mxu2 %v10463_v0  ;;  %v10481_v0 = vld [vmem:[#allocation24_spill] sm:$0xff] }
 0x21e   :  { %v10483_v38 = vld [vmem:[#allocation224_spill] sm:$0xff] }
 0x21f   :  { %2383 = vmatpush.bf16.msrb.mxu1 %v7026_v29  ;;  %v10469_v29 = vld [vmem:[#allocation35_spill] sm:$0xff] }
 0x220   :  { %2478 = vmatpush.bf16.msra.mxu0 %v6387_v9  ;;  %v10467_v9 = vld [vmem:[#allocation8_spill] sm:$0xff]  ;;  %v2128_v46 = vpop.f32.mrf.mxu1 }
 0x221   :  { %2512 = vmatpush.bf16.msra.mxu3 %v10464_v19  ;;  %v10482_v19 = vld [vmem:[#allocation58_spill] sm:$0xff] }
 0x223   :  { %2384 = vmatpush.bf16.msrb.mxu1 %v10466_v54  ;;  %v6120_v54 = vpop.eup %6119 }
 0x224   :  { %2479 = vmatpush.bf16.msra.mxu0 %v10465_v1  ;;  %v2167_v63 = vpop.f32.mrf.mxu0  ;;  %v2204_v1 = vpop.f32.mrf.mxu3 }
 0x225   :  { %2513 = vmatpush.bf16.msra.mxu3 %v10468_v44  ;;  %v2399_v63 = vmul.f32 0.5, %v6120_v54 }
 0x226   :  { %2385 = vmatmul.bf16.vlgmr.msrb.gmra.mxu1 %v7256_v47  ;;  %v10476_v47 = vld [vmem:[#allocation47_spill] sm:$0xff] }
 0x227   :  { %2486 = vmatpush.bf16.msra.mxu1 %v10467_v9  ;;  %v10475_v9 = vld [vmem:[#allocation50_spill] sm:$0xff] }
 0x228   :  { %2480 = vmatpush.bf16.msra.mxu0 %v10469_v29  ;;  %v2243_v29 = vpop.f32.mrf.mxu2  ;;  %v2178_v46 = vpop.f32.mrf.mxu1 }
 0x229   :  { %2514 = vmatpush.bf16.msra.mxu3 %v10472_v34 }
 0x22b   :  { %2487 = vmatpush.bf16.msra.mxu1 %v10471_v8  ;;  %v2179_v8 = vadd.f32 %v2178_v46, %v2165_v58 }
 0x22c   :  { %2525 = vmatpush.bf16.msrb.mxu0 %v10470_v12  ;;  %v2217_v12 = vpop.f32.mrf.mxu0  ;;  %v2206_v58 = vpop.f32.mrf.mxu3 }
 0x22d   :  { %2515 = vmatpush.bf16.msra.mxu3 %v10475_v9  ;;  %v2218_v34 = vadd.f32 %v2217_v12, %v2204_v1  ;;  %v2192_v44 = vadd.f32 %v2191_v51, %v2179_v8  ;;  %v10485_v1 = vld [vmem:[#allocation55_spill] sm:$0xff]  ;;  %v10486_v51 = vld [vmem:[#allocation225_spill] sm:$0xff]  ;;  %v10492_v58 = vld [vmem:[#allocation66_spill] sm:$0xff] }
 0x22f   :  { %2488 = vmatpush.bf16.msra.mxu1 %v10474_v24  ;;  %v10480_v24 = vld [vmem:[#allocation223_spill] sm:$0xff]  ;;  %v2405_v60 = vadd.f32 %v2192_v44, %v10483_v38 }
 0x230   :  { %2526 = vmatpush.bf16.msrb.mxu0 %v10473_v59  ;;  %v10479_v59 = vld [vmem:[#allocation51_spill] sm:$0xff]  ;;  %v123_v9 = vmul.f32 %v10480_v24, %v7429_v16  ;;  %v2245_v8 = vpop.f32.mrf.mxu2  ;;  %v2180_v46 = vpop.f32.mrf.mxu1 }
 0x231   :  { %2516 = vmatpush.bf16.msra.mxu3 %v10478_v21  ;;  %v10489_v44 = vld [vmem:[#allocation227_spill] sm:$0xff] }
 0x232   :  { %v217_v12 = vadd.f32 %v10486_v51, %v123_v9  ;;  %v10493_v9 = vld [vmem:[#allocation63_spill] sm:$0xff] }
 0x233   :  { %2489 = vmatpush.bf16.msra.mxu1 %v10477_v37  ;;  %v10484_v37 = vld [vmem:[#allocation226_spill] sm:$0xff]  ;;  %v10494_v46 = vld [vmem:[#allocation39_spill] sm:$0xff] }
 0x234   :  { %2527 = vmatpush.bf16.msrb.mxu0 %v10476_v47  ;;  %v2402_v47 = vadd.f32 0.5, %v2399_v63  ;;  %v124_v21 = vmul.f32 %v10484_v37, %v7429_v16  ;;  %v2219_v24 = vpop.f32.mrf.mxu0  ;;  %v2391_v63 = vadd.f32 %v7418_v31, %v217_v12  ;;  %v10497_v31 = vld [vmem:[#allocation44_spill] sm:$0xff] }
 0x235   :  { %2517 = vmatpush.bf16.msra.mxu3 %v10482_v19  ;;  %v10490_v19 = vld [vmem:[#allocation59_spill] sm:$0xff] }
 0x236   :  { %v7466_v54 = vmul.f32 %v2405_v60, %v2402_v47  ;;  %v218_v38 = vadd.f32 %v10489_v44, %v124_v21  ;;  %v10491_v47 = vld [vmem:[#allocation32_spill] sm:$0xff]  ;;  %v2394_v37 = vmul.f32 0.5, %v2391_v63  ;;  %v10496_v24 = vld [vmem:[#allocation67_spill] sm:$0xff] }
 0x237   :  { %2490 = vmatpush.bf16.msra.mxu1 %v10481_v0  ;;  %v10488_v0 = vld [vmem:[#allocation62_spill] sm:$0xff] }
 0x238   :  { %2528 = vmatpush.bf16.msrb.mxu0 %v10479_v59  ;;  %v10487_v59 = vld [vmem:[#allocation28_spill] sm:$0xff]  ;;  %v2392_v60 = vadd.f32 %v2153_v27, %v218_v38  ;;  %6121 = vtanh.f32 %v2394_v37 }
 0x239   :  { %2518 = vmatpush.bf16.msra.mxu3 %v10488_v0  ;;  %v10498_v27 = vld [vmem:[#allocation48_spill] sm:$0xff] }
 0x23a   :  { %v2395_v8 = vmul.f32 0.5, %v2392_v60  ;;  %v10502_v0 = vld [vmem:[#allocation56_spill] sm:$0xff] }
 0x23b   :  { %2491 = vmatpush.bf16.msra.mxu1 %v10487_v59  ;;  %v10495_v59 = vld [vmem:[#allocation40_spill] sm:$0xff] }
 0x23c   :  { %2529 = vmatpush.bf16.msrb.mxu0 %v10485_v1  ;;  %6123 = vtanh.f32 %v2395_v8  ;;  %v10500_v1 = vld [vmem:[#allocation228_spill] sm:$0xff]  ;;  %v127_v8 = vmul.f32 %v7211_v50, %v7429_v16 }
 0x23d   :  { %2519 = vmatpush.bf16.msra.mxu3 %v10492_v58  ;;  %v10504_v50 = vld [vmem:[#allocation64_spill] sm:$0xff] }
 0x23e   :  { %v6122_v21 = vpop.eup %6121 }
 0x23f   :  { %2492 = vmatpush.bf16.msra.mxu1 %v10491_v47  ;;  %v2400_v12 = vmul.f32 0.5, %v6122_v21  ;;  %v10501_v21 = vld [vmem:[#allocation229_spill] sm:$0xff] }
 0x240   :  { %2530 = vmatpush.bf16.msrb.mxu0 %v10490_v19 }
 0x241   :  { %v2403_v37 = vadd.f32 0.5, %v2400_v12 }
 0x242   :  { %v6124_v38 = vpop.eup %6123 }
 0x243   :  { %2493 = vmatpush.bf16.msra.mxu1 %v10494_v46  ;;  %v2230_v44 = vpop.f32.mrf.mxu1  ;;  %v2256_v63 = vpop.f32.mrf.mxu3  ;;  %v2401_v19 = vmul.f32 0.5, %v6124_v38  ;;  %v10499_v46 = vld [vmem:[#allocation52_spill] sm:$0xff] }
 0x244   :  { %2531 = vmatpush.bf16.msrb.mxu0 %v10493_v9  ;;  %v2231_v47 = vadd.f32 %v2230_v44, %v2218_v34  ;;  %v2257_v9 = vadd.f32 %v2256_v63, %v2243_v29  ;;  %v221_v29 = vadd.f32 %v7227_v32, %v127_v8 }
 0x245   :  { %v2295_v60 = vpop.f32.mrf.mxu2 }
 0x247   :  { %2538 = vmatpush.bf16.msrb.mxu1 %v10495_v59 }
 0x248   :  { %2532 = vmatpush.bf16.msrb.mxu0 %v10496_v24  ;;  %v2269_v59 = vpop.f32.mrf.mxu0  ;;  %v2406_v24 = vadd.f32 %v2231_v47, %v10500_v1  ;;  %v10503_v47 = vld [vmem:[#allocation60_spill] sm:$0xff] }
 0x24a   :  { %v7487_v51 = vmul.f32 %v2406_v24, %v2403_v37 }
 0x24b   :  { %2539 = vmatpush.bf16.msrb.mxu1 %v10497_v31  ;;  %v2270_v31 = vadd.f32 %v2269_v59, %v2257_v9  ;;  %v2232_v44 = vpop.f32.mrf.mxu1  ;;  %v2258_v38 = vpop.f32.mrf.mxu3  ;;  %v10505_v59 = vld [vmem:[#allocation71_spill] sm:$0xff] }
 0x24d   :  { %v2407_v58 = vadd.f32 %v2270_v31, %v10501_v21  ;;  %v2297_v12 = vpop.f32.mrf.mxu2  ;;  %v10509_v21 = vld [vmem:[#allocation234_spill] sm:$0xff] }
 0x24f   :  { %2540 = vmatpush.bf16.msrb.mxu1 %v10498_v27  ;;  %v2404_v27 = vadd.f32 0.5, %v2401_v19  ;;  %v10506_v19 = vld [vmem:[#allocation230_spill] sm:$0xff] }
 0x250   :  { %v2271_v1 = vpop.f32.mrf.mxu0  ;;  %v128_v9 = vmul.f32 %v10506_v19, %v7429_v16 }
 0x251   :  { %v2410_v34 = vmul.f32 %v2407_v58, %v2404_v27  ;;  %v10507_v58 = vld [vmem:[#allocation231_spill] sm:$0xff] }
 0x252   :  { %v222_v27 = vadd.f32 %v10507_v58, %v128_v9 }
 0x253   :  { %2541 = vmatpush.bf16.msrb.mxu1 %v10499_v46  ;;  %v7492_v63 = vadd.f32 %v2410_v34, %v221_v29  ;;  %v10508_v34 = vld [vmem:[#allocation232_spill] sm:$0xff] }
 0x254   :  { %v125_v38 = vmul.f32 %v10508_v34, %v7429_v16 }
 0x257   :  { %2542 = vmatpush.bf16.msrb.mxu1 %v10502_v0 }
 0x25b   :  { %2543 = vmatpush.bf16.msrb.mxu1 %v10503_v47 }
 0x25f   :  { %2544 = vmatpush.bf16.msrb.mxu1 %v10504_v50 }
 0x263   :  { %2545 = vmatpush.bf16.msrb.mxu1 %v10505_v59  ;;  %v2282_v24 = vpop.f32.mrf.mxu1  ;;  %v2308_v31 = vpop.f32.mrf.mxu3  ;;  %v219_v59 = vadd.f32 %v10509_v21, %v125_v38 }
 0x264   :  { %v2296_v37 = vadd.f32 %v2295_v60, %v2282_v24 }
 0x265   :  { %v2347_v8 = vpop.f32.mrf.mxu2  ;;  %v2411_v19 = vadd.f32 %v7466_v54, %v219_v59  ;;  %v10511_v59 = vld [vmem:[#allocation235_spill] sm:$0xff] }
 0x266   :  { %v2309_v44 = vadd.f32 %v2308_v31, %v2296_v37 }
 0x268   :  { %v2321_v29 = vpop.f32.mrf.mxu0  ;;  %v2417_v12 = vadd.f32 %v2309_v44, %v222_v27 }
 0x26a   :  { %v2420_v1 = vmul.f32 0.5, %v2417_v12 }
 0x26b   :  { %v2284_v32 = vpop.f32.mrf.mxu1  ;;  %v2310_v50 = vpop.f32.mrf.mxu3 }
 0x26c   :  { %6125 = vtanh.f32 %v2420_v1  ;;  %v10510_v32 = vld [vmem:[#allocation233_spill] sm:$0xff] }
 0x26d   :  { %v2349_v47 = vpop.f32.mrf.mxu2  ;;  %6127 = vtanh.f32 %v2411_v19 }
 0x270   :  { %v2323_v0 = vpop.f32.mrf.mxu0 }
 0x271   :  { %v129_v0 = vmul.f32 %v10510_v32, %v7429_v16 }
 0x272   :  { %v6126_v60 = vpop.eup %6125 }
 0x273   :  { %v2426_v24 = vmul.f32 0.5, %v6126_v60  ;;  %v6128_v37 = vpop.eup %6127  ;;  %v223_v19 = vadd.f32 %v10511_v59, %v129_v0  ;;  %v10513_v60 = vld [vmem:[#allocation77_spill] sm:$0xff] }
 0x275   :  { %v2429_v9 = vadd.f32 0.5, %v2426_v24  ;;  %v10514_v24 = vld [vmem:[#allocation80_spill] sm:$0xff] }
 0x277   :  { %v2432_v31 = vsub.f32 1.0, %v2429_v9  ;;  %v2438_v34 = vmul.f32 %v2429_v9, %v7187_v41 }
 0x279   :  { %v2435_v58 = vmul.f32 %v6128_v37, %v2432_v31 }
 0x27b   :  { %v7505_v27 = vadd.f32 %v2438_v34, %v2435_v58  ;;  %v10512_v34 = vld [vmem:[#allocation236_spill] sm:$0xff] }
 0x27c   :  { %v126_v38 = vmul.f32 %v10512_v34, %v7429_v16 }
 0x27d   :  { %v7509_v50 = vpack.c.bf16 %v7505_v27, %v7505_v27 }
 0x27f   :  { %2455 = vmatmul.bf16.vlgmr.msrb.gmra.mxu2 %v7509_v50  ;;  %2494 = vmatmul.bf16.vlgmr.msra.gmra.mxu1 %v7509_v50 }
 0x280   :  { %2551 = vmatpush.bf16.msrb.mxu2 %v10312_v36  ;;  %2590 = vmatpush.bf16.msra.mxu1 %v10313_v39 }
 0x283   :  { %v2334_v54 = vpop.f32.mrf.mxu1  ;;  %v2360_v41 = vpop.f32.mrf.mxu3 }
 0x284   :  { %v2335_v47 = vadd.f32 %v2334_v54, %v2321_v29  ;;  %2552 = vmatpush.bf16.msrb.mxu2 %v10316_v14  ;;  %2591 = vmatpush.bf16.msra.mxu1 %v10317_v10  ;;  %v10515_v29 = vld [vmem:[#allocation237_spill] sm:$0xff] }
 0x285   :  { %v220_v31 = vadd.f32 %v10515_v29, %v126_v38  ;;  %v10518_v38 = vld [vmem:[#allocation92_spill] sm:$0xff] }
 0x286   :  { %v2348_v58 = vadd.f32 %v2347_v8, %v2335_v47 }
 0x287   :  { %v2412_v8 = vadd.f32 %v7487_v51, %v220_v31  ;;  %v10519_v31 = vld [vmem:[#allocation72_spill] sm:$0xff] }
 0x288   :  { %v2373_v44 = vpop.f32.mrf.mxu0  ;;  %v2418_v12 = vadd.f32 %v2348_v58, %v223_v19  ;;  %2553 = vmatpush.bf16.msrb.mxu2 %v10513_v60  ;;  %2592 = vmatpush.bf16.msra.mxu1 %v10514_v24  ;;  %v10516_v19 = vld [vmem:[#allocation88_spill] sm:$0xff] }
 0x28a   :  { %v2421_v1 = vmul.f32 0.5, %v2418_v12 }
 0x28b   :  { %v2336_v9 = vpop.f32.mrf.mxu1  ;;  %v2362_v37 = vpop.f32.mrf.mxu3 }
 0x28c   :  { %6129 = vtanh.f32 %v2421_v1  ;;  %2554 = vmatpush.bf16.msrb.mxu2 %v10324_v52  ;;  %2593 = vmatpush.bf16.msra.mxu1 %v10326_v35  ;;  %v10517_v9 = vld [vmem:[#allocation89_spill] sm:$0xff] }
 0x28d   :  { %6131 = vtanh.f32 %v2412_v8  ;;  %v10520_v8 = vld [vmem:[#allocation96_spill] sm:$0xff] }
 0x290   :  { %v2375_v0 = vpop.f32.mrf.mxu0  ;;  %2555 = vmatpush.bf16.msrb.mxu2 %v10327_v13  ;;  %2594 = vmatpush.bf16.msra.mxu1 %v10516_v19  ;;  %v10522_v13 = vld [vmem:[#allocation97_spill] sm:$0xff] }
 0x292   :  { %v6130_v54 = vpop.eup %6129 }
 0x293   :  { %v2427_v47 = vmul.f32 0.5, %v6130_v54  ;;  %v6132_v1 = vpop.eup %6131 }
 0x294   :  { %2556 = vmatpush.bf16.msrb.mxu2 %v10517_v9  ;;  %2595 = vmatpush.bf16.msra.mxu1 %v10518_v38  ;;  %v2374_v9 = vadd.f32 %v2373_v44, %v2360_v41  ;;  %v45_v44 = vld [vmem:[%s9518_s0 + $0x10] sm:$0xff] }
 0x295   :  { %v2430_v58 = vadd.f32 0.5, %v2427_v47  ;;  %v10521_v47 = vld [vmem:[#allocation68_spill] sm:$0xff]  ;;  %65 = vperm.xlu1 %6096, %v45_v44  }
 0x296   :  { %v130_v19 = vmul.f32 %v10521_v47, %v7429_v16  ;;  %v10525_v16 = vld [vmem:[#allocation104_spill] sm:$0xff]  ;;  %v10526_v47 = vld [vmem:[#allocation74_spill] sm:$0xff] }
 0x297   :  { %v2433_v12 = vsub.f32 1.0, %v2430_v58  ;;  %v2439_v37 = vmul.f32 %v2430_v58, %v10519_v31  ;;  %v10534_v44 = vld [vmem:[#allocation116_spill] sm:$0xff] }
 0x298   :  { %2557 = vmatpush.bf16.msrb.mxu2 %v10333_v25  ;;  %2596 = vmatpush.bf16.msra.mxu1 %v10520_v8 }
 0x299   :  { %v2436_v51 = vmul.f32 %v6132_v1, %v2433_v12  ;;  %v10523_v12 = vld [vmem:[#allocation69_spill] sm:$0xff]  ;;  %v10524_v1 = vld [vmem:[#allocation76_spill] sm:$0xff] }
 0x29b   :  { %v7533_v0 = vadd.f32 %v2439_v37, %v2436_v51  ;;  %v224_v51 = vadd.f32 %v10524_v1, %v130_v19  ;;  %v10531_v1 = vld [vmem:[#allocation112_spill] sm:$0xff] }
 0x29c   :  { %2558 = vmatpush.bf16.msrb.mxu2 %v10522_v13  ;;  %2597 = vmatpush.bf16.msra.mxu1 %v10338_v28  ;;  %v10527_v28 = vld [vmem:[#allocation105_spill] sm:$0xff]  ;;  %v10528_v13 = vld [vmem:[#allocation108_spill] sm:$0xff] }
 0x29d   :  { %v7539_v54 = vpack.c.bf16 %v7533_v0, %v7533_v0 }
 0x29f   :  { %2468 = vmatmul.bf16.vlgmr.msrb.gmra.mxu3 %v7539_v54  ;;  %2507 = vmatmul.bf16.vlgmr.msra.gmra.mxu2 %v7539_v54 }
 0x2a0   :  { %2546 = vmatmul.bf16.vlgmr.msrb.gmra.mxu1 %v7539_v54  ;;  %2564 = vmatpush.bf16.msrb.mxu3 %v10523_v12 }
 0x2a1   :  { %2603 = vmatpush.bf16.msra.mxu2 %v10339_v4  ;;  %2642 = vmatpush.bf16.msrb.mxu1 %v10525_v16  ;;  %v10538_v16 = vld [vmem:[#allocation81_spill] sm:$0xff] }
 0x2a3   :  { %v2386_v58 = vpop.f32.mrf.mxu1 }
 0x2a4   :  { %v2387_v31 = vadd.f32 %v2386_v58, %v2374_v9  ;;  %2565 = vmatpush.bf16.msrb.mxu3 %v10526_v47  ;;  %v10529_v9 = vld [vmem:[#allocation78_spill] sm:$0xff]  ;;  %v10530_v58 = vld [vmem:[#allocation109_spill] sm:$0xff] }
 0x2a5   :  { %2604 = vmatpush.bf16.msra.mxu2 %v10527_v28  ;;  %2643 = vmatpush.bf16.msrb.mxu1 %v10528_v13  ;;  %v10533_v47 = vld [vmem:[#allocation113_spill] sm:$0xff]  ;;  %v10535_v13 = vld [vmem:[#allocation86_spill] sm:$0xff] }
 0x2a6   :  { %v2419_v41 = vadd.f32 %v2387_v31, %v224_v51  ;;  %v10532_v31 = vld [vmem:[#allocation82_spill] sm:$0xff] }
 0x2a8   :  { %v2422_v37 = vmul.f32 0.5, %v2419_v41  ;;  %2566 = vmatpush.bf16.msrb.mxu3 %v10529_v9  ;;  %v10537_v9 = vld [vmem:[#allocation120_spill] sm:$0xff] }
 0x2a9   :  { %2605 = vmatpush.bf16.msra.mxu2 %v10530_v58  ;;  %2644 = vmatpush.bf16.msrb.mxu1 %v10531_v1 }
 0x2aa   :  { %6133 = vtanh.f32 %v2422_v37 }
 0x2ab   :  { %v2388_v19 = vpop.f32.mrf.mxu1  ;;  %6135 = vtanh.f32 %v7492_v63  ;;  %v10539_v63 = vld [vmem:[#allocation90_spill] sm:$0xff] }
 0x2ac   :  { %2567 = vmatpush.bf16.msrb.mxu3 %v10532_v31  ;;  %v10536_v19 = vld [vmem:[#allocation117_spill] sm:$0xff] }
 0x2ad   :  { %2606 = vmatpush.bf16.msra.mxu2 %v10533_v47  ;;  %2645 = vmatpush.bf16.msrb.mxu1 %v10534_v44  ;;  %v10541_v47 = vld [vmem:[#allocation124_spill] sm:$0xff] }
 0x2b0   :  { %v6134_v51 = vpop.eup %6133  ;;  %2568 = vmatpush.bf16.msrb.mxu3 %v10535_v13  ;;  %v10542_v13 = vld [vmem:[#allocation94_spill] sm:$0xff] }
 0x2b1   :  { %v2428_v41 = vmul.f32 0.5, %v6134_v51  ;;  %2607 = vmatpush.bf16.msra.mxu2 %v10536_v19  ;;  %2646 = vmatpush.bf16.msrb.mxu1 %v10537_v9  ;;  %v6136_v58 = vpop.eup %6135  ;;  %v10540_v51 = vld [vmem:[#allocation121_spill] sm:$0xff]  ;;  %v10544_v9 = vld [vmem:[#allocation128_spill] sm:$0xff] }
 0x2b2   :  { %v10543_v19 = vld [vmem:[#allocation125_spill] sm:$0xff] }
 0x2b3   :  { %v2431_v28 = vadd.f32 0.5, %v2428_v41 }
 0x2b4   :  { %2569 = vmatpush.bf16.msrb.mxu3 %v10539_v63 }
 0x2b5   :  { %v2434_v37 = vsub.f32 1.0, %v2431_v28  ;;  %v2440_v4 = vmul.f32 %v2431_v28, %v10538_v16  ;;  %2608 = vmatpush.bf16.msra.mxu2 %v10540_v51  ;;  %2647 = vmatpush.bf16.msrb.mxu1 %v10541_v47  ;;  %v10545_v28 = vld [vmem:[#allocation70_spill] sm:$0xff]  ;;  %v10547_v16 = vld [vmem:[#allocation129_spill] sm:$0xff]  ;;  %v10556_v51 = vld [vmem:[#allocation79_spill] sm:$0xff] }
 0x2b6   :  { %v10554_v47 = vld [vmem:[#allocation137_spill] sm:$0xff] }
 0x2b7   :  { %v2437_v1 = vmul.f32 %v6136_v58, %v2434_v37  ;;  %v10548_v58 = vld [vmem:[#allocation135_spill] sm:$0xff]  ;;  %v10550_v37 = vld [vmem:[#allocation132_spill] sm:$0xff] }
 0x2b8   :  { %2570 = vmatpush.bf16.msrb.mxu3 %v10542_v13  ;;  %v10553_v13 = vld [vmem:[#allocation106_spill] sm:$0xff] }
 0x2b9   :  { %v7570_v31 = vadd.f32 %v2440_v4, %v2437_v1  ;;  %2609 = vmatpush.bf16.msra.mxu2 %v10543_v19  ;;  %2648 = vmatpush.bf16.msrb.mxu1 %v10544_v9  ;;  %v10546_v4 = vld [vmem:[#allocation98_spill] sm:$0xff]  ;;  %v10549_v1 = vld [vmem:[#allocation101_spill] sm:$0xff]  ;;  %v10551_v9 = vld [vmem:[#allocation136_spill] sm:$0xff] }
 0x2ba   :  { %v10552_v19 = vld [vmem:[#allocation75_spill] sm:$0xff] }
 0x2bb   :  { %v7576_v41 = vpack.c.bf16 %v7570_v31, %v7570_v31 }
 0x2bc   :  { %2571 = vmatpush.bf16.msrb.mxu3 %v10546_v4  ;;  %v10557_v4 = vld [vmem:[#allocation110_spill] sm:$0xff] }
 0x2bd   :  { %2481 = vmatmul.bf16.vlgmr.msra.gmra.mxu0 %v7576_v41  ;;  %2520 = vmatmul.bf16.vlgmr.msra.gmra.mxu3 %v7576_v41 }
 0x2be   :  { %2559 = vmatmul.bf16.vlgmr.msrb.gmra.mxu2 %v7576_v41  ;;  %2577 = vmatpush.bf16.msra.mxu0 %v10545_v28  ;;  %v10555_v28 = vld [vmem:[#allocation140_spill] sm:$0xff] }
 0x2bf   :  { %2598 = vmatmul.bf16.vlgmr.msra.gmra.mxu1 %v7576_v41  ;;  %2610 = vmatpush.bf16.msra.mxu2 %v10547_v16  ;;  %v10558_v16 = vld [vmem:[#allocation141_spill] sm:$0xff] }
 0x2c0   :  { %2649 = vmatpush.bf16.msrb.mxu1 %v10548_v58  ;;  %2616 = vmatpush.bf16.msra.mxu3 %v10549_v1  ;;  %v10559_v58 = vld [vmem:[#allocation144_spill] sm:$0xff]  ;;  %v10560_v1 = vld [vmem:[#allocation83_spill] sm:$0xff] }
 0x2c2   :  { %2578 = vmatpush.bf16.msra.mxu0 %v10552_v19  ;;  %v10563_v19 = vld [vmem:[#allocation148_spill] sm:$0xff] }
 0x2c3   :  { %2655 = vmatpush.bf16.msrb.mxu2 %v10550_v37  ;;  %v10561_v37 = vld [vmem:[#allocation114_spill] sm:$0xff] }
 0x2c4   :  { %2694 = vmatpush.bf16.msra.mxu1 %v10551_v9  ;;  %2617 = vmatpush.bf16.msra.mxu3 %v10553_v13  ;;  %v10562_v9 = vld [vmem:[#allocation145_spill] sm:$0xff]  ;;  %v10575_v13 = vld [vmem:[#allocation160_spill] sm:$0xff] }
 0x2c6   :  { %2579 = vmatpush.bf16.msra.mxu0 %v10556_v51  ;;  %v10572_v51 = vld [vmem:[#allocation95_spill] sm:$0xff] }
 0x2c7   :  { %2656 = vmatpush.bf16.msrb.mxu2 %v10554_v47  ;;  %v10574_v47 = vld [vmem:[#allocation157_spill] sm:$0xff] }
 0x2c8   :  { %2695 = vmatpush.bf16.msra.mxu1 %v10555_v28  ;;  %2618 = vmatpush.bf16.msra.mxu3 %v10557_v4  ;;  %v10564_v28 = vld [vmem:[#allocation87_spill] sm:$0xff]  ;;  %v10571_v4 = vld [vmem:[#allocation156_spill] sm:$0xff] }
 0x2ca   :  { %2580 = vmatpush.bf16.msra.mxu0 %v10560_v1  ;;  %v10567_v1 = vld [vmem:[#allocation152_spill] sm:$0xff] }
 0x2cb   :  { %2657 = vmatpush.bf16.msrb.mxu2 %v10558_v16  ;;  %v10565_v16 = vld [vmem:[#allocation118_spill] sm:$0xff] }
 0x2cc   :  { %2696 = vmatpush.bf16.msra.mxu1 %v10559_v58  ;;  %2619 = vmatpush.bf16.msra.mxu3 %v10561_v37  ;;  %v10566_v58 = vld [vmem:[#allocation149_spill] sm:$0xff]  ;;  %v10568_v37 = vld [vmem:[#allocation91_spill] sm:$0xff] }
 0x2cd   :  { %2533 = vmatmul.bf16.vlgmr.msrb.gmra.mxu0 %v7509_v50  ;;  %2572 = vmatmul.bf16.vlgmr.msrb.gmra.mxu3 %v7509_v50 }
 0x2ce   :  { %2581 = vmatpush.bf16.msra.mxu0 %v10564_v28  ;;  %2611 = vmatmul.bf16.vlgmr.msra.gmra.mxu2 %v7509_v50  ;;  %v10573_v28 = vld [vmem:[#allocation126_spill] sm:$0xff] }
 0x2cf   :  { %2658 = vmatpush.bf16.msrb.mxu2 %v10562_v9  ;;  %2650 = vmatmul.bf16.vlgmr.msrb.gmra.mxu1 %v7509_v50  ;;  %v10569_v9 = vld [vmem:[#allocation122_spill] sm:$0xff] }
 0x2d0   :  { %2697 = vmatpush.bf16.msra.mxu1 %v10563_v19  ;;  %2620 = vmatpush.bf16.msra.mxu3 %v10565_v16  ;;  %v10570_v19 = vld [vmem:[#allocation153_spill] sm:$0xff]  ;;  %v10576_v16 = vld [vmem:[#allocation99_spill] sm:$0xff] }
 0x2d2   :  { %2582 = vmatpush.bf16.msra.mxu0 %v10568_v37  ;;  %v10579_v37 = vld [vmem:[#allocation161_spill] sm:$0xff] }
 0x2d3   :  { %2659 = vmatpush.bf16.msrb.mxu2 %v10566_v58  ;;  %v10577_v58 = vld [vmem:[#allocation102_spill] sm:$0xff] }
 0x2d4   :  { %2698 = vmatpush.bf16.msra.mxu1 %v10567_v1  ;;  %2621 = vmatpush.bf16.msra.mxu3 %v10569_v9  ;;  %v10578_v1 = vld [vmem:[#allocation130_spill] sm:$0xff]  ;;  %v10580_v9 = vld [vmem:[#allocation167_spill] sm:$0xff] }
 0x2d6   :  { %2583 = vmatpush.bf16.msra.mxu0 %v10572_v51  ;;  %v10583_v51 = vld [vmem:[#allocation168_spill] sm:$0xff] }
 0x2d7   :  { %2660 = vmatpush.bf16.msrb.mxu2 %v10570_v19  ;;  %v10581_v19 = vld [vmem:[#allocation133_spill] sm:$0xff] }
 0x2d8   :  { %2699 = vmatpush.bf16.msra.mxu1 %v10571_v4  ;;  %2622 = vmatpush.bf16.msra.mxu3 %v10573_v28  ;;  %v10582_v4 = vld [vmem:[#allocation164_spill] sm:$0xff] }
 0x2d9   :  { %v10595_v28 = vld [vmem:[#allocation180_spill] sm:$0xff] }
 0x2da   :  { %2584 = vmatpush.bf16.msra.mxu0 %v10576_v16  ;;  %v10592_v16 = vld [vmem:[#allocation115_spill] sm:$0xff] }
 0x2db   :  { %2661 = vmatpush.bf16.msrb.mxu2 %v10574_v47  ;;  %v10594_v47 = vld [vmem:[#allocation177_spill] sm:$0xff] }
 0x2dc   :  { %2700 = vmatpush.bf16.msra.mxu1 %v10575_v13  ;;  %2623 = vmatpush.bf16.msra.mxu3 %v10578_v1  ;;  %v10584_v13 = vld [vmem:[#allocation107_spill] sm:$0xff]  ;;  %v10585_v1 = vld [vmem:[#allocation138_spill] sm:$0xff] }
 0x2dd   :  { %2585 = vmatmul.bf16.vlgmr.msra.gmra.mxu0 %v7539_v54 }
 0x2de   :  { %2629 = vmatpush.bf16.msrb.mxu0 %v10577_v58  ;;  %v10591_v58 = vld [vmem:[#allocation176_spill] sm:$0xff] }
 0x2df   :  { %2662 = vmatpush.bf16.msrb.mxu2 %v10579_v37  ;;  %2624 = vmatmul.bf16.vlgmr.msra.gmra.mxu3 %v7539_v54  ;;  %v10586_v37 = vld [vmem:[#allocation169_spill] sm:$0xff] }
 0x2e0   :  { %2701 = vmatpush.bf16.msra.mxu1 %v10580_v9  ;;  %2668 = vmatpush.bf16.msrb.mxu3 %v10581_v19  ;;  %v10587_v9 = vld [vmem:[#allocation172_spill] sm:$0xff]  ;;  %v10588_v19 = vld [vmem:[#allocation111_spill] sm:$0xff] }
 0x2e2   :  { %2630 = vmatpush.bf16.msrb.mxu0 %v10584_v13  ;;  %2663 = vmatmul.bf16.vlgmr.msrb.gmra.mxu2 %v7539_v54  ;;  %v10593_v13 = vld [vmem:[#allocation146_spill] sm:$0xff] }
 0x2e3   :  { %2707 = vmatpush.bf16.msra.mxu2 %v10582_v4  ;;  %2702 = vmatmul.bf16.vlgmr.msra.gmra.mxu1 %v7539_v54  ;;  %v10589_v4 = vld [vmem:[#allocation142_spill] sm:$0xff] }
 0x2e4   :  { %2746 = vmatpush.bf16.msrb.mxu1 %v10583_v51  ;;  %2669 = vmatpush.bf16.msrb.mxu3 %v10585_v1  ;;  %v10590_v51 = vld [vmem:[#allocation173_spill] sm:$0xff]  ;;  %v10596_v1 = vld [vmem:[#allocation119_spill] sm:$0xff] }
 0x2e6   :  { %2631 = vmatpush.bf16.msrb.mxu0 %v10588_v19  ;;  %v10625_v19 = vld [vmem:[#allocation182_spill] sm:$0xff] }
 0x2e7   :  { %2708 = vmatpush.bf16.msra.mxu2 %v10586_v37  ;;  %v10597_v37 = vld [vmem:[#allocation150_spill] sm:$0xff] }
 0x2e8   :  { %2747 = vmatpush.bf16.msrb.mxu1 %v10587_v9  ;;  %2670 = vmatpush.bf16.msrb.mxu3 %v10589_v4  ;;  %v10598_v4 = vld [vmem:[#allocation123_spill] sm:$0xff] }
 0x2ea   :  { %2632 = vmatpush.bf16.msrb.mxu0 %v10592_v16  ;;  %v10600_v16 = vld [vmem:[#allocation188_spill] sm:$0xff] }
 0x2eb   :  { %2709 = vmatpush.bf16.msra.mxu2 %v10590_v51  ;;  %v10599_v51 = vld [vmem:[#allocation154_spill] sm:$0xff] }
 0x2ec   :  { %2748 = vmatpush.bf16.msrb.mxu1 %v10591_v58  ;;  %2671 = vmatpush.bf16.msrb.mxu3 %v10593_v13  ;;  %v10601_v13 = vld [vmem:[#allocation127_spill] sm:$0xff]  ;;  %v10622_v58 = vld [vmem:[#allocation13_spill] sm:$0xff] }
 0x2ee   :  { %2633 = vmatpush.bf16.msrb.mxu0 %v10596_v1  ;;  %v10604_v1 = vld [vmem:[#allocation192_spill] sm:$0xff] }
 0x2ef   :  { %2710 = vmatpush.bf16.msra.mxu2 %v10594_v47  ;;  %v10602_v47 = vld [vmem:[#allocation158_spill] sm:$0xff] }
 0x2f0   :  { %2749 = vmatpush.bf16.msrb.mxu1 %v10595_v28  ;;  %2672 = vmatpush.bf16.msrb.mxu3 %v10597_v37  ;;  %v10603_v28 = vld [vmem:[#allocation189_spill] sm:$0xff]  ;;  %v10605_v37 = vld [vmem:[#allocation131_spill] sm:$0xff] }
 0x2f2   :  { %2634 = vmatpush.bf16.msrb.mxu0 %v10598_v4  ;;  %v10608_v4 = vld [vmem:[#allocation193_spill] sm:$0xff] }
 0x2f3   :  { %2711 = vmatpush.bf16.msra.mxu2 %v10419_v62  ;;  %v10606_v62 = vld [vmem:[#allocation134_spill] sm:$0xff] }
 0x2f4   :  { %2750 = vmatpush.bf16.msrb.mxu1 %v10421_v2  ;;  %2673 = vmatpush.bf16.msrb.mxu3 %v10599_v51  ;;  %v10607_v2 = vld [vmem:[#allocation162_spill] sm:$0xff]  ;;  %v10609_v51 = vld [vmem:[#allocation199_spill] sm:$0xff] }
 0x2f6   :  { %2635 = vmatpush.bf16.msrb.mxu0 %v10601_v13  ;;  %v10611_v13 = vld [vmem:[#allocation196_spill] sm:$0xff] }
 0x2f7   :  { %2712 = vmatpush.bf16.msra.mxu2 %v10423_v26  ;;  %v10621_v26 = vld [vmem:[#allocation178_spill] sm:$0xff] }
 0x2f8   :  { %2751 = vmatpush.bf16.msrb.mxu1 %v10600_v16  ;;  %2674 = vmatpush.bf16.msrb.mxu3 %v10602_v47  ;;  %v10610_v16 = vld [vmem:[#allocation165_spill] sm:$0xff] }
 0x2fa   :  { %2636 = vmatpush.bf16.msrb.mxu0 %v10605_v37  ;;  %v10616_v37 = vld [vmem:[#allocation143_spill] sm:$0xff] }
 0x2fb   :  { %2713 = vmatpush.bf16.msra.mxu2 %v10603_v28  ;;  %v10612_v28 = vld [vmem:[#allocation139_spill] sm:$0xff] }
 0x2fc   :  { %2752 = vmatpush.bf16.msrb.mxu1 %v10604_v1  ;;  %2675 = vmatpush.bf16.msrb.mxu3 %v10607_v2  ;;  %v10614_v2 = vld [vmem:[#allocation5_spill] sm:$0xff]  ;;  %v10619_v1 = vld [vmem:[#allocation203_spill] sm:$0xff] }
 0x2fd   :  { %2637 = vmatmul.bf16.vlgmr.msrb.gmra.mxu0 %v7576_v41 }
 0x2fe   :  { %2681 = vmatpush.bf16.msra.mxu0 %v10606_v62  ;;  %v10613_v62 = vld [vmem:[#allocation170_spill] sm:$0xff] }
 0x2ff   :  { %2714 = vmatpush.bf16.msra.mxu2 %v10608_v4  ;;  %2676 = vmatmul.bf16.vlgmr.msrb.gmra.mxu3 %v7576_v41  ;;  %v10615_v4 = vld [vmem:[#allocation200_spill] sm:$0xff] }
 0x300   :  { %2753 = vmatpush.bf16.msrb.mxu1 %v10609_v51  ;;  %2720 = vmatpush.bf16.msra.mxu3 %v10610_v16  ;;  %v2495_v51 = vpop.f32.mrf.mxu1  ;;  %v10617_v16 = vld [vmem:[#allocation174_spill] sm:$0xff] }
 0x302   :  { %2682 = vmatpush.bf16.msra.mxu0 %v10612_v28  ;;  %2715 = vmatmul.bf16.vlgmr.msra.gmra.mxu2 %v7576_v41  ;;  %v10620_v28 = vld [vmem:[#allocation147_spill] sm:$0xff]  ;;  %v2456_v47 = vpop.f32.mrf.mxu2 }
 0x303   :  { %2759 = vmatpush.bf16.msrb.mxu2 %v10611_v13  ;;  %2754 = vmatmul.bf16.vlgmr.msrb.gmra.mxu1 %v7576_v41  ;;  %v10618_v13 = vld [vmem:[#allocation9_spill] sm:$0xff] }
 0x304   :  { %2721 = vmatpush.bf16.msra.mxu3 %v10613_v62  ;;  %2855 = vmatpush.bf16.msra.mxu1 %v10614_v2  ;;  %v10623_v62 = vld [vmem:[#allocation206_spill] sm:$0xff] }
 0x306   :  { %2683 = vmatpush.bf16.msra.mxu0 %v10616_v37 }
 0x307   :  { %2760 = vmatpush.bf16.msrb.mxu2 %v10615_v4  ;;  %v10624_v4 = vld [vmem:[#allocation151_spill] sm:$0xff] }
 0x308   :  { %2722 = vmatpush.bf16.msra.mxu3 %v10617_v16  ;;  %2856 = vmatpush.bf16.msra.mxu1 %v10618_v13  ;;  %v2497_v2 = vpop.f32.mrf.mxu1  ;;  %v10626_v13 = vld [vmem:[#allocation155_spill] sm:$0xff] }
 0x309   :  { %v10629_v2 = vld [vmem:[#allocation190_spill] sm:$0xff] }
 0x30a   :  { %2684 = vmatpush.bf16.msra.mxu0 %v10620_v28  ;;  %v10627_v28 = vld [vmem:[#allocation186_spill] sm:$0xff] }
 0x30b   :  { %2761 = vmatpush.bf16.msrb.mxu2 %v10619_v1  ;;  %v2458_v1 = vpop.f32.mrf.mxu2 }
 0x30c   :  { %2723 = vmatpush.bf16.msra.mxu3 %v10621_v26  ;;  %2857 = vmatpush.bf16.msra.mxu1 %v10622_v58  ;;  %v10628_v58 = vld [vmem:[#allocation159_spill] sm:$0xff]  ;;  %v10633_v1 = vld [vmem:[#allocation197_spill] sm:$0xff] }
 0x30e   :  { %2685 = vmatpush.bf16.msra.mxu0 %v10624_v4 }
 0x30f   :  { %2762 = vmatpush.bf16.msrb.mxu2 %v10623_v62 }
 0x310   :  { %2724 = vmatpush.bf16.msra.mxu3 %v10625_v19  ;;  %2858 = vmatpush.bf16.msra.mxu1 %v10444_v53  ;;  %v10630_v53 = vld [vmem:[#allocation163_spill] sm:$0xff] }
 0x312   :  { %2686 = vmatpush.bf16.msra.mxu0 %v10626_v13  ;;  %v10632_v13 = vld [vmem:[#allocation194_spill] sm:$0xff] }
 0x313   :  { %2763 = vmatpush.bf16.msrb.mxu2 %v10445_v42  ;;  %v10631_v42 = vld [vmem:[#allocation166_spill] sm:$0xff] }
 0x314   :  { %2725 = vmatpush.bf16.msra.mxu3 %v10627_v28  ;;  %2859 = vmatpush.bf16.msra.mxu1 %v6369_v56 }
 0x316   :  { %2687 = vmatpush.bf16.msra.mxu0 %v10628_v58 }
 0x317   :  { %2764 = vmatpush.bf16.msrb.mxu2 %v10448_v30 }
 0x318   :  { %2726 = vmatpush.bf16.msra.mxu3 %v10629_v2  ;;  %2860 = vmatpush.bf16.msra.mxu1 %v6381_v5  ;;  %v10634_v5 = vld [vmem:[#allocation171_spill] sm:$0xff] }
 0x31a   :  { %2688 = vmatpush.bf16.msra.mxu0 %v10630_v53 }
 0x31b   :  { %2765 = vmatpush.bf16.msrb.mxu2 %v7015_v20 }
 0x31c   :  { %2727 = vmatpush.bf16.msra.mxu3 %v10632_v13  ;;  %2861 = vmatpush.bf16.msra.mxu1 %v6393_v23  ;;  %v10635_v13 = vld [vmem:[#allocation201_spill] sm:$0xff] }
 0x31d   :  { %2689 = vmatmul.bf16.vlgmr.msra.gmra.mxu0 %v7509_v50  ;;  %v7707_v23 = vpop.f32.mrf.mxu1 }
 0x31e   :  { %2733 = vmatpush.bf16.msrb.mxu0 %v10631_v42 }
 0x31f   :  { %2766 = vmatpush.bf16.msrb.mxu2 %v7030_v22  ;;  %2728 = vmatmul.bf16.vlgmr.msra.gmra.mxu3 %v7509_v50  ;;  %v10636_v22 = vld [vmem:[#allocation175_spill] sm:$0xff] }
 0x320   :  { %2772 = vmatpush.bf16.msrb.mxu3 %v10633_v1  ;;  %2862 = vmatpush.bf16.msra.mxu1 %v6405_v43  ;;  %v10688_v1 = vld [vmem:[#allocation28_spill] sm:$0xff] }
 0x322   :  { %2734 = vmatpush.bf16.msrb.mxu0 %v10634_v5  ;;  %2767 = vmatmul.bf16.vlgmr.msrb.gmra.mxu2 %v7509_v50  ;;  %v10637_v5 = vld [vmem:[#allocation179_spill] sm:$0xff]  ;;  %v2469_v50 = vpop.f32.mrf.mxu3  ;;  %v2508_v43 = vpop.f32.mrf.mxu2 }
 0x323   :  { %2868 = vmatpush.bf16.msra.mxu2 %v6326_v7 }
 0x324   :  { %2907 = vmatpush.bf16.msrb.mxu1 %v6414_v55  ;;  %2773 = vmatpush.bf16.msrb.mxu3 %v10635_v13  ;;  %v10638_v55 = vld [vmem:[#allocation207_spill] sm:$0xff]  ;;  %v2470_v13 = vadd.f32 %v2469_v50, %v2456_v47 }
 0x325   :  { %v2549_v7 = vpop.f32.mrf.mxu1  ;;  %v10643_v50 = vld [vmem:[#allocation195_spill] sm:$0xff] }
 0x326   :  { %2735 = vmatpush.bf16.msrb.mxu0 %v10636_v22  ;;  %v10639_v22 = vld [vmem:[#allocation183_spill] sm:$0xff] }
 0x327   :  { %2869 = vmatpush.bf16.msra.mxu2 %v6337_v17  ;;  %v2509_v17 = vadd.f32 %v2508_v43, %v2495_v51  ;;  %v10641_v7 = vld [vmem:[#allocation191_spill] sm:$0xff]  ;;  %v50_v51 = vld [vmem:[%s9518_s0 + $0x38] sm:$0xff] }
 0x328   :  { %2908 = vmatpush.bf16.msrb.mxu1 %v6429_v18  ;;  %2774 = vmatpush.bf16.msrb.mxu3 %v10446_v61  ;;  %v46_v61 = vld [vmem:[%s9518_s0 + $0x18] sm:$0xff] }
 0x329   :  { %70 = vperm.xlu1 %6096, %v46_v61   ;;  %v10642_v61 = vld [vmem:[#allocation218_spill] sm:$0xff] }
 0x32a   :  { %2736 = vmatpush.bf16.msrb.mxu0 %v10637_v5  ;;  %v10640_v5 = vld [vmem:[#allocation187_spill] sm:$0xff]  ;;  %v2471_v47 = vpop.f32.mrf.mxu3  ;;  %v2510_v43 = vpop.f32.mrf.mxu2 }
 0x32b   :  { %2870 = vmatpush.bf16.msra.mxu2 %v6349_v33  ;;  %v10644_v47 = vld [vmem:[#allocation30_spill] sm:$0xff] }
 0x32c   :  { %2909 = vmatpush.bf16.msrb.mxu1 %v6442_v40  ;;  %2775 = vmatpush.bf16.msrb.mxu3 %v10638_v55  ;;  %v10645_v43 = vld [vmem:[#allocation198_spill] sm:$0xff]  ;;  %v10670_v40 = vld [vmem:[#allocation31_spill] sm:$0xff] }
 0x32e   :  { %2737 = vmatpush.bf16.msrb.mxu0 %v10639_v22 }
 0x32f   :  { %2871 = vmatpush.bf16.msra.mxu2 %v6361_v45 }
 0x330   :  { %2910 = vmatpush.bf16.msrb.mxu1 %v6458_v11  ;;  %2776 = vmatpush.bf16.msrb.mxu3 %v10451_v49  ;;  %v10661_v49 = vld [vmem:[#allocation50_spill] sm:$0xff]  ;;  %v10664_v11 = vld [vmem:[#allocation215_spill] sm:$0xff] }
 0x331   :  { %90 = vperm.xlu1 %6096, %v50_v51   ;;  %v10652_v51 = vld [vmem:[#allocation65_spill] sm:$0xff] }
 0x332   :  { %2738 = vmatpush.bf16.msrb.mxu0 %v10640_v5  ;;  %v10655_v5 = vld [vmem:[#allocation42_spill] sm:$0xff] }
 0x333   :  { %2872 = vmatpush.bf16.msra.mxu2 %v6373_v57  ;;  %v10658_v57 = vld [vmem:[#allocation46_spill] sm:$0xff] }
 0x334   :  { %2911 = vmatpush.bf16.msrb.mxu1 %v6473_v48  ;;  %2777 = vmatpush.bf16.msrb.mxu3 %v10453_v3  ;;  %v10646_v3 = vld [vmem:[#allocation61_spill] sm:$0xff]  ;;  %v10649_v48 = vld [vmem:[#allocation34_spill] sm:$0xff] }
 0x336   :  { %2739 = vmatpush.bf16.msrb.mxu0 %v10641_v7  ;;  %v10647_v7 = vld [vmem:[#allocation221_spill] sm:$0xff] }
 0x337   :  { %2873 = vmatpush.bf16.msra.mxu2 %v6385_v6  ;;  %v10648_v6 = vld [vmem:[#allocation7_spill] sm:$0xff] }
 0x338   :  { %2912 = vmatpush.bf16.msrb.mxu1 %v6485_v15  ;;  %2778 = vmatpush.bf16.msrb.mxu3 %v10642_v61  ;;  %v10650_v15 = vld [vmem:[#allocation202_spill] sm:$0xff]  ;;  %v10651_v61 = vld [vmem:[#allocation37_spill] sm:$0xff] }
 0x33a   :  { %2740 = vmatpush.bf16.msrb.mxu0 %v10643_v50  ;;  %v2482_v50 = vpop.f32.mrf.mxu0 }
 0x33b   :  { %2874 = vmatpush.bf16.msra.mxu2 %v10644_v47  ;;  %v10653_v47 = vld [vmem:[#allocation11_spill] sm:$0xff] }
 0x33c   :  { %2913 = vmatpush.bf16.msrb.mxu1 %v10646_v3  ;;  %2779 = vmatpush.bf16.msrb.mxu3 %v10647_v7  ;;  %v10654_v3 = vld [vmem:[#allocation205_spill] sm:$0xff]  ;;  %v2599_v7 = vpop.f32.mrf.mxu1 }
 0x33d   :  { %2741 = vmatmul.bf16.vlgmr.msrb.gmra.mxu0 %v7539_v54 }
 0x33e   :  { %2785 = vmatpush.bf16.msra.mxu0 %v10645_v43  ;;  %v2483_v43 = vadd.f32 %v2482_v50, %v2470_v13  ;;  %v10659_v50 = vld [vmem:[#allocation19_spill] sm:$0xff] }
 0x33f   :  { %2875 = vmatpush.bf16.msra.mxu2 %v10649_v48  ;;  %2780 = vmatmul.bf16.vlgmr.msrb.gmra.mxu3 %v7539_v54  ;;  %v10657_v48 = vld [vmem:[#allocation208_spill] sm:$0xff] }
 0x340   :  { %2881 = vmatpush.bf16.msra.mxu3 %v10648_v6  ;;  %2914 = vmatpush.bf16.msrb.mxu1 %v10652_v51  ;;  %v10656_v6 = vld [vmem:[#allocation15_spill] sm:$0xff]  ;;  %v7753_v51 = vpop.permute.xlu1 %65 }
 0x341   :  { %v2560_v54 = vpop.f32.mrf.mxu2 }
 0x342   :  { %2786 = vmatpush.bf16.msra.mxu0 %v10650_v15  ;;  %v2521_v15 = vpop.f32.mrf.mxu3  ;;  %v2484_v13 = vpop.f32.mrf.mxu0 }
 0x343   :  { %2920 = vmatpush.bf16.msrb.mxu2 %v10651_v61  ;;  %v7751_v61 = vadd.f32 %v2521_v15, %v2509_v17  ;;  %v10665_v15 = vld [vmem:[#allocation54_spill] sm:$0xff] }
 0x344   :  { %2882 = vmatpush.bf16.msra.mxu3 %v10653_v47  ;;  %v10660_v47 = vld [vmem:[#allocation211_spill] sm:$0xff] }
 0x346   :  { %2787 = vmatpush.bf16.msra.mxu0 %v10654_v3  ;;  %v2601_v3 = vpop.f32.mrf.mxu1 }
 0x347   :  { %2921 = vmatpush.bf16.msrb.mxu2 %v10655_v5 }
 0x348   :  { %2883 = vmatpush.bf16.msra.mxu3 %v10656_v6  ;;  %v10662_v6 = vld [vmem:[#allocation213_spill] sm:$0xff] }
 0x349   :  { %v131_v5 = vmul.f32 %v10662_v6, %v7753_v51  ;;  %v2562_v13 = vpop.f32.mrf.mxu2 }
 0x34a   :  { %2788 = vmatpush.bf16.msra.mxu0 %v10657_v48  ;;  %v10663_v48 = vld [vmem:[#allocation23_spill] sm:$0xff]  ;;  %v2523_v17 = vpop.f32.mrf.mxu3  ;;  %v2534_v45 = vpop.f32.mrf.mxu0  ;;  %v10673_v13 = vld [vmem:[#allocation8_spill] sm:$0xff] }
 0x34b   :  { %2922 = vmatpush.bf16.msrb.mxu2 %v10658_v57  ;;  %v10666_v57 = vld [vmem:[#allocation217_spill] sm:$0xff]  ;;  %v2548_v3 = vadd.f32 %v7707_v23, %v2534_v45  ;;  %v10671_v17 = vld [vmem:[#allocation222_spill] sm:$0xff]  ;;  %v10674_v45 = vld [vmem:[#allocation35_spill] sm:$0xff] }
 0x34c   :  { %2884 = vmatpush.bf16.msra.mxu3 %v10659_v50  ;;  %v225_v22 = vadd.f32 %v10666_v57, %v131_v5  ;;  %v10667_v50 = vld [vmem:[#allocation27_spill] sm:$0xff]  ;;  %v10675_v23 = vld [vmem:[#allocation38_spill] sm:$0xff] }
 0x34e   :  { %2789 = vmatpush.bf16.msra.mxu0 %v10660_v47  ;;  %v10668_v47 = vld [vmem:[#allocation219_spill] sm:$0xff]  ;;  %v2798_v6 = vadd.f32 %v2483_v43, %v225_v22  ;;  %v2651_v55 = vpop.f32.mrf.mxu1  ;;  %v10676_v22 = vld [vmem:[#allocation66_spill] sm:$0xff] }
 0x34f   :  { %2923 = vmatpush.bf16.msrb.mxu2 %v10661_v49  ;;  %v10669_v49 = vld [vmem:[#allocation58_spill] sm:$0xff] }
 0x350   :  { %2885 = vmatpush.bf16.msra.mxu3 %v10663_v48  ;;  %v2561_v48 = vadd.f32 %v2560_v54, %v2548_v3  ;;  %v2801_v5 = vmul.f32 0.5, %v2798_v6  ;;  %v10677_v54 = vld [vmem:[#allocation12_spill] sm:$0xff]  ;;  %v10678_v3 = vld [vmem:[#allocation43_spill] sm:$0xff] }
 0x351   :  { %v10679_v6 = vld [vmem:[#allocation16_spill] sm:$0xff] }
 0x352   :  { %2790 = vmatpush.bf16.msra.mxu0 %v10664_v11  ;;  %v2573_v57 = vpop.f32.mrf.mxu3  ;;  %6137 = vtanh.f32 %v2801_v5 }
 0x353   :  { %2924 = vmatpush.bf16.msrb.mxu2 %v10665_v15  ;;  %v10672_v15 = vld [vmem:[#allocation62_spill] sm:$0xff] }
 0x354   :  { %2886 = vmatpush.bf16.msra.mxu3 %v10667_v50  ;;  %v2612_v50 = vpop.f32.mrf.mxu2 }
 0x356   :  { %2791 = vmatpush.bf16.msra.mxu0 %v10668_v47  ;;  %v2536_v47 = vpop.f32.mrf.mxu0  ;;  %v2653_v43 = vpop.f32.mrf.mxu1 }
 0x357   :  { %2925 = vmatpush.bf16.msrb.mxu2 %v10669_v49  ;;  %v10681_v47 = vld [vmem:[#allocation20_spill] sm:$0xff] }
 0x358   :  { %2887 = vmatpush.bf16.msra.mxu3 %v10670_v40  ;;  %v10680_v40 = vld [vmem:[#allocation47_spill] sm:$0xff] }
 0x35a   :  { %2792 = vmatpush.bf16.msra.mxu0 %v10671_v17 }
 0x35b   :  { %2926 = vmatpush.bf16.msrb.mxu2 %v10672_v15  ;;  %v6138_v15 = vpop.eup %6137 }
 0x35c   :  { %2888 = vmatpush.bf16.msra.mxu3 %v10674_v45  ;;  %v2614_v17 = vpop.f32.mrf.mxu2  ;;  %v2807_v45 = vmul.f32 0.5, %v6138_v15 }
 0x35d   :  { %2793 = vmatmul.bf16.vlgmr.msra.gmra.mxu0 %v7576_v41  ;;  %v10686_v17 = vld [vmem:[#allocation225_spill] sm:$0xff] }
 0x35e   :  { %2894 = vmatpush.bf16.msrb.mxu0 %v10673_v13  ;;  %v2575_v13 = vpop.f32.mrf.mxu3  ;;  %v2586_v41 = vpop.f32.mrf.mxu0 }
 0x35f   :  { %2927 = vmatpush.bf16.msrb.mxu2 %v10676_v22  ;;  %v10682_v22 = vld [vmem:[#allocation223_spill] sm:$0xff]  ;;  %v10685_v13 = vld [vmem:[#allocation224_spill] sm:$0xff] }
 0x360   :  { %2933 = vmatpush.bf16.msrb.mxu3 %v10675_v23  ;;  %v2587_v23 = vadd.f32 %v2586_v41, %v2573_v57  ;;  %v132_v5 = vmul.f32 %v10682_v22, %v7753_v51  ;;  %v2703_v43 = vpop.f32.mrf.mxu1  ;;  %v10687_v57 = vld [vmem:[#allocation55_spill] sm:$0xff] }
 0x362   :  { %2895 = vmatpush.bf16.msrb.mxu0 %v10677_v54  ;;  %v2600_v49 = vadd.f32 %v2599_v7, %v2587_v23  ;;  %v10683_v54 = vld [vmem:[#allocation51_spill] sm:$0xff]  ;;  %v226_v33 = vadd.f32 %v10686_v17, %v132_v5  ;;  %v10689_v7 = vld [vmem:[#allocation226_spill] sm:$0xff]  ;;  %v10691_v5 = vld [vmem:[#allocation32_spill] sm:$0xff] }
 0x363   :  { %v133_v23 = vmul.f32 %v10689_v7, %v7753_v51  ;;  %v10696_v7 = vld [vmem:[#allocation67_spill] sm:$0xff] }
 0x364   :  { %2934 = vmatpush.bf16.msrb.mxu3 %v10678_v3  ;;  %v10684_v3 = vld [vmem:[#allocation24_spill] sm:$0xff]  ;;  %v2813_v11 = vadd.f32 %v2600_v49, %v10685_v13  ;;  %v10690_v49 = vld [vmem:[#allocation59_spill] sm:$0xff] }
 0x365   :  { %v2664_v15 = vpop.f32.mrf.mxu2  ;;  %v10693_v13 = vld [vmem:[#allocation63_spill] sm:$0xff] }
 0x366   :  { %2896 = vmatpush.bf16.msrb.mxu0 %v10679_v6  ;;  %v2810_v6 = vadd.f32 0.5, %v2807_v45  ;;  %v2665_v41 = vadd.f32 %v2664_v15, %v2651_v55  ;;  %v2588_v22 = vpop.f32.mrf.mxu0  ;;  %v2799_v45 = vadd.f32 %v7751_v61, %v226_v33  ;;  %v10694_v55 = vld [vmem:[#allocation39_spill] sm:$0xff]  ;;  %v10695_v15 = vld [vmem:[#allocation40_spill] sm:$0xff] }
 0x367   :  { %v10697_v61 = vld [vmem:[#allocation44_spill] sm:$0xff] }
 0x368   :  { %2935 = vmatpush.bf16.msrb.mxu3 %v10680_v40  ;;  %v2625_v40 = vpop.f32.mrf.mxu3  ;;  %v7787_v18 = vmul.f32 %v2813_v11, %v2810_v6  ;;  %v10692_v11 = vld [vmem:[#allocation227_spill] sm:$0xff] }
 0x369   :  { %v227_v6 = vadd.f32 %v10692_v11, %v133_v23 }
 0x36a   :  { %2897 = vmatpush.bf16.msrb.mxu0 %v10681_v47  ;;  %v2626_v47 = vadd.f32 %v2625_v40, %v2612_v50  ;;  %v2802_v40 = vmul.f32 0.5, %v2799_v45 }
 0x36b   :  { %v2800_v22 = vadd.f32 %v2561_v48, %v227_v6  ;;  %v10699_v48 = vld [vmem:[#allocation228_spill] sm:$0xff] }
 0x36c   :  { %2936 = vmatpush.bf16.msrb.mxu3 %v10683_v54  ;;  %6139 = vtanh.f32 %v2802_v40 }
 0x36d   :  { %v2666_v17 = vpop.f32.mrf.mxu2  ;;  %v2803_v33 = vmul.f32 0.5, %v2800_v22 }
 0x36e   :  { %2898 = vmatpush.bf16.msrb.mxu0 %v10684_v3  ;;  %v2705_v3 = vpop.f32.mrf.mxu1 }
 0x36f   :  { %6141 = vtanh.f32 %v2803_v33 }
 0x370   :  { %2937 = vmatpush.bf16.msrb.mxu3 %v10687_v57  ;;  %v2627_v50 = vpop.f32.mrf.mxu3 }
 0x372   :  { %2899 = vmatpush.bf16.msrb.mxu0 %v10688_v1  ;;  %v6140_v3 = vpop.eup %6139 }
 0x373   :  { %v2808_v23 = vmul.f32 0.5, %v6140_v3 }
 0x374   :  { %2938 = vmatpush.bf16.msrb.mxu3 %v10690_v49  ;;  %v10701_v49 = vld [vmem:[#allocation60_spill] sm:$0xff] }
 0x375   :  { %v6142_v50 = vpop.eup %6141 }
 0x376   :  { %2900 = vmatpush.bf16.msrb.mxu0 %v10691_v5  ;;  %v10698_v5 = vld [vmem:[#allocation48_spill] sm:$0xff]  ;;  %v2809_v22 = vmul.f32 0.5, %v6142_v50  ;;  %v10705_v50 = vld [vmem:[#allocation230_spill] sm:$0xff] }
 0x378   :  { %2939 = vmatpush.bf16.msrb.mxu3 %v10693_v13  ;;  %v10700_v13 = vld [vmem:[#allocation56_spill] sm:$0xff]  ;;  %v2812_v3 = vadd.f32 0.5, %v2809_v22 }
 0x379   :  { %v10707_v22 = vld [vmem:[#allocation232_spill] sm:$0xff] }
 0x37a   :  { %2901 = vmatpush.bf16.msrb.mxu0 %v10694_v55  ;;  %v2638_v45 = vpop.f32.mrf.mxu0  ;;  %v2811_v55 = vadd.f32 0.5, %v2808_v23  ;;  %v10703_v23 = vld [vmem:[#allocation64_spill] sm:$0xff] }
 0x37b   :  { %v2639_v17 = vadd.f32 %v2638_v45, %v2626_v47 }
 0x37c   :  { %2940 = vmatpush.bf16.msrb.mxu3 %v10696_v7 }
 0x37d   :  { %v2814_v6 = vadd.f32 %v2639_v17, %v10699_v48 }
 0x37e   :  { %2946 = vmatpush.bf16.msra.mxu0 %v10695_v15 }
 0x37f   :  { %v2817_v40 = vmul.f32 %v2814_v6, %v2811_v55  ;;  %v10704_v55 = vld [vmem:[#allocation71_spill] sm:$0xff]  ;;  %v137_v6 = vmul.f32 %v10705_v50, %v7753_v51 }
 0x380   :  { %v2755_v15 = vpop.f32.mrf.mxu1 }
 0x382   :  { %2947 = vmatpush.bf16.msra.mxu0 %v10697_v61  ;;  %v2677_v7 = vpop.f32.mrf.mxu3  ;;  %v2640_v61 = vpop.f32.mrf.mxu0 }
 0x383   :  { %v2678_v11 = vadd.f32 %v2677_v7, %v2665_v41  ;;  %v10706_v41 = vld [vmem:[#allocation231_spill] sm:$0xff] }
 0x384   :  { %v231_v7 = vadd.f32 %v10706_v41, %v137_v6 }
 0x385   :  { %v2716_v33 = vpop.f32.mrf.mxu2 }
 0x386   :  { %2948 = vmatpush.bf16.msra.mxu0 %v10698_v5  ;;  %v10702_v5 = vld [vmem:[#allocation229_spill] sm:$0xff] }
 0x387   :  { %v2815_v47 = vadd.f32 %v2678_v11, %v10702_v5 }
 0x388   :  { %v2757_v45 = vpop.f32.mrf.mxu1 }
 0x38a   :  { %2949 = vmatpush.bf16.msra.mxu0 %v10499_v46  ;;  %v7808_v46 = vmul.f32 %v2815_v47, %v2812_v3  ;;  %v2679_v17 = vpop.f32.mrf.mxu3 }
 0x38d   :  { %v2718_v48 = vpop.f32.mrf.mxu2 }
 0x38e   :  { %2950 = vmatpush.bf16.msra.mxu0 %v10700_v13 }
 0x392   :  { %2951 = vmatpush.bf16.msra.mxu0 %v10701_v49  ;;  %v134_v49 = vmul.f32 %v10707_v22, %v7753_v51 }
 0x394   :  { %v228_v3 = vadd.f32 %v10509_v21, %v134_v49 }
 0x396   :  { %2952 = vmatpush.bf16.msra.mxu0 %v10703_v23 }
 0x39a   :  { %2953 = vmatpush.bf16.msra.mxu0 %v10704_v55  ;;  %v2690_v61 = vpop.f32.mrf.mxu0  ;;  %v2819_v55 = vadd.f32 %v7787_v18, %v228_v3  ;;  %v138_v18 = vmul.f32 %v10510_v32, %v7753_v51 }
 0x39b   :  { %v2704_v13 = vadd.f32 %v2703_v43, %v2690_v61 }
 0x39d   :  { %v2717_v11 = vadd.f32 %v2716_v33, %v2704_v13 }
 0x39f   :  { %v2825_v45 = vadd.f32 %v2717_v11, %v231_v7 }
 0x3a1   :  { %v2828_v47 = vmul.f32 0.5, %v2825_v45 }
 0x3a2   :  { %v2692_v23 = vpop.f32.mrf.mxu0  ;;  %v2729_v17 = vpop.f32.mrf.mxu3 }
 0x3a3   :  { %6143 = vtanh.f32 %v2828_v47  ;;  %v135_v23 = vmul.f32 %v10512_v34, %v7753_v51  ;;  %v10708_v47 = vld [vmem:[#allocation85_spill] sm:$0xff] }
 0x3a4   :  { %6145 = vtanh.f32 %v2819_v55 }
 0x3a5   :  { %v2768_v48 = vpop.f32.mrf.mxu2 }
 0x3a9   :  { %v6144_v5 = vpop.eup %6143 }
 0x3aa   :  { %v2834_v50 = vmul.f32 0.5, %v6144_v5  ;;  %v2731_v1 = vpop.f32.mrf.mxu3  ;;  %v6146_v41 = vpop.eup %6145 }
 0x3ac   :  { %v2837_v43 = vadd.f32 0.5, %v2834_v50 }
 0x3ad   :  { %v2770_v6 = vpop.f32.mrf.mxu2 }
 0x3ae   :  { %v2840_v61 = vsub.f32 1.0, %v2837_v43  ;;  %v2846_v13 = vmul.f32 %v2837_v43, %v7505_v27  ;;  %v232_v27 = vadd.f32 %v10511_v59, %v138_v18 }
 0x3b0   :  { %v2843_v22 = vmul.f32 %v6146_v41, %v2840_v61  ;;  %v229_v41 = vadd.f32 %v10515_v29, %v135_v23  ;;  %v7858_v23 = vld [vmem:[%s9519_s1 + $0x8] ss:$0 sm:$0xff] }
 0x3b2   :  { %v7820_v33 = vadd.f32 %v2846_v13, %v2843_v22  ;;  %v2820_v45 = vadd.f32 %v2817_v40, %v229_v41  ;;  %v10710_v13 = vld [vmem:[#allocation89_spill] sm:$0xff]  ;;  %v10712_v41 = vld [vmem:[#allocation103_spill] sm:$0xff] }
 0x3b4   :  { %v7824_v49 = vpack.c.bf16 %v7820_v33, %v7820_v33 }
 0x3b6   :  { %2863 = vmatmul.bf16.vlgmr.msra.gmra.mxu1 %v7824_v49  ;;  %2902 = vmatmul.bf16.vlgmr.msrb.gmra.mxu0 %v7824_v49 }
 0x3b7   :  { %2959 = vmatpush.bf16.msra.mxu1 %v10312_v36  ;;  %2998 = vmatpush.bf16.msrb.mxu0 %v10313_v39 }
 0x3ba   :  { %v2742_v1 = vpop.f32.mrf.mxu0 }
 0x3bb   :  { %v2743_v5 = vadd.f32 %v2742_v1, %v2729_v17  ;;  %2960 = vmatpush.bf16.msra.mxu1 %v10316_v14  ;;  %2999 = vmatpush.bf16.msrb.mxu0 %v10317_v10  ;;  %v10709_v17 = vld [vmem:[#allocation88_spill] sm:$0xff] }
 0x3bd   :  { %v2756_v55 = vadd.f32 %v2755_v15, %v2743_v5 }
 0x3bf   :  { %v2826_v50 = vadd.f32 %v2756_v55, %v232_v27  ;;  %2961 = vmatpush.bf16.msra.mxu1 %v10513_v60  ;;  %3000 = vmatpush.bf16.msrb.mxu0 %v10514_v24  ;;  %v139_v55 = vmul.f32 %v7858_v23, %v7753_v51 }
 0x3c1   :  { %v2829_v7 = vmul.f32 0.5, %v2826_v50 }
 0x3c2   :  { %v2744_v22 = vpop.f32.mrf.mxu0  ;;  %v2781_v11 = vpop.f32.mrf.mxu3 }
 0x3c3   :  { %6147 = vtanh.f32 %v2829_v7  ;;  %2962 = vmatpush.bf16.msra.mxu1 %v10324_v52  ;;  %3001 = vmatpush.bf16.msrb.mxu0 %v10326_v35  ;;  %v2782_v50 = vadd.f32 %v2781_v11, %v2768_v48  ;;  %v10713_v22 = vld [vmem:[#allocation73_spill] sm:$0xff]  ;;  %v7873_v48 = vld [vmem:[%s9521_s3 + $0x8] ss:$0 sm:$0xff] }
 0x3c4   :  { %6149 = vtanh.f32 %v2820_v45  ;;  %v136_v45 = vmul.f32 %v10713_v22, %v7753_v51  ;;  %v233_v11 = vadd.f32 %v7873_v48, %v139_v55  ;;  %v10720_v55 = vld [vmem:[#allocation78_spill] sm:$0xff] }
 0x3c7   :  { %2963 = vmatpush.bf16.msra.mxu1 %v10708_v47  ;;  %3002 = vmatpush.bf16.msrb.mxu0 %v10709_v17 }
 0x3c9   :  { %v6148_v15 = vpop.eup %6147 }
 0x3ca   :  { %v2835_v3 = vmul.f32 0.5, %v6148_v15  ;;  %v2783_v6 = vpop.f32.mrf.mxu3  ;;  %v6150_v18 = vpop.eup %6149 }
 0x3cb   :  { %2964 = vmatpush.bf16.msra.mxu1 %v10710_v13  ;;  %3003 = vmatpush.bf16.msrb.mxu0 %v10518_v38  ;;  %v10715_v6 = vld [vmem:[#allocation104_spill] sm:$0xff] }
 0x3cc   :  { %v2838_v43 = vadd.f32 0.5, %v2835_v3  ;;  %v10714_v3 = vld [vmem:[#allocation100_spill] sm:$0xff] }
 0x3ce   :  { %v2841_v61 = vsub.f32 1.0, %v2838_v43  ;;  %v2847_v1 = vmul.f32 %v2838_v43, %v7533_v0  ;;  %v10711_v0 = vld [vmem:[#allocation97_spill] sm:$0xff] }
 0x3cf   :  { %2965 = vmatpush.bf16.msra.mxu1 %v10333_v25  ;;  %3004 = vmatpush.bf16.msrb.mxu0 %v10520_v8 }
 0x3d0   :  { %v2844_v40 = vmul.f32 %v6150_v18, %v2841_v61  ;;  %v10716_v61 = vld [vmem:[#allocation238_spill] sm:$0xff] }
 0x3d1   :  { %v230_v18 = vadd.f32 %v10716_v61, %v136_v45  ;;  %v10723_v45 = vld [vmem:[#allocation82_spill] sm:$0xff] }
 0x3d2   :  { %v7847_v27 = vadd.f32 %v2847_v1, %v2844_v40  ;;  %v10717_v40 = vld [vmem:[#allocation74_spill] sm:$0xff]  ;;  %v10718_v1 = vld [vmem:[#allocation105_spill] sm:$0xff] }
 0x3d3   :  { %2966 = vmatpush.bf16.msra.mxu1 %v10711_v0  ;;  %3005 = vmatpush.bf16.msrb.mxu0 %v10712_v41  ;;  %v2821_v0 = vadd.f32 %v7808_v46, %v230_v18  ;;  %v10726_v46 = vld [vmem:[#allocation117_spill] sm:$0xff]  ;;  %v10727_v18 = vld [vmem:[#allocation120_spill] sm:$0xff] }
 0x3d4   :  { %v7853_v5 = vpack.c.bf16 %v7847_v27, %v7847_v27 }
 0x3d6   :  { %2876 = vmatmul.bf16.vlgmr.msra.gmra.mxu2 %v7853_v5  ;;  %2915 = vmatmul.bf16.vlgmr.msrb.gmra.mxu1 %v7853_v5 }
 0x3d7   :  { %2954 = vmatmul.bf16.vlgmr.msra.gmra.mxu0 %v7853_v5  ;;  %2972 = vmatpush.bf16.msra.mxu2 %v10523_v12  ;;  %v10719_v12 = vld [vmem:[#allocation108_spill] sm:$0xff] }
 0x3d8   :  { %3011 = vmatpush.bf16.msrb.mxu1 %v10714_v3  ;;  %3050 = vmatpush.bf16.msra.mxu0 %v10715_v6 }
 0x3da   :  { %v2794_v7 = vpop.f32.mrf.mxu0 }
 0x3db   :  { %v2795_v15 = vadd.f32 %v2794_v7, %v2782_v50  ;;  %2973 = vmatpush.bf16.msra.mxu2 %v10717_v40  ;;  %v10721_v50 = vld [vmem:[#allocation109_spill] sm:$0xff]  ;;  %v10722_v7 = vld [vmem:[#allocation112_spill] sm:$0xff] }
 0x3dc   :  { %3012 = vmatpush.bf16.msrb.mxu1 %v10718_v1  ;;  %3051 = vmatpush.bf16.msra.mxu0 %v10719_v12 }
 0x3dd   :  { %v2827_v43 = vadd.f32 %v2795_v15, %v233_v11 }
 0x3df   :  { %v2830_v51 = vmul.f32 0.5, %v2827_v43  ;;  %2974 = vmatpush.bf16.msra.mxu2 %v10720_v55  ;;  %v10724_v43 = vld [vmem:[#allocation113_spill] sm:$0xff] }
 0x3e0   :  { %3013 = vmatpush.bf16.msrb.mxu1 %v10721_v50  ;;  %3052 = vmatpush.bf16.msra.mxu0 %v10722_v7 }
 0x3e1   :  { %6151 = vtanh.f32 %v2830_v51  ;;  %v10725_v51 = vld [vmem:[#allocation86_spill] sm:$0xff] }
 0x3e2   :  { %v2796_v41 = vpop.f32.mrf.mxu0  ;;  %6153 = vtanh.f32 %v2821_v0 }
 0x3e3   :  { %2975 = vmatpush.bf16.msra.mxu2 %v10723_v45 }
 0x3e4   :  { %3014 = vmatpush.bf16.msrb.mxu1 %v10724_v43  ;;  %3053 = vmatpush.bf16.msra.mxu0 %v10534_v44  ;;  %v10729_v43 = vld [vmem:[#allocation124_spill] sm:$0xff] }
 0x3e7   :  { %v6152_v11 = vpop.eup %6151  ;;  %2976 = vmatpush.bf16.msra.mxu2 %v10725_v51  ;;  %v10730_v51 = vld [vmem:[#allocation94_spill] sm:$0xff] }
 0x3e8   :  { %v2836_v15 = vmul.f32 0.5, %v6152_v11  ;;  %3015 = vmatpush.bf16.msrb.mxu1 %v10726_v46  ;;  %3054 = vmatpush.bf16.msra.mxu0 %v10727_v18  ;;  %v6154_v50 = vpop.eup %6153  ;;  %v10728_v11 = vld [vmem:[#allocation121_spill] sm:$0xff]  ;;  %v10732_v18 = vld [vmem:[#allocation128_spill] sm:$0xff] }
 0x3e9   :  { %v10731_v46 = vld [vmem:[#allocation125_spill] sm:$0xff] }
 0x3ea   :  { %v2839_v12 = vadd.f32 0.5, %v2836_v15 }
 0x3eb   :  { %2977 = vmatpush.bf16.msra.mxu2 %v10539_v63 }
 0x3ec   :  { %v2842_v41 = vsub.f32 1.0, %v2839_v12  ;;  %v2848_v7 = vmul.f32 %v2839_v12, %v7570_v31  ;;  %3016 = vmatpush.bf16.msrb.mxu1 %v10728_v11  ;;  %3055 = vmatpush.bf16.msra.mxu0 %v10729_v43  ;;  %v10733_v12 = vld [vmem:[#allocation70_spill] sm:$0xff]  ;;  %v10742_v43 = vld [vmem:[#allocation137_spill] sm:$0xff]  ;;  %v10744_v11 = vld [vmem:[#allocation79_spill] sm:$0xff] }
 0x3ed   :  { %v10734_v31 = vld [vmem:[#allocation98_spill] sm:$0xff] }
 0x3ee   :  { %v2845_v55 = vmul.f32 %v6154_v50, %v2842_v41  ;;  %v10736_v50 = vld [vmem:[#allocation135_spill] sm:$0xff]  ;;  %v10738_v41 = vld [vmem:[#allocation132_spill] sm:$0xff] }
 0x3ef   :  { %2978 = vmatpush.bf16.msra.mxu2 %v10730_v51  ;;  %v10741_v51 = vld [vmem:[#allocation106_spill] sm:$0xff] }
 0x3f0   :  { %v7894_v0 = vadd.f32 %v2848_v7, %v2845_v55  ;;  %3017 = vmatpush.bf16.msrb.mxu1 %v10731_v46  ;;  %3056 = vmatpush.bf16.msra.mxu0 %v10732_v18  ;;  %v10735_v55 = vld [vmem:[#allocation129_spill] sm:$0xff]  ;;  %v10739_v18 = vld [vmem:[#allocation136_spill] sm:$0xff]  ;;  %v10740_v46 = vld [vmem:[#allocation75_spill] sm:$0xff] }
 0x3f1   :  { %v10737_v7 = vld [vmem:[#allocation101_spill] sm:$0xff] }
 0x3f2   :  { %v7900_v15 = vpack.c.bf16 %v7894_v0, %v7894_v0 }
 0x3f3   :  { %2979 = vmatpush.bf16.msra.mxu2 %v10734_v31  ;;  %v10745_v31 = vld [vmem:[#allocation110_spill] sm:$0xff] }
 0x3f4   :  { %2889 = vmatmul.bf16.vlgmr.msra.gmra.mxu3 %v7900_v15  ;;  %2928 = vmatmul.bf16.vlgmr.msrb.gmra.mxu2 %v7900_v15 }
 0x3f5   :  { %2967 = vmatmul.bf16.vlgmr.msra.gmra.mxu1 %v7900_v15  ;;  %2985 = vmatpush.bf16.msra.mxu3 %v10733_v12  ;;  %v10743_v12 = vld [vmem:[#allocation140_spill] sm:$0xff] }
 0x3f6   :  { %3006 = vmatmul.bf16.vlgmr.msrb.gmra.mxu0 %v7900_v15  ;;  %3018 = vmatpush.bf16.msrb.mxu1 %v10735_v55  ;;  %v10746_v55 = vld [vmem:[#allocation141_spill] sm:$0xff] }
 0x3f7   :  { %3057 = vmatpush.bf16.msra.mxu0 %v10736_v50  ;;  %3024 = vmatpush.bf16.msrb.mxu2 %v10737_v7  ;;  %v10747_v50 = vld [vmem:[#allocation144_spill] sm:$0xff]  ;;  %v10748_v7 = vld [vmem:[#allocation83_spill] sm:$0xff] }
 0x3f9   :  { %2986 = vmatpush.bf16.msra.mxu3 %v10740_v46  ;;  %v10751_v46 = vld [vmem:[#allocation148_spill] sm:$0xff] }
 0x3fa   :  { %3063 = vmatpush.bf16.msra.mxu1 %v10738_v41  ;;  %v10749_v41 = vld [vmem:[#allocation114_spill] sm:$0xff] }
 0x3fb   :  { %3102 = vmatpush.bf16.msrb.mxu0 %v10739_v18  ;;  %3025 = vmatpush.bf16.msrb.mxu2 %v10741_v51  ;;  %v10750_v18 = vld [vmem:[#allocation145_spill] sm:$0xff]  ;;  %v10763_v51 = vld [vmem:[#allocation160_spill] sm:$0xff] }
 0x3fd   :  { %2987 = vmatpush.bf16.msra.mxu3 %v10744_v11  ;;  %v10760_v11 = vld [vmem:[#allocation95_spill] sm:$0xff] }
 0x3fe   :  { %3064 = vmatpush.bf16.msra.mxu1 %v10742_v43  ;;  %v10762_v43 = vld [vmem:[#allocation157_spill] sm:$0xff] }
 0x3ff   :  { %3103 = vmatpush.bf16.msrb.mxu0 %v10743_v12  ;;  %3026 = vmatpush.bf16.msrb.mxu2 %v10745_v31  ;;  %v10752_v12 = vld [vmem:[#allocation87_spill] sm:$0xff]  ;;  %v10759_v31 = vld [vmem:[#allocation156_spill] sm:$0xff] }
 0x401   :  { %2988 = vmatpush.bf16.msra.mxu3 %v10748_v7  ;;  %v10755_v7 = vld [vmem:[#allocation152_spill] sm:$0xff] }
 0x402   :  { %3065 = vmatpush.bf16.msra.mxu1 %v10746_v55  ;;  %v10753_v55 = vld [vmem:[#allocation118_spill] sm:$0xff] }
 0x403   :  { %3104 = vmatpush.bf16.msrb.mxu0 %v10747_v50  ;;  %3027 = vmatpush.bf16.msrb.mxu2 %v10749_v41  ;;  %v10754_v50 = vld [vmem:[#allocation149_spill] sm:$0xff]  ;;  %v10756_v41 = vld [vmem:[#allocation91_spill] sm:$0xff] }
 0x404   :  { %2941 = vmatmul.bf16.vlgmr.msrb.gmra.mxu3 %v7824_v49  ;;  %2980 = vmatmul.bf16.vlgmr.msra.gmra.mxu2 %v7824_v49 }
 0x405   :  { %2989 = vmatpush.bf16.msra.mxu3 %v10752_v12  ;;  %3019 = vmatmul.bf16.vlgmr.msrb.gmra.mxu1 %v7824_v49  ;;  %v10761_v12 = vld [vmem:[#allocation126_spill] sm:$0xff] }
 0x406   :  { %3066 = vmatpush.bf16.msra.mxu1 %v10750_v18  ;;  %3058 = vmatmul.bf16.vlgmr.msra.gmra.mxu0 %v7824_v49  ;;  %v10757_v18 = vld [vmem:[#allocation122_spill] sm:$0xff] }
 0x407   :  { %3105 = vmatpush.bf16.msrb.mxu0 %v10751_v46  ;;  %3028 = vmatpush.bf16.msrb.mxu2 %v10753_v55  ;;  %v10758_v46 = vld [vmem:[#allocation153_spill] sm:$0xff]  ;;  %v10764_v55 = vld [vmem:[#allocation99_spill] sm:$0xff] }
 0x409   :  { %2990 = vmatpush.bf16.msra.mxu3 %v10756_v41  ;;  %v10767_v41 = vld [vmem:[#allocation161_spill] sm:$0xff] }
 0x40a   :  { %3067 = vmatpush.bf16.msra.mxu1 %v10754_v50  ;;  %v10765_v50 = vld [vmem:[#allocation102_spill] sm:$0xff] }
 0x40b   :  { %3106 = vmatpush.bf16.msrb.mxu0 %v10755_v7  ;;  %3029 = vmatpush.bf16.msrb.mxu2 %v10757_v18  ;;  %v10766_v7 = vld [vmem:[#allocation130_spill] sm:$0xff]  ;;  %v10768_v18 = vld [vmem:[#allocation167_spill] sm:$0xff] }
 0x40d   :  { %2991 = vmatpush.bf16.msra.mxu3 %v10760_v11  ;;  %v10771_v11 = vld [vmem:[#allocation168_spill] sm:$0xff] }
 0x40e   :  { %3068 = vmatpush.bf16.msra.mxu1 %v10758_v46  ;;  %v10769_v46 = vld [vmem:[#allocation133_spill] sm:$0xff] }
 0x40f   :  { %3107 = vmatpush.bf16.msrb.mxu0 %v10759_v31  ;;  %3030 = vmatpush.bf16.msrb.mxu2 %v10761_v12  ;;  %v10770_v31 = vld [vmem:[#allocation164_spill] sm:$0xff] }
 0x411   :  { %2992 = vmatpush.bf16.msra.mxu3 %v10764_v55  ;;  %v10781_v55 = vld [vmem:[#allocation177_spill] sm:$0xff] }
 0x412   :  { %3069 = vmatpush.bf16.msra.mxu1 %v10762_v43  ;;  %v10782_v43 = vld [vmem:[#allocation180_spill] sm:$0xff] }
 0x413   :  { %3108 = vmatpush.bf16.msrb.mxu0 %v10763_v51  ;;  %3031 = vmatpush.bf16.msrb.mxu2 %v10766_v7  ;;  %v10772_v51 = vld [vmem:[#allocation107_spill] sm:$0xff]  ;;  %v10773_v7 = vld [vmem:[#allocation138_spill] sm:$0xff] }
 0x414   :  { %2993 = vmatmul.bf16.vlgmr.msra.gmra.mxu3 %v7853_v5 }
 0x415   :  { %3037 = vmatpush.bf16.msrb.mxu3 %v10765_v50  ;;  %v10779_v50 = vld [vmem:[#allocation115_spill] sm:$0xff] }
 0x416   :  { %3070 = vmatpush.bf16.msra.mxu1 %v10767_v41  ;;  %3032 = vmatmul.bf16.vlgmr.msrb.gmra.mxu2 %v7853_v5  ;;  %v10774_v41 = vld [vmem:[#allocation169_spill] sm:$0xff] }
 0x417   :  { %3109 = vmatpush.bf16.msrb.mxu0 %v10768_v18  ;;  %3076 = vmatpush.bf16.msra.mxu2 %v10769_v46  ;;  %v10775_v46 = vld [vmem:[#allocation111_spill] sm:$0xff]  ;;  %v10778_v18 = vld [vmem:[#allocation176_spill] sm:$0xff] }
 0x419   :  { %3038 = vmatpush.bf16.msrb.mxu3 %v10772_v51  ;;  %3071 = vmatmul.bf16.vlgmr.msra.gmra.mxu1 %v7853_v5  ;;  %v10780_v51 = vld [vmem:[#allocation146_spill] sm:$0xff] }
 0x41a   :  { %3115 = vmatpush.bf16.msrb.mxu1 %v10770_v31  ;;  %3110 = vmatmul.bf16.vlgmr.msrb.gmra.mxu0 %v7853_v5  ;;  %v10776_v31 = vld [vmem:[#allocation142_spill] sm:$0xff] }
 0x41b   :  { %3154 = vmatpush.bf16.msra.mxu0 %v10771_v11  ;;  %3077 = vmatpush.bf16.msra.mxu2 %v10773_v7  ;;  %v10777_v11 = vld [vmem:[#allocation173_spill] sm:$0xff]  ;;  %v10783_v7 = vld [vmem:[#allocation119_spill] sm:$0xff] }
 0x41d   :  { %3039 = vmatpush.bf16.msrb.mxu3 %v10775_v46  ;;  %v10786_v46 = vld [vmem:[#allocation184_spill] sm:$0xff] }
 0x41e   :  { %3116 = vmatpush.bf16.msrb.mxu1 %v10774_v41  ;;  %v10784_v41 = vld [vmem:[#allocation150_spill] sm:$0xff] }
 0x41f   :  { %3155 = vmatpush.bf16.msra.mxu0 %v10587_v9  ;;  %3078 = vmatpush.bf16.msra.mxu2 %v10776_v31  ;;  %v10785_v9 = vld [vmem:[#allocation181_spill] sm:$0xff]  ;;  %v10787_v31 = vld [vmem:[#allocation123_spill] sm:$0xff] }
 0x421   :  { %3040 = vmatpush.bf16.msrb.mxu3 %v10779_v50  ;;  %v10790_v50 = vld [vmem:[#allocation188_spill] sm:$0xff] }
 0x422   :  { %3117 = vmatpush.bf16.msrb.mxu1 %v10777_v11  ;;  %v10788_v11 = vld [vmem:[#allocation154_spill] sm:$0xff] }
 0x423   :  { %3156 = vmatpush.bf16.msra.mxu0 %v10778_v18  ;;  %3079 = vmatpush.bf16.msra.mxu2 %v10780_v51  ;;  %v10789_v18 = vld [vmem:[#allocation185_spill] sm:$0xff]  ;;  %v10791_v51 = vld [vmem:[#allocation127_spill] sm:$0xff] }
 0x425   :  { %3041 = vmatpush.bf16.msrb.mxu3 %v10783_v7  ;;  %v10794_v7 = vld [vmem:[#allocation192_spill] sm:$0xff] }
 0x426   :  { %3118 = vmatpush.bf16.msrb.mxu1 %v10781_v55  ;;  %v10792_v55 = vld [vmem:[#allocation158_spill] sm:$0xff] }
 0x427   :  { %3157 = vmatpush.bf16.msra.mxu0 %v10782_v43  ;;  %3080 = vmatpush.bf16.msra.mxu2 %v10784_v41  ;;  %v10793_v43 = vld [vmem:[#allocation189_spill] sm:$0xff]  ;;  %v10795_v41 = vld [vmem:[#allocation131_spill] sm:$0xff] }
 0x429   :  { %3042 = vmatpush.bf16.msrb.mxu3 %v10787_v31  ;;  %v10798_v31 = vld [vmem:[#allocation193_spill] sm:$0xff] }
 0x42a   :  { %3119 = vmatpush.bf16.msrb.mxu1 %v10785_v9  ;;  %v10796_v9 = vld [vmem:[#allocation134_spill] sm:$0xff] }
 0x42b   :  { %3158 = vmatpush.bf16.msra.mxu0 %v10786_v46  ;;  %3081 = vmatpush.bf16.msra.mxu2 %v10788_v11  ;;  %v10797_v46 = vld [vmem:[#allocation162_spill] sm:$0xff]  ;;  %v10799_v11 = vld [vmem:[#allocation199_spill] sm:$0xff] }
 0x42d   :  { %3043 = vmatpush.bf16.msrb.mxu3 %v10791_v51  ;;  %v10801_v51 = vld [vmem:[#allocation196_spill] sm:$0xff] }
 0x42e   :  { %3120 = vmatpush.bf16.msrb.mxu1 %v10789_v18 }
 0x42f   :  { %3159 = vmatpush.bf16.msra.mxu0 %v10790_v50  ;;  %3082 = vmatpush.bf16.msra.mxu2 %v10792_v55  ;;  %v10800_v50 = vld [vmem:[#allocation165_spill] sm:$0xff] }
 0x431   :  { %3044 = vmatpush.bf16.msrb.mxu3 %v10795_v41 }
 0x432   :  { %3121 = vmatpush.bf16.msrb.mxu1 %v10793_v43  ;;  %v10802_v43 = vld [vmem:[#allocation139_spill] sm:$0xff] }
 0x433   :  { %3160 = vmatpush.bf16.msra.mxu0 %v10794_v7  ;;  %3083 = vmatpush.bf16.msra.mxu2 %v10797_v46  ;;  %v10804_v46 = vld [vmem:[#allocation5_spill] sm:$0xff]  ;;  %v2903_v41 = vpop.f32.mrf.mxu0 }
 0x434   :  { %3045 = vmatmul.bf16.vlgmr.msrb.gmra.mxu3 %v7900_v15  ;;  %v10809_v7 = vld [vmem:[#allocation13_spill] sm:$0xff] }
 0x435   :  { %3089 = vmatpush.bf16.msra.mxu3 %v10796_v9  ;;  %v10803_v9 = vld [vmem:[#allocation170_spill] sm:$0xff] }
 0x436   :  { %3122 = vmatpush.bf16.msrb.mxu1 %v10798_v31  ;;  %3084 = vmatmul.bf16.vlgmr.msra.gmra.mxu2 %v7900_v15  ;;  %v10805_v31 = vld [vmem:[#allocation200_spill] sm:$0xff] }
 0x437   :  { %3161 = vmatpush.bf16.msra.mxu0 %v10799_v11  ;;  %3128 = vmatpush.bf16.msrb.mxu2 %v10800_v50  ;;  %v2864_v11 = vpop.f32.mrf.mxu1  ;;  %v10807_v50 = vld [vmem:[#allocation203_spill] sm:$0xff] }
 0x439   :  { %3090 = vmatpush.bf16.msra.mxu3 %v10802_v43  ;;  %3123 = vmatmul.bf16.vlgmr.msrb.gmra.mxu1 %v7900_v15  ;;  %v10808_v43 = vld [vmem:[#allocation147_spill] sm:$0xff] }
 0x43a   :  { %3167 = vmatpush.bf16.msra.mxu1 %v10801_v51  ;;  %3162 = vmatmul.bf16.vlgmr.msra.gmra.mxu0 %v7900_v15  ;;  %v10806_v51 = vld [vmem:[#allocation9_spill] sm:$0xff] }
 0x43b   :  { %3129 = vmatpush.bf16.msrb.mxu2 %v10803_v9  ;;  %3263 = vmatpush.bf16.msrb.mxu0 %v10804_v46 }
 0x43d   :  { %3091 = vmatpush.bf16.msra.mxu3 %v10616_v37  ;;  %v10810_v37 = vld [vmem:[#allocation17_spill] sm:$0xff] }
 0x43e   :  { %3168 = vmatpush.bf16.msra.mxu1 %v10805_v31  ;;  %v2905_v31 = vpop.f32.mrf.mxu0 }
 0x43f   :  { %3130 = vmatpush.bf16.msrb.mxu2 %v10617_v16  ;;  %3264 = vmatpush.bf16.msrb.mxu0 %v10806_v51  ;;  %v2866_v46 = vpop.f32.mrf.mxu1  ;;  %v10811_v16 = vld [vmem:[#allocation209_spill] sm:$0xff]  ;;  %v10812_v51 = vld [vmem:[#allocation155_spill] sm:$0xff]  ;;  %v10814_v31 = vld [vmem:[#allocation194_spill] sm:$0xff] }
 0x440   :  { %v10813_v46 = vld [vmem:[#allocation25_spill] sm:$0xff] }
 0x441   :  { %3092 = vmatpush.bf16.msra.mxu3 %v10808_v43  ;;  %v10877_v43 = vld [vmem:[#allocation12_spill] sm:$0xff] }
 0x442   :  { %3169 = vmatpush.bf16.msra.mxu1 %v10807_v50 }
 0x443   :  { %3131 = vmatpush.bf16.msrb.mxu2 %v10621_v26  ;;  %3265 = vmatpush.bf16.msrb.mxu0 %v10809_v7  ;;  %v10875_v26 = vld [vmem:[#allocation38_spill] sm:$0xff] }
 0x445   :  { %3093 = vmatpush.bf16.msra.mxu3 %v10624_v4 }
 0x446   :  { %3170 = vmatpush.bf16.msra.mxu1 %v10623_v62  ;;  %v10864_v62 = vld [vmem:[#allocation54_spill] sm:$0xff] }
 0x447   :  { %3132 = vmatpush.bf16.msrb.mxu2 %v10625_v19  ;;  %3266 = vmatpush.bf16.msrb.mxu0 %v10810_v37  ;;  %v10833_v37 = vld [vmem:[#allocation49_spill] sm:$0xff] }
 0x448   :  { %v10837_v19 = vld [vmem:[#allocation53_spill] sm:$0xff] }
 0x449   :  { %3094 = vmatpush.bf16.msra.mxu3 %v10812_v51  ;;  %v10815_v51 = vld [vmem:[#allocation29_spill] sm:$0xff] }
 0x44a   :  { %3171 = vmatpush.bf16.msra.mxu1 %v10811_v16  ;;  %v10831_v16 = vld [vmem:[#allocation18_spill] sm:$0xff] }
 0x44b   :  { %3133 = vmatpush.bf16.msrb.mxu2 %v10627_v28  ;;  %3267 = vmatpush.bf16.msrb.mxu0 %v6369_v56  ;;  %v10816_v28 = vld [vmem:[#allocation220_spill] sm:$0xff] }
 0x44c   :  { %v10826_v56 = vld [vmem:[#allocation204_spill] sm:$0xff] }
 0x44d   :  { %3095 = vmatpush.bf16.msra.mxu3 %v10628_v58  ;;  %v10818_v58 = vld [vmem:[#allocation6_spill] sm:$0xff] }
 0x44e   :  { %3172 = vmatpush.bf16.msra.mxu1 %v10448_v30  ;;  %v10817_v30 = vld [vmem:[#allocation197_spill] sm:$0xff] }
 0x44f   :  { %3134 = vmatpush.bf16.msrb.mxu2 %v10629_v2  ;;  %3268 = vmatpush.bf16.msrb.mxu0 %v10813_v46  ;;  %v10819_v46 = vld [vmem:[#allocation171_spill] sm:$0xff] }
 0x451   :  { %3096 = vmatpush.bf16.msra.mxu3 %v10630_v53  ;;  %v10820_v53 = vld [vmem:[#allocation33_spill] sm:$0xff] }
 0x452   :  { %3173 = vmatpush.bf16.msra.mxu1 %v7015_v20 }
 0x453   :  { %3135 = vmatpush.bf16.msrb.mxu2 %v10814_v31  ;;  %3269 = vmatpush.bf16.msrb.mxu0 %v10815_v51  ;;  %v10822_v31 = vld [vmem:[#allocation201_spill] sm:$0xff]  ;;  %v10823_v51 = vld [vmem:[#allocation10_spill] sm:$0xff]  ;;  %v2916_v20 = vpop.f32.mrf.mxu1 }
 0x454   :  { %3097 = vmatmul.bf16.vlgmr.msra.gmra.mxu3 %v7824_v49  ;;  %v8031_v2 = vpop.f32.mrf.mxu0 }
 0x455   :  { %3141 = vmatpush.bf16.msrb.mxu3 %v10631_v42  ;;  %v10821_v42 = vld [vmem:[#allocation36_spill] sm:$0xff] }
 0x456   :  { %3174 = vmatpush.bf16.msra.mxu1 %v10816_v28  ;;  %3136 = vmatmul.bf16.vlgmr.msrb.gmra.mxu2 %v7824_v49  ;;  %v10824_v28 = vld [vmem:[#allocation175_spill] sm:$0xff] }
 0x457   :  { %3180 = vmatpush.bf16.msra.mxu2 %v10817_v30  ;;  %3270 = vmatpush.bf16.msrb.mxu0 %v10820_v53  ;;  %v2917_v30 = vadd.f32 %v2916_v20, %v2903_v41 }
 0x459   :  { %3142 = vmatpush.bf16.msrb.mxu3 %v10819_v46  ;;  %3175 = vmatmul.bf16.vlgmr.msra.gmra.mxu1 %v7824_v49  ;;  %v10827_v46 = vld [vmem:[#allocation14_spill] sm:$0xff]  ;;  %v10828_v49 = vld [vmem:[#allocation179_spill] sm:$0xff]  ;;  %v2877_v53 = vpop.f32.mrf.mxu2 }
 0x45a   :  { %3276 = vmatpush.bf16.msrb.mxu1 %v10818_v58  ;;  %v10825_v58 = vld [vmem:[#allocation41_spill] sm:$0xff] }
 0x45b   :  { %3315 = vmatpush.bf16.msra.mxu0 %v10821_v42  ;;  %3181 = vmatpush.bf16.msra.mxu2 %v10822_v31  ;;  %v10829_v42 = vld [vmem:[#allocation45_spill] sm:$0xff]  ;;  %v10830_v31 = vld [vmem:[#allocation207_spill] sm:$0xff]  ;;  %v2918_v20 = vpop.f32.mrf.mxu1 }
 0x45c   :  { %v2957_v41 = vpop.f32.mrf.mxu0  ;;  %v10842_v20 = vld [vmem:[#allocation218_spill] sm:$0xff] }
 0x45d   :  { %3143 = vmatpush.bf16.msrb.mxu3 %v10824_v28  ;;  %v10832_v28 = vld [vmem:[#allocation183_spill] sm:$0xff]  ;;  %v10843_v41 = vld [vmem:[#allocation30_spill] sm:$0xff] }
 0x45e   :  { %3277 = vmatpush.bf16.msrb.mxu1 %v10823_v51  ;;  %v2878_v51 = vadd.f32 %v2877_v53, %v2864_v11  ;;  %v10839_v53 = vld [vmem:[#allocation26_spill] sm:$0xff]  ;;  %v10840_v11 = vld [vmem:[#allocation191_spill] sm:$0xff] }
 0x45f   :  { %3316 = vmatpush.bf16.msra.mxu0 %v10825_v58  ;;  %3182 = vmatpush.bf16.msra.mxu2 %v10826_v56  ;;  %v10834_v58 = vld [vmem:[#allocation210_spill] sm:$0xff] }
 0x460   :  { %v10835_v56 = vld [vmem:[#allocation22_spill] sm:$0xff] }
 0x461   :  { %3144 = vmatpush.bf16.msrb.mxu3 %v10828_v49  ;;  %v2879_v49 = vpop.f32.mrf.mxu2 }
 0x462   :  { %3278 = vmatpush.bf16.msrb.mxu1 %v10827_v46  ;;  %v10836_v46 = vld [vmem:[#allocation187_spill] sm:$0xff]  ;;  %v10847_v49 = vld [vmem:[#allocation221_spill] sm:$0xff] }
 0x463   :  { %3317 = vmatpush.bf16.msra.mxu0 %v10829_v42  ;;  %3183 = vmatpush.bf16.msra.mxu2 %v10830_v31  ;;  %v10838_v42 = vld [vmem:[#allocation214_spill] sm:$0xff] }
 0x464   :  { %v10861_v31 = vld [vmem:[#allocation50_spill] sm:$0xff] }
 0x465   :  { %3145 = vmatpush.bf16.msrb.mxu3 %v10832_v28  ;;  %v10841_v28 = vld [vmem:[#allocation57_spill] sm:$0xff] }
 0x466   :  { %3279 = vmatpush.bf16.msrb.mxu1 %v10831_v16  ;;  %v10859_v16 = vld [vmem:[#allocation19_spill] sm:$0xff] }
 0x467   :  { %3318 = vmatpush.bf16.msra.mxu0 %v10833_v37  ;;  %3184 = vmatpush.bf16.msra.mxu2 %v10834_v58  ;;  %v10844_v58 = vld [vmem:[#allocation195_spill] sm:$0xff] }
 0x469   :  { %3146 = vmatpush.bf16.msrb.mxu3 %v10836_v46  ;;  %v10846_v46 = vld [vmem:[#allocation61_spill] sm:$0xff] }
 0x46a   :  { %3280 = vmatpush.bf16.msrb.mxu1 %v10835_v56  ;;  %v10845_v56 = vld [vmem:[#allocation198_spill] sm:$0xff] }
 0x46b   :  { %3319 = vmatpush.bf16.msra.mxu0 %v10837_v19  ;;  %3185 = vmatpush.bf16.msra.mxu2 %v10838_v42  ;;  %v10848_v42 = vld [vmem:[#allocation7_spill] sm:$0xff] }
 0x46d   :  { %3147 = vmatpush.bf16.msrb.mxu3 %v10840_v11  ;;  %v10850_v11 = vld [vmem:[#allocation202_spill] sm:$0xff] }
 0x46e   :  { %3281 = vmatpush.bf16.msrb.mxu1 %v10839_v53  ;;  %v10849_v53 = vld [vmem:[#allocation34_spill] sm:$0xff] }
 0x46f   :  { %3320 = vmatpush.bf16.msra.mxu0 %v10841_v28  ;;  %3186 = vmatpush.bf16.msra.mxu2 %v10842_v20  ;;  %v10851_v28 = vld [vmem:[#allocation37_spill] sm:$0xff]  ;;  %v10855_v20 = vld [vmem:[#allocation42_spill] sm:$0xff] }
 0x471   :  { %3148 = vmatpush.bf16.msrb.mxu3 %v10844_v58 }
 0x472   :  { %3282 = vmatpush.bf16.msrb.mxu1 %v10843_v41  ;;  %v10852_v41 = vld [vmem:[#allocation65_spill] sm:$0xff]  ;;  %v2968_v58 = vpop.f32.mrf.mxu1 }
 0x473   :  { %3321 = vmatpush.bf16.msra.mxu0 %v10846_v46  ;;  %3187 = vmatpush.bf16.msra.mxu2 %v10847_v49  ;;  %v10854_v46 = vld [vmem:[#allocation205_spill] sm:$0xff]  ;;  %v8065_v49 = vpop.f32.mrf.mxu0 }
 0x474   :  { %3149 = vmatmul.bf16.vlgmr.msrb.gmra.mxu3 %v7853_v5 }
 0x475   :  { %3193 = vmatpush.bf16.msra.mxu3 %v10845_v56  ;;  %v10853_v56 = vld [vmem:[#allocation11_spill] sm:$0xff] }
 0x476   :  { %3283 = vmatpush.bf16.msrb.mxu1 %v10849_v53  ;;  %3188 = vmatmul.bf16.vlgmr.msra.gmra.mxu2 %v7853_v5  ;;  %v10857_v53 = vld [vmem:[#allocation208_spill] sm:$0xff] }
 0x477   :  { %3289 = vmatpush.bf16.msrb.mxu2 %v10848_v42  ;;  %3322 = vmatpush.bf16.msra.mxu0 %v10852_v41  ;;  %v10856_v42 = vld [vmem:[#allocation15_spill] sm:$0xff]  ;;  %v2929_v19 = vpop.f32.mrf.mxu2 }
 0x478   :  { %v8071_v37 = vadd.f32 %v2929_v19, %v2917_v30  ;;  %v8080_v30 = vpop.permute.xlu1 %70  ;;  %v10866_v19 = vld [vmem:[#allocation219_spill] sm:$0xff] }
 0x479   :  { %3194 = vmatpush.bf16.msra.mxu3 %v10850_v11  ;;  %v2890_v11 = vpop.f32.mrf.mxu3 }
 0x47a   :  { %3328 = vmatpush.bf16.msra.mxu1 %v10851_v28  ;;  %v10858_v28 = vld [vmem:[#allocation46_spill] sm:$0xff]  ;;  %v2891_v5 = vadd.f32 %v2890_v11, %v2878_v51  ;;  %v2970_v41 = vpop.f32.mrf.mxu1 }
 0x47b   :  { %3290 = vmatpush.bf16.msrb.mxu2 %v10853_v56  ;;  %v10860_v56 = vld [vmem:[#allocation211_spill] sm:$0xff]  ;;  %v10867_v51 = vld [vmem:[#allocation58_spill] sm:$0xff] }
 0x47d   :  { %3195 = vmatpush.bf16.msra.mxu3 %v10854_v46  ;;  %v3009_v46 = vpop.f32.mrf.mxu0 }
 0x47e   :  { %3329 = vmatpush.bf16.msra.mxu1 %v10855_v20  ;;  %v10862_v20 = vld [vmem:[#allocation23_spill] sm:$0xff]  ;;  %v10868_v46 = vld [vmem:[#allocation213_spill] sm:$0xff] }
 0x47f   :  { %3291 = vmatpush.bf16.msrb.mxu2 %v10856_v42  ;;  %v10863_v42 = vld [vmem:[#allocation215_spill] sm:$0xff]  ;;  %v2931_v4 = vpop.f32.mrf.mxu2  ;;  %v140_v11 = vmul.f32 %v10868_v46, %v8080_v30 }
 0x480   :  { %v10871_v4 = vld [vmem:[#allocation62_spill] sm:$0xff]  ;;  %v10874_v46 = vld [vmem:[#allocation35_spill] sm:$0xff] }
 0x481   :  { %3196 = vmatpush.bf16.msra.mxu3 %v10857_v53  ;;  %v2892_v53 = vpop.f32.mrf.mxu3 }
 0x482   :  { %3330 = vmatpush.bf16.msra.mxu1 %v10858_v28  ;;  %v10865_v28 = vld [vmem:[#allocation27_spill] sm:$0xff]  ;;  %v3020_v41 = vpop.f32.mrf.mxu1  ;;  %v10872_v53 = vld [vmem:[#allocation217_spill] sm:$0xff] }
 0x483   :  { %3292 = vmatpush.bf16.msrb.mxu2 %v10859_v16 }
 0x485   :  { %3197 = vmatpush.bf16.msra.mxu3 %v10860_v56  ;;  %v10873_v56 = vld [vmem:[#allocation8_spill] sm:$0xff] }
 0x486   :  { %3331 = vmatpush.bf16.msra.mxu1 %v10861_v31  ;;  %v3059_v31 = vpop.f32.mrf.mxu0 }
 0x487   :  { %3293 = vmatpush.bf16.msrb.mxu2 %v10862_v20  ;;  %v10869_v20 = vld [vmem:[#allocation31_spill] sm:$0xff]  ;;  %v2981_v16 = vpop.f32.mrf.mxu2 }
 0x489   :  { %3198 = vmatpush.bf16.msra.mxu3 %v10863_v42  ;;  %v10870_v42 = vld [vmem:[#allocation222_spill] sm:$0xff] }
 0x48a   :  { %3332 = vmatpush.bf16.msra.mxu1 %v10864_v62  ;;  %v234_v62 = vadd.f32 %v10872_v53, %v140_v11  ;;  %v10878_v53 = vld [vmem:[#allocation43_spill] sm:$0xff] }
 0x48b   :  { %3294 = vmatpush.bf16.msrb.mxu2 %v10865_v28  ;;  %v2942_v28 = vpop.f32.mrf.mxu3 }
 0x48d   :  { %3199 = vmatpush.bf16.msra.mxu3 %v10866_v19  ;;  %v2956_v19 = vadd.f32 %v8031_v2, %v2942_v28  ;;  %v10879_v28 = vld [vmem:[#allocation16_spill] sm:$0xff]  ;;  %v10880_v2 = vld [vmem:[#allocation47_spill] sm:$0xff] }
 0x48e   :  { %3333 = vmatpush.bf16.msra.mxu1 %v10867_v51  ;;  %v3206_v51 = vadd.f32 %v2891_v5, %v234_v62 }
 0x48f   :  { %3295 = vmatpush.bf16.msrb.mxu2 %v10869_v20  ;;  %v2969_v7 = vadd.f32 %v2968_v58, %v2956_v19  ;;  %v10876_v20 = vld [vmem:[#allocation66_spill] sm:$0xff]  ;;  %v2983_v62 = vpop.f32.mrf.mxu2 }
 0x490   :  { %v3209_v11 = vmul.f32 0.5, %v3206_v51 }
 0x491   :  { %3200 = vmatpush.bf16.msra.mxu3 %v10870_v42  ;;  %v3022_v42 = vpop.f32.mrf.mxu1 }
 0x492   :  { %3334 = vmatpush.bf16.msra.mxu1 %v10871_v4  ;;  %v3061_v4 = vpop.f32.mrf.mxu0  ;;  %6155 = vtanh.f32 %v3209_v11  ;;  %v10883_v11 = vld [vmem:[#allocation28_spill] sm:$0xff] }
 0x493   :  { %3296 = vmatpush.bf16.msrb.mxu2 %v10874_v46  ;;  %v10882_v4 = vld [vmem:[#allocation24_spill] sm:$0xff] }
 0x494   :  { %3201 = vmatmul.bf16.vlgmr.msra.gmra.mxu3 %v7900_v15  ;;  %v10881_v15 = vld [vmem:[#allocation20_spill] sm:$0xff] }
 0x495   :  { %3302 = vmatpush.bf16.msrb.mxu3 %v10873_v56  ;;  %v2944_v56 = vpop.f32.mrf.mxu3 }
 0x496   :  { %3335 = vmatpush.bf16.msra.mxu1 %v10876_v20  ;;  %v10885_v20 = vld [vmem:[#allocation226_spill] sm:$0xff] }
 0x497   :  { %3341 = vmatpush.bf16.msra.mxu2 %v10875_v26  ;;  %v10886_v26 = vld [vmem:[#allocation224_spill] sm:$0xff] }
 0x498   :  { %v6156_v42 = vpop.eup %6155 }
 0x499   :  { %3303 = vmatpush.bf16.msrb.mxu3 %v10877_v43  ;;  %v3072_v58 = vpop.f32.mrf.mxu1  ;;  %v3215_v56 = vmul.f32 0.5, %v6156_v42  ;;  %v10887_v42 = vld [vmem:[#allocation59_spill] sm:$0xff] }
 0x49a   :  { %v3073_v5 = vadd.f32 %v3072_v58, %v3059_v31  ;;  %v8101_v19 = vpop.f32.mrf.mxu0  ;;  %v10884_v31 = vld [vmem:[#allocation223_spill] sm:$0xff] }
 0x49b   :  { %3342 = vmatpush.bf16.msra.mxu2 %v10878_v53  ;;  %v3033_v53 = vpop.f32.mrf.mxu2  ;;  %v141_v58 = vmul.f32 %v10884_v31, %v8080_v30 }
 0x49d   :  { %3304 = vmatpush.bf16.msrb.mxu3 %v10879_v28  ;;  %v2994_v51 = vpop.f32.mrf.mxu3  ;;  %v3034_v28 = vadd.f32 %v3033_v53, %v3020_v41  ;;  %v10889_v53 = vld [vmem:[#allocation225_spill] sm:$0xff] }
 0x49e   :  { %v2995_v43 = vadd.f32 %v2994_v51, %v2981_v16  ;;  %v10888_v16 = vld [vmem:[#allocation32_spill] sm:$0xff]  ;;  %v235_v51 = vadd.f32 %v10889_v53, %v141_v58 }
 0x49f   :  { %3343 = vmatpush.bf16.msra.mxu2 %v10880_v2 }
 0x4a0   :  { %v3008_v62 = vadd.f32 %v8065_v49, %v2995_v43  ;;  %v10890_v49 = vld [vmem:[#allocation227_spill] sm:$0xff] }
 0x4a1   :  { %3305 = vmatpush.bf16.msrb.mxu3 %v10881_v15  ;;  %v3074_v15 = vpop.f32.mrf.mxu1 }
 0x4a2   :  { %v3113_v2 = vpop.f32.mrf.mxu0  ;;  %v3221_v46 = vadd.f32 %v3008_v62, %v10886_v26  ;;  %v10894_v62 = vld [vmem:[#allocation67_spill] sm:$0xff] }
 0x4a3   :  { %3344 = vmatpush.bf16.msra.mxu2 %v10683_v54  ;;  %v3218_v54 = vadd.f32 0.5, %v3215_v56  ;;  %v3035_v43 = vpop.f32.mrf.mxu2  ;;  %v3207_v2 = vadd.f32 %v8071_v37, %v235_v51  ;;  %v10892_v56 = vld [vmem:[#allocation39_spill] sm:$0xff] }
 0x4a5   :  { %3306 = vmatpush.bf16.msrb.mxu3 %v10882_v4  ;;  %v142_v4 = vmul.f32 %v10885_v20, %v8080_v30  ;;  %v3224_v41 = vmul.f32 %v3221_v46, %v3218_v54  ;;  %v10893_v20 = vld [vmem:[#allocation40_spill] sm:$0xff] }
 0x4a6   :  { %v10895_v54 = vld [vmem:[#allocation44_spill] sm:$0xff] }
 0x4a7   :  { %3345 = vmatpush.bf16.msra.mxu2 %v10687_v57  ;;  %v236_v15 = vadd.f32 %v10890_v49, %v142_v4  ;;  %v10891_v57 = vld [vmem:[#allocation63_spill] sm:$0xff]  ;;  %v10896_v46 = vld [vmem:[#allocation48_spill] sm:$0xff] }
 0x4a8   :  { %v10897_v4 = vld [vmem:[#allocation52_spill] sm:$0xff] }
 0x4a9   :  { %3307 = vmatpush.bf16.msrb.mxu3 %v10883_v11  ;;  %v2996_v11 = vpop.f32.mrf.mxu3  ;;  %v3208_v31 = vadd.f32 %v2969_v7, %v236_v15  ;;  %v10898_v7 = vld [vmem:[#allocation56_spill] sm:$0xff] }
 0x4ab   :  { %3346 = vmatpush.bf16.msra.mxu2 %v10887_v42  ;;  %v3210_v42 = vmul.f32 0.5, %v3207_v2 }
 0x4ad   :  { %3308 = vmatpush.bf16.msrb.mxu3 %v10888_v16  ;;  %v3211_v16 = vmul.f32 0.5, %v3208_v31  ;;  %6157 = vtanh.f32 %v3210_v42  ;;  %v145_v31 = vmul.f32 %v10713_v22, %v8080_v30 }
 0x4af   :  { %3347 = vmatpush.bf16.msra.mxu2 %v10891_v57  ;;  %6159 = vtanh.f32 %v3211_v16  ;;  %v10901_v57 = vld [vmem:[#allocation229_spill] sm:$0xff] }
 0x4b1   :  { %3309 = vmatpush.bf16.msrb.mxu3 %v10892_v56  ;;  %v10900_v56 = vld [vmem:[#allocation60_spill] sm:$0xff] }
 0x4b3   :  { %3348 = vmatpush.bf16.msra.mxu2 %v10894_v62  ;;  %v6158_v11 = vpop.eup %6157 }
 0x4b4   :  { %v3216_v43 = vmul.f32 0.5, %v6158_v11 }
 0x4b5   :  { %3354 = vmatpush.bf16.msra.mxu3 %v10893_v20  ;;  %v6160_v37 = vpop.eup %6159 }
 0x4b6   :  { %v3124_v58 = vpop.f32.mrf.mxu1  ;;  %v3217_v20 = vmul.f32 0.5, %v6160_v37  ;;  %v3219_v16 = vadd.f32 0.5, %v3216_v43  ;;  %v10903_v43 = vld [vmem:[#allocation71_spill] sm:$0xff] }
 0x4b7   :  { %v3163_v51 = vpop.f32.mrf.mxu0  ;;  %v3046_v15 = vpop.f32.mrf.mxu3 }
 0x4b8   :  { %v3047_v62 = vadd.f32 %v3046_v15, %v3034_v28  ;;  %v10902_v28 = vld [vmem:[#allocation64_spill] sm:$0xff] }
 0x4b9   :  { %3355 = vmatpush.bf16.msra.mxu3 %v10895_v54  ;;  %v3085_v2 = vpop.f32.mrf.mxu2  ;;  %v10899_v54 = vld [vmem:[#allocation228_spill] sm:$0xff] }
 0x4ba   :  { %v3086_v42 = vadd.f32 %v3085_v2, %v3073_v5 }
 0x4bc   :  { %v3223_v53 = vadd.f32 %v3086_v42, %v10901_v57 }
 0x4bd   :  { %3356 = vmatpush.bf16.msra.mxu3 %v10896_v46  ;;  %v3222_v46 = vadd.f32 %v3047_v62, %v10899_v54 }
 0x4be   :  { %v3126_v26 = vpop.f32.mrf.mxu1 }
 0x4bf   :  { %v3225_v11 = vmul.f32 %v3222_v46, %v3219_v16  ;;  %v3165_v49 = vpop.f32.mrf.mxu0  ;;  %v3048_v22 = vpop.f32.mrf.mxu3  ;;  %v10905_v46 = vld [vmem:[#allocation231_spill] sm:$0xff] }
 0x4c1   :  { %3357 = vmatpush.bf16.msra.mxu3 %v10897_v4  ;;  %v3220_v4 = vadd.f32 0.5, %v3217_v20  ;;  %v3087_v5 = vpop.f32.mrf.mxu2  ;;  %v10904_v20 = vld [vmem:[#allocation230_spill] sm:$0xff] }
 0x4c2   :  { %v146_v2 = vmul.f32 %v10904_v20, %v8080_v30 }
 0x4c3   :  { %v3226_v37 = vmul.f32 %v3223_v53, %v3220_v4  ;;  %v10906_v4 = vld [vmem:[#allocation232_spill] sm:$0xff] }
 0x4c5   :  { %3358 = vmatpush.bf16.msra.mxu3 %v10898_v7  ;;  %v239_v7 = vadd.f32 %v10716_v61, %v145_v31  ;;  %v240_v31 = vadd.f32 %v10905_v46, %v146_v2 }
 0x4c7   :  { %v8133_v15 = vadd.f32 %v3226_v37, %v239_v7  ;;  %v143_v7 = vmul.f32 %v10906_v4, %v8080_v30 }
 0x4c9   :  { %3359 = vmatpush.bf16.msra.mxu3 %v10900_v56  ;;  %v237_v61 = vadd.f32 %v10509_v21, %v143_v7 }
 0x4cd   :  { %3360 = vmatpush.bf16.msra.mxu3 %v10902_v28  ;;  %v3227_v28 = vadd.f32 %v3224_v41, %v237_v61  ;;  %v147_v61 = vmul.f32 %v10510_v32, %v8080_v30 }
 0x4d1   :  { %3361 = vmatpush.bf16.msra.mxu3 %v10903_v43 }
 0x4d6   :  { %v8136_v62 = vpop.f32.mrf.mxu1 }
 0x4d7   :  { %v3098_v42 = vpop.f32.mrf.mxu3 }
 0x4d8   :  { %v3112_v26 = vadd.f32 %v8101_v19, %v3098_v42 }
 0x4d9   :  { %v3137_v49 = vpop.f32.mrf.mxu2 }
 0x4da   :  { %v3125_v53 = vadd.f32 %v3124_v58, %v3112_v26 }
 0x4dc   :  { %v3233_v16 = vadd.f32 %v3125_v53, %v240_v31 }
 0x4de   :  { %v3178_v22 = vpop.f32.mrf.mxu1  ;;  %v3236_v37 = vmul.f32 0.5, %v3233_v16 }
 0x4df   :  { %v3100_v5 = vpop.f32.mrf.mxu3 }
 0x4e0   :  { %6161 = vtanh.f32 %v3236_v37 }
 0x4e1   :  { %v3139_v43 = vpop.f32.mrf.mxu2  ;;  %6163 = vtanh.f32 %v3227_v28 }
 0x4e2   :  { %v144_v43 = vmul.f32 %v10512_v34, %v8080_v30 }
 0x4e6   :  { %v6162_v20 = vpop.eup %6161 }
 0x4e7   :  { %v3242_v56 = vmul.f32 0.5, %v6162_v20  ;;  %v6164_v54 = vpop.eup %6163 }
 0x4e9   :  { %v3245_v19 = vadd.f32 0.5, %v3242_v56 }
 0x4eb   :  { %v3248_v42 = vsub.f32 1.0, %v3245_v19  ;;  %v3254_v58 = vmul.f32 %v3245_v19, %v7820_v33  ;;  %v241_v33 = vadd.f32 %v10511_v59, %v147_v61 }
 0x4ed   :  { %v3251_v2 = vmul.f32 %v6164_v54, %v3248_v42 }
 0x4ef   :  { %v8146_v26 = vadd.f32 %v3254_v58, %v3251_v2 }
 0x4f1   :  { %v8150_v31 = vpack.c.bf16 %v8146_v26, %v8146_v26 }
 0x4f3   :  { %3271 = vmatmul.bf16.vlgmr.msrb.gmra.mxu0 %v8150_v31  ;;  %3310 = vmatmul.bf16.vlgmr.msrb.gmra.mxu3 %v8150_v31 }
 0x4f4   :  { %3367 = vmatpush.bf16.msrb.mxu0 %v10312_v36  ;;  %3406 = vmatpush.bf16.msrb.mxu3 %v10313_v39 }
 0x4f7   :  { %v3150_v41 = vpop.f32.mrf.mxu3 }
 0x4f8   :  { %v3151_v56 = vadd.f32 %v3150_v41, %v3137_v49  ;;  %3368 = vmatpush.bf16.msrb.mxu0 %v10316_v14  ;;  %3407 = vmatpush.bf16.msrb.mxu3 %v10317_v10  ;;  %v238_v49 = vadd.f32 %v10515_v29, %v144_v43  ;;  %v148_v41 = vmul.f32 %v7858_v23, %v8080_v30  ;;  %v10909_v43 = vld [vmem:[#allocation69_spill] sm:$0xff] }
 0x4f9   :  { %v3189_v28 = vpop.f32.mrf.mxu2 }
 0x4fa   :  { %v3164_v54 = vadd.f32 %v3163_v51, %v3151_v56  ;;  %v3228_v16 = vadd.f32 %v3225_v11, %v238_v49  ;;  %v3190_v56 = vadd.f32 %v3189_v28, %v8136_v62  ;;  %v10910_v62 = vld [vmem:[#allocation108_spill] sm:$0xff]  ;;  %v10912_v49 = vld [vmem:[#allocation109_spill] sm:$0xff] }
 0x4fc   :  { %v3234_v20 = vadd.f32 %v3164_v54, %v241_v33  ;;  %3369 = vmatpush.bf16.msrb.mxu0 %v10513_v60  ;;  %3408 = vmatpush.bf16.msrb.mxu3 %v10514_v24  ;;  %v10907_v33 = vld [vmem:[#allocation97_spill] sm:$0xff]  ;;  %v10908_v54 = vld [vmem:[#allocation103_spill] sm:$0xff] }
 0x4fe   :  { %v3237_v53 = vmul.f32 0.5, %v3234_v20  ;;  %v242_v20 = vadd.f32 %v7873_v48, %v148_v41  ;;  %v10913_v48 = vld [vmem:[#allocation112_spill] sm:$0xff] }
 0x4ff   :  { %v3152_v7 = vpop.f32.mrf.mxu3 }
 0x500   :  { %6165 = vtanh.f32 %v3237_v53  ;;  %3370 = vmatpush.bf16.msrb.mxu0 %v10324_v52  ;;  %3409 = vmatpush.bf16.msrb.mxu3 %v10326_v35  ;;  %v10911_v7 = vld [vmem:[#allocation78_spill] sm:$0xff] }
 0x501   :  { %v3191_v51 = vpop.f32.mrf.mxu2  ;;  %6167 = vtanh.f32 %v3228_v16 }
 0x504   :  { %3371 = vmatpush.bf16.msrb.mxu0 %v10708_v47  ;;  %3410 = vmatpush.bf16.msrb.mxu3 %v10709_v17 }
 0x506   :  { %v6166_v22 = vpop.eup %6165 }
 0x507   :  { %v3243_v37 = vmul.f32 0.5, %v6166_v22  ;;  %v6168_v42 = vpop.eup %6167  ;;  %v10914_v22 = vld [vmem:[#allocation113_spill] sm:$0xff] }
 0x508   :  { %3372 = vmatpush.bf16.msrb.mxu0 %v10710_v13  ;;  %3411 = vmatpush.bf16.msrb.mxu3 %v10518_v38 }
 0x509   :  { %v3246_v5 = vadd.f32 0.5, %v3243_v37 }
 0x50b   :  { %v3249_v19 = vsub.f32 1.0, %v3246_v5  ;;  %v3255_v2 = vmul.f32 %v3246_v5, %v7847_v27  ;;  %v10915_v5 = vld [vmem:[#allocation86_spill] sm:$0xff] }
 0x50c   :  { %3373 = vmatpush.bf16.msrb.mxu0 %v10333_v25  ;;  %3412 = vmatpush.bf16.msrb.mxu3 %v10520_v8 }
 0x50d   :  { %v3252_v11 = vmul.f32 %v6168_v42, %v3249_v19  ;;  %v10916_v42 = vld [vmem:[#allocation117_spill] sm:$0xff] }
 0x50f   :  { %v8173_v58 = vadd.f32 %v3255_v2, %v3252_v11  ;;  %v10917_v11 = vld [vmem:[#allocation120_spill] sm:$0xff] }
 0x510   :  { %3374 = vmatpush.bf16.msrb.mxu0 %v10907_v33  ;;  %3413 = vmatpush.bf16.msrb.mxu3 %v10908_v54 }
 0x511   :  { %v8179_v61 = vpack.c.bf16 %v8173_v58, %v8173_v58 }
 0x513   :  { %3284 = vmatmul.bf16.vlgmr.msrb.gmra.mxu1 %v8179_v61  ;;  %3323 = vmatmul.bf16.vlgmr.msra.gmra.mxu0 %v8179_v61 }
 0x514   :  { %3362 = vmatmul.bf16.vlgmr.msra.gmra.mxu3 %v8179_v61  ;;  %3380 = vmatpush.bf16.msrb.mxu1 %v10909_v43 }
 0x515   :  { %3419 = vmatpush.bf16.msra.mxu0 %v10714_v3  ;;  %3458 = vmatpush.bf16.msra.mxu3 %v10715_v6 }
 0x517   :  { %v3202_v27 = vpop.f32.mrf.mxu3 }
 0x518   :  { %v3203_v53 = vadd.f32 %v3202_v27, %v3190_v56  ;;  %3381 = vmatpush.bf16.msrb.mxu1 %v10717_v40  ;;  %v10919_v27 = vld [vmem:[#allocation121_spill] sm:$0xff] }
 0x519   :  { %3420 = vmatpush.bf16.msra.mxu0 %v10718_v1  ;;  %3459 = vmatpush.bf16.msra.mxu3 %v10910_v62 }
 0x51a   :  { %v3235_v23 = vadd.f32 %v3203_v53, %v242_v20  ;;  %v10920_v20 = vld [vmem:[#allocation124_spill] sm:$0xff] }
 0x51c   :  { %v3238_v30 = vmul.f32 0.5, %v3235_v23  ;;  %3382 = vmatpush.bf16.msrb.mxu1 %v10911_v7  ;;  %v10921_v23 = vld [vmem:[#allocation94_spill] sm:$0xff] }
 0x51d   :  { %3421 = vmatpush.bf16.msra.mxu0 %v10912_v49  ;;  %3460 = vmatpush.bf16.msra.mxu3 %v10913_v48 }
 0x51e   :  { %6169 = vtanh.f32 %v3238_v30  ;;  %v10922_v30 = vld [vmem:[#allocation125_spill] sm:$0xff] }
 0x51f   :  { %v3204_v28 = vpop.f32.mrf.mxu3  ;;  %6171 = vtanh.f32 %v8133_v15 }
 0x520   :  { %3383 = vmatpush.bf16.msrb.mxu1 %v10723_v45  ;;  %v10923_v28 = vld [vmem:[#allocation128_spill] sm:$0xff] }
 0x521   :  { %3422 = vmatpush.bf16.msra.mxu0 %v10914_v22  ;;  %3461 = vmatpush.bf16.msra.mxu3 %v10534_v44  ;;  %v11091_v44 = vld [vmem:[#allocation59_spill] sm:$0xff] }
 0x524   :  { %v6170_v16 = vpop.eup %6169  ;;  %3384 = vmatpush.bf16.msrb.mxu1 %v10915_v5  ;;  %v11090_v5 = vld [vmem:[#allocation224_spill] sm:$0xff] }
 0x525   :  { %v3244_v51 = vmul.f32 0.5, %v6170_v16  ;;  %3423 = vmatpush.bf16.msra.mxu0 %v10916_v42  ;;  %3462 = vmatpush.bf16.msra.mxu3 %v10917_v11  ;;  %v6172_v2 = vpop.eup %6171  ;;  %v10925_v16 = vld [vmem:[#allocation98_spill] sm:$0xff]  ;;  %v11079_v11 = vld [vmem:[#allocation43_spill] sm:$0xff] }
 0x527   :  { %v3247_v37 = vadd.f32 0.5, %v3244_v51  ;;  %v10926_v51 = vld [vmem:[#allocation129_spill] sm:$0xff] }
 0x528   :  { %3385 = vmatpush.bf16.msrb.mxu1 %v10539_v63 }
 0x529   :  { %v3250_v19 = vsub.f32 1.0, %v3247_v37  ;;  %v3256_v56 = vmul.f32 %v3247_v37, %v7894_v0  ;;  %3424 = vmatpush.bf16.msra.mxu0 %v10919_v27  ;;  %3463 = vmatpush.bf16.msra.mxu3 %v10920_v20  ;;  %v10924_v0 = vld [vmem:[#allocation70_spill] sm:$0xff]  ;;  %v10927_v37 = vld [vmem:[#allocation135_spill] sm:$0xff] }
 0x52a   :  { %v11072_v20 = vld [vmem:[#allocation222_spill] sm:$0xff] }
 0x52b   :  { %v3253_v41 = vmul.f32 %v6172_v2, %v3250_v19  ;;  %v47_v19 = vld [vmem:[%s9518_s0 + $0x20] sm:$0xff]  ;;  %v11073_v27 = vld [vmem:[#allocation62_spill] sm:$0xff] }
 0x52c   :  { %3386 = vmatpush.bf16.msrb.mxu1 %v10921_v23  ;;  %v10928_v2 = vld [vmem:[#allocation101_spill] sm:$0xff]  ;;  %75 = vperm.xlu2 %6097, %v47_v19   ;;  %v10942_v19 = vld [vmem:[#allocation148_spill] sm:$0xff] }
 0x52d   :  { %v8208_v15 = vadd.f32 %v3256_v56, %v3253_v41  ;;  %3425 = vmatpush.bf16.msra.mxu0 %v10922_v30  ;;  %3464 = vmatpush.bf16.msra.mxu3 %v10923_v28  ;;  %v10929_v41 = vld [vmem:[#allocation132_spill] sm:$0xff]  ;;  %v10931_v28 = vld [vmem:[#allocation75_spill] sm:$0xff]  ;;  %v10936_v30 = vld [vmem:[#allocation110_spill] sm:$0xff] }
 0x52e   :  { %v10930_v56 = vld [vmem:[#allocation136_spill] sm:$0xff]  ;;  %v10937_v23 = vld [vmem:[#allocation141_spill] sm:$0xff] }
 0x52f   :  { %10918 = vst [vmem:[#allocation84_spill] sm:$0xff] %v8208_v15  ;;  %v8214_v53 = vpack.c.bf16 %v8208_v15, %v8208_v15 }
 0x530   :  { %3387 = vmatpush.bf16.msrb.mxu1 %v10925_v16  ;;  %v10933_v16 = vld [vmem:[#allocation137_spill] sm:$0xff] }
 0x531   :  { %3297 = vmatmul.bf16.vlgmr.msrb.gmra.mxu2 %v8214_v53  ;;  %3336 = vmatmul.bf16.vlgmr.msra.gmra.mxu1 %v8214_v53 }
 0x532   :  { %3375 = vmatmul.bf16.vlgmr.msrb.gmra.mxu0 %v8214_v53  ;;  %3393 = vmatpush.bf16.msrb.mxu2 %v10924_v0  ;;  %v10932_v0 = vld [vmem:[#allocation106_spill] sm:$0xff] }
 0x533   :  { %3414 = vmatmul.bf16.vlgmr.msrb.gmra.mxu3 %v8214_v53  ;;  %3426 = vmatpush.bf16.msra.mxu0 %v10926_v51  ;;  %v10934_v51 = vld [vmem:[#allocation140_spill] sm:$0xff] }
 0x534   :  { %3465 = vmatpush.bf16.msra.mxu3 %v10927_v37  ;;  %3432 = vmatpush.bf16.msra.mxu1 %v10928_v2  ;;  %v10935_v37 = vld [vmem:[#allocation79_spill] sm:$0xff]  ;;  %v10938_v2 = vld [vmem:[#allocation144_spill] sm:$0xff] }
 0x536   :  { %3394 = vmatpush.bf16.msrb.mxu2 %v10931_v28  ;;  %v10941_v28 = vld [vmem:[#allocation145_spill] sm:$0xff] }
 0x537   :  { %3471 = vmatpush.bf16.msrb.mxu0 %v10929_v41  ;;  %v10939_v41 = vld [vmem:[#allocation83_spill] sm:$0xff] }
 0x538   :  { %3510 = vmatpush.bf16.msrb.mxu3 %v10930_v56  ;;  %3433 = vmatpush.bf16.msra.mxu1 %v10932_v0  ;;  %v10940_v56 = vld [vmem:[#allocation114_spill] sm:$0xff] }
 0x539   :  { %v11065_v0 = vld [vmem:[#allocation54_spill] sm:$0xff] }
 0x53a   :  { %3395 = vmatpush.bf16.msrb.mxu2 %v10935_v37  ;;  %v10951_v37 = vld [vmem:[#allocation95_spill] sm:$0xff] }
 0x53b   :  { %3472 = vmatpush.bf16.msrb.mxu0 %v10933_v16  ;;  %v10953_v16 = vld [vmem:[#allocation160_spill] sm:$0xff] }
 0x53c   :  { %3511 = vmatpush.bf16.msrb.mxu3 %v10934_v51  ;;  %3434 = vmatpush.bf16.msra.mxu1 %v10936_v30  ;;  %v10943_v51 = vld [vmem:[#allocation87_spill] sm:$0xff]  ;;  %v10950_v30 = vld [vmem:[#allocation156_spill] sm:$0xff] }
 0x53e   :  { %3396 = vmatpush.bf16.msrb.mxu2 %v10939_v41  ;;  %v10946_v41 = vld [vmem:[#allocation152_spill] sm:$0xff] }
 0x53f   :  { %3473 = vmatpush.bf16.msrb.mxu0 %v10937_v23  ;;  %v10944_v23 = vld [vmem:[#allocation118_spill] sm:$0xff] }
 0x540   :  { %3512 = vmatpush.bf16.msrb.mxu3 %v10938_v2  ;;  %3435 = vmatpush.bf16.msra.mxu1 %v10940_v56  ;;  %v10945_v2 = vld [vmem:[#allocation149_spill] sm:$0xff]  ;;  %v10947_v56 = vld [vmem:[#allocation91_spill] sm:$0xff] }
 0x541   :  { %3349 = vmatmul.bf16.vlgmr.msra.gmra.mxu2 %v8150_v31  ;;  %3388 = vmatmul.bf16.vlgmr.msrb.gmra.mxu1 %v8150_v31 }
 0x542   :  { %3397 = vmatpush.bf16.msrb.mxu2 %v10943_v51  ;;  %3427 = vmatmul.bf16.vlgmr.msra.gmra.mxu0 %v8150_v31  ;;  %v10952_v51 = vld [vmem:[#allocation157_spill] sm:$0xff] }
 0x543   :  { %3474 = vmatpush.bf16.msrb.mxu0 %v10941_v28  ;;  %3466 = vmatmul.bf16.vlgmr.msra.gmra.mxu3 %v8150_v31  ;;  %v10948_v28 = vld [vmem:[#allocation122_spill] sm:$0xff] }
 0x544   :  { %3513 = vmatpush.bf16.msrb.mxu3 %v10942_v19  ;;  %3436 = vmatpush.bf16.msra.mxu1 %v10944_v23  ;;  %v10949_v19 = vld [vmem:[#allocation153_spill] sm:$0xff]  ;;  %v10954_v23 = vld [vmem:[#allocation99_spill] sm:$0xff] }
 0x546   :  { %3398 = vmatpush.bf16.msrb.mxu2 %v10947_v56  ;;  %v10957_v56 = vld [vmem:[#allocation161_spill] sm:$0xff] }
 0x547   :  { %3475 = vmatpush.bf16.msrb.mxu0 %v10945_v2  ;;  %v10955_v2 = vld [vmem:[#allocation102_spill] sm:$0xff] }
 0x548   :  { %3514 = vmatpush.bf16.msrb.mxu3 %v10946_v41  ;;  %3437 = vmatpush.bf16.msra.mxu1 %v10948_v28  ;;  %v10956_v41 = vld [vmem:[#allocation130_spill] sm:$0xff]  ;;  %v10958_v28 = vld [vmem:[#allocation167_spill] sm:$0xff] }
 0x54a   :  { %3399 = vmatpush.bf16.msrb.mxu2 %v10951_v37  ;;  %v10961_v37 = vld [vmem:[#allocation168_spill] sm:$0xff] }
 0x54b   :  { %3476 = vmatpush.bf16.msrb.mxu0 %v10949_v19  ;;  %v10959_v19 = vld [vmem:[#allocation133_spill] sm:$0xff] }
 0x54c   :  { %3515 = vmatpush.bf16.msrb.mxu3 %v10950_v30  ;;  %3438 = vmatpush.bf16.msra.mxu1 %v10761_v12  ;;  %v10960_v30 = vld [vmem:[#allocation164_spill] sm:$0xff] }
 0x54d   :  { %v10973_v12 = vld [vmem:[#allocation180_spill] sm:$0xff] }
 0x54e   :  { %3400 = vmatpush.bf16.msrb.mxu2 %v10954_v23  ;;  %v10970_v23 = vld [vmem:[#allocation115_spill] sm:$0xff] }
 0x54f   :  { %3477 = vmatpush.bf16.msrb.mxu0 %v10952_v51  ;;  %v10972_v51 = vld [vmem:[#allocation177_spill] sm:$0xff] }
 0x550   :  { %3516 = vmatpush.bf16.msrb.mxu3 %v10953_v16  ;;  %3439 = vmatpush.bf16.msra.mxu1 %v10956_v41  ;;  %v10962_v16 = vld [vmem:[#allocation107_spill] sm:$0xff]  ;;  %v10963_v41 = vld [vmem:[#allocation138_spill] sm:$0xff] }
 0x551   :  { %3401 = vmatmul.bf16.vlgmr.msrb.gmra.mxu2 %v8179_v61 }
 0x552   :  { %3445 = vmatpush.bf16.msra.mxu2 %v10955_v2  ;;  %v10969_v2 = vld [vmem:[#allocation176_spill] sm:$0xff] }
 0x553   :  { %3478 = vmatpush.bf16.msrb.mxu0 %v10957_v56  ;;  %3440 = vmatmul.bf16.vlgmr.msra.gmra.mxu1 %v8179_v61  ;;  %v10964_v56 = vld [vmem:[#allocation169_spill] sm:$0xff] }
 0x554   :  { %3517 = vmatpush.bf16.msrb.mxu3 %v10958_v28  ;;  %3484 = vmatpush.bf16.msrb.mxu1 %v10959_v19  ;;  %v10965_v28 = vld [vmem:[#allocation172_spill] sm:$0xff]  ;;  %v10966_v19 = vld [vmem:[#allocation111_spill] sm:$0xff] }
 0x556   :  { %3446 = vmatpush.bf16.msra.mxu2 %v10962_v16  ;;  %3479 = vmatmul.bf16.vlgmr.msrb.gmra.mxu0 %v8179_v61  ;;  %v10971_v16 = vld [vmem:[#allocation146_spill] sm:$0xff] }
 0x557   :  { %3523 = vmatpush.bf16.msra.mxu0 %v10960_v30  ;;  %3518 = vmatmul.bf16.vlgmr.msrb.gmra.mxu3 %v8179_v61  ;;  %v10967_v30 = vld [vmem:[#allocation142_spill] sm:$0xff] }
 0x558   :  { %3562 = vmatpush.bf16.msra.mxu3 %v10961_v37  ;;  %3485 = vmatpush.bf16.msrb.mxu1 %v10963_v41  ;;  %v10968_v37 = vld [vmem:[#allocation173_spill] sm:$0xff]  ;;  %v10974_v41 = vld [vmem:[#allocation119_spill] sm:$0xff] }
 0x55a   :  { %3447 = vmatpush.bf16.msra.mxu2 %v10966_v19  ;;  %v10977_v19 = vld [vmem:[#allocation184_spill] sm:$0xff] }
 0x55b   :  { %3524 = vmatpush.bf16.msra.mxu0 %v10964_v56  ;;  %v10975_v56 = vld [vmem:[#allocation150_spill] sm:$0xff] }
 0x55c   :  { %3563 = vmatpush.bf16.msra.mxu3 %v10965_v28  ;;  %3486 = vmatpush.bf16.msrb.mxu1 %v10967_v30  ;;  %v10976_v28 = vld [vmem:[#allocation181_spill] sm:$0xff]  ;;  %v10978_v30 = vld [vmem:[#allocation123_spill] sm:$0xff] }
 0x55e   :  { %3448 = vmatpush.bf16.msra.mxu2 %v10970_v23  ;;  %v10980_v23 = vld [vmem:[#allocation188_spill] sm:$0xff] }
 0x55f   :  { %3525 = vmatpush.bf16.msra.mxu0 %v10968_v37  ;;  %v10979_v37 = vld [vmem:[#allocation154_spill] sm:$0xff] }
 0x560   :  { %3564 = vmatpush.bf16.msra.mxu3 %v10969_v2  ;;  %3487 = vmatpush.bf16.msrb.mxu1 %v10971_v16  ;;  %v10981_v16 = vld [vmem:[#allocation127_spill] sm:$0xff] }
 0x562   :  { %3449 = vmatpush.bf16.msra.mxu2 %v10974_v41  ;;  %v10983_v41 = vld [vmem:[#allocation192_spill] sm:$0xff] }
 0x563   :  { %3526 = vmatpush.bf16.msra.mxu0 %v10972_v51  ;;  %v11007_v51 = vld [vmem:[#allocation21_spill] sm:$0xff] }
 0x564   :  { %3565 = vmatpush.bf16.msra.mxu3 %v10973_v12  ;;  %3488 = vmatpush.bf16.msrb.mxu1 %v10975_v56  ;;  %v10982_v12 = vld [vmem:[#allocation189_spill] sm:$0xff]  ;;  %v10984_v56 = vld [vmem:[#allocation131_spill] sm:$0xff] }
 0x566   :  { %3450 = vmatpush.bf16.msra.mxu2 %v10978_v30  ;;  %v10987_v30 = vld [vmem:[#allocation193_spill] sm:$0xff] }
 0x567   :  { %3527 = vmatpush.bf16.msra.mxu0 %v10976_v28  ;;  %v10985_v28 = vld [vmem:[#allocation134_spill] sm:$0xff] }
 0x568   :  { %3566 = vmatpush.bf16.msra.mxu3 %v10977_v19  ;;  %3489 = vmatpush.bf16.msrb.mxu1 %v10979_v37  ;;  %v10986_v19 = vld [vmem:[#allocation162_spill] sm:$0xff]  ;;  %v10988_v37 = vld [vmem:[#allocation199_spill] sm:$0xff] }
 0x56a   :  { %3451 = vmatpush.bf16.msra.mxu2 %v10981_v16  ;;  %v10990_v16 = vld [vmem:[#allocation196_spill] sm:$0xff] }
 0x56b   :  { %3528 = vmatpush.bf16.msra.mxu0 %v10789_v18  ;;  %v11002_v18 = vld [vmem:[#allocation182_spill] sm:$0xff] }
 0x56c   :  { %3567 = vmatpush.bf16.msra.mxu3 %v10980_v23  ;;  %3490 = vmatpush.bf16.msrb.mxu1 %v10792_v55  ;;  %v10989_v23 = vld [vmem:[#allocation165_spill] sm:$0xff] }
 0x56d   :  { %v10999_v55 = vld [vmem:[#allocation13_spill] sm:$0xff] }
 0x56e   :  { %3452 = vmatpush.bf16.msra.mxu2 %v10984_v56 }
 0x56f   :  { %3529 = vmatpush.bf16.msra.mxu0 %v10982_v12  ;;  %v10991_v12 = vld [vmem:[#allocation139_spill] sm:$0xff] }
 0x570   :  { %3568 = vmatpush.bf16.msra.mxu3 %v10983_v41  ;;  %3491 = vmatpush.bf16.msrb.mxu1 %v10986_v19  ;;  %v10992_v19 = vld [vmem:[#allocation5_spill] sm:$0xff]  ;;  %v10998_v41 = vld [vmem:[#allocation178_spill] sm:$0xff] }
 0x571   :  { %3453 = vmatmul.bf16.vlgmr.msra.gmra.mxu2 %v8214_v53 }
 0x572   :  { %3497 = vmatpush.bf16.msrb.mxu2 %v10985_v28  ;;  %v10994_v28 = vld [vmem:[#allocation143_spill] sm:$0xff] }
 0x573   :  { %3530 = vmatpush.bf16.msra.mxu0 %v10987_v30  ;;  %3492 = vmatmul.bf16.vlgmr.msrb.gmra.mxu1 %v8214_v53  ;;  %v10993_v30 = vld [vmem:[#allocation200_spill] sm:$0xff] }
 0x574   :  { %3569 = vmatpush.bf16.msra.mxu3 %v10988_v37  ;;  %3536 = vmatpush.bf16.msra.mxu1 %v10989_v23  ;;  %v3272_v37 = vpop.f32.mrf.mxu0  ;;  %v10995_v23 = vld [vmem:[#allocation174_spill] sm:$0xff] }
 0x576   :  { %3498 = vmatpush.bf16.msrb.mxu2 %v10991_v12  ;;  %3531 = vmatmul.bf16.vlgmr.msra.gmra.mxu0 %v8214_v53  ;;  %v10997_v12 = vld [vmem:[#allocation147_spill] sm:$0xff]  ;;  %v3311_v56 = vpop.f32.mrf.mxu3 }
 0x577   :  { %3575 = vmatpush.bf16.msrb.mxu0 %v10990_v16  ;;  %3570 = vmatmul.bf16.vlgmr.msra.gmra.mxu3 %v8214_v53  ;;  %v10996_v16 = vld [vmem:[#allocation9_spill] sm:$0xff] }
 0x578   :  { %3537 = vmatpush.bf16.msra.mxu1 %v10803_v9  ;;  %3671 = vmatpush.bf16.msrb.mxu3 %v10992_v19  ;;  %v11000_v9 = vld [vmem:[#allocation206_spill] sm:$0xff] }
 0x57a   :  { %3499 = vmatpush.bf16.msrb.mxu2 %v10994_v28  ;;  %v11003_v28 = vld [vmem:[#allocation17_spill] sm:$0xff] }
 0x57b   :  { %3576 = vmatpush.bf16.msrb.mxu0 %v10993_v30  ;;  %v11001_v30 = vld [vmem:[#allocation151_spill] sm:$0xff] }
 0x57c   :  { %3538 = vmatpush.bf16.msra.mxu1 %v10995_v23  ;;  %3672 = vmatpush.bf16.msrb.mxu3 %v10996_v16  ;;  %v3274_v19 = vpop.f32.mrf.mxu0  ;;  %v11004_v23 = vld [vmem:[#allocation209_spill] sm:$0xff]  ;;  %v11005_v16 = vld [vmem:[#allocation155_spill] sm:$0xff] }
 0x57d   :  { %v11010_v19 = vld [vmem:[#allocation190_spill] sm:$0xff] }
 0x57e   :  { %3500 = vmatpush.bf16.msrb.mxu2 %v10997_v12  ;;  %v11006_v12 = vld [vmem:[#allocation186_spill] sm:$0xff] }
 0x57f   :  { %3577 = vmatpush.bf16.msrb.mxu0 %v10807_v50  ;;  %v3313_v50 = vpop.f32.mrf.mxu3 }
 0x580   :  { %3539 = vmatpush.bf16.msra.mxu1 %v10998_v41  ;;  %3673 = vmatpush.bf16.msrb.mxu3 %v10999_v55  ;;  %v11008_v41 = vld [vmem:[#allocation212_spill] sm:$0xff]  ;;  %v11009_v55 = vld [vmem:[#allocation159_spill] sm:$0xff]  ;;  %v11016_v50 = vld [vmem:[#allocation29_spill] sm:$0xff] }
 0x582   :  { %3501 = vmatpush.bf16.msrb.mxu2 %v11001_v30  ;;  %v11011_v30 = vld [vmem:[#allocation25_spill] sm:$0xff] }
 0x583   :  { %3578 = vmatpush.bf16.msrb.mxu0 %v11000_v9  ;;  %v11027_v9 = vld [vmem:[#allocation204_spill] sm:$0xff] }
 0x584   :  { %3540 = vmatpush.bf16.msra.mxu1 %v11002_v18  ;;  %3674 = vmatpush.bf16.msrb.mxu3 %v11003_v28  ;;  %v11012_v18 = vld [vmem:[#allocation216_spill] sm:$0xff]  ;;  %v11013_v28 = vld [vmem:[#allocation163_spill] sm:$0xff] }
 0x586   :  { %3502 = vmatpush.bf16.msrb.mxu2 %v11005_v16  ;;  %v11015_v16 = vld [vmem:[#allocation194_spill] sm:$0xff] }
 0x587   :  { %3579 = vmatpush.bf16.msrb.mxu0 %v11004_v23  ;;  %v11014_v23 = vld [vmem:[#allocation166_spill] sm:$0xff] }
 0x588   :  { %3541 = vmatpush.bf16.msra.mxu1 %v11006_v12  ;;  %3675 = vmatpush.bf16.msrb.mxu3 %v11007_v51  ;;  %v11017_v12 = vld [vmem:[#allocation220_spill] sm:$0xff]  ;;  %v11026_v51 = vld [vmem:[#allocation41_spill] sm:$0xff] }
 0x58a   :  { %3503 = vmatpush.bf16.msrb.mxu2 %v11009_v55  ;;  %v11019_v55 = vld [vmem:[#allocation6_spill] sm:$0xff] }
 0x58b   :  { %3580 = vmatpush.bf16.msrb.mxu0 %v11008_v41  ;;  %v11018_v41 = vld [vmem:[#allocation197_spill] sm:$0xff] }
 0x58c   :  { %3542 = vmatpush.bf16.msra.mxu1 %v11010_v19  ;;  %3676 = vmatpush.bf16.msrb.mxu3 %v11011_v30  ;;  %v11020_v30 = vld [vmem:[#allocation171_spill] sm:$0xff] }
 0x58e   :  { %3504 = vmatpush.bf16.msrb.mxu2 %v11013_v28  ;;  %v11021_v28 = vld [vmem:[#allocation33_spill] sm:$0xff] }
 0x58f   :  { %3581 = vmatpush.bf16.msrb.mxu0 %v11012_v18 }
 0x590   :  { %3543 = vmatpush.bf16.msra.mxu1 %v11015_v16  ;;  %3677 = vmatpush.bf16.msrb.mxu3 %v11016_v50  ;;  %v11023_v16 = vld [vmem:[#allocation201_spill] sm:$0xff]  ;;  %v11024_v50 = vld [vmem:[#allocation10_spill] sm:$0xff]  ;;  %v3285_v18 = vpop.f32.mrf.mxu1 }
 0x591   :  { %3505 = vmatmul.bf16.vlgmr.msrb.gmra.mxu2 %v8150_v31  ;;  %v3286_v19 = vadd.f32 %v3285_v18, %v3272_v37 }
 0x592   :  { %3549 = vmatpush.bf16.msra.mxu2 %v11014_v23  ;;  %v11022_v23 = vld [vmem:[#allocation36_spill] sm:$0xff] }
 0x593   :  { %3582 = vmatpush.bf16.msrb.mxu0 %v11017_v12  ;;  %3544 = vmatmul.bf16.vlgmr.msra.gmra.mxu1 %v8150_v31  ;;  %v11025_v12 = vld [vmem:[#allocation175_spill] sm:$0xff] }
 0x594   :  { %3588 = vmatpush.bf16.msrb.mxu1 %v11018_v41  ;;  %3678 = vmatpush.bf16.msrb.mxu3 %v11021_v28  ;;  %v3324_v41 = vpop.f32.mrf.mxu0  ;;  %v11030_v28 = vld [vmem:[#allocation45_spill] sm:$0xff] }
 0x596   :  { %3550 = vmatpush.bf16.msra.mxu2 %v11020_v30  ;;  %3583 = vmatmul.bf16.vlgmr.msrb.gmra.mxu0 %v8150_v31  ;;  %v11028_v30 = vld [vmem:[#allocation14_spill] sm:$0xff]  ;;  %v11029_v31 = vld [vmem:[#allocation179_spill] sm:$0xff] }
 0x597   :  { %3684 = vmatpush.bf16.msra.mxu0 %v11019_v55  ;;  %v3325_v55 = vadd.f32 %v3324_v41, %v3311_v56  ;;  %v11034_v41 = vld [vmem:[#allocation49_spill] sm:$0xff]  ;;  %v11035_v56 = vld [vmem:[#allocation210_spill] sm:$0xff] }
 0x598   :  { %3723 = vmatpush.bf16.msra.mxu3 %v11022_v23  ;;  %3589 = vmatpush.bf16.msrb.mxu1 %v11023_v16  ;;  %v11031_v23 = vld [vmem:[#allocation207_spill] sm:$0xff]  ;;  %v8354_v16 = vpop.f32.mrf.mxu3  ;;  %v3287_v18 = vpop.f32.mrf.mxu1 }
 0x599   :  { %v11043_v18 = vld [vmem:[#allocation218_spill] sm:$0xff] }
 0x59a   :  { %3551 = vmatpush.bf16.msra.mxu2 %v11025_v12  ;;  %v11033_v12 = vld [vmem:[#allocation183_spill] sm:$0xff] }
 0x59b   :  { %3685 = vmatpush.bf16.msra.mxu0 %v11024_v50  ;;  %v11032_v50 = vld [vmem:[#allocation18_spill] sm:$0xff] }
 0x59c   :  { %3724 = vmatpush.bf16.msra.mxu3 %v11026_v51  ;;  %3590 = vmatpush.bf16.msrb.mxu1 %v11027_v9  ;;  %v3326_v37 = vpop.f32.mrf.mxu0  ;;  %v11036_v9 = vld [vmem:[#allocation22_spill] sm:$0xff] }
 0x59d   :  { %v11040_v51 = vld [vmem:[#allocation26_spill] sm:$0xff] }
 0x59e   :  { %3552 = vmatpush.bf16.msra.mxu2 %v11029_v31  ;;  %v11038_v31 = vld [vmem:[#allocation53_spill] sm:$0xff]  ;;  %v11044_v37 = vld [vmem:[#allocation30_spill] sm:$0xff] }
 0x59f   :  { %3686 = vmatpush.bf16.msra.mxu0 %v11028_v30  ;;  %v11037_v30 = vld [vmem:[#allocation187_spill] sm:$0xff] }
 0x5a0   :  { %3725 = vmatpush.bf16.msra.mxu3 %v11030_v28  ;;  %3591 = vmatpush.bf16.msrb.mxu1 %v11031_v23  ;;  %v11039_v28 = vld [vmem:[#allocation214_spill] sm:$0xff]  ;;  %v3365_v23 = vpop.f32.mrf.mxu3 }
 0x5a1   :  { %v11049_v23 = vld [vmem:[#allocation7_spill] sm:$0xff] }
 0x5a2   :  { %3553 = vmatpush.bf16.msra.mxu2 %v11033_v12  ;;  %v11042_v12 = vld [vmem:[#allocation57_spill] sm:$0xff] }
 0x5a3   :  { %3687 = vmatpush.bf16.msra.mxu0 %v11032_v50  ;;  %v11041_v50 = vld [vmem:[#allocation191_spill] sm:$0xff] }
 0x5a4   :  { %3726 = vmatpush.bf16.msra.mxu3 %v11034_v41  ;;  %3592 = vmatpush.bf16.msrb.mxu1 %v11035_v56  ;;  %v11045_v56 = vld [vmem:[#allocation195_spill] sm:$0xff] }
 0x5a6   :  { %3554 = vmatpush.bf16.msra.mxu2 %v11037_v30  ;;  %v11047_v30 = vld [vmem:[#allocation61_spill] sm:$0xff] }
 0x5a7   :  { %3688 = vmatpush.bf16.msra.mxu0 %v11036_v9  ;;  %v11046_v9 = vld [vmem:[#allocation198_spill] sm:$0xff] }
 0x5a8   :  { %3727 = vmatpush.bf16.msra.mxu3 %v11038_v31  ;;  %3593 = vmatpush.bf16.msrb.mxu1 %v11039_v28  ;;  %v11048_v31 = vld [vmem:[#allocation221_spill] sm:$0xff]  ;;  %v11056_v28 = vld [vmem:[#allocation42_spill] sm:$0xff] }
 0x5aa   :  { %3555 = vmatpush.bf16.msra.mxu2 %v11041_v50  ;;  %v11051_v50 = vld [vmem:[#allocation202_spill] sm:$0xff] }
 0x5ab   :  { %3689 = vmatpush.bf16.msra.mxu0 %v11040_v51  ;;  %v11050_v51 = vld [vmem:[#allocation34_spill] sm:$0xff] }
 0x5ac   :  { %3728 = vmatpush.bf16.msra.mxu3 %v11042_v12  ;;  %3594 = vmatpush.bf16.msrb.mxu1 %v11043_v18  ;;  %v11052_v12 = vld [vmem:[#allocation37_spill] sm:$0xff]  ;;  %v11054_v18 = vld [vmem:[#allocation11_spill] sm:$0xff] }
 0x5ae   :  { %3556 = vmatpush.bf16.msra.mxu2 %v11045_v56  ;;  %v3337_v56 = vpop.f32.mrf.mxu1 }
 0x5af   :  { %3690 = vmatpush.bf16.msra.mxu0 %v11044_v37  ;;  %v11053_v37 = vld [vmem:[#allocation65_spill] sm:$0xff] }
 0x5b0   :  { %3729 = vmatpush.bf16.msra.mxu3 %v11047_v30  ;;  %3595 = vmatpush.bf16.msrb.mxu1 %v11048_v31  ;;  %v3376_v30 = vpop.f32.mrf.mxu0  ;;  %v11055_v31 = vld [vmem:[#allocation205_spill] sm:$0xff] }
 0x5b1   :  { %3557 = vmatmul.bf16.vlgmr.msra.gmra.mxu2 %v8179_v61 }
 0x5b2   :  { %3601 = vmatpush.bf16.msrb.mxu2 %v11046_v9  ;;  %v8380_v9 = vadd.f32 %v3337_v56, %v3325_v55  ;;  %v11060_v55 = vld [vmem:[#allocation19_spill] sm:$0xff] }
 0x5b3   :  { %3691 = vmatpush.bf16.msra.mxu0 %v11050_v51  ;;  %3596 = vmatmul.bf16.vlgmr.msrb.gmra.mxu1 %v8179_v61  ;;  %v11058_v51 = vld [vmem:[#allocation208_spill] sm:$0xff]  ;;  %v11061_v56 = vld [vmem:[#allocation211_spill] sm:$0xff] }
 0x5b4   :  { %3697 = vmatpush.bf16.msra.mxu1 %v11049_v23  ;;  %3730 = vmatpush.bf16.msra.mxu3 %v11053_v37  ;;  %v11057_v23 = vld [vmem:[#allocation15_spill] sm:$0xff] }
 0x5b6   :  { %3602 = vmatpush.bf16.msrb.mxu2 %v11051_v50  ;;  %v3298_v50 = vpop.f32.mrf.mxu2  ;;  %v3415_v41 = vpop.f32.mrf.mxu3 }
 0x5b7   :  { %3736 = vmatpush.bf16.msrb.mxu0 %v11052_v12  ;;  %v11059_v12 = vld [vmem:[#allocation46_spill] sm:$0xff]  ;;  %v3299_v61 = vadd.f32 %v3298_v50, %v3286_v19  ;;  %v3339_v37 = vpop.f32.mrf.mxu1  ;;  %v8397_v50 = vpop.permute.xlu2 %75 }
 0x5b8   :  { %3698 = vmatpush.bf16.msra.mxu1 %v11054_v18  ;;  %v3378_v2 = vpop.f32.mrf.mxu0  ;;  %v11062_v18 = vld [vmem:[#allocation50_spill] sm:$0xff]  ;;  %v11066_v37 = vld [vmem:[#allocation213_spill] sm:$0xff] }
 0x5b9   :  { %v48_v19 = vld [vmem:[%s9518_s0 + $0x28] sm:$0xff] }
 0x5ba   :  { %3603 = vmatpush.bf16.msrb.mxu2 %v11055_v31  ;;  %v11063_v31 = vld [vmem:[#allocation23_spill] sm:$0xff]  ;;  %80 = vperm.xlu2 %6097, %v48_v19  }
 0x5bb   :  { %3737 = vmatpush.bf16.msrb.mxu0 %v11056_v28  ;;  %v11064_v28 = vld [vmem:[#allocation215_spill] sm:$0xff] }
 0x5bc   :  { %3699 = vmatpush.bf16.msra.mxu1 %v11057_v23 }
 0x5be   :  { %3604 = vmatpush.bf16.msrb.mxu2 %v11058_v51  ;;  %v3300_v23 = vpop.f32.mrf.mxu2  ;;  %v3417_v2 = vpop.f32.mrf.mxu3  ;;  %v11071_v51 = vld [vmem:[#allocation31_spill] sm:$0xff] }
 0x5bf   :  { %3738 = vmatpush.bf16.msrb.mxu0 %v11059_v12  ;;  %v11074_v2 = vld [vmem:[#allocation8_spill] sm:$0xff] }
 0x5c0   :  { %3700 = vmatpush.bf16.msra.mxu1 %v11060_v55  ;;  %v11067_v55 = vld [vmem:[#allocation27_spill] sm:$0xff]  ;;  %v3428_v23 = vpop.f32.mrf.mxu0 }
 0x5c2   :  { %3605 = vmatpush.bf16.msrb.mxu2 %v11061_v56  ;;  %v149_v56 = vmul.f32 %v11066_v37, %v8397_v50 }
 0x5c3   :  { %3739 = vmatpush.bf16.msrb.mxu0 %v11062_v18  ;;  %v11068_v18 = vld [vmem:[#allocation219_spill] sm:$0xff] }
 0x5c4   :  { %3701 = vmatpush.bf16.msra.mxu1 %v11063_v31  ;;  %v3389_v31 = vpop.f32.mrf.mxu1 }
 0x5c6   :  { %3606 = vmatpush.bf16.msrb.mxu2 %v11064_v28  ;;  %v11069_v28 = vld [vmem:[#allocation58_spill] sm:$0xff]  ;;  %v3350_v19 = vpop.f32.mrf.mxu2  ;;  %v3467_v63 = vpop.f32.mrf.mxu3 }
 0x5c7   :  { %3740 = vmatpush.bf16.msrb.mxu0 %v11065_v0  ;;  %v11070_v0 = vld [vmem:[#allocation217_spill] sm:$0xff]  ;;  %v3364_v37 = vadd.f32 %v8354_v16, %v3350_v19  ;;  %v11080_v16 = vld [vmem:[#allocation16_spill] sm:$0xff] }
 0x5c8   :  { %3702 = vmatpush.bf16.msra.mxu1 %v11067_v55  ;;  %v243_v12 = vadd.f32 %v11070_v0, %v149_v56  ;;  %v11076_v56 = vld [vmem:[#allocation38_spill] sm:$0xff]  ;;  %v11078_v0 = vld [vmem:[#allocation12_spill] sm:$0xff] }
 0x5ca   :  { %3607 = vmatpush.bf16.msrb.mxu2 %v11068_v18  ;;  %v3614_v55 = vadd.f32 %v3299_v61, %v243_v12  ;;  %v11075_v18 = vld [vmem:[#allocation35_spill] sm:$0xff] }
 0x5cb   :  { %3741 = vmatpush.bf16.msrb.mxu0 %v11069_v28  ;;  %v3377_v28 = vadd.f32 %v3376_v30, %v3364_v37  ;;  %v11082_v30 = vld [vmem:[#allocation20_spill] sm:$0xff] }
 0x5cc   :  { %3703 = vmatpush.bf16.msra.mxu1 %v11071_v51  ;;  %v3391_v15 = vpop.f32.mrf.mxu1  ;;  %v11077_v51 = vld [vmem:[#allocation66_spill] sm:$0xff] }
 0x5ce   :  { %3608 = vmatpush.bf16.msrb.mxu2 %v11072_v20  ;;  %v3430_v20 = vpop.f32.mrf.mxu0  ;;  %v3469_v12 = vpop.f32.mrf.mxu3 }
 0x5cf   :  { %3742 = vmatpush.bf16.msrb.mxu0 %v11073_v27  ;;  %v3617_v27 = vmul.f32 0.5, %v3614_v55  ;;  %v11083_v20 = vld [vmem:[#allocation226_spill] sm:$0xff] }
 0x5d0   :  { %3704 = vmatpush.bf16.msra.mxu1 %v11075_v18 }
 0x5d1   :  { %3609 = vmatmul.bf16.vlgmr.msrb.gmra.mxu2 %v8214_v53  ;;  %6173 = vtanh.f32 %v3617_v27  ;;  %v11081_v53 = vld [vmem:[#allocation47_spill] sm:$0xff] }
 0x5d2   :  { %3710 = vmatpush.bf16.msra.mxu2 %v11074_v2  ;;  %v3352_v2 = vpop.f32.mrf.mxu2  ;;  %v11086_v27 = vld [vmem:[#allocation227_spill] sm:$0xff] }
 0x5d3   :  { %3743 = vmatpush.bf16.msrb.mxu0 %v11077_v51  ;;  %v151_v51 = vmul.f32 %v11083_v20, %v8397_v50 }
 0x5d4   :  { %3749 = vmatpush.bf16.msrb.mxu1 %v11076_v56  ;;  %v3441_v61 = vpop.f32.mrf.mxu1 }
 0x5d5   :  { %v3442_v15 = vadd.f32 %v3441_v61, %v3428_v23  ;;  %v245_v12 = vadd.f32 %v11086_v27, %v151_v51 }
 0x5d6   :  { %3711 = vmatpush.bf16.msra.mxu2 %v11078_v0  ;;  %v3480_v37 = vpop.f32.mrf.mxu0  ;;  %v11084_v0 = vld [vmem:[#allocation51_spill] sm:$0xff] }
 0x5d7   :  { %v3481_v19 = vadd.f32 %v3480_v37, %v3467_v63  ;;  %v6174_v55 = vpop.eup %6173  ;;  %v11089_v37 = vld [vmem:[#allocation28_spill] sm:$0xff]  ;;  %v3616_v42 = vadd.f32 %v3377_v28, %v245_v12  ;;  %v11097_v28 = vld [vmem:[#allocation67_spill] sm:$0xff] }
 0x5d8   :  { %3750 = vmatpush.bf16.msrb.mxu1 %v11079_v11  ;;  %v11085_v11 = vld [vmem:[#allocation24_spill] sm:$0xff] }
 0x5da   :  { %3712 = vmatpush.bf16.msra.mxu2 %v11080_v16  ;;  %v3402_v2 = vpop.f32.mrf.mxu2  ;;  %v3623_v16 = vmul.f32 0.5, %v6174_v55  ;;  %v3519_v61 = vpop.f32.mrf.mxu3  ;;  %v11092_v55 = vld [vmem:[#allocation225_spill] sm:$0xff] }
 0x5db   :  { %v3403_v56 = vadd.f32 %v3402_v2, %v3389_v31  ;;  %v11093_v31 = vld [vmem:[#allocation32_spill] sm:$0xff] }
 0x5dc   :  { %3751 = vmatpush.bf16.msrb.mxu1 %v11081_v53  ;;  %v11087_v53 = vld [vmem:[#allocation55_spill] sm:$0xff]  ;;  %v3443_v63 = vpop.f32.mrf.mxu1 }
 0x5dd   :  { %v3416_v20 = vadd.f32 %v3415_v41, %v3403_v56  ;;  %v11095_v41 = vld [vmem:[#allocation39_spill] sm:$0xff] }
 0x5de   :  { %3713 = vmatpush.bf16.msra.mxu2 %v11082_v30  ;;  %v11088_v30 = vld [vmem:[#allocation223_spill] sm:$0xff]  ;;  %v3482_v18 = vpop.f32.mrf.mxu0 }
 0x5df   :  { %v150_v23 = vmul.f32 %v11088_v30, %v8397_v50  ;;  %v11094_v30 = vld [vmem:[#allocation63_spill] sm:$0xff]  ;;  %v11096_v18 = vld [vmem:[#allocation40_spill] sm:$0xff] }
 0x5e0   :  { %3752 = vmatpush.bf16.msrb.mxu1 %v11084_v0  ;;  %v3626_v0 = vadd.f32 0.5, %v3623_v16  ;;  %v11098_v16 = vld [vmem:[#allocation44_spill] sm:$0xff] }
 0x5e1   :  { %v244_v51 = vadd.f32 %v11092_v55, %v150_v23 }
 0x5e2   :  { %3714 = vmatpush.bf16.msra.mxu2 %v11085_v11  ;;  %v3629_v11 = vadd.f32 %v3416_v20, %v11090_v5  ;;  %v3404_v27 = vpop.f32.mrf.mxu2 }
 0x5e3   :  { %v3615_v63 = vadd.f32 %v8380_v9, %v244_v51  ;;  %v11100_v27 = vld [vmem:[#allocation52_spill] sm:$0xff] }
 0x5e4   :  { %3753 = vmatpush.bf16.msrb.mxu1 %v11087_v53  ;;  %v3632_v2 = vmul.f32 %v3629_v11, %v3626_v0  ;;  %v3619_v53 = vmul.f32 0.5, %v3616_v42  ;;  %v11099_v11 = vld [vmem:[#allocation48_spill] sm:$0xff] }
 0x5e5   :  { %v3618_v56 = vmul.f32 0.5, %v3615_v63 }
 0x5e6   :  { %3715 = vmatpush.bf16.msra.mxu2 %v11089_v37  ;;  %v3521_v37 = vpop.f32.mrf.mxu3  ;;  %6175 = vtanh.f32 %v3619_v53 }
 0x5e7   :  { %6177 = vtanh.f32 %v3618_v56 }
 0x5e8   :  { %3754 = vmatpush.bf16.msrb.mxu1 %v11091_v44 }
 0x5ea   :  { %3716 = vmatpush.bf16.msra.mxu2 %v11093_v31  ;;  %v11103_v31 = vld [vmem:[#allocation60_spill] sm:$0xff] }
 0x5ec   :  { %3755 = vmatpush.bf16.msrb.mxu1 %v11094_v30  ;;  %v6176_v20 = vpop.eup %6175 }
 0x5ed   :  { %v3625_v42 = vmul.f32 0.5, %v6176_v20  ;;  %v6178_v9 = vpop.eup %6177 }
 0x5ee   :  { %3717 = vmatpush.bf16.msra.mxu2 %v11095_v41  ;;  %v3624_v53 = vmul.f32 0.5, %v6178_v9  ;;  %v11102_v41 = vld [vmem:[#allocation228_spill] sm:$0xff]  ;;  %v11105_v9 = vld [vmem:[#allocation71_spill] sm:$0xff] }
 0x5ef   :  { %v3628_v37 = vadd.f32 0.5, %v3625_v42 }
 0x5f0   :  { %3756 = vmatpush.bf16.msrb.mxu1 %v11097_v28  ;;  %v3493_v0 = vpop.f32.mrf.mxu1  ;;  %v3627_v28 = vadd.f32 0.5, %v3624_v53 }
 0x5f1   :  { %v3494_v12 = vadd.f32 %v3493_v0, %v3481_v19  ;;  %v11104_v0 = vld [vmem:[#allocation64_spill] sm:$0xff] }
 0x5f2   :  { %3762 = vmatpush.bf16.msrb.mxu2 %v11096_v18  ;;  %v11101_v18 = vld [vmem:[#allocation56_spill] sm:$0xff] }
 0x5f3   :  { %v3532_v23 = vpop.f32.mrf.mxu0  ;;  %v3631_v51 = vadd.f32 %v3494_v12, %v10901_v57 }
 0x5f5   :  { %v8442_v63 = vmul.f32 %v3631_v51, %v3628_v37 }
 0x5f6   :  { %3763 = vmatpush.bf16.msrb.mxu2 %v11098_v16  ;;  %v3454_v16 = vpop.f32.mrf.mxu2 }
 0x5f7   :  { %v3455_v56 = vadd.f32 %v3454_v16, %v3442_v15  ;;  %v11106_v15 = vld [vmem:[#allocation230_spill] sm:$0xff] }
 0x5f8   :  { %v3495_v30 = vpop.f32.mrf.mxu1  ;;  %v155_v16 = vmul.f32 %v11106_v15, %v8397_v50 }
 0x5fa   :  { %3764 = vmatpush.bf16.msrb.mxu2 %v11099_v11  ;;  %v3630_v11 = vadd.f32 %v3455_v56, %v11102_v41  ;;  %v3571_v20 = vpop.f32.mrf.mxu3  ;;  %v249_v53 = vadd.f32 %v10905_v46, %v155_v16 }
 0x5fc   :  { %v3633_v19 = vmul.f32 %v3630_v11, %v3627_v28 }
 0x5fe   :  { %3765 = vmatpush.bf16.msrb.mxu2 %v11100_v27  ;;  %v3534_v27 = vpop.f32.mrf.mxu0  ;;  %v3456_v42 = vpop.f32.mrf.mxu2 }
 0x5ff   :  { %v152_v27 = vmul.f32 %v10906_v4, %v8397_v50 }
 0x602   :  { %3766 = vmatpush.bf16.msrb.mxu2 %v11101_v18  ;;  %v3573_v12 = vpop.f32.mrf.mxu3 }
 0x603   :  { %v246_v12 = vadd.f32 %v10509_v21, %v152_v27 }
 0x606   :  { %3767 = vmatpush.bf16.msrb.mxu2 %v11103_v31  ;;  %v3635_v31 = vadd.f32 %v3632_v2, %v246_v12 }
 0x60a   :  { %3768 = vmatpush.bf16.msrb.mxu2 %v11104_v0 }
 0x60e   :  { %3769 = vmatpush.bf16.msrb.mxu2 %v11105_v9 }
 0x610   :  { %v3545_v18 = vpop.f32.mrf.mxu1 }
 0x613   :  { %v8448_v37 = vpop.f32.mrf.mxu0 }
 0x614   :  { %v3506_v51 = vpop.f32.mrf.mxu2 }
 0x615   :  { %v3520_v30 = vadd.f32 %v3519_v61, %v3506_v51 }
 0x617   :  { %v3533_v28 = vadd.f32 %v3532_v23, %v3520_v30 }
 0x618   :  { %v3547_v11 = vpop.f32.mrf.mxu1 }
 0x619   :  { %v3641_v56 = vadd.f32 %v3533_v28, %v249_v53 }
 0x61b   :  { %v3586_v42 = vpop.f32.mrf.mxu0  ;;  %v3644_v9 = vmul.f32 0.5, %v3641_v56 }
 0x61c   :  { %v3508_v0 = vpop.f32.mrf.mxu2 }
 0x61d   :  { %6179 = vtanh.f32 %v3644_v9  ;;  %v156_v0 = vmul.f32 %v10510_v32, %v8397_v50 }
 0x61e   :  { %6181 = vtanh.f32 %v3635_v31  ;;  %v153_v31 = vmul.f32 %v10512_v34, %v8397_v50 }
 0x623   :  { %v6180_v57 = vpop.eup %6179 }
 0x624   :  { %v3650_v15 = vmul.f32 0.5, %v6180_v57  ;;  %v6182_v16 = vpop.eup %6181  ;;  %v250_v57 = vadd.f32 %v10511_v59, %v156_v0 }
 0x626   :  { %v3653_v41 = vadd.f32 0.5, %v3650_v15  ;;  %v247_v15 = vadd.f32 %v10515_v29, %v153_v31 }
 0x628   :  { %v3656_v44 = vsub.f32 1.0, %v3653_v41  ;;  %v3662_v51 = vmul.f32 %v3653_v41, %v8146_v26 }
 0x62a   :  { %v3659_v61 = vmul.f32 %v6182_v16, %v3656_v44 }
 0x62c   :  { %v8457_v4 = vadd.f32 %v3662_v51, %v3659_v61  ;;  %v8495_v51 = vld [vmem:[%s9519_s1 + $0x8] ss:$0 sm:$0xff] }
 0x62d   :  { %v157_v0 = vmul.f32 %v8495_v51, %v8397_v50 }
 0x62e   :  { %v8461_v23 = vpack.c.bf16 %v8457_v4, %v8457_v4 }
 0x630   :  { %v3597_v53 = vpop.f32.mrf.mxu1  ;;  %3679 = vmatmul.bf16.vlgmr.msrb.gmra.mxu3 %v8461_v23  ;;  %3718 = vmatmul.bf16.vlgmr.msra.gmra.mxu2 %v8461_v23 }
 0x631   :  { %3775 = vmatpush.bf16.msrb.mxu3 %v10312_v36  ;;  %3814 = vmatpush.bf16.msra.mxu2 %v10313_v39 }
 0x634   :  { %v3558_v44 = vpop.f32.mrf.mxu2 }
 0x635   :  { %v3559_v26 = vadd.f32 %v3558_v44, %v3545_v18  ;;  %3776 = vmatpush.bf16.msrb.mxu3 %v10316_v14  ;;  %3815 = vmatpush.bf16.msra.mxu2 %v10317_v10  ;;  %v3636_v18 = vadd.f32 %v3633_v19, %v247_v15 }
 0x637   :  { %v3572_v2 = vadd.f32 %v3571_v20, %v3559_v26 }
 0x638   :  { %v3599_v9 = vpop.f32.mrf.mxu1 }
 0x639   :  { %v3642_v41 = vadd.f32 %v3572_v2, %v250_v57  ;;  %3777 = vmatpush.bf16.msrb.mxu3 %v10513_v60  ;;  %3816 = vmatpush.bf16.msra.mxu2 %v10514_v24  ;;  %v11107_v57 = vld [vmem:[#allocation73_spill] sm:$0xff] }
 0x63a   :  { %v154_v26 = vmul.f32 %v11107_v57, %v8397_v50 }
 0x63b   :  { %v3645_v30 = vmul.f32 0.5, %v3642_v41  ;;  %v11108_v41 = vld [vmem:[#allocation238_spill] sm:$0xff] }
 0x63c   :  { %v3560_v27 = vpop.f32.mrf.mxu2  ;;  %v248_v9 = vadd.f32 %v11108_v41, %v154_v26 }
 0x63d   :  { %6183 = vtanh.f32 %v3645_v30  ;;  %3778 = vmatpush.bf16.msrb.mxu3 %v10324_v52  ;;  %3817 = vmatpush.bf16.msra.mxu2 %v10326_v35 }
 0x63e   :  { %6185 = vtanh.f32 %v3636_v18  ;;  %v3637_v30 = vadd.f32 %v8442_v63, %v248_v9  ;;  %v11111_v63 = vld [vmem:[#allocation117_spill] sm:$0xff]  ;;  %v11118_v9 = vld [vmem:[#allocation94_spill] sm:$0xff] }
 0x641   :  { %3779 = vmatpush.bf16.msrb.mxu3 %v10708_v47  ;;  %3818 = vmatpush.bf16.msra.mxu2 %v10709_v17 }
 0x643   :  { %v6184_v20 = vpop.eup %6183 }
 0x644   :  { %v3651_v28 = vmul.f32 0.5, %v6184_v20  ;;  %v6186_v42 = vpop.eup %6185  ;;  %v11109_v20 = vld [vmem:[#allocation116_spill] sm:$0xff] }
 0x645   :  { %3780 = vmatpush.bf16.msrb.mxu3 %v10710_v13  ;;  %3819 = vmatpush.bf16.msra.mxu2 %v10518_v38 }
 0x646   :  { %v3654_v11 = vadd.f32 0.5, %v3651_v28 }
 0x648   :  { %v3657_v56 = vsub.f32 1.0, %v3654_v11  ;;  %v3663_v19 = vmul.f32 %v3654_v11, %v8173_v58  ;;  %v3598_v58 = vadd.f32 %v3597_v53, %v8448_v37  ;;  %v8511_v37 = vld [vmem:[%s9521_s3 + $0x8] ss:$0 sm:$0xff] }
 0x649   :  { %3781 = vmatpush.bf16.msrb.mxu3 %v10333_v25  ;;  %3820 = vmatpush.bf16.msra.mxu2 %v10520_v8  ;;  %v251_v53 = vadd.f32 %v8511_v37, %v157_v0  ;;  %v11110_v11 = vld [vmem:[#allocation86_spill] sm:$0xff]  ;;  %v11113_v0 = vld [vmem:[#allocation84_spill] sm:$0xff] }
 0x64a   :  { %v3660_v12 = vmul.f32 %v6186_v42, %v3657_v56  ;;  %v11112_v42 = vld [vmem:[#allocation120_spill] sm:$0xff] }
 0x64c   :  { %v8484_v16 = vadd.f32 %v3663_v19, %v3660_v12 }
 0x64d   :  { %3782 = vmatpush.bf16.msrb.mxu3 %v10907_v33  ;;  %3821 = vmatpush.bf16.msra.mxu2 %v10908_v54 }
 0x64e   :  { %v8490_v61 = vpack.c.bf16 %v8484_v16, %v8484_v16 }
 0x650   :  { %3692 = vmatmul.bf16.vlgmr.msra.gmra.mxu0 %v8490_v61  ;;  %3731 = vmatmul.bf16.vlgmr.msra.gmra.mxu3 %v8490_v61 }
 0x651   :  { %3770 = vmatmul.bf16.vlgmr.msrb.gmra.mxu2 %v8490_v61  ;;  %3788 = vmatpush.bf16.msra.mxu0 %v10909_v43 }
 0x652   :  { %3827 = vmatpush.bf16.msra.mxu3 %v10714_v3  ;;  %3866 = vmatpush.bf16.msrb.mxu2 %v10715_v6 }
 0x654   :  { %v3610_v44 = vpop.f32.mrf.mxu2 }
 0x655   :  { %v3611_v31 = vadd.f32 %v3610_v44, %v3598_v58  ;;  %3789 = vmatpush.bf16.msra.mxu0 %v10717_v40  ;;  %v11114_v44 = vld [vmem:[#allocation90_spill] sm:$0xff] }
 0x656   :  { %3828 = vmatpush.bf16.msra.mxu3 %v10718_v1  ;;  %3867 = vmatpush.bf16.msrb.mxu2 %v10910_v62 }
 0x657   :  { %v3643_v2 = vadd.f32 %v3611_v31, %v251_v53  ;;  %v11116_v53 = vld [vmem:[#allocation121_spill] sm:$0xff]  ;;  %v11117_v31 = vld [vmem:[#allocation124_spill] sm:$0xff] }
 0x659   :  { %v3646_v50 = vmul.f32 0.5, %v3643_v2  ;;  %3790 = vmatpush.bf16.msra.mxu0 %v10911_v7 }
 0x65a   :  { %3829 = vmatpush.bf16.msra.mxu3 %v10912_v49  ;;  %3868 = vmatpush.bf16.msrb.mxu2 %v10913_v48 }
 0x65b   :  { %6187 = vtanh.f32 %v3646_v50  ;;  %v11119_v50 = vld [vmem:[#allocation125_spill] sm:$0xff] }
 0x65c   :  { %v3612_v15 = vpop.f32.mrf.mxu2  ;;  %6189 = vtanh.f32 %v3637_v30  ;;  %v11121_v30 = vld [vmem:[#allocation70_spill] sm:$0xff] }
 0x65d   :  { %3791 = vmatpush.bf16.msra.mxu0 %v10723_v45  ;;  %v11120_v15 = vld [vmem:[#allocation128_spill] sm:$0xff] }
 0x65e   :  { %3830 = vmatpush.bf16.msra.mxu3 %v10914_v22  ;;  %3869 = vmatpush.bf16.msrb.mxu2 %v11109_v20 }
 0x661   :  { %v6188_v27 = vpop.eup %6187  ;;  %3792 = vmatpush.bf16.msra.mxu0 %v11110_v11  ;;  %v11272_v11 = vld [vmem:[#allocation58_spill] sm:$0xff] }
 0x662   :  { %v3652_v18 = vmul.f32 0.5, %v6188_v27  ;;  %3831 = vmatpush.bf16.msra.mxu3 %v11111_v63  ;;  %3870 = vmatpush.bf16.msrb.mxu2 %v11112_v42  ;;  %v6190_v12 = vpop.eup %6189  ;;  %v11122_v27 = vld [vmem:[#allocation98_spill] sm:$0xff]  ;;  %v11270_v42 = vld [vmem:[#allocation27_spill] sm:$0xff] }
 0x663   :  { %v11271_v63 = vld [vmem:[#allocation219_spill] sm:$0xff] }
 0x664   :  { %v3655_v28 = vadd.f32 0.5, %v3652_v18  ;;  %v11123_v18 = vld [vmem:[#allocation129_spill] sm:$0xff] }
 0x665   :  { %3793 = vmatpush.bf16.msra.mxu0 %v11114_v44  ;;  %v11240_v44 = vld [vmem:[#allocation53_spill] sm:$0xff] }
 0x666   :  { %v3658_v56 = vsub.f32 1.0, %v3655_v28  ;;  %v3664_v58 = vmul.f32 %v3655_v28, %v11113_v0  ;;  %3832 = vmatpush.bf16.msra.mxu3 %v11116_v53  ;;  %3871 = vmatpush.bf16.msrb.mxu2 %v11117_v31  ;;  %v11124_v28 = vld [vmem:[#allocation135_spill] sm:$0xff]  ;;  %v11208_v31 = vld [vmem:[#allocation186_spill] sm:$0xff]  ;;  %v11209_v53 = vld [vmem:[#allocation21_spill] sm:$0xff] }
 0x667   :  { %v11128_v0 = vld [vmem:[#allocation75_spill] sm:$0xff] }
 0x668   :  { %v3661_v19 = vmul.f32 %v6190_v12, %v3658_v56  ;;  %v11125_v56 = vld [vmem:[#allocation101_spill] sm:$0xff]  ;;  %v11126_v12 = vld [vmem:[#allocation132_spill] sm:$0xff] }
 0x669   :  { %3794 = vmatpush.bf16.msra.mxu0 %v11118_v9  ;;  %v11201_v9 = vld [vmem:[#allocation13_spill] sm:$0xff] }
 0x66a   :  { %v8532_v26 = vadd.f32 %v3664_v58, %v3661_v19  ;;  %3833 = vmatpush.bf16.msra.mxu3 %v11119_v50  ;;  %3872 = vmatpush.bf16.msrb.mxu2 %v11120_v15  ;;  %v11127_v19 = vld [vmem:[#allocation136_spill] sm:$0xff]  ;;  %v11129_v58 = vld [vmem:[#allocation106_spill] sm:$0xff]  ;;  %v11130_v15 = vld [vmem:[#allocation137_spill] sm:$0xff] }
 0x66b   :  { %v11132_v50 = vld [vmem:[#allocation79_spill] sm:$0xff] }
 0x66c   :  { %11115 = vst [vmem:[#allocation93_spill] sm:$0xff] %v8532_v26  ;;  %v8538_v2 = vpack.c.bf16 %v8532_v26, %v8532_v26  ;;  %v11262_v26 = vld [vmem:[#allocation19_spill] sm:$0xff] }
 0x66d   :  { %3795 = vmatpush.bf16.msra.mxu0 %v11122_v27  ;;  %v11133_v27 = vld [vmem:[#allocation110_spill] sm:$0xff] }
 0x66e   :  { %3705 = vmatmul.bf16.vlgmr.msra.gmra.mxu1 %v8538_v2  ;;  %3744 = vmatmul.bf16.vlgmr.msrb.gmra.mxu0 %v8538_v2 }
 0x66f   :  { %3783 = vmatmul.bf16.vlgmr.msrb.gmra.mxu3 %v8538_v2  ;;  %3801 = vmatpush.bf16.msra.mxu1 %v11121_v30  ;;  %v11131_v30 = vld [vmem:[#allocation140_spill] sm:$0xff] }
 0x670   :  { %3822 = vmatmul.bf16.vlgmr.msra.gmra.mxu2 %v8538_v2  ;;  %3834 = vmatpush.bf16.msra.mxu3 %v11123_v18  ;;  %v11134_v18 = vld [vmem:[#allocation141_spill] sm:$0xff] }
 0x671   :  { %3873 = vmatpush.bf16.msrb.mxu2 %v11124_v28  ;;  %3840 = vmatpush.bf16.msrb.mxu0 %v11125_v56  ;;  %v11135_v28 = vld [vmem:[#allocation144_spill] sm:$0xff]  ;;  %v11136_v56 = vld [vmem:[#allocation83_spill] sm:$0xff] }
 0x673   :  { %3802 = vmatpush.bf16.msra.mxu1 %v11128_v0  ;;  %v11139_v0 = vld [vmem:[#allocation148_spill] sm:$0xff] }
 0x674   :  { %3879 = vmatpush.bf16.msrb.mxu3 %v11126_v12  ;;  %v11137_v12 = vld [vmem:[#allocation114_spill] sm:$0xff] }
 0x675   :  { %3918 = vmatpush.bf16.msra.mxu2 %v11127_v19  ;;  %3841 = vmatpush.bf16.msrb.mxu0 %v11129_v58  ;;  %v11138_v19 = vld [vmem:[#allocation145_spill] sm:$0xff]  ;;  %v11151_v58 = vld [vmem:[#allocation160_spill] sm:$0xff] }
 0x677   :  { %3803 = vmatpush.bf16.msra.mxu1 %v11132_v50  ;;  %v11148_v50 = vld [vmem:[#allocation95_spill] sm:$0xff] }
 0x678   :  { %3880 = vmatpush.bf16.msrb.mxu3 %v11130_v15  ;;  %v11150_v15 = vld [vmem:[#allocation157_spill] sm:$0xff] }
 0x679   :  { %3919 = vmatpush.bf16.msra.mxu2 %v11131_v30  ;;  %3842 = vmatpush.bf16.msrb.mxu0 %v11133_v27  ;;  %v11140_v30 = vld [vmem:[#allocation87_spill] sm:$0xff]  ;;  %v11147_v27 = vld [vmem:[#allocation156_spill] sm:$0xff] }
 0x67b   :  { %3804 = vmatpush.bf16.msra.mxu1 %v11136_v56  ;;  %v11143_v56 = vld [vmem:[#allocation152_spill] sm:$0xff] }
 0x67c   :  { %3881 = vmatpush.bf16.msrb.mxu3 %v11134_v18  ;;  %v11141_v18 = vld [vmem:[#allocation118_spill] sm:$0xff] }
 0x67d   :  { %3920 = vmatpush.bf16.msra.mxu2 %v11135_v28  ;;  %3843 = vmatpush.bf16.msrb.mxu0 %v11137_v12  ;;  %v11142_v28 = vld [vmem:[#allocation149_spill] sm:$0xff]  ;;  %v11144_v12 = vld [vmem:[#allocation91_spill] sm:$0xff] }
 0x67e   :  { %3757 = vmatmul.bf16.vlgmr.msrb.gmra.mxu1 %v8461_v23  ;;  %3796 = vmatmul.bf16.vlgmr.msra.gmra.mxu0 %v8461_v23 }
 0x67f   :  { %3805 = vmatpush.bf16.msra.mxu1 %v11140_v30  ;;  %3835 = vmatmul.bf16.vlgmr.msra.gmra.mxu3 %v8461_v23  ;;  %v11149_v30 = vld [vmem:[#allocation126_spill] sm:$0xff] }
 0x680   :  { %3882 = vmatpush.bf16.msrb.mxu3 %v11138_v19  ;;  %3874 = vmatmul.bf16.vlgmr.msrb.gmra.mxu2 %v8461_v23  ;;  %v11145_v19 = vld [vmem:[#allocation122_spill] sm:$0xff] }
 0x681   :  { %3921 = vmatpush.bf16.msra.mxu2 %v11139_v0  ;;  %3844 = vmatpush.bf16.msrb.mxu0 %v11141_v18  ;;  %v11146_v0 = vld [vmem:[#allocation153_spill] sm:$0xff]  ;;  %v11152_v18 = vld [vmem:[#allocation99_spill] sm:$0xff] }
 0x683   :  { %3806 = vmatpush.bf16.msra.mxu1 %v11144_v12  ;;  %v11155_v12 = vld [vmem:[#allocation161_spill] sm:$0xff] }
 0x684   :  { %3883 = vmatpush.bf16.msrb.mxu3 %v11142_v28  ;;  %v11153_v28 = vld [vmem:[#allocation102_spill] sm:$0xff] }
 0x685   :  { %3922 = vmatpush.bf16.msra.mxu2 %v11143_v56  ;;  %3845 = vmatpush.bf16.msrb.mxu0 %v11145_v19  ;;  %v11154_v56 = vld [vmem:[#allocation130_spill] sm:$0xff]  ;;  %v11156_v19 = vld [vmem:[#allocation167_spill] sm:$0xff] }
 0x687   :  { %3807 = vmatpush.bf16.msra.mxu1 %v11148_v50  ;;  %v11159_v50 = vld [vmem:[#allocation168_spill] sm:$0xff] }
 0x688   :  { %3884 = vmatpush.bf16.msrb.mxu3 %v11146_v0  ;;  %v11157_v0 = vld [vmem:[#allocation133_spill] sm:$0xff] }
 0x689   :  { %3923 = vmatpush.bf16.msra.mxu2 %v11147_v27  ;;  %3846 = vmatpush.bf16.msrb.mxu0 %v11149_v30  ;;  %v11158_v27 = vld [vmem:[#allocation164_spill] sm:$0xff] }
 0x68a   :  { %v11171_v30 = vld [vmem:[#allocation180_spill] sm:$0xff] }
 0x68b   :  { %3808 = vmatpush.bf16.msra.mxu1 %v11152_v18  ;;  %v11168_v18 = vld [vmem:[#allocation115_spill] sm:$0xff] }
 0x68c   :  { %3885 = vmatpush.bf16.msrb.mxu3 %v11150_v15  ;;  %v11170_v15 = vld [vmem:[#allocation177_spill] sm:$0xff] }
 0x68d   :  { %3924 = vmatpush.bf16.msra.mxu2 %v11151_v58  ;;  %3847 = vmatpush.bf16.msrb.mxu0 %v11154_v56  ;;  %v11160_v58 = vld [vmem:[#allocation107_spill] sm:$0xff]  ;;  %v11161_v56 = vld [vmem:[#allocation138_spill] sm:$0xff] }
 0x68e   :  { %3809 = vmatmul.bf16.vlgmr.msra.gmra.mxu1 %v8490_v61 }
 0x68f   :  { %3853 = vmatpush.bf16.msrb.mxu1 %v11153_v28  ;;  %v11167_v28 = vld [vmem:[#allocation176_spill] sm:$0xff] }
 0x690   :  { %3886 = vmatpush.bf16.msrb.mxu3 %v11155_v12  ;;  %3848 = vmatmul.bf16.vlgmr.msrb.gmra.mxu0 %v8490_v61  ;;  %v11162_v12 = vld [vmem:[#allocation169_spill] sm:$0xff] }
 0x691   :  { %3925 = vmatpush.bf16.msra.mxu2 %v11156_v19  ;;  %3892 = vmatpush.bf16.msra.mxu0 %v11157_v0  ;;  %v11163_v19 = vld [vmem:[#allocation172_spill] sm:$0xff]  ;;  %v11164_v0 = vld [vmem:[#allocation111_spill] sm:$0xff] }
 0x693   :  { %3854 = vmatpush.bf16.msrb.mxu1 %v11160_v58  ;;  %3887 = vmatmul.bf16.vlgmr.msrb.gmra.mxu3 %v8490_v61  ;;  %v11169_v58 = vld [vmem:[#allocation146_spill] sm:$0xff] }
 0x694   :  { %3931 = vmatpush.bf16.msra.mxu3 %v11158_v27  ;;  %3926 = vmatmul.bf16.vlgmr.msra.gmra.mxu2 %v8490_v61  ;;  %v11165_v27 = vld [vmem:[#allocation142_spill] sm:$0xff] }
 0x695   :  { %3970 = vmatpush.bf16.msrb.mxu2 %v11159_v50  ;;  %3893 = vmatpush.bf16.msra.mxu0 %v11161_v56  ;;  %v11166_v50 = vld [vmem:[#allocation173_spill] sm:$0xff]  ;;  %v11172_v56 = vld [vmem:[#allocation119_spill] sm:$0xff] }
 0x697   :  { %3855 = vmatpush.bf16.msrb.mxu1 %v11164_v0  ;;  %v11175_v0 = vld [vmem:[#allocation184_spill] sm:$0xff] }
 0x698   :  { %3932 = vmatpush.bf16.msra.mxu3 %v11162_v12  ;;  %v11173_v12 = vld [vmem:[#allocation150_spill] sm:$0xff] }
 0x699   :  { %3971 = vmatpush.bf16.msrb.mxu2 %v11163_v19  ;;  %3894 = vmatpush.bf16.msra.mxu0 %v11165_v27  ;;  %v11174_v19 = vld [vmem:[#allocation181_spill] sm:$0xff]  ;;  %v11176_v27 = vld [vmem:[#allocation123_spill] sm:$0xff] }
 0x69b   :  { %3856 = vmatpush.bf16.msrb.mxu1 %v11168_v18  ;;  %v11179_v18 = vld [vmem:[#allocation188_spill] sm:$0xff] }
 0x69c   :  { %3933 = vmatpush.bf16.msra.mxu3 %v11166_v50  ;;  %v11177_v50 = vld [vmem:[#allocation154_spill] sm:$0xff] }
 0x69d   :  { %3972 = vmatpush.bf16.msrb.mxu2 %v11167_v28  ;;  %3895 = vmatpush.bf16.msra.mxu0 %v11169_v58  ;;  %v11178_v28 = vld [vmem:[#allocation185_spill] sm:$0xff]  ;;  %v11180_v58 = vld [vmem:[#allocation127_spill] sm:$0xff] }
 0x69f   :  { %3857 = vmatpush.bf16.msrb.mxu1 %v11172_v56  ;;  %v11183_v56 = vld [vmem:[#allocation192_spill] sm:$0xff] }
 0x6a0   :  { %3934 = vmatpush.bf16.msra.mxu3 %v11170_v15  ;;  %v11181_v15 = vld [vmem:[#allocation158_spill] sm:$0xff] }
 0x6a1   :  { %3973 = vmatpush.bf16.msrb.mxu2 %v11171_v30  ;;  %3896 = vmatpush.bf16.msra.mxu0 %v11173_v12  ;;  %v11182_v30 = vld [vmem:[#allocation189_spill] sm:$0xff]  ;;  %v11184_v12 = vld [vmem:[#allocation131_spill] sm:$0xff] }
 0x6a3   :  { %3858 = vmatpush.bf16.msrb.mxu1 %v11176_v27  ;;  %v11187_v27 = vld [vmem:[#allocation193_spill] sm:$0xff] }
 0x6a4   :  { %3935 = vmatpush.bf16.msra.mxu3 %v11174_v19  ;;  %v11185_v19 = vld [vmem:[#allocation134_spill] sm:$0xff] }
 0x6a5   :  { %3974 = vmatpush.bf16.msrb.mxu2 %v11175_v0  ;;  %3897 = vmatpush.bf16.msra.mxu0 %v11177_v50  ;;  %v11186_v0 = vld [vmem:[#allocation162_spill] sm:$0xff]  ;;  %v11188_v50 = vld [vmem:[#allocation199_spill] sm:$0xff] }
 0x6a7   :  { %3859 = vmatpush.bf16.msrb.mxu1 %v11180_v58  ;;  %v11190_v58 = vld [vmem:[#allocation196_spill] sm:$0xff] }
 0x6a8   :  { %3936 = vmatpush.bf16.msra.mxu3 %v11178_v28  ;;  %v11200_v28 = vld [vmem:[#allocation178_spill] sm:$0xff] }
 0x6a9   :  { %3975 = vmatpush.bf16.msrb.mxu2 %v11179_v18  ;;  %3898 = vmatpush.bf16.msra.mxu0 %v11181_v15  ;;  %v11189_v18 = vld [vmem:[#allocation165_spill] sm:$0xff] }
 0x6ab   :  { %3860 = vmatpush.bf16.msrb.mxu1 %v11184_v12  ;;  %v11196_v12 = vld [vmem:[#allocation174_spill] sm:$0xff] }
 0x6ac   :  { %3937 = vmatpush.bf16.msra.mxu3 %v11182_v30  ;;  %v11191_v30 = vld [vmem:[#allocation139_spill] sm:$0xff] }
 0x6ad   :  { %3976 = vmatpush.bf16.msrb.mxu2 %v11183_v56  ;;  %3899 = vmatpush.bf16.msra.mxu0 %v11186_v0  ;;  %v11193_v0 = vld [vmem:[#allocation5_spill] sm:$0xff]  ;;  %v11199_v56 = vld [vmem:[#allocation147_spill] sm:$0xff] }
 0x6ae   :  { %3861 = vmatmul.bf16.vlgmr.msrb.gmra.mxu1 %v8538_v2 }
 0x6af   :  { %3905 = vmatpush.bf16.msra.mxu1 %v11185_v19  ;;  %v11192_v19 = vld [vmem:[#allocation170_spill] sm:$0xff] }
 0x6b0   :  { %3938 = vmatpush.bf16.msra.mxu3 %v11187_v27  ;;  %3900 = vmatmul.bf16.vlgmr.msra.gmra.mxu0 %v8538_v2  ;;  %v11194_v27 = vld [vmem:[#allocation200_spill] sm:$0xff] }
 0x6b1   :  { %3977 = vmatpush.bf16.msrb.mxu2 %v11188_v50  ;;  %3944 = vmatpush.bf16.msrb.mxu0 %v11189_v18  ;;  %v11195_v50 = vld [vmem:[#allocation143_spill] sm:$0xff]  ;;  %v11197_v18 = vld [vmem:[#allocation9_spill] sm:$0xff] }
 0x6b3   :  { %3906 = vmatpush.bf16.msra.mxu1 %v11191_v30  ;;  %3939 = vmatmul.bf16.vlgmr.msra.gmra.mxu3 %v8538_v2  ;;  %v3680_v30 = vpop.f32.mrf.mxu3  ;;  %v3719_v15 = vpop.f32.mrf.mxu2 }
 0x6b4   :  { %3983 = vmatpush.bf16.msrb.mxu3 %v11190_v58  ;;  %3978 = vmatmul.bf16.vlgmr.msrb.gmra.mxu2 %v8538_v2  ;;  %v11198_v58 = vld [vmem:[#allocation203_spill] sm:$0xff] }
 0x6b5   :  { %3945 = vmatpush.bf16.msrb.mxu0 %v11192_v19  ;;  %4079 = vmatpush.bf16.msra.mxu2 %v11193_v0  ;;  %v11202_v19 = vld [vmem:[#allocation206_spill] sm:$0xff]  ;;  %v11203_v0 = vld [vmem:[#allocation151_spill] sm:$0xff] }
 0x6b7   :  { %3907 = vmatpush.bf16.msra.mxu1 %v11195_v50  ;;  %v11205_v50 = vld [vmem:[#allocation17_spill] sm:$0xff] }
 0x6b8   :  { %3984 = vmatpush.bf16.msrb.mxu3 %v11194_v27  ;;  %v11204_v27 = vld [vmem:[#allocation182_spill] sm:$0xff] }
 0x6b9   :  { %3946 = vmatpush.bf16.msrb.mxu0 %v11196_v12  ;;  %4080 = vmatpush.bf16.msra.mxu2 %v11197_v18  ;;  %v11206_v12 = vld [vmem:[#allocation209_spill] sm:$0xff]  ;;  %v11207_v18 = vld [vmem:[#allocation155_spill] sm:$0xff] }
 0x6bb   :  { %3908 = vmatpush.bf16.msra.mxu1 %v11199_v56  ;;  %v3721_v56 = vpop.f32.mrf.mxu2 }
 0x6bc   :  { %3985 = vmatpush.bf16.msrb.mxu3 %v11198_v58  ;;  %v3682_v58 = vpop.f32.mrf.mxu3  ;;  %v11218_v56 = vld [vmem:[#allocation29_spill] sm:$0xff] }
 0x6bd   :  { %3947 = vmatpush.bf16.msrb.mxu0 %v11200_v28  ;;  %4081 = vmatpush.bf16.msra.mxu2 %v11201_v9  ;;  %v11210_v28 = vld [vmem:[#allocation212_spill] sm:$0xff]  ;;  %v11211_v9 = vld [vmem:[#allocation159_spill] sm:$0xff]  ;;  %v11217_v58 = vld [vmem:[#allocation194_spill] sm:$0xff] }
 0x6bf   :  { %3909 = vmatpush.bf16.msra.mxu1 %v11203_v0  ;;  %v11213_v0 = vld [vmem:[#allocation25_spill] sm:$0xff] }
 0x6c0   :  { %3986 = vmatpush.bf16.msrb.mxu3 %v11202_v19  ;;  %v11212_v19 = vld [vmem:[#allocation190_spill] sm:$0xff] }
 0x6c1   :  { %3948 = vmatpush.bf16.msrb.mxu0 %v11204_v27  ;;  %4082 = vmatpush.bf16.msra.mxu2 %v11205_v50  ;;  %v11214_v27 = vld [vmem:[#allocation216_spill] sm:$0xff]  ;;  %v11215_v50 = vld [vmem:[#allocation163_spill] sm:$0xff] }
 0x6c3   :  { %3910 = vmatpush.bf16.msra.mxu1 %v11207_v18 }
 0x6c4   :  { %3987 = vmatpush.bf16.msrb.mxu3 %v11206_v12  ;;  %v11216_v12 = vld [vmem:[#allocation166_spill] sm:$0xff] }
 0x6c5   :  { %3949 = vmatpush.bf16.msrb.mxu0 %v11208_v31  ;;  %4083 = vmatpush.bf16.msra.mxu2 %v11209_v53  ;;  %v11219_v31 = vld [vmem:[#allocation220_spill] sm:$0xff]  ;;  %v11230_v53 = vld [vmem:[#allocation14_spill] sm:$0xff] }
 0x6c7   :  { %3911 = vmatpush.bf16.msra.mxu1 %v11211_v9  ;;  %v11221_v9 = vld [vmem:[#allocation6_spill] sm:$0xff] }
 0x6c8   :  { %3988 = vmatpush.bf16.msrb.mxu3 %v11210_v28  ;;  %v11220_v28 = vld [vmem:[#allocation197_spill] sm:$0xff] }
 0x6c9   :  { %3950 = vmatpush.bf16.msrb.mxu0 %v11212_v19  ;;  %4084 = vmatpush.bf16.msra.mxu2 %v11213_v0  ;;  %v11222_v0 = vld [vmem:[#allocation171_spill] sm:$0xff]  ;;  %v11228_v19 = vld [vmem:[#allocation41_spill] sm:$0xff] }
 0x6cb   :  { %3912 = vmatpush.bf16.msra.mxu1 %v11215_v50  ;;  %v11223_v50 = vld [vmem:[#allocation33_spill] sm:$0xff] }
 0x6cc   :  { %3989 = vmatpush.bf16.msrb.mxu3 %v11214_v27 }
 0x6cd   :  { %3951 = vmatpush.bf16.msrb.mxu0 %v11217_v58  ;;  %4085 = vmatpush.bf16.msra.mxu2 %v11218_v56  ;;  %v11225_v58 = vld [vmem:[#allocation201_spill] sm:$0xff]  ;;  %v11226_v56 = vld [vmem:[#allocation10_spill] sm:$0xff]  ;;  %v3693_v27 = vpop.f32.mrf.mxu0 }
 0x6ce   :  { %3913 = vmatmul.bf16.vlgmr.msra.gmra.mxu1 %v8461_v23 }
 0x6cf   :  { %3957 = vmatpush.bf16.msrb.mxu1 %v11216_v12  ;;  %v11224_v12 = vld [vmem:[#allocation36_spill] sm:$0xff] }
 0x6d0   :  { %3990 = vmatpush.bf16.msrb.mxu3 %v11219_v31  ;;  %3952 = vmatmul.bf16.vlgmr.msrb.gmra.mxu0 %v8461_v23  ;;  %v11227_v31 = vld [vmem:[#allocation175_spill] sm:$0xff] }
 0x6d1   :  { %3996 = vmatpush.bf16.msra.mxu0 %v11220_v28  ;;  %4086 = vmatpush.bf16.msra.mxu2 %v11223_v50  ;;  %v3694_v28 = vadd.f32 %v3693_v27, %v3680_v30  ;;  %v11232_v50 = vld [vmem:[#allocation45_spill] sm:$0xff] }
 0x6d2   :  { %v11236_v27 = vld [vmem:[#allocation49_spill] sm:$0xff] }
 0x6d3   :  { %3958 = vmatpush.bf16.msrb.mxu1 %v11222_v0  ;;  %3991 = vmatmul.bf16.vlgmr.msrb.gmra.mxu3 %v8461_v23  ;;  %v11231_v0 = vld [vmem:[#allocation179_spill] sm:$0xff]  ;;  %v3732_v23 = vpop.f32.mrf.mxu3 }
 0x6d4   :  { %4092 = vmatpush.bf16.msra.mxu3 %v11221_v9  ;;  %v11229_v9 = vld [vmem:[#allocation204_spill] sm:$0xff]  ;;  %v3771_v18 = vpop.f32.mrf.mxu2 }
 0x6d5   :  { %4131 = vmatpush.bf16.msrb.mxu2 %v11224_v12  ;;  %3997 = vmatpush.bf16.msra.mxu0 %v11225_v58  ;;  %v11233_v12 = vld [vmem:[#allocation207_spill] sm:$0xff]  ;;  %v3733_v58 = vadd.f32 %v3732_v23, %v3719_v15  ;;  %v3695_v30 = vpop.f32.mrf.mxu0  ;;  %v11242_v23 = vld [vmem:[#allocation26_spill] sm:$0xff] }
 0x6d6   :  { %v11245_v30 = vld [vmem:[#allocation218_spill] sm:$0xff] }
 0x6d7   :  { %3959 = vmatpush.bf16.msrb.mxu1 %v11227_v31  ;;  %v11235_v31 = vld [vmem:[#allocation183_spill] sm:$0xff] }
 0x6d8   :  { %4093 = vmatpush.bf16.msra.mxu3 %v11226_v56  ;;  %v11234_v56 = vld [vmem:[#allocation18_spill] sm:$0xff] }
 0x6d9   :  { %4132 = vmatpush.bf16.msrb.mxu2 %v11228_v19  ;;  %3998 = vmatpush.bf16.msra.mxu0 %v11229_v9  ;;  %v11237_v19 = vld [vmem:[#allocation210_spill] sm:$0xff] }
 0x6da   :  { %v11238_v9 = vld [vmem:[#allocation22_spill] sm:$0xff] }
 0x6db   :  { %3960 = vmatpush.bf16.msrb.mxu1 %v11231_v0  ;;  %v3734_v0 = vpop.f32.mrf.mxu3 }
 0x6dc   :  { %4094 = vmatpush.bf16.msra.mxu3 %v11230_v53  ;;  %v11239_v53 = vld [vmem:[#allocation187_spill] sm:$0xff]  ;;  %v3773_v15 = vpop.f32.mrf.mxu2  ;;  %v11249_v0 = vld [vmem:[#allocation61_spill] sm:$0xff] }
 0x6dd   :  { %4133 = vmatpush.bf16.msrb.mxu2 %v11232_v50  ;;  %3999 = vmatpush.bf16.msra.mxu0 %v11233_v12  ;;  %v11241_v50 = vld [vmem:[#allocation214_spill] sm:$0xff]  ;;  %v11251_v15 = vld [vmem:[#allocation7_spill] sm:$0xff] }
 0x6df   :  { %3961 = vmatpush.bf16.msrb.mxu1 %v11235_v31  ;;  %v11244_v31 = vld [vmem:[#allocation57_spill] sm:$0xff] }
 0x6e0   :  { %4095 = vmatpush.bf16.msra.mxu3 %v11234_v56  ;;  %v11243_v56 = vld [vmem:[#allocation191_spill] sm:$0xff] }
 0x6e1   :  { %4134 = vmatpush.bf16.msrb.mxu2 %v11236_v27  ;;  %4000 = vmatpush.bf16.msra.mxu0 %v11237_v19  ;;  %v11246_v27 = vld [vmem:[#allocation30_spill] sm:$0xff]  ;;  %v11247_v19 = vld [vmem:[#allocation195_spill] sm:$0xff] }
 0x6e3   :  { %3962 = vmatpush.bf16.msrb.mxu1 %v11239_v53 }
 0x6e4   :  { %4096 = vmatpush.bf16.msra.mxu3 %v11238_v9  ;;  %v11248_v9 = vld [vmem:[#allocation198_spill] sm:$0xff] }
 0x6e5   :  { %4135 = vmatpush.bf16.msrb.mxu2 %v11240_v44  ;;  %4001 = vmatpush.bf16.msra.mxu0 %v11241_v50  ;;  %v11250_v44 = vld [vmem:[#allocation221_spill] sm:$0xff] }
 0x6e6   :  { %v11257_v50 = vld [vmem:[#allocation205_spill] sm:$0xff] }
 0x6e7   :  { %3963 = vmatpush.bf16.msrb.mxu1 %v11243_v56  ;;  %v11253_v56 = vld [vmem:[#allocation202_spill] sm:$0xff] }
 0x6e8   :  { %4097 = vmatpush.bf16.msra.mxu3 %v11242_v23  ;;  %v11252_v23 = vld [vmem:[#allocation34_spill] sm:$0xff] }
 0x6e9   :  { %4136 = vmatpush.bf16.msrb.mxu2 %v11244_v31  ;;  %4002 = vmatpush.bf16.msra.mxu0 %v11245_v30  ;;  %v11254_v31 = vld [vmem:[#allocation37_spill] sm:$0xff] }
 0x6eb   :  { %3964 = vmatpush.bf16.msrb.mxu1 %v11247_v19  ;;  %v3706_v19 = vpop.f32.mrf.mxu1 }
 0x6ec   :  { %4098 = vmatpush.bf16.msra.mxu3 %v11246_v27  ;;  %v11255_v27 = vld [vmem:[#allocation65_spill] sm:$0xff]  ;;  %v3707_v30 = vadd.f32 %v3706_v19, %v3694_v28  ;;  %v11263_v28 = vld [vmem:[#allocation211_spill] sm:$0xff]  ;;  %v11264_v19 = vld [vmem:[#allocation50_spill] sm:$0xff] }
 0x6ed   :  { %4137 = vmatpush.bf16.msrb.mxu2 %v11249_v0  ;;  %4003 = vmatpush.bf16.msra.mxu0 %v11250_v44  ;;  %v11256_v44 = vld [vmem:[#allocation11_spill] sm:$0xff] }
 0x6ee   :  { %3965 = vmatmul.bf16.vlgmr.msrb.gmra.mxu1 %v8490_v61 }
 0x6ef   :  { %4009 = vmatpush.bf16.msra.mxu1 %v11248_v9  ;;  %v3745_v9 = vpop.f32.mrf.mxu0 }
 0x6f0   :  { %4099 = vmatpush.bf16.msra.mxu3 %v11252_v23  ;;  %4004 = vmatmul.bf16.vlgmr.msra.gmra.mxu0 %v8490_v61  ;;  %v8699_v0 = vadd.f32 %v3745_v9, %v3733_v58  ;;  %v11259_v23 = vld [vmem:[#allocation15_spill] sm:$0xff]  ;;  %v8708_v9 = vpop.permute.xlu2 %80  ;;  %v11265_v58 = vld [vmem:[#allocation213_spill] sm:$0xff] }
 0x6f1   :  { %4105 = vmatpush.bf16.msrb.mxu0 %v11251_v15  ;;  %4138 = vmatpush.bf16.msrb.mxu2 %v11255_v27  ;;  %v11258_v15 = vld [vmem:[#allocation42_spill] sm:$0xff] }
 0x6f2   :  { %v3784_v61 = vpop.f32.mrf.mxu3 }
 0x6f3   :  { %4010 = vmatpush.bf16.msra.mxu1 %v11253_v56  ;;  %v11260_v56 = vld [vmem:[#allocation208_spill] sm:$0xff]  ;;  %v3823_v53 = vpop.f32.mrf.mxu2  ;;  %v3708_v27 = vpop.f32.mrf.mxu1 }
 0x6f4   :  { %4144 = vmatpush.bf16.msrb.mxu3 %v11254_v31  ;;  %v11261_v31 = vld [vmem:[#allocation46_spill] sm:$0xff] }
 0x6f5   :  { %4106 = vmatpush.bf16.msrb.mxu0 %v11256_v44 }
 0x6f7   :  { %4011 = vmatpush.bf16.msra.mxu1 %v11257_v50  ;;  %v3747_v12 = vpop.f32.mrf.mxu0 }
 0x6f8   :  { %4145 = vmatpush.bf16.msrb.mxu3 %v11258_v15  ;;  %v158_v15 = vmul.f32 %v11265_v58, %v8708_v9  ;;  %v11269_v12 = vld [vmem:[#allocation217_spill] sm:$0xff] }
 0x6f9   :  { %4107 = vmatpush.bf16.msrb.mxu0 %v11259_v23  ;;  %v11266_v23 = vld [vmem:[#allocation23_spill] sm:$0xff] }
 0x6fa   :  { %v3786_v50 = vpop.f32.mrf.mxu3  ;;  %v252_v44 = vadd.f32 %v11269_v12, %v158_v15 }
 0x6fb   :  { %4012 = vmatpush.bf16.msra.mxu1 %v11260_v56  ;;  %v11267_v56 = vld [vmem:[#allocation215_spill] sm:$0xff]  ;;  %v3825_v27 = vpop.f32.mrf.mxu2 }
 0x6fc   :  { %4146 = vmatpush.bf16.msrb.mxu3 %v11261_v31  ;;  %v11268_v31 = vld [vmem:[#allocation54_spill] sm:$0xff]  ;;  %v4022_v58 = vadd.f32 %v3707_v30, %v252_v44  ;;  %v11276_v27 = vld [vmem:[#allocation8_spill] sm:$0xff] }
 0x6fd   :  { %4108 = vmatpush.bf16.msrb.mxu0 %v11262_v26  ;;  %v3758_v26 = vpop.f32.mrf.mxu1  ;;  %v11279_v44 = vld [vmem:[#allocation66_spill] sm:$0xff]  ;;  %v11280_v30 = vld [vmem:[#allocation12_spill] sm:$0xff] }
 0x6fe   :  { %v4025_v50 = vmul.f32 0.5, %v4022_v58 }
 0x6ff   :  { %4013 = vmatpush.bf16.msra.mxu1 %v11263_v28  ;;  %v3772_v28 = vadd.f32 %v3771_v18, %v3758_v26 }
 0x700   :  { %4147 = vmatpush.bf16.msrb.mxu3 %v11264_v19  ;;  %v3797_v19 = vpop.f32.mrf.mxu0  ;;  %6191 = vtanh.f32 %v4025_v50  ;;  %v11285_v50 = vld [vmem:[#allocation51_spill] sm:$0xff] }
 0x701   :  { %4109 = vmatpush.bf16.msrb.mxu0 %v11266_v23  ;;  %v3785_v20 = vadd.f32 %v3784_v61, %v3772_v28  ;;  %v11273_v23 = vld [vmem:[#allocation31_spill] sm:$0xff]  ;;  %v11282_v28 = vld [vmem:[#allocation16_spill] sm:$0xff] }
 0x702   :  { %v3836_v15 = vpop.f32.mrf.mxu3  ;;  %v11281_v61 = vld [vmem:[#allocation43_spill] sm:$0xff] }
 0x703   :  { %4014 = vmatpush.bf16.msra.mxu1 %v11267_v56  ;;  %v11274_v56 = vld [vmem:[#allocation222_spill] sm:$0xff]  ;;  %v3875_v12 = vpop.f32.mrf.mxu2 }
 0x704   :  { %4148 = vmatpush.bf16.msrb.mxu3 %v11268_v31  ;;  %v11275_v31 = vld [vmem:[#allocation62_spill] sm:$0xff] }
 0x705   :  { %4110 = vmatpush.bf16.msrb.mxu0 %v11270_v42  ;;  %v3760_v26 = vpop.f32.mrf.mxu1  ;;  %v11287_v42 = vld [vmem:[#allocation24_spill] sm:$0xff] }
 0x706   :  { %v6192_v58 = vpop.eup %6191  ;;  %v11284_v26 = vld [vmem:[#allocation20_spill] sm:$0xff] }
 0x707   :  { %4015 = vmatpush.bf16.msra.mxu1 %v11271_v63  ;;  %v11277_v63 = vld [vmem:[#allocation35_spill] sm:$0xff] }
 0x708   :  { %4149 = vmatpush.bf16.msrb.mxu3 %v11272_v11  ;;  %v3799_v18 = vpop.f32.mrf.mxu0  ;;  %v11278_v11 = vld [vmem:[#allocation38_spill] sm:$0xff] }
 0x709   :  { %4111 = vmatpush.bf16.msrb.mxu0 %v11273_v23  ;;  %v4031_v18 = vmul.f32 0.5, %v6192_v58  ;;  %v11289_v58 = vld [vmem:[#allocation55_spill] sm:$0xff] }
 0x70b   :  { %4016 = vmatpush.bf16.msra.mxu1 %v11274_v56  ;;  %v11283_v56 = vld [vmem:[#allocation47_spill] sm:$0xff] }
 0x70c   :  { %4150 = vmatpush.bf16.msrb.mxu3 %v11275_v31  ;;  %v3877_v31 = vpop.f32.mrf.mxu2 }
 0x70d   :  { %4112 = vmatpush.bf16.msrb.mxu0 %v11277_v63  ;;  %v11288_v31 = vld [vmem:[#allocation226_spill] sm:$0xff] }
 0x70e   :  { %4017 = vmatmul.bf16.vlgmr.msra.gmra.mxu1 %v8538_v2  ;;  %v3810_v2 = vpop.f32.mrf.mxu1 }
 0x70f   :  { %4118 = vmatpush.bf16.msrb.mxu1 %v11276_v27  ;;  %v3838_v27 = vpop.f32.mrf.mxu3 }
 0x710   :  { %4151 = vmatpush.bf16.msrb.mxu3 %v11279_v44  ;;  %v3849_v63 = vpop.f32.mrf.mxu0  ;;  %v160_v27 = vmul.f32 %v11288_v31, %v8708_v9 }
 0x711   :  { %4157 = vmatpush.bf16.msra.mxu0 %v11278_v11  ;;  %v3811_v11 = vadd.f32 %v3810_v2, %v3797_v19  ;;  %v3850_v23 = vadd.f32 %v3849_v63, %v3836_v15  ;;  %v11290_v15 = vld [vmem:[#allocation28_spill] sm:$0xff]  ;;  %v11291_v2 = vld [vmem:[#allocation227_spill] sm:$0xff] }
 0x713   :  { %4119 = vmatpush.bf16.msrb.mxu1 %v11280_v30  ;;  %v3824_v44 = vadd.f32 %v3823_v53, %v3811_v11  ;;  %v11286_v30 = vld [vmem:[#allocation223_spill] sm:$0xff] }
 0x715   :  { %4158 = vmatpush.bf16.msra.mxu0 %v11281_v61  ;;  %v159_v61 = vmul.f32 %v11286_v30, %v8708_v9 }
 0x716   :  { %v3812_v19 = vpop.f32.mrf.mxu1 }
 0x717   :  { %4120 = vmatpush.bf16.msrb.mxu1 %v11282_v28  ;;  %v4034_v28 = vadd.f32 0.5, %v4031_v18  ;;  %v253_v11 = vadd.f32 %v11092_v55, %v159_v61  ;;  %v3927_v53 = vpop.f32.mrf.mxu2  ;;  %v11295_v61 = vld [vmem:[#allocation39_spill] sm:$0xff] }
 0x718   :  { %v3851_v18 = vpop.f32.mrf.mxu0 }
 0x719   :  { %4159 = vmatpush.bf16.msra.mxu0 %v11283_v56  ;;  %v4037_v56 = vadd.f32 %v3824_v44, %v11090_v5  ;;  %v4023_v30 = vadd.f32 %v8699_v0, %v253_v11  ;;  %v11294_v5 = vld [vmem:[#allocation63_spill] sm:$0xff]  ;;  %v11298_v0 = vld [vmem:[#allocation44_spill] sm:$0xff] }
 0x71a   :  { %v11299_v11 = vld [vmem:[#allocation48_spill] sm:$0xff] }
 0x71b   :  { %4121 = vmatpush.bf16.msrb.mxu1 %v11284_v26  ;;  %v8741_v22 = vmul.f32 %v4037_v56, %v4034_v28  ;;  %v3888_v26 = vpop.f32.mrf.mxu3  ;;  %v11293_v56 = vld [vmem:[#allocation32_spill] sm:$0xff]  ;;  %v4026_v44 = vmul.f32 0.5, %v4023_v30 }
 0x71c   :  { %v3889_v63 = vadd.f32 %v3888_v26, %v3875_v12  ;;  %v11296_v26 = vld [vmem:[#allocation40_spill] sm:$0xff] }
 0x71d   :  { %4160 = vmatpush.bf16.msra.mxu0 %v11285_v50  ;;  %v11292_v50 = vld [vmem:[#allocation59_spill] sm:$0xff]  ;;  %6193 = vtanh.f32 %v4026_v44 }
 0x71f   :  { %4122 = vmatpush.bf16.msrb.mxu1 %v11287_v42  ;;  %v254_v42 = vadd.f32 %v11291_v2, %v160_v27  ;;  %v3929_v12 = vpop.f32.mrf.mxu2  ;;  %v11297_v27 = vld [vmem:[#allocation67_spill] sm:$0xff] }
 0x720   :  { %v11300_v12 = vld [vmem:[#allocation52_spill] sm:$0xff] }
 0x721   :  { %4161 = vmatpush.bf16.msra.mxu0 %v11289_v58  ;;  %v4024_v31 = vadd.f32 %v3785_v20, %v254_v42 }
 0x723   :  { %4123 = vmatpush.bf16.msrb.mxu1 %v11290_v15  ;;  %v4027_v28 = vmul.f32 0.5, %v4024_v31  ;;  %v3890_v58 = vpop.f32.mrf.mxu3  ;;  %v6194_v20 = vpop.eup %6193 }
 0x724   :  { %v4032_v30 = vmul.f32 0.5, %v6194_v20 }
 0x725   :  { %4162 = vmatpush.bf16.msra.mxu0 %v11292_v50  ;;  %6195 = vtanh.f32 %v4027_v28  ;;  %v11303_v50 = vld [vmem:[#allocation56_spill] sm:$0xff] }
 0x726   :  { %v4035_v28 = vadd.f32 0.5, %v4032_v30 }
 0x727   :  { %4124 = vmatpush.bf16.msrb.mxu1 %v11293_v56 }
 0x729   :  { %4163 = vmatpush.bf16.msra.mxu0 %v11294_v5 }
 0x72b   :  { %4125 = vmatpush.bf16.msrb.mxu1 %v11295_v61  ;;  %v6196_v42 = vpop.eup %6195  ;;  %v3862_v31 = vpop.f32.mrf.mxu1  ;;  %v11301_v61 = vld [vmem:[#allocation228_spill] sm:$0xff] }
 0x72c   :  { %v4033_v58 = vmul.f32 0.5, %v6196_v42  ;;  %v3863_v19 = vadd.f32 %v3862_v31, %v3850_v23 }
 0x72d   :  { %4164 = vmatpush.bf16.msra.mxu0 %v11297_v27  ;;  %v3901_v18 = vpop.f32.mrf.mxu0 }
 0x72e   :  { %v3902_v44 = vadd.f32 %v3901_v18, %v3889_v63  ;;  %v4038_v27 = vadd.f32 %v3863_v19, %v11301_v61  ;;  %v4036_v5 = vadd.f32 0.5, %v4033_v58  ;;  %v11305_v63 = vld [vmem:[#allocation64_spill] sm:$0xff]  ;;  %v11306_v19 = vld [vmem:[#allocation71_spill] sm:$0xff] }
 0x72f   :  { %4170 = vmatpush.bf16.msra.mxu1 %v11296_v26  ;;  %v163_v26 = vmul.f32 %v11107_v57, %v8708_v9  ;;  %v11304_v57 = vld [vmem:[#allocation60_spill] sm:$0xff] }
 0x730   :  { %v4041_v56 = vmul.f32 %v4038_v27, %v4035_v28  ;;  %v11307_v27 = vld [vmem:[#allocation230_spill] sm:$0xff] }
 0x731   :  { %v257_v20 = vadd.f32 %v11108_v41, %v163_v26  ;;  %v164_v18 = vmul.f32 %v11307_v27, %v8708_v9 }
 0x733   :  { %4171 = vmatpush.bf16.msra.mxu1 %v11298_v0  ;;  %v11302_v0 = vld [vmem:[#allocation229_spill] sm:$0xff]  ;;  %v3864_v31 = vpop.f32.mrf.mxu1 }
 0x734   :  { %v4039_v2 = vadd.f32 %v3902_v44, %v11302_v0 }
 0x735   :  { %v3903_v15 = vpop.f32.mrf.mxu0 }
 0x736   :  { %v4042_v42 = vmul.f32 %v4039_v2, %v4036_v5  ;;  %v258_v2 = vadd.f32 %v10905_v46, %v164_v18 }
 0x737   :  { %4172 = vmatpush.bf16.msra.mxu1 %v11299_v11  ;;  %v3979_v11 = vpop.f32.mrf.mxu2 }
 0x738   :  { %v8763_v23 = vadd.f32 %v4042_v42, %v257_v20  ;;  %v11308_v20 = vld [vmem:[#allocation232_spill] sm:$0xff] }
 0x739   :  { %v161_v15 = vmul.f32 %v11308_v20, %v8708_v9 }
 0x73b   :  { %4173 = vmatpush.bf16.msra.mxu1 %v11300_v12  ;;  %v3940_v12 = vpop.f32.mrf.mxu3 }
 0x73f   :  { %4174 = vmatpush.bf16.msra.mxu1 %v11303_v50  ;;  %v3981_v58 = vpop.f32.mrf.mxu2 }
 0x743   :  { %4175 = vmatpush.bf16.msra.mxu1 %v11304_v57  ;;  %v3942_v30 = vpop.f32.mrf.mxu3 }
 0x744   :  { %v255_v30 = vadd.f32 %v10509_v21, %v161_v15 }
 0x747   :  { %4176 = vmatpush.bf16.msra.mxu1 %v11305_v63  ;;  %v4043_v63 = vadd.f32 %v8741_v22, %v255_v30  ;;  %v165_v22 = vmul.f32 %v10510_v32, %v8708_v9 }
 0x74b   :  { %4177 = vmatpush.bf16.msra.mxu1 %v11306_v19  ;;  %v3914_v44 = vpop.f32.mrf.mxu1 }
 0x74c   :  { %v3928_v26 = vadd.f32 %v3927_v53, %v3914_v44 }
 0x74d   :  { %v3953_v5 = vpop.f32.mrf.mxu0 }
 0x74e   :  { %v3941_v28 = vadd.f32 %v3940_v12, %v3928_v26 }
 0x750   :  { %v4049_v42 = vadd.f32 %v3941_v28, %v258_v2  ;;  %v162_v28 = vmul.f32 %v10512_v34, %v8708_v9 }
 0x752   :  { %v4052_v31 = vmul.f32 0.5, %v4049_v42 }
 0x753   :  { %v3916_v41 = vpop.f32.mrf.mxu1 }
 0x754   :  { %6197 = vtanh.f32 %v4052_v31 }
 0x755   :  { %v3955_v19 = vpop.f32.mrf.mxu0  ;;  %6199 = vtanh.f32 %v4043_v63 }
 0x756   :  { %v3992_v58 = vpop.f32.mrf.mxu3 }
 0x75a   :  { %v6198_v27 = vpop.eup %6197 }
 0x75b   :  { %v4058_v53 = vmul.f32 0.5, %v6198_v27  ;;  %v6200_v12 = vpop.eup %6199 }
 0x75d   :  { %v4061_v0 = vadd.f32 0.5, %v4058_v53 }
 0x75e   :  { %v3994_v44 = vpop.f32.mrf.mxu3 }
 0x75f   :  { %v4064_v18 = vsub.f32 1.0, %v4061_v0  ;;  %v4070_v20 = vmul.f32 %v4061_v0, %v8457_v4  ;;  %v259_v4 = vadd.f32 %v10511_v59, %v165_v22 }
 0x761   :  { %v4067_v26 = vmul.f32 %v6200_v12, %v4064_v18 }
 0x763   :  { %v8776_v2 = vadd.f32 %v4070_v20, %v4067_v26 }
 0x765   :  { %v8780_v41 = vpack.c.bf16 %v8776_v2, %v8776_v2 }
 0x767   :  { %4087 = vmatmul.bf16.vlgmr.msra.gmra.mxu2 %v8780_v41  ;;  %4126 = vmatmul.bf16.vlgmr.msrb.gmra.mxu1 %v8780_v41 }
 0x768   :  { %4183 = vmatpush.bf16.msra.mxu2 %v10312_v36  ;;  %4222 = vmatpush.bf16.msrb.mxu1 %v10313_v39 }
 0x76b   :  { %v3966_v63 = vpop.f32.mrf.mxu1 }
 0x76c   :  { %v3967_v19 = vadd.f32 %v3966_v63, %v3953_v5  ;;  %4184 = vmatpush.bf16.msra.mxu2 %v10316_v14  ;;  %4223 = vmatpush.bf16.msrb.mxu1 %v10317_v10  ;;  %v256_v5 = vadd.f32 %v10515_v29, %v162_v28 }
 0x76d   :  { %v4005_v27 = vpop.f32.mrf.mxu0 }
 0x76e   :  { %v3980_v0 = vadd.f32 %v3979_v11, %v3967_v19  ;;  %v4044_v31 = vadd.f32 %v4041_v56, %v256_v5  ;;  %v166_v19 = vmul.f32 %v8495_v51, %v8708_v9  ;;  %v11311_v5 = vld [vmem:[#allocation86_spill] sm:$0xff] }
 0x770   :  { %v4050_v20 = vadd.f32 %v3980_v0, %v259_v4  ;;  %4185 = vmatpush.bf16.msra.mxu2 %v10513_v60  ;;  %4224 = vmatpush.bf16.msrb.mxu1 %v10514_v24  ;;  %v4006_v4 = vadd.f32 %v4005_v27, %v3992_v58  ;;  %v260_v0 = vadd.f32 %v8511_v37, %v166_v19  ;;  %v11318_v19 = vld [vmem:[#allocation124_spill] sm:$0xff] }
 0x772   :  { %v4053_v15 = vmul.f32 0.5, %v4050_v20  ;;  %v11309_v20 = vld [vmem:[#allocation113_spill] sm:$0xff] }
 0x773   :  { %v3968_v42 = vpop.f32.mrf.mxu1 }
 0x774   :  { %6201 = vtanh.f32 %v4053_v15  ;;  %4186 = vmatpush.bf16.msra.mxu2 %v10324_v52  ;;  %4225 = vmatpush.bf16.msrb.mxu1 %v10326_v35  ;;  %v11310_v15 = vld [vmem:[#allocation116_spill] sm:$0xff] }
 0x775   :  { %v4007_v11 = vpop.f32.mrf.mxu0  ;;  %6203 = vtanh.f32 %v4044_v31 }
 0x776   :  { %v11312_v11 = vld [vmem:[#allocation117_spill] sm:$0xff] }
 0x778   :  { %4187 = vmatpush.bf16.msra.mxu2 %v10708_v47  ;;  %4226 = vmatpush.bf16.msrb.mxu1 %v10709_v17 }
 0x77a   :  { %v6202_v30 = vpop.eup %6201 }
 0x77b   :  { %v4059_v53 = vmul.f32 0.5, %v6202_v30  ;;  %v6204_v12 = vpop.eup %6203  ;;  %v11313_v30 = vld [vmem:[#allocation120_spill] sm:$0xff] }
 0x77c   :  { %4188 = vmatpush.bf16.msra.mxu2 %v10710_v13  ;;  %4227 = vmatpush.bf16.msrb.mxu1 %v10518_v38 }
 0x77d   :  { %v4062_v44 = vadd.f32 0.5, %v4059_v53 }
 0x77f   :  { %v4065_v18 = vsub.f32 1.0, %v4062_v44  ;;  %v4071_v26 = vmul.f32 %v4062_v44, %v8484_v16 }
 0x780   :  { %4189 = vmatpush.bf16.msra.mxu2 %v10333_v25  ;;  %4228 = vmatpush.bf16.msrb.mxu1 %v10520_v8 }
 0x781   :  { %v4068_v56 = vmul.f32 %v6204_v12, %v4065_v18  ;;  %v11314_v18 = vld [vmem:[#allocation93_spill] sm:$0xff] }
 0x783   :  { %v8803_v22 = vadd.f32 %v4071_v26, %v4068_v56  ;;  %v11317_v26 = vld [vmem:[#allocation121_spill] sm:$0xff] }
 0x784   :  { %4190 = vmatpush.bf16.msra.mxu2 %v10907_v33  ;;  %4229 = vmatpush.bf16.msrb.mxu1 %v10908_v54 }
 0x785   :  { %v8809_v63 = vpack.c.bf16 %v8803_v22, %v8803_v22 }
 0x787   :  { %4100 = vmatmul.bf16.vlgmr.msra.gmra.mxu3 %v8809_v63  ;;  %4139 = vmatmul.bf16.vlgmr.msrb.gmra.mxu2 %v8809_v63 }
 0x788   :  { %4178 = vmatmul.bf16.vlgmr.msra.gmra.mxu1 %v8809_v63  ;;  %4196 = vmatpush.bf16.msra.mxu3 %v10909_v43 }
 0x789   :  { %4235 = vmatpush.bf16.msrb.mxu2 %v10714_v3  ;;  %4274 = vmatpush.bf16.msra.mxu1 %v10715_v6 }
 0x78b   :  { %v4018_v16 = vpop.f32.mrf.mxu1 }
 0x78c   :  { %v4019_v28 = vadd.f32 %v4018_v16, %v4006_v4  ;;  %4197 = vmatpush.bf16.msra.mxu3 %v10717_v40  ;;  %v11319_v16 = vld [vmem:[#allocation94_spill] sm:$0xff] }
 0x78d   :  { %4236 = vmatpush.bf16.msrb.mxu2 %v10718_v1  ;;  %4275 = vmatpush.bf16.msra.mxu1 %v10910_v62 }
 0x78e   :  { %v4051_v51 = vadd.f32 %v4019_v28, %v260_v0  ;;  %v11320_v0 = vld [vmem:[#allocation125_spill] sm:$0xff]  ;;  %v11321_v28 = vld [vmem:[#allocation128_spill] sm:$0xff] }
 0x790   :  { %v4054_v9 = vmul.f32 0.5, %v4051_v51  ;;  %4198 = vmatpush.bf16.msra.mxu3 %v10911_v7  ;;  %v11322_v51 = vld [vmem:[#allocation70_spill] sm:$0xff] }
 0x791   :  { %4237 = vmatpush.bf16.msrb.mxu2 %v10912_v49  ;;  %4276 = vmatpush.bf16.msra.mxu1 %v10913_v48 }
 0x792   :  { %6205 = vtanh.f32 %v4054_v9  ;;  %v11323_v9 = vld [vmem:[#allocation98_spill] sm:$0xff] }
 0x793   :  { %v4020_v58 = vpop.f32.mrf.mxu1  ;;  %6207 = vtanh.f32 %v8763_v23  ;;  %v11315_v23 = vld [vmem:[#allocation90_spill] sm:$0xff] }
 0x794   :  { %4199 = vmatpush.bf16.msra.mxu3 %v10723_v45  ;;  %v11324_v58 = vld [vmem:[#allocation129_spill] sm:$0xff] }
 0x795   :  { %4238 = vmatpush.bf16.msrb.mxu2 %v11309_v20  ;;  %4277 = vmatpush.bf16.msra.mxu1 %v11310_v15 }
 0x798   :  { %v6206_v37 = vpop.eup %6205  ;;  %4200 = vmatpush.bf16.msra.mxu3 %v11311_v5 }
 0x799   :  { %v4060_v27 = vmul.f32 0.5, %v6206_v37  ;;  %4239 = vmatpush.bf16.msrb.mxu2 %v11312_v11  ;;  %4278 = vmatpush.bf16.msra.mxu1 %v11313_v30  ;;  %v6208_v53 = vpop.eup %6207  ;;  %v11325_v37 = vld [vmem:[#allocation135_spill] sm:$0xff] }
 0x79a   :  { %v11484_v11 = vld [vmem:[#allocation47_spill] sm:$0xff] }
 0x79b   :  { %v4063_v42 = vadd.f32 0.5, %v4060_v27  ;;  %v11326_v27 = vld [vmem:[#allocation101_spill] sm:$0xff] }
 0x79c   :  { %4201 = vmatpush.bf16.msra.mxu3 %v11315_v23 }
 0x79d   :  { %v4066_v31 = vsub.f32 1.0, %v4063_v42  ;;  %v4072_v12 = vmul.f32 %v4063_v42, %v11314_v18  ;;  %4240 = vmatpush.bf16.msrb.mxu2 %v11317_v26  ;;  %4279 = vmatpush.bf16.msra.mxu1 %v11318_v19  ;;  %v11327_v42 = vld [vmem:[#allocation132_spill] sm:$0xff]  ;;  %v11331_v18 = vld [vmem:[#allocation137_spill] sm:$0xff] }
 0x79f   :  { %v4069_v44 = vmul.f32 %v6208_v53, %v4066_v31  ;;  %v11328_v31 = vld [vmem:[#allocation136_spill] sm:$0xff]  ;;  %v11329_v53 = vld [vmem:[#allocation75_spill] sm:$0xff] }
 0x7a0   :  { %4202 = vmatpush.bf16.msra.mxu3 %v11319_v16  ;;  %v11410_v16 = vld [vmem:[#allocation21_spill] sm:$0xff] }
 0x7a1   :  { %v8837_v56 = vadd.f32 %v4072_v12, %v4069_v44  ;;  %4241 = vmatpush.bf16.msrb.mxu2 %v11320_v0  ;;  %4280 = vmatpush.bf16.msra.mxu1 %v11321_v28  ;;  %v11330_v44 = vld [vmem:[#allocation106_spill] sm:$0xff]  ;;  %v11332_v12 = vld [vmem:[#allocation140_spill] sm:$0xff]  ;;  %v11402_v28 = vld [vmem:[#allocation13_spill] sm:$0xff] }
 0x7a2   :  { %v11405_v0 = vld [vmem:[#allocation182_spill] sm:$0xff] }
 0x7a3   :  { %11316 = vst [vmem:[#allocation234_spill] sm:$0xff] %v8837_v56  ;;  %v8843_v4 = vpack.c.bf16 %v8837_v56, %v8837_v56  ;;  %v11471_v56 = vld [vmem:[#allocation27_spill] sm:$0xff] }
 0x7a4   :  { %4203 = vmatpush.bf16.msra.mxu3 %v11323_v9  ;;  %v11334_v9 = vld [vmem:[#allocation110_spill] sm:$0xff] }
 0x7a5   :  { %4113 = vmatmul.bf16.vlgmr.msrb.gmra.mxu0 %v8843_v4  ;;  %4152 = vmatmul.bf16.vlgmr.msrb.gmra.mxu3 %v8843_v4 }
 0x7a6   :  { %4191 = vmatmul.bf16.vlgmr.msra.gmra.mxu2 %v8843_v4  ;;  %4209 = vmatpush.bf16.msrb.mxu0 %v11322_v51  ;;  %v11333_v51 = vld [vmem:[#allocation79_spill] sm:$0xff] }
 0x7a7   :  { %4230 = vmatmul.bf16.vlgmr.msrb.gmra.mxu1 %v8843_v4  ;;  %4242 = vmatpush.bf16.msrb.mxu2 %v11324_v58  ;;  %v11335_v58 = vld [vmem:[#allocation141_spill] sm:$0xff] }
 0x7a8   :  { %4281 = vmatpush.bf16.msra.mxu1 %v11325_v37  ;;  %4248 = vmatpush.bf16.msrb.mxu3 %v11326_v27  ;;  %v11336_v37 = vld [vmem:[#allocation144_spill] sm:$0xff]  ;;  %v11337_v27 = vld [vmem:[#allocation83_spill] sm:$0xff] }
 0x7aa   :  { %4210 = vmatpush.bf16.msrb.mxu0 %v11329_v53  ;;  %v11340_v53 = vld [vmem:[#allocation148_spill] sm:$0xff] }
 0x7ab   :  { %4287 = vmatpush.bf16.msra.mxu2 %v11327_v42  ;;  %v11338_v42 = vld [vmem:[#allocation114_spill] sm:$0xff] }
 0x7ac   :  { %4326 = vmatpush.bf16.msrb.mxu1 %v11328_v31  ;;  %4249 = vmatpush.bf16.msrb.mxu3 %v11330_v44  ;;  %v11339_v31 = vld [vmem:[#allocation145_spill] sm:$0xff]  ;;  %v11352_v44 = vld [vmem:[#allocation160_spill] sm:$0xff] }
 0x7ae   :  { %4211 = vmatpush.bf16.msrb.mxu0 %v11333_v51  ;;  %v11349_v51 = vld [vmem:[#allocation95_spill] sm:$0xff] }
 0x7af   :  { %4288 = vmatpush.bf16.msra.mxu2 %v11331_v18  ;;  %v11351_v18 = vld [vmem:[#allocation157_spill] sm:$0xff] }
 0x7b0   :  { %4327 = vmatpush.bf16.msrb.mxu1 %v11332_v12  ;;  %4250 = vmatpush.bf16.msrb.mxu3 %v11334_v9  ;;  %v11341_v12 = vld [vmem:[#allocation87_spill] sm:$0xff]  ;;  %v11348_v9 = vld [vmem:[#allocation156_spill] sm:$0xff] }
 0x7b2   :  { %4212 = vmatpush.bf16.msrb.mxu0 %v11337_v27  ;;  %v11344_v27 = vld [vmem:[#allocation152_spill] sm:$0xff] }
 0x7b3   :  { %4289 = vmatpush.bf16.msra.mxu2 %v11335_v58  ;;  %v11342_v58 = vld [vmem:[#allocation118_spill] sm:$0xff] }
 0x7b4   :  { %4328 = vmatpush.bf16.msrb.mxu1 %v11336_v37  ;;  %4251 = vmatpush.bf16.msrb.mxu3 %v11338_v42  ;;  %v11343_v37 = vld [vmem:[#allocation149_spill] sm:$0xff]  ;;  %v11345_v42 = vld [vmem:[#allocation91_spill] sm:$0xff] }
 0x7b5   :  { %4165 = vmatmul.bf16.vlgmr.msra.gmra.mxu0 %v8780_v41  ;;  %4204 = vmatmul.bf16.vlgmr.msra.gmra.mxu3 %v8780_v41 }
 0x7b6   :  { %4213 = vmatpush.bf16.msrb.mxu0 %v11341_v12  ;;  %4243 = vmatmul.bf16.vlgmr.msrb.gmra.mxu2 %v8780_v41  ;;  %v11350_v12 = vld [vmem:[#allocation126_spill] sm:$0xff] }
 0x7b7   :  { %4290 = vmatpush.bf16.msra.mxu2 %v11339_v31  ;;  %4282 = vmatmul.bf16.vlgmr.msra.gmra.mxu1 %v8780_v41  ;;  %v11346_v31 = vld [vmem:[#allocation122_spill] sm:$0xff] }
 0x7b8   :  { %4329 = vmatpush.bf16.msrb.mxu1 %v11340_v53  ;;  %4252 = vmatpush.bf16.msrb.mxu3 %v11342_v58  ;;  %v11347_v53 = vld [vmem:[#allocation153_spill] sm:$0xff]  ;;  %v11353_v58 = vld [vmem:[#allocation99_spill] sm:$0xff] }
 0x7ba   :  { %4214 = vmatpush.bf16.msrb.mxu0 %v11345_v42  ;;  %v11356_v42 = vld [vmem:[#allocation161_spill] sm:$0xff] }
 0x7bb   :  { %4291 = vmatpush.bf16.msra.mxu2 %v11343_v37  ;;  %v11354_v37 = vld [vmem:[#allocation102_spill] sm:$0xff] }
 0x7bc   :  { %4330 = vmatpush.bf16.msrb.mxu1 %v11344_v27  ;;  %4253 = vmatpush.bf16.msrb.mxu3 %v11346_v31  ;;  %v11355_v27 = vld [vmem:[#allocation130_spill] sm:$0xff]  ;;  %v11357_v31 = vld [vmem:[#allocation167_spill] sm:$0xff] }
 0x7be   :  { %4215 = vmatpush.bf16.msrb.mxu0 %v11349_v51  ;;  %v11360_v51 = vld [vmem:[#allocation168_spill] sm:$0xff] }
 0x7bf   :  { %4292 = vmatpush.bf16.msra.mxu2 %v11347_v53  ;;  %v11358_v53 = vld [vmem:[#allocation133_spill] sm:$0xff] }
 0x7c0   :  { %4331 = vmatpush.bf16.msrb.mxu1 %v11348_v9  ;;  %4254 = vmatpush.bf16.msrb.mxu3 %v11350_v12  ;;  %v11359_v9 = vld [vmem:[#allocation164_spill] sm:$0xff] }
 0x7c1   :  { %v11372_v12 = vld [vmem:[#allocation180_spill] sm:$0xff] }
 0x7c2   :  { %4216 = vmatpush.bf16.msrb.mxu0 %v11353_v58  ;;  %v11369_v58 = vld [vmem:[#allocation115_spill] sm:$0xff] }
 0x7c3   :  { %4293 = vmatpush.bf16.msra.mxu2 %v11351_v18  ;;  %v11371_v18 = vld [vmem:[#allocation177_spill] sm:$0xff] }
 0x7c4   :  { %4332 = vmatpush.bf16.msrb.mxu1 %v11352_v44  ;;  %4255 = vmatpush.bf16.msrb.mxu3 %v11355_v27  ;;  %v11361_v44 = vld [vmem:[#allocation107_spill] sm:$0xff]  ;;  %v11362_v27 = vld [vmem:[#allocation138_spill] sm:$0xff] }
 0x7c5   :  { %4217 = vmatmul.bf16.vlgmr.msrb.gmra.mxu0 %v8809_v63 }
 0x7c6   :  { %4261 = vmatpush.bf16.msra.mxu0 %v11354_v37  ;;  %v11368_v37 = vld [vmem:[#allocation176_spill] sm:$0xff] }
 0x7c7   :  { %4294 = vmatpush.bf16.msra.mxu2 %v11356_v42  ;;  %4256 = vmatmul.bf16.vlgmr.msrb.gmra.mxu3 %v8809_v63  ;;  %v11363_v42 = vld [vmem:[#allocation169_spill] sm:$0xff] }
 0x7c8   :  { %4333 = vmatpush.bf16.msrb.mxu1 %v11357_v31  ;;  %4300 = vmatpush.bf16.msra.mxu3 %v11358_v53  ;;  %v11364_v31 = vld [vmem:[#allocation172_spill] sm:$0xff]  ;;  %v11365_v53 = vld [vmem:[#allocation111_spill] sm:$0xff] }
 0x7ca   :  { %4262 = vmatpush.bf16.msra.mxu0 %v11361_v44  ;;  %4295 = vmatmul.bf16.vlgmr.msra.gmra.mxu2 %v8809_v63  ;;  %v11370_v44 = vld [vmem:[#allocation146_spill] sm:$0xff] }
 0x7cb   :  { %4339 = vmatpush.bf16.msrb.mxu2 %v11359_v9  ;;  %4334 = vmatmul.bf16.vlgmr.msrb.gmra.mxu1 %v8809_v63  ;;  %v11366_v9 = vld [vmem:[#allocation142_spill] sm:$0xff] }
 0x7cc   :  { %4378 = vmatpush.bf16.msra.mxu1 %v11360_v51  ;;  %4301 = vmatpush.bf16.msra.mxu3 %v11362_v27  ;;  %v11367_v51 = vld [vmem:[#allocation173_spill] sm:$0xff]  ;;  %v11373_v27 = vld [vmem:[#allocation119_spill] sm:$0xff] }
 0x7ce   :  { %4263 = vmatpush.bf16.msra.mxu0 %v11365_v53  ;;  %v11376_v53 = vld [vmem:[#allocation184_spill] sm:$0xff] }
 0x7cf   :  { %4340 = vmatpush.bf16.msrb.mxu2 %v11363_v42  ;;  %v11374_v42 = vld [vmem:[#allocation150_spill] sm:$0xff] }
 0x7d0   :  { %4379 = vmatpush.bf16.msra.mxu1 %v11364_v31  ;;  %4302 = vmatpush.bf16.msra.mxu3 %v11366_v9  ;;  %v11375_v31 = vld [vmem:[#allocation181_spill] sm:$0xff]  ;;  %v11377_v9 = vld [vmem:[#allocation123_spill] sm:$0xff] }
 0x7d2   :  { %4264 = vmatpush.bf16.msra.mxu0 %v11369_v58  ;;  %v11380_v58 = vld [vmem:[#allocation188_spill] sm:$0xff] }
 0x7d3   :  { %4341 = vmatpush.bf16.msrb.mxu2 %v11367_v51  ;;  %v11378_v51 = vld [vmem:[#allocation154_spill] sm:$0xff] }
 0x7d4   :  { %4380 = vmatpush.bf16.msra.mxu1 %v11368_v37  ;;  %4303 = vmatpush.bf16.msra.mxu3 %v11370_v44  ;;  %v11379_v37 = vld [vmem:[#allocation185_spill] sm:$0xff]  ;;  %v11381_v44 = vld [vmem:[#allocation127_spill] sm:$0xff] }
 0x7d6   :  { %4265 = vmatpush.bf16.msra.mxu0 %v11373_v27  ;;  %v11384_v27 = vld [vmem:[#allocation192_spill] sm:$0xff] }
 0x7d7   :  { %4342 = vmatpush.bf16.msrb.mxu2 %v11371_v18  ;;  %v11382_v18 = vld [vmem:[#allocation158_spill] sm:$0xff] }
 0x7d8   :  { %4381 = vmatpush.bf16.msra.mxu1 %v11372_v12  ;;  %4304 = vmatpush.bf16.msra.mxu3 %v11374_v42  ;;  %v11383_v12 = vld [vmem:[#allocation189_spill] sm:$0xff]  ;;  %v11385_v42 = vld [vmem:[#allocation131_spill] sm:$0xff] }
 0x7da   :  { %4266 = vmatpush.bf16.msra.mxu0 %v11377_v9  ;;  %v11388_v9 = vld [vmem:[#allocation193_spill] sm:$0xff] }
 0x7db   :  { %4343 = vmatpush.bf16.msrb.mxu2 %v11375_v31  ;;  %v11386_v31 = vld [vmem:[#allocation134_spill] sm:$0xff] }
 0x7dc   :  { %4382 = vmatpush.bf16.msra.mxu1 %v11376_v53  ;;  %4305 = vmatpush.bf16.msra.mxu3 %v11378_v51  ;;  %v11387_v53 = vld [vmem:[#allocation162_spill] sm:$0xff]  ;;  %v11389_v51 = vld [vmem:[#allocation199_spill] sm:$0xff] }
 0x7de   :  { %4267 = vmatpush.bf16.msra.mxu0 %v11381_v44  ;;  %v11391_v44 = vld [vmem:[#allocation196_spill] sm:$0xff] }
 0x7df   :  { %4344 = vmatpush.bf16.msrb.mxu2 %v11379_v37  ;;  %v11401_v37 = vld [vmem:[#allocation178_spill] sm:$0xff] }
 0x7e0   :  { %4383 = vmatpush.bf16.msra.mxu1 %v11380_v58  ;;  %4306 = vmatpush.bf16.msra.mxu3 %v11382_v18  ;;  %v11390_v58 = vld [vmem:[#allocation165_spill] sm:$0xff] }
 0x7e2   :  { %4268 = vmatpush.bf16.msra.mxu0 %v11385_v42  ;;  %v11396_v42 = vld [vmem:[#allocation143_spill] sm:$0xff] }
 0x7e3   :  { %4345 = vmatpush.bf16.msrb.mxu2 %v11383_v12  ;;  %v11392_v12 = vld [vmem:[#allocation139_spill] sm:$0xff] }
 0x7e4   :  { %4384 = vmatpush.bf16.msra.mxu1 %v11384_v27  ;;  %4307 = vmatpush.bf16.msra.mxu3 %v11387_v53  ;;  %v11394_v53 = vld [vmem:[#allocation5_spill] sm:$0xff]  ;;  %v11399_v27 = vld [vmem:[#allocation203_spill] sm:$0xff] }
 0x7e5   :  { %4269 = vmatmul.bf16.vlgmr.msra.gmra.mxu0 %v8843_v4 }
 0x7e6   :  { %4313 = vmatpush.bf16.msrb.mxu0 %v11386_v31  ;;  %v11393_v31 = vld [vmem:[#allocation170_spill] sm:$0xff] }
 0x7e7   :  { %4346 = vmatpush.bf16.msrb.mxu2 %v11388_v9  ;;  %4308 = vmatmul.bf16.vlgmr.msra.gmra.mxu3 %v8843_v4  ;;  %v11395_v9 = vld [vmem:[#allocation200_spill] sm:$0xff] }
 0x7e8   :  { %4385 = vmatpush.bf16.msra.mxu1 %v11389_v51  ;;  %4352 = vmatpush.bf16.msrb.mxu3 %v11390_v58  ;;  %v4127_v51 = vpop.f32.mrf.mxu1  ;;  %v11397_v58 = vld [vmem:[#allocation174_spill] sm:$0xff] }
 0x7ea   :  { %4314 = vmatpush.bf16.msrb.mxu0 %v11392_v12  ;;  %4347 = vmatmul.bf16.vlgmr.msrb.gmra.mxu2 %v8843_v4  ;;  %v11400_v12 = vld [vmem:[#allocation147_spill] sm:$0xff]  ;;  %v4088_v18 = vpop.f32.mrf.mxu2 }
 0x7eb   :  { %4391 = vmatpush.bf16.msra.mxu2 %v11391_v44  ;;  %4386 = vmatmul.bf16.vlgmr.msra.gmra.mxu1 %v8843_v4  ;;  %v11398_v44 = vld [vmem:[#allocation9_spill] sm:$0xff] }
 0x7ec   :  { %4353 = vmatpush.bf16.msrb.mxu3 %v11393_v31  ;;  %4487 = vmatpush.bf16.msrb.mxu1 %v11394_v53  ;;  %v11403_v31 = vld [vmem:[#allocation206_spill] sm:$0xff] }
 0x7ee   :  { %4315 = vmatpush.bf16.msrb.mxu0 %v11396_v42  ;;  %v11406_v42 = vld [vmem:[#allocation17_spill] sm:$0xff] }
 0x7ef   :  { %4392 = vmatpush.bf16.msra.mxu2 %v11395_v9  ;;  %v11404_v9 = vld [vmem:[#allocation151_spill] sm:$0xff] }
 0x7f0   :  { %4354 = vmatpush.bf16.msrb.mxu3 %v11397_v58  ;;  %4488 = vmatpush.bf16.msrb.mxu1 %v11398_v44  ;;  %v4129_v53 = vpop.f32.mrf.mxu1  ;;  %v11407_v58 = vld [vmem:[#allocation209_spill] sm:$0xff]  ;;  %v11408_v44 = vld [vmem:[#allocation155_spill] sm:$0xff] }
 0x7f1   :  { %v11413_v53 = vld [vmem:[#allocation190_spill] sm:$0xff] }
 0x7f2   :  { %4316 = vmatpush.bf16.msrb.mxu0 %v11400_v12  ;;  %v11409_v12 = vld [vmem:[#allocation186_spill] sm:$0xff] }
 0x7f3   :  { %4393 = vmatpush.bf16.msra.mxu2 %v11399_v27  ;;  %v4090_v27 = vpop.f32.mrf.mxu2 }
 0x7f4   :  { %4355 = vmatpush.bf16.msrb.mxu3 %v11401_v37  ;;  %4489 = vmatpush.bf16.msrb.mxu1 %v11402_v28  ;;  %v11411_v37 = vld [vmem:[#allocation212_spill] sm:$0xff]  ;;  %v11412_v28 = vld [vmem:[#allocation159_spill] sm:$0xff]  ;;  %v11419_v27 = vld [vmem:[#allocation29_spill] sm:$0xff] }
 0x7f6   :  { %4317 = vmatpush.bf16.msrb.mxu0 %v11404_v9  ;;  %v11414_v9 = vld [vmem:[#allocation25_spill] sm:$0xff] }
 0x7f7   :  { %4394 = vmatpush.bf16.msra.mxu2 %v11403_v31  ;;  %v11435_v31 = vld [vmem:[#allocation18_spill] sm:$0xff] }
 0x7f8   :  { %4356 = vmatpush.bf16.msrb.mxu3 %v11405_v0  ;;  %4490 = vmatpush.bf16.msrb.mxu1 %v11406_v42  ;;  %v11415_v0 = vld [vmem:[#allocation216_spill] sm:$0xff]  ;;  %v11416_v42 = vld [vmem:[#allocation163_spill] sm:$0xff] }
 0x7fa   :  { %4318 = vmatpush.bf16.msrb.mxu0 %v11408_v44  ;;  %v11418_v44 = vld [vmem:[#allocation194_spill] sm:$0xff] }
 0x7fb   :  { %4395 = vmatpush.bf16.msra.mxu2 %v11407_v58  ;;  %v11417_v58 = vld [vmem:[#allocation166_spill] sm:$0xff] }
 0x7fc   :  { %4357 = vmatpush.bf16.msrb.mxu3 %v11409_v12  ;;  %4491 = vmatpush.bf16.msrb.mxu1 %v11410_v16  ;;  %v11420_v12 = vld [vmem:[#allocation220_spill] sm:$0xff]  ;;  %v11421_v16 = vld [vmem:[#allocation197_spill] sm:$0xff] }
 0x7fe   :  { %4319 = vmatpush.bf16.msrb.mxu0 %v11412_v28  ;;  %v11422_v28 = vld [vmem:[#allocation6_spill] sm:$0xff] }
 0x7ff   :  { %4396 = vmatpush.bf16.msra.mxu2 %v11411_v37  ;;  %v11433_v37 = vld [vmem:[#allocation45_spill] sm:$0xff] }
 0x800   :  { %4358 = vmatpush.bf16.msrb.mxu3 %v11413_v53  ;;  %4492 = vmatpush.bf16.msrb.mxu1 %v11414_v9  ;;  %v11423_v9 = vld [vmem:[#allocation171_spill] sm:$0xff]  ;;  %v11431_v53 = vld [vmem:[#allocation14_spill] sm:$0xff] }
 0x802   :  { %4320 = vmatpush.bf16.msrb.mxu0 %v11416_v42  ;;  %v11424_v42 = vld [vmem:[#allocation33_spill] sm:$0xff] }
 0x803   :  { %4397 = vmatpush.bf16.msra.mxu2 %v11415_v0 }
 0x804   :  { %4359 = vmatpush.bf16.msrb.mxu3 %v11418_v44  ;;  %4493 = vmatpush.bf16.msrb.mxu1 %v11419_v27  ;;  %v11426_v44 = vld [vmem:[#allocation201_spill] sm:$0xff]  ;;  %v11427_v27 = vld [vmem:[#allocation10_spill] sm:$0xff] }
 0x805   :  { %4321 = vmatmul.bf16.vlgmr.msrb.gmra.mxu0 %v8780_v41  ;;  %v8974_v0 = vpop.f32.mrf.mxu1 }
 0x806   :  { %4365 = vmatpush.bf16.msra.mxu0 %v11417_v58  ;;  %v11425_v58 = vld [vmem:[#allocation36_spill] sm:$0xff] }
 0x807   :  { %4398 = vmatpush.bf16.msra.mxu2 %v11420_v12  ;;  %4360 = vmatmul.bf16.vlgmr.msrb.gmra.mxu3 %v8780_v41  ;;  %v11428_v12 = vld [vmem:[#allocation175_spill] sm:$0xff] }
 0x808   :  { %4404 = vmatpush.bf16.msra.mxu3 %v11421_v16  ;;  %4494 = vmatpush.bf16.msrb.mxu1 %v11424_v42  ;;  %v11429_v16 = vld [vmem:[#allocation41_spill] sm:$0xff] }
 0x80a   :  { %4366 = vmatpush.bf16.msra.mxu0 %v11423_v9  ;;  %4399 = vmatmul.bf16.vlgmr.msra.gmra.mxu2 %v8780_v41  ;;  %v11432_v9 = vld [vmem:[#allocation179_spill] sm:$0xff]  ;;  %v4101_v41 = vpop.f32.mrf.mxu3  ;;  %v4140_v42 = vpop.f32.mrf.mxu2 }
 0x80b   :  { %4500 = vmatpush.bf16.msrb.mxu2 %v11422_v28  ;;  %v11430_v28 = vld [vmem:[#allocation204_spill] sm:$0xff] }
 0x80c   :  { %4539 = vmatpush.bf16.msra.mxu1 %v11425_v58  ;;  %4405 = vmatpush.bf16.msra.mxu3 %v11426_v44  ;;  %v11434_v58 = vld [vmem:[#allocation207_spill] sm:$0xff]  ;;  %v4102_v44 = vadd.f32 %v4101_v41, %v4088_v18  ;;  %v11445_v18 = vld [vmem:[#allocation57_spill] sm:$0xff]  ;;  %v11447_v41 = vld [vmem:[#allocation30_spill] sm:$0xff] }
 0x80d   :  { %v4181_v19 = vpop.f32.mrf.mxu1 }
 0x80e   :  { %4367 = vmatpush.bf16.msra.mxu0 %v11428_v12  ;;  %v11436_v12 = vld [vmem:[#allocation183_spill] sm:$0xff]  ;;  %v11446_v19 = vld [vmem:[#allocation218_spill] sm:$0xff] }
 0x80f   :  { %4501 = vmatpush.bf16.msrb.mxu2 %v11427_v27  ;;  %v4141_v27 = vadd.f32 %v4140_v42, %v4127_v51  ;;  %v11443_v51 = vld [vmem:[#allocation26_spill] sm:$0xff]  ;;  %v11448_v42 = vld [vmem:[#allocation195_spill] sm:$0xff] }
 0x810   :  { %4540 = vmatpush.bf16.msra.mxu1 %v11429_v16  ;;  %4406 = vmatpush.bf16.msra.mxu3 %v11430_v28  ;;  %v11437_v16 = vld [vmem:[#allocation49_spill] sm:$0xff]  ;;  %v11438_v28 = vld [vmem:[#allocation210_spill] sm:$0xff] }
 0x812   :  { %4368 = vmatpush.bf16.msra.mxu0 %v11432_v9  ;;  %v11440_v9 = vld [vmem:[#allocation187_spill] sm:$0xff]  ;;  %v4103_v26 = vpop.f32.mrf.mxu3  ;;  %v4142_v23 = vpop.f32.mrf.mxu2 }
 0x813   :  { %4502 = vmatpush.bf16.msrb.mxu2 %v11431_v53  ;;  %v11439_v53 = vld [vmem:[#allocation22_spill] sm:$0xff]  ;;  %v11450_v26 = vld [vmem:[#allocation61_spill] sm:$0xff] }
 0x814   :  { %4541 = vmatpush.bf16.msra.mxu1 %v11433_v37  ;;  %4407 = vmatpush.bf16.msra.mxu3 %v11434_v58  ;;  %v11441_v37 = vld [vmem:[#allocation53_spill] sm:$0xff]  ;;  %v11442_v58 = vld [vmem:[#allocation214_spill] sm:$0xff] }
 0x815   :  { %v11451_v23 = vld [vmem:[#allocation221_spill] sm:$0xff] }
 0x816   :  { %4369 = vmatpush.bf16.msra.mxu0 %v11436_v12 }
 0x817   :  { %4503 = vmatpush.bf16.msrb.mxu2 %v11435_v31  ;;  %v11444_v31 = vld [vmem:[#allocation191_spill] sm:$0xff] }
 0x818   :  { %4542 = vmatpush.bf16.msra.mxu1 %v11437_v16  ;;  %4408 = vmatpush.bf16.msra.mxu3 %v11438_v28  ;;  %v11449_v16 = vld [vmem:[#allocation198_spill] sm:$0xff]  ;;  %v11470_v28 = vld [vmem:[#allocation217_spill] sm:$0xff] }
 0x81a   :  { %4370 = vmatpush.bf16.msra.mxu0 %v11440_v9  ;;  %v11467_v9 = vld [vmem:[#allocation23_spill] sm:$0xff] }
 0x81b   :  { %4504 = vmatpush.bf16.msrb.mxu2 %v11439_v53  ;;  %v11452_v53 = vld [vmem:[#allocation7_spill] sm:$0xff] }
 0x81c   :  { %4543 = vmatpush.bf16.msra.mxu1 %v11441_v37  ;;  %4409 = vmatpush.bf16.msra.mxu3 %v11442_v58  ;;  %v11453_v37 = vld [vmem:[#allocation34_spill] sm:$0xff] }
 0x81d   :  { %v11462_v58 = vld [vmem:[#allocation46_spill] sm:$0xff] }
 0x81e   :  { %4371 = vmatpush.bf16.msra.mxu0 %v11444_v31  ;;  %v11459_v31 = vld [vmem:[#allocation42_spill] sm:$0xff] }
 0x81f   :  { %4505 = vmatpush.bf16.msrb.mxu2 %v11443_v51  ;;  %v11454_v51 = vld [vmem:[#allocation202_spill] sm:$0xff] }
 0x820   :  { %4544 = vmatpush.bf16.msra.mxu1 %v11445_v18  ;;  %4410 = vmatpush.bf16.msra.mxu3 %v11446_v19  ;;  %v11455_v18 = vld [vmem:[#allocation37_spill] sm:$0xff]  ;;  %v11457_v19 = vld [vmem:[#allocation11_spill] sm:$0xff] }
 0x822   :  { %4372 = vmatpush.bf16.msra.mxu0 %v11448_v42  ;;  %v4114_v42 = vpop.f32.mrf.mxu0 }
 0x823   :  { %4506 = vmatpush.bf16.msrb.mxu2 %v11447_v41  ;;  %v11456_v41 = vld [vmem:[#allocation65_spill] sm:$0xff] }
 0x824   :  { %4545 = vmatpush.bf16.msra.mxu1 %v11450_v26  ;;  %4411 = vmatpush.bf16.msra.mxu3 %v11451_v23  ;;  %v11458_v26 = vld [vmem:[#allocation205_spill] sm:$0xff]  ;;  %v4231_v23 = vpop.f32.mrf.mxu1 }
 0x825   :  { %4373 = vmatmul.bf16.vlgmr.msra.gmra.mxu0 %v8809_v63 }
 0x826   :  { %4417 = vmatpush.bf16.msrb.mxu0 %v11449_v16  ;;  %v4115_v16 = vadd.f32 %v4114_v42, %v4102_v44  ;;  %v11463_v44 = vld [vmem:[#allocation19_spill] sm:$0xff] }
 0x827   :  { %4507 = vmatpush.bf16.msrb.mxu2 %v11453_v37  ;;  %4412 = vmatmul.bf16.vlgmr.msra.gmra.mxu3 %v8809_v63  ;;  %v11461_v37 = vld [vmem:[#allocation208_spill] sm:$0xff]  ;;  %v11464_v42 = vld [vmem:[#allocation211_spill] sm:$0xff] }
 0x828   :  { %4513 = vmatpush.bf16.msrb.mxu3 %v11452_v53  ;;  %4546 = vmatpush.bf16.msra.mxu1 %v11456_v41  ;;  %v11460_v53 = vld [vmem:[#allocation15_spill] sm:$0xff] }
 0x829   :  { %v9014_v63 = vpop.f32.mrf.mxu2 }
 0x82a   :  { %4418 = vmatpush.bf16.msrb.mxu0 %v11454_v51  ;;  %v4153_v51 = vpop.f32.mrf.mxu3  ;;  %v4116_v41 = vpop.f32.mrf.mxu0 }
 0x82b   :  { %4552 = vmatpush.bf16.msra.mxu2 %v11455_v18  ;;  %v9012_v18 = vadd.f32 %v4153_v51, %v4141_v27  ;;  %v11469_v51 = vld [vmem:[#allocation54_spill] sm:$0xff] }
 0x82c   :  { %4514 = vmatpush.bf16.msrb.mxu3 %v11457_v19  ;;  %v9017_v19 = vpop.permute.xlu0 %85 }
 0x82e   :  { %4419 = vmatpush.bf16.msrb.mxu0 %v11458_v26  ;;  %v4233_v26 = vpop.f32.mrf.mxu1 }
 0x82f   :  { %4553 = vmatpush.bf16.msra.mxu2 %v11459_v31  ;;  %v11465_v31 = vld [vmem:[#allocation50_spill] sm:$0xff] }
 0x830   :  { %4515 = vmatpush.bf16.msrb.mxu3 %v11460_v53  ;;  %v11466_v53 = vld [vmem:[#allocation213_spill] sm:$0xff]  ;;  %v11473_v26 = vld [vmem:[#allocation58_spill] sm:$0xff] }
 0x831   :  { %v4194_v41 = vpop.f32.mrf.mxu2 }
 0x832   :  { %4420 = vmatpush.bf16.msrb.mxu0 %v11461_v37  ;;  %v167_v37 = vmul.f32 %v11466_v53, %v9017_v19  ;;  %v4155_v27 = vpop.f32.mrf.mxu3  ;;  %v4166_v12 = vpop.f32.mrf.mxu0  ;;  %v11474_v53 = vld [vmem:[#allocation31_spill] sm:$0xff] }
 0x833   :  { %4554 = vmatpush.bf16.msra.mxu2 %v11462_v58  ;;  %v11468_v58 = vld [vmem:[#allocation215_spill] sm:$0xff] }
 0x834   :  { %4516 = vmatpush.bf16.msrb.mxu3 %v11463_v44  ;;  %v261_v44 = vadd.f32 %v11470_v28, %v167_v37  ;;  %v11478_v28 = vld [vmem:[#allocation35_spill] sm:$0xff] }
 0x836   :  { %4421 = vmatpush.bf16.msrb.mxu0 %v11464_v42  ;;  %v11472_v42 = vld [vmem:[#allocation219_spill] sm:$0xff]  ;;  %v4283_v30 = vpop.f32.mrf.mxu1 }
 0x837   :  { %4555 = vmatpush.bf16.msra.mxu2 %v11465_v31  ;;  %v4430_v31 = vadd.f32 %v4115_v16, %v261_v44  ;;  %v11480_v16 = vld [vmem:[#allocation66_spill] sm:$0xff]  ;;  %v11481_v44 = vld [vmem:[#allocation12_spill] sm:$0xff] }
 0x838   :  { %4517 = vmatpush.bf16.msrb.mxu3 %v11467_v9  ;;  %v11475_v9 = vld [vmem:[#allocation222_spill] sm:$0xff] }
 0x839   :  { %v4433_v27 = vmul.f32 0.5, %v4430_v31  ;;  %v4244_v37 = vpop.f32.mrf.mxu2 }
 0x83a   :  { %4422 = vmatpush.bf16.msrb.mxu0 %v11468_v58  ;;  %v11476_v58 = vld [vmem:[#allocation62_spill] sm:$0xff]  ;;  %v4205_v41 = vpop.f32.mrf.mxu3 }
 0x83b   :  { %4556 = vmatpush.bf16.msra.mxu2 %v11469_v51  ;;  %v11477_v51 = vld [vmem:[#allocation8_spill] sm:$0xff]  ;;  %6209 = vtanh.f32 %v4433_v27 }
 0x83c   :  { %4518 = vmatpush.bf16.msrb.mxu3 %v11471_v56  ;;  %v4168_v56 = vpop.f32.mrf.mxu0 }
 0x83d   :  { %v11485_v56 = vld [vmem:[#allocation20_spill] sm:$0xff] }
 0x83e   :  { %4423 = vmatpush.bf16.msrb.mxu0 %v11472_v42  ;;  %v11479_v42 = vld [vmem:[#allocation38_spill] sm:$0xff] }
 0x83f   :  { %4557 = vmatpush.bf16.msra.mxu2 %v11473_v26  ;;  %v11482_v26 = vld [vmem:[#allocation43_spill] sm:$0xff] }
 0x840   :  { %4519 = vmatpush.bf16.msrb.mxu3 %v11474_v53  ;;  %v4285_v53 = vpop.f32.mrf.mxu1 }
 0x841   :  { %v11487_v53 = vld [vmem:[#allocation223_spill] sm:$0xff] }
 0x842   :  { %4424 = vmatpush.bf16.msrb.mxu0 %v11475_v9  ;;  %v4207_v31 = vpop.f32.mrf.mxu3  ;;  %v4246_v9 = vpop.f32.mrf.mxu2 }
 0x843   :  { %4558 = vmatpush.bf16.msra.mxu2 %v11476_v58  ;;  %v11483_v58 = vld [vmem:[#allocation16_spill] sm:$0xff] }
 0x844   :  { %4520 = vmatpush.bf16.msrb.mxu3 %v11478_v28  ;;  %v11489_v31 = vld [vmem:[#allocation224_spill] sm:$0xff] }
 0x845   :  { %4425 = vmatmul.bf16.vlgmr.msrb.gmra.mxu0 %v8843_v4  ;;  %v4218_v4 = vpop.f32.mrf.mxu0 }
 0x846   :  { %4526 = vmatpush.bf16.msra.mxu0 %v11477_v51  ;;  %v6210_v51 = vpop.eup %6209 }
 0x847   :  { %4559 = vmatpush.bf16.msra.mxu2 %v11480_v16  ;;  %v4439_v28 = vmul.f32 0.5, %v6210_v51  ;;  %v11486_v16 = vld [vmem:[#allocation51_spill] sm:$0xff] }
 0x848   :  { %4565 = vmatpush.bf16.msra.mxu3 %v11479_v42  ;;  %v4219_v42 = vadd.f32 %v4218_v4, %v4205_v41  ;;  %v9043_v5 = vpop.f32.mrf.mxu1  ;;  %v11490_v51 = vld [vmem:[#allocation55_spill] sm:$0xff] }
 0x84a   :  { %4527 = vmatpush.bf16.msra.mxu0 %v11481_v44  ;;  %v4232_v27 = vadd.f32 %v4231_v23, %v4219_v42  ;;  %v168_v44 = vmul.f32 %v11487_v53, %v9017_v19  ;;  %v4257_v15 = vpop.f32.mrf.mxu3  ;;  %v11491_v42 = vld [vmem:[#allocation28_spill] sm:$0xff] }
 0x84b   :  { %v4258_v20 = vadd.f32 %v4257_v15, %v4244_v37  ;;  %v11494_v15 = vld [vmem:[#allocation32_spill] sm:$0xff] }
 0x84c   :  { %4566 = vmatpush.bf16.msra.mxu3 %v11482_v26  ;;  %v11488_v26 = vld [vmem:[#allocation24_spill] sm:$0xff]  ;;  %v4445_v9 = vadd.f32 %v4232_v27, %v11489_v31  ;;  %v262_v41 = vadd.f32 %v11092_v55, %v168_v44  ;;  %v11492_v27 = vld [vmem:[#allocation226_spill] sm:$0xff] }
 0x84d   :  { %v4220_v4 = vpop.f32.mrf.mxu0  ;;  %v169_v31 = vmul.f32 %v11492_v27, %v9017_v19 }
 0x84e   :  { %4528 = vmatpush.bf16.msra.mxu0 %v11483_v58  ;;  %v4442_v58 = vadd.f32 0.5, %v4439_v28  ;;  %v11496_v4 = vld [vmem:[#allocation63_spill] sm:$0xff] }
 0x850   :  { %4567 = vmatpush.bf16.msra.mxu3 %v11484_v11  ;;  %v9050_v11 = vmul.f32 %v4445_v9, %v4442_v58  ;;  %v4337_v28 = vpop.f32.mrf.mxu1  ;;  %v11493_v58 = vld [vmem:[#allocation59_spill] sm:$0xff] }
 0x851   :  { %v11500_v28 = vld [vmem:[#allocation44_spill] sm:$0xff] }
 0x852   :  { %4529 = vmatpush.bf16.msra.mxu0 %v11485_v56  ;;  %v4296_v56 = vpop.f32.mrf.mxu2  ;;  %v4259_v44 = vpop.f32.mrf.mxu3 }
 0x853   :  { %v4297_v23 = vadd.f32 %v4296_v56, %v4283_v30  ;;  %v11495_v30 = vld [vmem:[#allocation227_spill] sm:$0xff] }
 0x854   :  { %4568 = vmatpush.bf16.msra.mxu3 %v11486_v16  ;;  %v4180_v16 = vadd.f32 %v8974_v0, %v4166_v12  ;;  %v263_v56 = vadd.f32 %v11495_v30, %v169_v31  ;;  %v11497_v0 = vld [vmem:[#allocation39_spill] sm:$0xff] }
 0x856   :  { %4530 = vmatpush.bf16.msra.mxu0 %v11488_v26  ;;  %v4431_v26 = vadd.f32 %v9012_v18, %v262_v41  ;;  %v4193_v37 = vadd.f32 %v9014_v63, %v4180_v16  ;;  %v11498_v18 = vld [vmem:[#allocation40_spill] sm:$0xff]  ;;  %v11499_v41 = vld [vmem:[#allocation67_spill] sm:$0xff] }
 0x857   :  { %v11501_v63 = vld [vmem:[#allocation48_spill] sm:$0xff] }
 0x858   :  { %4569 = vmatpush.bf16.msra.mxu3 %v11490_v51  ;;  %v4434_v9 = vmul.f32 0.5, %v4431_v26  ;;  %v4432_v12 = vadd.f32 %v4193_v37, %v263_v56 }
 0x85a   :  { %4531 = vmatpush.bf16.msra.mxu0 %v11491_v42  ;;  %v4298_v51 = vpop.f32.mrf.mxu2  ;;  %6211 = vtanh.f32 %v4434_v9  ;;  %v4435_v42 = vmul.f32 0.5, %v4432_v12 }
 0x85c   :  { %4570 = vmatpush.bf16.msra.mxu3 %v11493_v58  ;;  %6213 = vtanh.f32 %v4435_v42 }
 0x85e   :  { %4532 = vmatpush.bf16.msra.mxu0 %v11494_v15  ;;  %v11502_v15 = vld [vmem:[#allocation52_spill] sm:$0xff] }
 0x860   :  { %4571 = vmatpush.bf16.msra.mxu3 %v11496_v4  ;;  %v6212_v58 = vpop.eup %6211 }
 0x861   :  { %v4440_v16 = vmul.f32 0.5, %v6212_v58  ;;  %v11504_v58 = vld [vmem:[#allocation229_spill] sm:$0xff] }
 0x862   :  { %4533 = vmatpush.bf16.msra.mxu0 %v11497_v0  ;;  %v4270_v31 = vpop.f32.mrf.mxu0  ;;  %v6214_v44 = vpop.eup %6213 }
 0x863   :  { %v4271_v26 = vadd.f32 %v4270_v31, %v4258_v20  ;;  %v4443_v51 = vadd.f32 0.5, %v4440_v16  ;;  %v4441_v4 = vmul.f32 0.5, %v6214_v44  ;;  %v11505_v31 = vld [vmem:[#allocation238_spill] sm:$0xff] }
 0x864   :  { %4572 = vmatpush.bf16.msra.mxu3 %v11499_v41 }
 0x865   :  { %v4446_v37 = vadd.f32 %v4271_v26, %v11301_v61  ;;  %v4444_v20 = vadd.f32 0.5, %v4441_v4 }
 0x866   :  { %4578 = vmatpush.bf16.msrb.mxu0 %v11498_v18  ;;  %v11503_v18 = vld [vmem:[#allocation73_spill] sm:$0xff] }
 0x867   :  { %v9071_v9 = vmul.f32 %v4446_v37, %v4443_v51  ;;  %v172_v41 = vmul.f32 %v11503_v18, %v9017_v19  ;;  %v11506_v51 = vld [vmem:[#allocation64_spill] sm:$0xff] }
 0x868   :  { %v4387_v56 = vpop.f32.mrf.mxu1 }
 0x869   :  { %v266_v26 = vadd.f32 %v11505_v31, %v172_v41  ;;  %v11509_v41 = vld [vmem:[#allocation232_spill] sm:$0xff] }
 0x86a   :  { %4579 = vmatpush.bf16.msrb.mxu0 %v11500_v28  ;;  %v4309_v0 = vpop.f32.mrf.mxu3  ;;  %v4272_v12 = vpop.f32.mrf.mxu0 }
 0x86b   :  { %v4310_v42 = vadd.f32 %v4309_v0, %v4297_v23  ;;  %v11507_v12 = vld [vmem:[#allocation71_spill] sm:$0xff]  ;;  %v11508_v23 = vld [vmem:[#allocation230_spill] sm:$0xff] }
 0x86c   :  { %v173_v0 = vmul.f32 %v11508_v23, %v9017_v19 }
 0x86d   :  { %v4348_v28 = vpop.f32.mrf.mxu2 }
 0x86e   :  { %4580 = vmatpush.bf16.msrb.mxu0 %v11501_v63  ;;  %v4447_v63 = vadd.f32 %v4310_v42, %v11504_v58  ;;  %v267_v4 = vadd.f32 %v10905_v46, %v173_v0 }
 0x870   :  { %v4389_v16 = vpop.f32.mrf.mxu1 }
 0x872   :  { %4581 = vmatpush.bf16.msrb.mxu0 %v11502_v15  ;;  %v4450_v15 = vmul.f32 %v4447_v63, %v4444_v20  ;;  %v4311_v44 = vpop.f32.mrf.mxu3  ;;  %v170_v20 = vmul.f32 %v11509_v41, %v9017_v19 }
 0x875   :  { %v4350_v37 = vpop.f32.mrf.mxu2 }
 0x876   :  { %4582 = vmatpush.bf16.msrb.mxu0 %v11303_v50  ;;  %v9080_v50 = vadd.f32 %v4450_v15, %v266_v26 }
 0x87a   :  { %4583 = vmatpush.bf16.msrb.mxu0 %v11304_v57 }
 0x87e   :  { %4584 = vmatpush.bf16.msrb.mxu0 %v11506_v51  ;;  %v264_v51 = vadd.f32 %v10509_v21, %v170_v20 }
 0x880   :  { %v4451_v37 = vadd.f32 %v9050_v11, %v264_v51  ;;  %v174_v11 = vmul.f32 %v10510_v32, %v9017_v19 }
 0x882   :  { %4585 = vmatpush.bf16.msrb.mxu0 %v11507_v12  ;;  %v4322_v61 = vpop.f32.mrf.mxu0 }
 0x883   :  { %v4336_v57 = vadd.f32 %v9043_v5, %v4322_v61 }
 0x885   :  { %v4349_v42 = vadd.f32 %v4348_v28, %v4336_v57 }
 0x887   :  { %v4457_v63 = vadd.f32 %v4349_v42, %v267_v4 }
 0x889   :  { %v4460_v16 = vmul.f32 0.5, %v4457_v63 }
 0x88a   :  { %v4324_v26 = vpop.f32.mrf.mxu0  ;;  %v4361_v15 = vpop.f32.mrf.mxu3 }
 0x88b   :  { %6215 = vtanh.f32 %v4460_v16  ;;  %v171_v16 = vmul.f32 %v10512_v34, %v9017_v19 }
 0x88c   :  { %6217 = vtanh.f32 %v4451_v37 }
 0x88d   :  { %v4400_v44 = vpop.f32.mrf.mxu2 }
 0x891   :  { %v6216_v12 = vpop.eup %6215 }
 0x892   :  { %v4466_v23 = vmul.f32 0.5, %v6216_v12  ;;  %v4363_v61 = vpop.f32.mrf.mxu3  ;;  %v6218_v57 = vpop.eup %6217 }
 0x894   :  { %v4469_v0 = vadd.f32 0.5, %v4466_v23 }
 0x895   :  { %v4402_v5 = vpop.f32.mrf.mxu2 }
 0x896   :  { %v4472_v28 = vsub.f32 1.0, %v4469_v0  ;;  %v4478_v4 = vmul.f32 %v4469_v0, %v8776_v2  ;;  %v11513_v5 = vld [vmem:[#allocation117_spill] sm:$0xff]  ;;  %v11515_v0 = vld [vmem:[#allocation234_spill] sm:$0xff] }
 0x898   :  { %v4475_v46 = vmul.f32 %v6218_v57, %v4472_v28  ;;  %v11517_v57 = vld [vmem:[#allocation121_spill] sm:$0xff] }
 0x89a   :  { %v9092_v42 = vadd.f32 %v4478_v4, %v4475_v46  ;;  %v268_v46 = vadd.f32 %v10511_v59, %v174_v11  ;;  %v11518_v4 = vld [vmem:[#allocation124_spill] sm:$0xff] }
 0x89c   :  { %v9096_v20 = vpack.c.bf16 %v9092_v42, %v9092_v42 }
 0x89e   :  { %4495 = vmatmul.bf16.vlgmr.msrb.gmra.mxu1 %v9096_v20  ;;  %4534 = vmatmul.bf16.vlgmr.msra.gmra.mxu0 %v9096_v20 }
 0x89f   :  { %4591 = vmatpush.bf16.msrb.mxu1 %v10312_v36  ;;  %4630 = vmatpush.bf16.msra.mxu0 %v10313_v39  ;;  %v265_v39 = vadd.f32 %v10515_v29, %v171_v16  ;;  %v11523_v16 = vld [vmem:[#allocation98_spill] sm:$0xff] }
 0x8a2   :  { %v4374_v23 = vpop.f32.mrf.mxu0 }
 0x8a3   :  { %v4375_v63 = vadd.f32 %v4374_v23, %v4361_v15  ;;  %4592 = vmatpush.bf16.msrb.mxu1 %v10316_v14  ;;  %4631 = vmatpush.bf16.msra.mxu0 %v10317_v10  ;;  %v11519_v23 = vld [vmem:[#allocation94_spill] sm:$0xff] }
 0x8a5   :  { %v4388_v2 = vadd.f32 %v4387_v56, %v4375_v63  ;;  %v4452_v56 = vadd.f32 %v9071_v9, %v265_v39  ;;  %v11520_v63 = vld [vmem:[#allocation125_spill] sm:$0xff]  ;;  %v11527_v39 = vld [vmem:[#allocation132_spill] sm:$0xff] }
 0x8a7   :  { %v4458_v26 = vadd.f32 %v4388_v2, %v268_v46  ;;  %4593 = vmatpush.bf16.msrb.mxu1 %v10513_v60  ;;  %4632 = vmatpush.bf16.msra.mxu0 %v10514_v24  ;;  %v11521_v46 = vld [vmem:[#allocation128_spill] sm:$0xff]  ;;  %v11522_v2 = vld [vmem:[#allocation70_spill] sm:$0xff] }
 0x8a9   :  { %v4461_v51 = vmul.f32 0.5, %v4458_v26  ;;  %v11524_v26 = vld [vmem:[#allocation129_spill] sm:$0xff] }
 0x8aa   :  { %v4376_v36 = vpop.f32.mrf.mxu0  ;;  %v4413_v15 = vpop.f32.mrf.mxu3 }
 0x8ab   :  { %6219 = vtanh.f32 %v4461_v51  ;;  %4594 = vmatpush.bf16.msrb.mxu1 %v10324_v52  ;;  %4633 = vmatpush.bf16.msra.mxu0 %v10326_v35  ;;  %v11525_v51 = vld [vmem:[#allocation135_spill] sm:$0xff]  ;;  %v11526_v36 = vld [vmem:[#allocation101_spill] sm:$0xff] }
 0x8ac   :  { %6221 = vtanh.f32 %v4452_v56  ;;  %v11529_v56 = vld [vmem:[#allocation75_spill] sm:$0xff] }
 0x8af   :  { %4595 = vmatpush.bf16.msrb.mxu1 %v10708_v47  ;;  %4634 = vmatpush.bf16.msra.mxu0 %v10709_v17  ;;  %v9131_v47 = vld [vmem:[%s9519_s1 + $0x8] ss:$0 sm:$0xff]  ;;  %v4414_v17 = vadd.f32 %v4413_v15, %v4400_v44  ;;  %v11528_v15 = vld [vmem:[#allocation136_spill] sm:$0xff] }
 0x8b1   :  { %v6220_v14 = vpop.eup %6219 }
 0x8b2   :  { %v4467_v10 = vmul.f32 0.5, %v6220_v14  ;;  %v4415_v60 = vpop.f32.mrf.mxu3  ;;  %v6222_v12 = vpop.eup %6221  ;;  %v11530_v14 = vld [vmem:[#allocation106_spill] sm:$0xff] }
 0x8b3   :  { %4596 = vmatpush.bf16.msrb.mxu1 %v10710_v13  ;;  %4635 = vmatpush.bf16.msra.mxu0 %v10518_v38  ;;  %v175_v38 = vmul.f32 %v9131_v47, %v9017_v19  ;;  %v11532_v60 = vld [vmem:[#allocation140_spill] sm:$0xff] }
 0x8b4   :  { %v4470_v24 = vadd.f32 0.5, %v4467_v10  ;;  %v11531_v10 = vld [vmem:[#allocation137_spill] sm:$0xff] }
 0x8b6   :  { %v4473_v37 = vsub.f32 1.0, %v4470_v24  ;;  %v4479_v52 = vmul.f32 %v4470_v24, %v8803_v22  ;;  %v11533_v24 = vld [vmem:[#allocation79_spill] sm:$0xff] }
 0x8b7   :  { %4597 = vmatpush.bf16.msrb.mxu1 %v10333_v25  ;;  %4636 = vmatpush.bf16.msra.mxu0 %v10520_v8  ;;  %v9144_v8 = vld [vmem:[%s9521_s3 + $0x8] ss:$0 sm:$0xff] }
 0x8b8   :  { %v4476_v9 = vmul.f32 %v6222_v12, %v4473_v37  ;;  %v269_v13 = vadd.f32 %v9144_v8, %v175_v38  ;;  %v11534_v37 = vld [vmem:[#allocation110_spill] sm:$0xff]  ;;  %v11535_v12 = vld [vmem:[#allocation141_spill] sm:$0xff] }
 0x8b9   :  { %v11538_v38 = vld [vmem:[#allocation114_spill] sm:$0xff] }
 0x8ba   :  { %v9120_v61 = vadd.f32 %v4479_v52, %v4476_v9  ;;  %v11536_v9 = vld [vmem:[#allocation144_spill] sm:$0xff]  ;;  %v11537_v52 = vld [vmem:[#allocation83_spill] sm:$0xff] }
 0x8bb   :  { %4598 = vmatpush.bf16.msrb.mxu1 %v10907_v33  ;;  %4637 = vmatpush.bf16.msra.mxu0 %v10908_v54 }
 0x8bc   :  { %v9126_v35 = vpack.c.bf16 %v9120_v61, %v9120_v61 }
 0x8be   :  { %4508 = vmatmul.bf16.vlgmr.msrb.gmra.mxu2 %v9126_v35  ;;  %4547 = vmatmul.bf16.vlgmr.msra.gmra.mxu1 %v9126_v35 }
 0x8bf   :  { %4586 = vmatmul.bf16.vlgmr.msrb.gmra.mxu0 %v9126_v35  ;;  %4604 = vmatpush.bf16.msrb.mxu2 %v10909_v43 }
 0x8c0   :  { %4643 = vmatpush.bf16.msra.mxu1 %v10714_v3  ;;  %4682 = vmatpush.bf16.msrb.mxu0 %v10715_v6  ;;  %v11510_v6 = vld [vmem:[#allocation113_spill] sm:$0xff] }
 0x8c2   :  { %v4426_v25 = vpop.f32.mrf.mxu0 }
 0x8c3   :  { %v4427_v22 = vadd.f32 %v4426_v25, %v4414_v17  ;;  %4605 = vmatpush.bf16.msrb.mxu2 %v10717_v40  ;;  %v11511_v40 = vld [vmem:[#allocation116_spill] sm:$0xff]  ;;  %v11539_v17 = vld [vmem:[#allocation145_spill] sm:$0xff] }
 0x8c4   :  { %4644 = vmatpush.bf16.msra.mxu1 %v10718_v1  ;;  %4683 = vmatpush.bf16.msrb.mxu0 %v10910_v62  ;;  %v11512_v62 = vld [vmem:[#allocation86_spill] sm:$0xff]  ;;  %v11540_v25 = vld [vmem:[#allocation148_spill] sm:$0xff] }
 0x8c5   :  { %v4459_v33 = vadd.f32 %v4427_v22, %v269_v13  ;;  %v11541_v13 = vld [vmem:[#allocation87_spill] sm:$0xff]  ;;  %v11542_v22 = vld [vmem:[#allocation118_spill] sm:$0xff] }
 0x8c7   :  { %v4462_v54 = vmul.f32 0.5, %v4459_v33  ;;  %4606 = vmatpush.bf16.msrb.mxu2 %v10911_v7  ;;  %v11514_v7 = vld [vmem:[#allocation120_spill] sm:$0xff]  ;;  %v11543_v33 = vld [vmem:[#allocation149_spill] sm:$0xff] }
 0x8c8   :  { %4645 = vmatpush.bf16.msra.mxu1 %v10912_v49  ;;  %4684 = vmatpush.bf16.msrb.mxu0 %v10913_v48 }
 0x8c9   :  { %6223 = vtanh.f32 %v4462_v54  ;;  %v11544_v54 = vld [vmem:[#allocation152_spill] sm:$0xff] }
 0x8ca   :  { %v4428_v43 = vpop.f32.mrf.mxu0  ;;  %6225 = vtanh.f32 %v9080_v50  ;;  %v11516_v50 = vld [vmem:[#allocation90_spill] sm:$0xff] }
 0x8cb   :  { %4607 = vmatpush.bf16.msrb.mxu2 %v10723_v45  ;;  %v11545_v43 = vld [vmem:[#allocation91_spill] sm:$0xff] }
 0x8cc   :  { %4646 = vmatpush.bf16.msra.mxu1 %v11510_v6  ;;  %4685 = vmatpush.bf16.msrb.mxu0 %v11511_v40  ;;  %v11548_v6 = vld [vmem:[#allocation156_spill] sm:$0xff]  ;;  %v11549_v40 = vld [vmem:[#allocation95_spill] sm:$0xff] }
 0x8cf   :  { %v6224_v19 = vpop.eup %6223  ;;  %4608 = vmatpush.bf16.msrb.mxu2 %v11512_v62  ;;  %v11551_v62 = vld [vmem:[#allocation157_spill] sm:$0xff] }
 0x8d0   :  { %v4468_v3 = vmul.f32 0.5, %v6224_v19  ;;  %4647 = vmatpush.bf16.msra.mxu1 %v11513_v5  ;;  %4686 = vmatpush.bf16.msrb.mxu0 %v11514_v7  ;;  %v6226_v49 = vpop.eup %6225  ;;  %v11546_v19 = vld [vmem:[#allocation122_spill] sm:$0xff]  ;;  %v11553_v5 = vld [vmem:[#allocation99_spill] sm:$0xff] }
 0x8d1   :  { %v11554_v7 = vld [vmem:[#allocation102_spill] sm:$0xff] }
 0x8d2   :  { %v4471_v1 = vadd.f32 0.5, %v4468_v3  ;;  %v11547_v3 = vld [vmem:[#allocation153_spill] sm:$0xff] }
 0x8d3   :  { %4609 = vmatpush.bf16.msrb.mxu2 %v11516_v50  ;;  %v11559_v50 = vld [vmem:[#allocation164_spill] sm:$0xff] }
 0x8d4   :  { %v4474_v44 = vsub.f32 1.0, %v4471_v1  ;;  %v4480_v28 = vmul.f32 %v4471_v1, %v11515_v0  ;;  %4648 = vmatpush.bf16.msra.mxu1 %v11517_v57  ;;  %4687 = vmatpush.bf16.msrb.mxu0 %v11518_v4  ;;  %v11550_v1 = vld [vmem:[#allocation126_spill] sm:$0xff]  ;;  %v11557_v0 = vld [vmem:[#allocation167_spill] sm:$0xff]  ;;  %v11560_v57 = vld [vmem:[#allocation168_spill] sm:$0xff] }
 0x8d5   :  { %v11561_v4 = vld [vmem:[#allocation107_spill] sm:$0xff] }
 0x8d6   :  { %v4477_v48 = vmul.f32 %v6226_v49, %v4474_v44  ;;  %v11552_v44 = vld [vmem:[#allocation160_spill] sm:$0xff]  ;;  %v11555_v49 = vld [vmem:[#allocation130_spill] sm:$0xff] }
 0x8d7   :  { %4610 = vmatpush.bf16.msrb.mxu2 %v11519_v23  ;;  %v11562_v23 = vld [vmem:[#allocation138_spill] sm:$0xff] }
 0x8d8   :  { %v9164_v45 = vadd.f32 %v4480_v28, %v4477_v48  ;;  %4649 = vmatpush.bf16.msra.mxu1 %v11520_v63  ;;  %4688 = vmatpush.bf16.msrb.mxu0 %v11521_v46  ;;  %v11556_v48 = vld [vmem:[#allocation161_spill] sm:$0xff]  ;;  %v11564_v46 = vld [vmem:[#allocation172_spill] sm:$0xff] }
 0x8d9   :  { %v11558_v28 = vld [vmem:[#allocation133_spill] sm:$0xff] }
 0x8da   :  { %v9170_v11 = vpack.c.bf16 %v9164_v45, %v9164_v45  ;;  %v11563_v63 = vld [vmem:[#allocation169_spill] sm:$0xff] }
 0x8db   :  { %4611 = vmatpush.bf16.msrb.mxu2 %v11523_v16  ;;  %v11566_v16 = vld [vmem:[#allocation142_spill] sm:$0xff] }
 0x8dc   :  { %4521 = vmatmul.bf16.vlgmr.msrb.gmra.mxu3 %v9170_v11  ;;  %4560 = vmatmul.bf16.vlgmr.msra.gmra.mxu2 %v9170_v11 }
 0x8dd   :  { %4599 = vmatmul.bf16.vlgmr.msrb.gmra.mxu1 %v9170_v11  ;;  %4617 = vmatpush.bf16.msrb.mxu3 %v11522_v2  ;;  %v11565_v2 = vld [vmem:[#allocation111_spill] sm:$0xff] }
 0x8de   :  { %4638 = vmatmul.bf16.vlgmr.msra.gmra.mxu0 %v9170_v11  ;;  %4650 = vmatpush.bf16.msra.mxu1 %v11524_v26  ;;  %v11567_v26 = vld [vmem:[#allocation173_spill] sm:$0xff] }
 0x8df   :  { %4689 = vmatpush.bf16.msrb.mxu0 %v11525_v51  ;;  %4656 = vmatpush.bf16.msra.mxu2 %v11526_v36  ;;  %v11568_v51 = vld [vmem:[#allocation176_spill] sm:$0xff]  ;;  %v11569_v36 = vld [vmem:[#allocation115_spill] sm:$0xff] }
 0x8e1   :  { %4618 = vmatpush.bf16.msrb.mxu3 %v11529_v56  ;;  %v11572_v56 = vld [vmem:[#allocation180_spill] sm:$0xff] }
 0x8e2   :  { %4695 = vmatpush.bf16.msrb.mxu1 %v11527_v39  ;;  %v11570_v39 = vld [vmem:[#allocation146_spill] sm:$0xff] }
 0x8e3   :  { %4734 = vmatpush.bf16.msra.mxu0 %v11528_v15  ;;  %4657 = vmatpush.bf16.msra.mxu2 %v11530_v14  ;;  %v11571_v15 = vld [vmem:[#allocation177_spill] sm:$0xff]  ;;  %v11573_v14 = vld [vmem:[#allocation119_spill] sm:$0xff] }
 0x8e5   :  { %4619 = vmatpush.bf16.msrb.mxu3 %v11533_v24  ;;  %v11576_v24 = vld [vmem:[#allocation184_spill] sm:$0xff] }
 0x8e6   :  { %4696 = vmatpush.bf16.msrb.mxu1 %v11531_v10  ;;  %v11574_v10 = vld [vmem:[#allocation150_spill] sm:$0xff] }
 0x8e7   :  { %4735 = vmatpush.bf16.msra.mxu0 %v11532_v60  ;;  %4658 = vmatpush.bf16.msra.mxu2 %v11534_v37  ;;  %v11575_v60 = vld [vmem:[#allocation181_spill] sm:$0xff]  ;;  %v11577_v37 = vld [vmem:[#allocation123_spill] sm:$0xff] }
 0x8e9   :  { %4620 = vmatpush.bf16.msrb.mxu3 %v11537_v52  ;;  %v11580_v52 = vld [vmem:[#allocation188_spill] sm:$0xff] }
 0x8ea   :  { %4697 = vmatpush.bf16.msrb.mxu1 %v11535_v12  ;;  %v11578_v12 = vld [vmem:[#allocation154_spill] sm:$0xff] }
 0x8eb   :  { %4736 = vmatpush.bf16.msra.mxu0 %v11536_v9  ;;  %4659 = vmatpush.bf16.msra.mxu2 %v11538_v38  ;;  %v11579_v9 = vld [vmem:[#allocation185_spill] sm:$0xff]  ;;  %v11581_v38 = vld [vmem:[#allocation127_spill] sm:$0xff] }
 0x8ec   :  { %4573 = vmatmul.bf16.vlgmr.msra.gmra.mxu3 %v9096_v20  ;;  %4612 = vmatmul.bf16.vlgmr.msrb.gmra.mxu2 %v9096_v20 }
 0x8ed   :  { %4621 = vmatpush.bf16.msrb.mxu3 %v11541_v13  ;;  %4651 = vmatmul.bf16.vlgmr.msra.gmra.mxu1 %v9096_v20  ;;  %v11584_v13 = vld [vmem:[#allocation192_spill] sm:$0xff] }
 0x8ee   :  { %4698 = vmatpush.bf16.msrb.mxu1 %v11539_v17  ;;  %4690 = vmatmul.bf16.vlgmr.msrb.gmra.mxu0 %v9096_v20  ;;  %v11582_v17 = vld [vmem:[#allocation158_spill] sm:$0xff] }
 0x8ef   :  { %4737 = vmatpush.bf16.msra.mxu0 %v11540_v25  ;;  %4660 = vmatpush.bf16.msra.mxu2 %v11542_v22  ;;  %v11583_v25 = vld [vmem:[#allocation189_spill] sm:$0xff]  ;;  %v11585_v22 = vld [vmem:[#allocation131_spill] sm:$0xff] }
 0x8f1   :  { %4622 = vmatpush.bf16.msrb.mxu3 %v11545_v43  ;;  %v11588_v43 = vld [vmem:[#allocation193_spill] sm:$0xff] }
 0x8f2   :  { %4699 = vmatpush.bf16.msrb.mxu1 %v11543_v33  ;;  %v11586_v33 = vld [vmem:[#allocation134_spill] sm:$0xff] }
 0x8f3   :  { %4738 = vmatpush.bf16.msra.mxu0 %v11544_v54  ;;  %4661 = vmatpush.bf16.msra.mxu2 %v11546_v19  ;;  %v11587_v54 = vld [vmem:[#allocation162_spill] sm:$0xff]  ;;  %v11589_v19 = vld [vmem:[#allocation199_spill] sm:$0xff] }
 0x8f5   :  { %4623 = vmatpush.bf16.msrb.mxu3 %v11549_v40  ;;  %v11592_v40 = vld [vmem:[#allocation139_spill] sm:$0xff] }
 0x8f6   :  { %4700 = vmatpush.bf16.msrb.mxu1 %v11547_v3  ;;  %v11590_v3 = vld [vmem:[#allocation165_spill] sm:$0xff] }
 0x8f7   :  { %4739 = vmatpush.bf16.msra.mxu0 %v11548_v6  ;;  %4662 = vmatpush.bf16.msra.mxu2 %v11550_v1  ;;  %v11591_v6 = vld [vmem:[#allocation196_spill] sm:$0xff]  ;;  %v11593_v1 = vld [vmem:[#allocation170_spill] sm:$0xff] }
 0x8f9   :  { %4624 = vmatpush.bf16.msrb.mxu3 %v11553_v5 }
 0x8fa   :  { %4701 = vmatpush.bf16.msrb.mxu1 %v11551_v62  ;;  %v11594_v62 = vld [vmem:[#allocation200_spill] sm:$0xff] }
 0x8fb   :  { %4740 = vmatpush.bf16.msra.mxu0 %v11552_v44  ;;  %4663 = vmatpush.bf16.msra.mxu2 %v11555_v49  ;;  %v11596_v49 = vld [vmem:[#allocation174_spill] sm:$0xff] }
 0x8fc   :  { %4625 = vmatmul.bf16.vlgmr.msrb.gmra.mxu3 %v9126_v35 }
 0x8fd   :  { %4669 = vmatpush.bf16.msra.mxu3 %v11554_v7  ;;  %v11595_v7 = vld [vmem:[#allocation143_spill] sm:$0xff] }
 0x8fe   :  { %4702 = vmatpush.bf16.msrb.mxu1 %v11556_v48  ;;  %4664 = vmatmul.bf16.vlgmr.msra.gmra.mxu2 %v9126_v35  ;;  %v11597_v48 = vld [vmem:[#allocation203_spill] sm:$0xff] }
 0x8ff   :  { %4741 = vmatpush.bf16.msra.mxu0 %v11557_v0  ;;  %4708 = vmatpush.bf16.msrb.mxu2 %v11558_v28  ;;  %v11598_v0 = vld [vmem:[#allocation147_spill] sm:$0xff]  ;;  %v11599_v28 = vld [vmem:[#allocation178_spill] sm:$0xff] }
 0x901   :  { %4670 = vmatpush.bf16.msra.mxu3 %v11561_v4  ;;  %4703 = vmatmul.bf16.vlgmr.msrb.gmra.mxu1 %v9126_v35 }
 0x902   :  { %4747 = vmatpush.bf16.msra.mxu1 %v11559_v50  ;;  %4742 = vmatmul.bf16.vlgmr.msra.gmra.mxu0 %v9126_v35  ;;  %v11600_v50 = vld [vmem:[#allocation206_spill] sm:$0xff] }
 0x903   :  { %4786 = vmatpush.bf16.msrb.mxu0 %v11560_v57  ;;  %4709 = vmatpush.bf16.msrb.mxu2 %v11562_v23  ;;  %v11601_v23 = vld [vmem:[#allocation151_spill] sm:$0xff] }
 0x905   :  { %4671 = vmatpush.bf16.msra.mxu3 %v11565_v2  ;;  %v11604_v2 = vld [vmem:[#allocation155_spill] sm:$0xff] }
 0x906   :  { %4748 = vmatpush.bf16.msra.mxu1 %v11563_v63  ;;  %v11602_v63 = vld [vmem:[#allocation182_spill] sm:$0xff] }
 0x907   :  { %4787 = vmatpush.bf16.msrb.mxu0 %v11564_v46  ;;  %4710 = vmatpush.bf16.msrb.mxu2 %v11566_v16  ;;  %v11603_v46 = vld [vmem:[#allocation209_spill] sm:$0xff]  ;;  %v11605_v16 = vld [vmem:[#allocation186_spill] sm:$0xff] }
 0x909   :  { %4672 = vmatpush.bf16.msra.mxu3 %v11569_v36  ;;  %v11608_v36 = vld [vmem:[#allocation190_spill] sm:$0xff] }
 0x90a   :  { %4749 = vmatpush.bf16.msra.mxu1 %v11567_v26  ;;  %v11606_v26 = vld [vmem:[#allocation212_spill] sm:$0xff] }
 0x90b   :  { %4788 = vmatpush.bf16.msrb.mxu0 %v11568_v51  ;;  %4711 = vmatpush.bf16.msrb.mxu2 %v11570_v39  ;;  %v11607_v51 = vld [vmem:[#allocation159_spill] sm:$0xff]  ;;  %v11609_v39 = vld [vmem:[#allocation216_spill] sm:$0xff] }
 0x90d   :  { %4673 = vmatpush.bf16.msra.mxu3 %v11573_v14  ;;  %v11612_v14 = vld [vmem:[#allocation194_spill] sm:$0xff] }
 0x90e   :  { %4750 = vmatpush.bf16.msra.mxu1 %v11571_v15  ;;  %v11610_v15 = vld [vmem:[#allocation163_spill] sm:$0xff] }
 0x90f   :  { %4789 = vmatpush.bf16.msrb.mxu0 %v11572_v56  ;;  %4712 = vmatpush.bf16.msrb.mxu2 %v11574_v10  ;;  %v11611_v56 = vld [vmem:[#allocation166_spill] sm:$0xff]  ;;  %v11613_v10 = vld [vmem:[#allocation220_spill] sm:$0xff] }
 0x911   :  { %4674 = vmatpush.bf16.msra.mxu3 %v11577_v37  ;;  %v11616_v37 = vld [vmem:[#allocation201_spill] sm:$0xff] }
 0x912   :  { %4751 = vmatpush.bf16.msra.mxu1 %v11575_v60  ;;  %v11614_v60 = vld [vmem:[#allocation197_spill] sm:$0xff] }
 0x913   :  { %4790 = vmatpush.bf16.msrb.mxu0 %v11576_v24  ;;  %4713 = vmatpush.bf16.msrb.mxu2 %v11578_v12  ;;  %v11615_v24 = vld [vmem:[#allocation171_spill] sm:$0xff] }
 0x914   :  { %v11617_v12 = vld [vmem:[#allocation175_spill] sm:$0xff] }
 0x915   :  { %4675 = vmatpush.bf16.msra.mxu3 %v11581_v38 }
 0x916   :  { %4752 = vmatpush.bf16.msra.mxu1 %v11579_v9 }
 0x917   :  { %4791 = vmatpush.bf16.msrb.mxu0 %v11580_v52  ;;  %4714 = vmatpush.bf16.msrb.mxu2 %v11582_v17  ;;  %v11618_v17 = vld [vmem:[#allocation204_spill] sm:$0xff] }
 0x919   :  { %4676 = vmatpush.bf16.msra.mxu3 %v11585_v22  ;;  %v11620_v22 = vld [vmem:[#allocation207_spill] sm:$0xff] }
 0x91a   :  { %4753 = vmatpush.bf16.msra.mxu1 %v11583_v25  ;;  %v11619_v25 = vld [vmem:[#allocation179_spill] sm:$0xff] }
 0x91b   :  { %4792 = vmatpush.bf16.msrb.mxu0 %v11584_v13  ;;  %4715 = vmatpush.bf16.msrb.mxu2 %v11587_v54  ;;  %v4496_v44 = vpop.f32.mrf.mxu1  ;;  %v4535_v5 = vpop.f32.mrf.mxu0  ;;  %v11621_v54 = vld [vmem:[#allocation183_spill] sm:$0xff] }
 0x91c   :  { %4677 = vmatmul.bf16.vlgmr.msra.gmra.mxu3 %v9170_v11 }
 0x91d   :  { %4721 = vmatpush.bf16.msrb.mxu3 %v11586_v33 }
 0x91e   :  { %4754 = vmatpush.bf16.msra.mxu1 %v11588_v43  ;;  %4716 = vmatmul.bf16.vlgmr.msrb.gmra.mxu2 %v9170_v11 }
 0x91f   :  { %4793 = vmatpush.bf16.msrb.mxu0 %v11589_v19  ;;  %4760 = vmatpush.bf16.msra.mxu2 %v11590_v3  ;;  %v11623_v3 = vld [vmem:[#allocation187_spill] sm:$0xff] }
 0x921   :  { %4722 = vmatpush.bf16.msrb.mxu3 %v11592_v40  ;;  %4755 = vmatmul.bf16.vlgmr.msra.gmra.mxu1 %v9170_v11  ;;  %v11624_v40 = vld [vmem:[#allocation214_spill] sm:$0xff] }
 0x922   :  { %4799 = vmatpush.bf16.msrb.mxu1 %v11591_v6  ;;  %4794 = vmatmul.bf16.vlgmr.msrb.gmra.mxu0 %v9170_v11 }
 0x923   :  { %4761 = vmatpush.bf16.msra.mxu2 %v11593_v1  ;;  %v4498_v57 = vpop.f32.mrf.mxu1  ;;  %v4537_v4 = vpop.f32.mrf.mxu0  ;;  %v11625_v1 = vld [vmem:[#allocation191_spill] sm:$0xff] }
 0x925   :  { %4723 = vmatpush.bf16.msrb.mxu3 %v11595_v7  ;;  %v11628_v7 = vld [vmem:[#allocation198_spill] sm:$0xff] }
 0x926   :  { %4800 = vmatpush.bf16.msrb.mxu1 %v11594_v62  ;;  %v11626_v62 = vld [vmem:[#allocation218_spill] sm:$0xff] }
 0x927   :  { %4762 = vmatpush.bf16.msra.mxu2 %v11596_v49  ;;  %v11630_v49 = vld [vmem:[#allocation202_spill] sm:$0xff] }
 0x929   :  { %4724 = vmatpush.bf16.msrb.mxu3 %v11598_v0  ;;  %v11631_v0 = vld [vmem:[#allocation205_spill] sm:$0xff] }
 0x92a   :  { %4801 = vmatpush.bf16.msrb.mxu1 %v11597_v48 }
 0x92b   :  { %4763 = vmatpush.bf16.msra.mxu2 %v11599_v28 }
 0x92d   :  { %4725 = vmatpush.bf16.msrb.mxu3 %v11601_v23 }
 0x92e   :  { %4802 = vmatpush.bf16.msrb.mxu1 %v11600_v50  ;;  %v11632_v50 = vld [vmem:[#allocation208_spill] sm:$0xff] }
 0x92f   :  { %4764 = vmatpush.bf16.msra.mxu2 %v11602_v63 }
 0x931   :  { %4726 = vmatpush.bf16.msrb.mxu3 %v11604_v2  ;;  %v11633_v2 = vld [vmem:[#allocation211_spill] sm:$0xff] }
 0x932   :  { %4803 = vmatpush.bf16.msrb.mxu1 %v11603_v46 }
 0x933   :  { %4765 = vmatpush.bf16.msra.mxu2 %v11605_v16 }
 0x935   :  { %4727 = vmatpush.bf16.msrb.mxu3 %v11607_v51 }
 0x936   :  { %4804 = vmatpush.bf16.msrb.mxu1 %v11606_v26  ;;  %v11634_v26 = vld [vmem:[#allocation215_spill] sm:$0xff] }
 0x937   :  { %4766 = vmatpush.bf16.msra.mxu2 %v11608_v36 }
 0x939   :  { %4728 = vmatpush.bf16.msrb.mxu3 %v11610_v15  ;;  %v11636_v15 = vld [vmem:[#allocation213_spill] sm:$0xff] }
 0x93a   :  { %4805 = vmatpush.bf16.msrb.mxu1 %v11609_v39  ;;  %v9309_v39 = vpop.permute.xlu1 %90 }
 0x93b   :  { %4767 = vmatpush.bf16.msra.mxu2 %v11612_v14  ;;  %v4548_v9 = vpop.f32.mrf.mxu1 }
 0x93c   :  { %4729 = vmatmul.bf16.vlgmr.msrb.gmra.mxu3 %v9096_v20  ;;  %v4549_v52 = vadd.f32 %v4548_v9, %v4535_v5  ;;  %v4587_v38 = vpop.f32.mrf.mxu0  ;;  %v11627_v5 = vld [vmem:[#allocation195_spill] sm:$0xff] }
 0x93d   :  { %4773 = vmatpush.bf16.msra.mxu3 %v11611_v56  ;;  %v176_v56 = vmul.f32 %v11636_v15, %v9309_v39 }
 0x93e   :  { %4806 = vmatpush.bf16.msrb.mxu1 %v11613_v10  ;;  %4768 = vmatmul.bf16.vlgmr.msra.gmra.mxu2 %v9096_v20 }
 0x93f   :  { %4812 = vmatpush.bf16.msrb.mxu2 %v11614_v60  ;;  %v11637_v60 = vld [vmem:[#allocation222_spill] sm:$0xff] }
 0x941   :  { %4774 = vmatpush.bf16.msra.mxu3 %v11615_v24  ;;  %4807 = vmatmul.bf16.vlgmr.msrb.gmra.mxu1 %v9096_v20  ;;  %v4509_v13 = vpop.f32.mrf.mxu2  ;;  %v11622_v20 = vld [vmem:[#allocation210_spill] sm:$0xff]  ;;  %v11638_v24 = vld [vmem:[#allocation217_spill] sm:$0xff] }
 0x942   :  { %v4510_v33 = vadd.f32 %v4509_v13, %v4496_v44  ;;  %v11629_v44 = vld [vmem:[#allocation221_spill] sm:$0xff] }
 0x943   :  { %4813 = vmatpush.bf16.msrb.mxu2 %v11616_v37  ;;  %v4550_v43 = vpop.f32.mrf.mxu1  ;;  %v270_v37 = vadd.f32 %v11638_v24, %v176_v56  ;;  %v4903_v24 = vld [vmem:[%s9523_s5 + $0x58] sm:$0xff] }
 0x944   :  { %v4589_v19 = vpop.f32.mrf.mxu0 }
 0x945   :  { %4775 = vmatpush.bf16.msra.mxu3 %v11617_v12 }
 0x947   :  { %4814 = vmatpush.bf16.msrb.mxu2 %v11618_v17 }
 0x949   :  { %4776 = vmatpush.bf16.msra.mxu3 %v11619_v25  ;;  %v4511_v6 = vpop.f32.mrf.mxu2 }
 0x94b   :  { %4815 = vmatpush.bf16.msrb.mxu2 %v11620_v22 }
 0x94d   :  { %4777 = vmatpush.bf16.msra.mxu3 %v11621_v54 }
 0x94f   :  { %4816 = vmatpush.bf16.msrb.mxu2 %v11622_v20 }
 0x951   :  { %4778 = vmatpush.bf16.msra.mxu3 %v11623_v3 }
 0x953   :  { %4817 = vmatpush.bf16.msrb.mxu2 %v11624_v40 }
 0x955   :  { %4779 = vmatpush.bf16.msra.mxu3 %v11625_v1 }
 0x957   :  { %4818 = vmatpush.bf16.msrb.mxu2 %v11626_v62 }
 0x959   :  { %4780 = vmatpush.bf16.msra.mxu3 %v11627_v5 }
 0x95a   :  { %v4600_v48 = vpop.f32.mrf.mxu1 }
 0x95b   :  { %4819 = vmatpush.bf16.msrb.mxu2 %v11629_v44  ;;  %v4639_v28 = vpop.f32.mrf.mxu0 }
 0x95c   :  { %4781 = vmatmul.bf16.vlgmr.msra.gmra.mxu3 %v9126_v35 }
 0x95d   :  { %4825 = vmatpush.bf16.msrb.mxu3 %v11628_v7 }
 0x95e   :  { %4820 = vmatmul.bf16.vlgmr.msrb.gmra.mxu2 %v9126_v35  ;;  %v11635_v35 = vld [vmem:[#allocation219_spill] sm:$0xff] }
 0x95f   :  { %v4522_v57 = vpop.f32.mrf.mxu3  ;;  %v4561_v4 = vpop.f32.mrf.mxu2 }
 0x960   :  { %v4523_v23 = vadd.f32 %v4522_v57, %v4510_v33  ;;  %v4562_v63 = vadd.f32 %v4561_v4, %v4549_v52  ;;  %v4907_v4 = vld [vmem:[%s9523_s5 + $0x78] sm:$0xff] }
 0x961   :  { %4826 = vmatpush.bf16.msrb.mxu3 %v11630_v49  ;;  %4944 = vmatpush.msra.mxu0 %v4907_v4  ;;  %v4921_v4 = vld [vmem:[%s9523_s5 + $0xe8] sm:$0xff] }
 0x962   :  { %v4602_v46 = vpop.f32.mrf.mxu1  ;;  %v4838_v17 = vadd.f32 %v4523_v23, %v270_v37 }
 0x963   :  { %v4641_v16 = vpop.f32.mrf.mxu0 }
 0x964   :  { %v4841_v33 = vmul.f32 0.5, %v4838_v17  ;;  %v4902_v17 = vld [vmem:[%s9523_s5 + $0x50] sm:$0xff] }
 0x965   :  { %4827 = vmatpush.bf16.msrb.mxu3 %v11631_v0  ;;  %v178_v0 = vmul.f32 %v11492_v27, %v9309_v39  ;;  %v4906_v27 = vld [vmem:[%s9523_s5 + $0x70] sm:$0xff] }
 0x966   :  { %6227 = vtanh.f32 %v4841_v33  ;;  %4945 = vmatpush.msra.mxu0 %v4906_v27  ;;  %v4918_v27 = vld [vmem:[%s9523_s5 + $0xd0] sm:$0xff] }
 0x967   :  { %v4524_v51 = vpop.f32.mrf.mxu3  ;;  %v4563_v36 = vpop.f32.mrf.mxu2 }
 0x969   :  { %4828 = vmatpush.bf16.msrb.mxu3 %v11632_v50  ;;  %v11639_v50 = vld [vmem:[#allocation224_spill] sm:$0xff] }
 0x96a   :  { %v4652_v14 = vpop.f32.mrf.mxu1 }
 0x96b   :  { %v4691_v10 = vpop.f32.mrf.mxu0 }
 0x96c   :  { %v6228_v6 = vpop.eup %6227 }
 0x96d   :  { %4829 = vmatpush.bf16.msrb.mxu3 %v11633_v2  ;;  %v4847_v62 = vmul.f32 0.5, %v6228_v6 }
 0x96f   :  { %v4574_v12 = vpop.f32.mrf.mxu3  ;;  %v4613_v52 = vpop.f32.mrf.mxu2 }
 0x970   :  { %v4588_v9 = vadd.f32 %v4587_v38, %v4574_v12 }
 0x971   :  { %4830 = vmatpush.bf16.msrb.mxu3 %v11634_v26 }
 0x972   :  { %v4601_v25 = vadd.f32 %v4600_v48, %v4588_v9  ;;  %v4654_v13 = vpop.f32.mrf.mxu1  ;;  %v4850_v48 = vadd.f32 0.5, %v4847_v62  ;;  %v181_v9 = vmul.f32 %v11503_v18, %v9309_v39 }
 0x973   :  { %v4693_v22 = vpop.f32.mrf.mxu0  ;;  %v11640_v13 = vld [vmem:[#allocation228_spill] sm:$0xff] }
 0x975   :  { %4831 = vmatpush.bf16.msrb.mxu3 %v11635_v35  ;;  %v4905_v35 = vld [vmem:[%s9523_s5 + $0x68] sm:$0xff] }
 0x976   :  { %4946 = vmatpush.msra.mxu0 %v4905_v35  ;;  %v11642_v35 = vld [vmem:[#allocation231_spill] sm:$0xff] }
 0x977   :  { %v4576_v54 = vpop.f32.mrf.mxu3  ;;  %v4615_v43 = vpop.f32.mrf.mxu2 }
 0x979   :  { %4832 = vmatpush.bf16.msrb.mxu3 %v11637_v60 }
 0x97c   :  { %4833 = vmatmul.bf16.vlgmr.msrb.gmra.mxu3 %v9170_v11  ;;  %v177_v11 = vmul.f32 %v11487_v53, %v9309_v39  ;;  %v272_v53 = vadd.f32 %v11495_v30, %v178_v0  ;;  %v4923_v0 = vld [vmem:[%s9523_s5 + $0xf8] sm:$0xff] }
 0x97d   :  { %4964 = vmatpush.msra.mxu1 %v4923_v0 }
 0x97e   :  { %v4704_v19 = vpop.f32.mrf.mxu1  ;;  %v4840_v26 = vadd.f32 %v4601_v25, %v272_v53 }
 0x97f   :  { %v4705_v20 = vadd.f32 %v4704_v19, %v4691_v10  ;;  %v9317_v3 = vpop.f32.mrf.mxu0  ;;  %v4626_v40 = vpop.f32.mrf.mxu3  ;;  %v4901_v19 = vld [vmem:[%s9523_s5 + $0x48] sm:$0xff] }
 0x980   :  { %v4627_v38 = vadd.f32 %v4626_v40, %v4613_v52  ;;  %v4843_v36 = vmul.f32 0.5, %v4840_v26  ;;  %v4919_v26 = vld [vmem:[%s9523_s5 + $0xd8] sm:$0xff] }
 0x981   :  { %v4665_v1 = vpop.f32.mrf.mxu2 }
 0x982   :  { %v4666_v5 = vadd.f32 %v4665_v1, %v4652_v14  ;;  %v4640_v7 = vadd.f32 %v4639_v28, %v4627_v38  ;;  %v271_v28 = vadd.f32 %v11092_v55, %v177_v11  ;;  %v4900_v1 = vld [vmem:[%s9523_s5 + $0x40] sm:$0xff]  ;;  %v4899_v38 = vld [vmem:[%s9523_s5 + $0x38] sm:$0xff] }
 0x983   :  { %v4895_v11 = vld [vmem:[%s9523_s5 + $0x18] sm:$0xff] }
 0x984   :  { %v4853_v57 = vadd.f32 %v4640_v7, %v11639_v50  ;;  %v4839_v16 = vadd.f32 %v4562_v63, %v271_v28  ;;  %v4904_v63 = vld [vmem:[%s9523_s5 + $0x60] sm:$0xff]  ;;  %v4898_v7 = vld [vmem:[%s9523_s5 + $0x30] sm:$0xff] }
 0x985   :  { %4947 = vmatpush.msra.mxu0 %v4904_v63  ;;  %v4892_v50 = vld [vmem:[%s9523_s5] sm:$0xff]  ;;  %v4917_v63 = vld [vmem:[%s9523_s5 + $0xc8] sm:$0xff] }
 0x986   :  { %v4706_v44 = vpop.f32.mrf.mxu1  ;;  %v9327_v23 = vmul.f32 %v4853_v57, %v4850_v48  ;;  %v4842_v51 = vmul.f32 0.5, %v4839_v16  ;;  %v4893_v48 = vld [vmem:[%s9523_s5 + $0x8] sm:$0xff]  ;;  %v4922_v57 = vld [vmem:[%s9523_s5 + $0xf0] sm:$0xff] }
 0x987   :  { %v4745_v49 = vpop.f32.mrf.mxu0  ;;  %v4628_v46 = vpop.f32.mrf.mxu3  ;;  %4948 = vmatpush.msra.mxu0 %v4903_v24  ;;  %v4896_v44 = vld [vmem:[%s9523_s5 + $0x20] sm:$0xff]  ;;  %4965 = vmatpush.msra.mxu1 %v4922_v57 }
 0x988   :  { %6229 = vtanh.f32 %v4842_v51  ;;  %v4894_v49 = vld [vmem:[%s9523_s5 + $0x10] sm:$0xff]  ;;  %v4920_v46 = vld [vmem:[%s9523_s5 + $0xe0] sm:$0xff] }
 0x989   :  { %v4667_v2 = vpop.f32.mrf.mxu2  ;;  %6231 = vtanh.f32 %v4843_v36  ;;  %4949 = vmatpush.msra.mxu0 %v4902_v17  ;;  %4966 = vmatpush.msra.mxu1 %v4921_v4  ;;  %v4913_v17 = vld [vmem:[%s9523_s5 + $0xa8] sm:$0xff]  ;;  %v180_v4 = vmul.f32 %v10512_v34, %v9309_v39 }
 0x98a   :  { %v11641_v2 = vld [vmem:[#allocation230_spill] sm:$0xff] }
 0x98b   :  { %4950 = vmatpush.msra.mxu0 %v4901_v19  ;;  %v182_v53 = vmul.f32 %v11641_v2, %v9309_v39  ;;  %4967 = vmatpush.msra.mxu1 %v4920_v46  ;;  %v4909_v19 = vld [vmem:[%s9523_s5 + $0x88] sm:$0xff]  ;;  %v4931_v2 = vld [vmem:[%s9523_s5 + $0x138] sm:$0xff] }
 0x98c   :  { %v4929_v34 = vld [vmem:[%s9523_s5 + $0x128] sm:$0xff] }
 0x98d   :  { %4951 = vmatpush.msra.mxu0 %v4900_v1  ;;  %4968 = vmatpush.msra.mxu1 %v4919_v26 }
 0x98e   :  { %v6230_v55 = vpop.eup %6229 }
 0x98f   :  { %v6232_v56 = vpop.eup %6231  ;;  %v4848_v14 = vmul.f32 0.5, %v6230_v55  ;;  %4952 = vmatpush.msra.mxu0 %v4899_v38  ;;  %v276_v55 = vadd.f32 %v11642_v35, %v182_v53  ;;  %4969 = vmatpush.msra.mxu1 %v4918_v27  ;;  %v4937_v38 = vld [vmem:[%s9523_s5 + $0x168] sm:$0xff]  ;;  %v4927_v27 = vld [vmem:[%s9523_s5 + $0x118] sm:$0xff] }
 0x990   :  { %v4849_v60 = vmul.f32 0.5, %v6232_v56 }
 0x991   :  { %v4851_v25 = vadd.f32 0.5, %v4848_v14  ;;  %4953 = vmatpush.msra.mxu0 %v4898_v7  ;;  %v179_v14 = vmul.f32 %v11509_v41, %v9309_v39  ;;  %4970 = vmatpush.msra.mxu1 %v4917_v63  ;;  %v4914_v41 = vld [vmem:[%s9523_s5 + $0xb0] sm:$0xff]  ;;  %v4924_v63 = vld [vmem:[%s9523_s5 + $0x100] sm:$0xff] }
 0x992   :  { %v4852_v33 = vadd.f32 0.5, %v4849_v60  ;;  %v4916_v60 = vld [vmem:[%s9523_s5 + $0xc0] sm:$0xff] }
 0x993   :  { %4971 = vmatpush.msra.mxu1 %v4916_v60 }
 0x99e   :  { %v9337_v15 = vpop.f32.mrf.mxu1 }
 0x99f   :  { %v9339_v30 = vpop.f32.mrf.mxu0  ;;  %v4678_v10 = vpop.f32.mrf.mxu3 }
 0x9a0   :  { %v4679_v37 = vadd.f32 %v4678_v10, %v4666_v5 }
 0x9a1   :  { %v4717_v12 = vpop.f32.mrf.mxu2 }
 0x9a2   :  { %v4718_v52 = vadd.f32 %v4717_v12, %v4705_v20  ;;  %v4854_v22 = vadd.f32 %v4679_v37, %v11640_v13  ;;  %v275_v20 = vadd.f32 %v11505_v31, %v181_v9  ;;  %v4897_v31 = vld [vmem:[%s9523_s5 + $0x28] sm:$0xff]  ;;  %v273_v12 = vadd.f32 %v10509_v21, %v179_v14 }
 0x9a3   :  { %4954 = vmatpush.msra.mxu0 %v4897_v31  ;;  %v4935_v31 = vld [vmem:[%s9523_s5 + $0x158] sm:$0xff] }
 0x9a4   :  { %v4855_v54 = vadd.f32 %v4718_v52, %v11504_v58  ;;  %v9357_v6 = vmul.f32 %v4854_v22, %v4851_v25  ;;  %v4859_v52 = vadd.f32 %v9327_v23, %v273_v12  ;;  %v4912_v25 = vld [vmem:[%s9523_s5 + $0xa0] sm:$0xff]  ;;  %v4911_v22 = vld [vmem:[%s9523_s5 + $0x98] sm:$0xff] }
 0x9a5   :  { %4955 = vmatpush.msra.mxu0 %v4896_v44 }
 0x9a6   :  { %v4758_v43 = vpop.f32.mrf.mxu1  ;;  %v4858_v40 = vmul.f32 %v4855_v54, %v4852_v33  ;;  %v4910_v33 = vld [vmem:[%s9523_s5 + $0x90] sm:$0xff]  ;;  %v4939_v54 = vld [vmem:[%s9523_s5 + $0x178] sm:$0xff] }
 0x9a7   :  { %v4797_v18 = vpop.f32.mrf.mxu0  ;;  %v4680_v58 = vpop.f32.mrf.mxu3  ;;  %4956 = vmatpush.msra.mxu0 %v4895_v11  ;;  %4984 = vmatpush.msra.mxu2 %v4939_v54  ;;  %v4934_v11 = vld [vmem:[%s9523_s5 + $0x150] sm:$0xff] }
 0x9a8   :  { %v9363_v62 = vadd.f32 %v4858_v40, %v275_v20  ;;  %v4938_v20 = vld [vmem:[%s9523_s5 + $0x170] sm:$0xff]  ;;  %v4908_v40 = vld [vmem:[%s9523_s5 + $0x80] sm:$0xff] }
 0x9a9   :  { %v4719_v5 = vpop.f32.mrf.mxu2  ;;  %4957 = vmatpush.msra.mxu0 %v4894_v49  ;;  %4985 = vmatpush.msra.mxu2 %v4938_v20 }
 0x9aa   :  { %v4936_v5 = vld [vmem:[%s9523_s5 + $0x160] sm:$0xff] }
 0x9ab   :  { %4958 = vmatpush.msra.mxu0 %v4893_v48  ;;  %4986 = vmatpush.msra.mxu2 %v4937_v38  ;;  %v4933_v48 = vld [vmem:[%s9523_s5 + $0x148] sm:$0xff] }
 0x9ad   :  { %4959 = vmatpush.msra.mxu0 %v4892_v50  ;;  %4987 = vmatpush.msra.mxu2 %v4936_v5 }
 0x9af   :  { %4988 = vmatpush.msra.mxu2 %v4935_v31 }
 0x9b1   :  { %4989 = vmatpush.msra.mxu2 %v4934_v11 }
 0x9b3   :  { %4990 = vmatpush.msra.mxu2 %v4933_v48 }
 0x9be   :  { %v9398_v28 = vpop.f32.mrf.mxu1 }
 0x9bf   :  { %v4730_v16 = vpop.f32.mrf.mxu3 }
 0x9c0   :  { %v4744_v51 = vadd.f32 %v9317_v3, %v4730_v16  ;;  %v274_v16 = vadd.f32 %v10515_v29, %v180_v4 }
 0x9c1   :  { %v4769_v36 = vpop.f32.mrf.mxu2 }
 0x9c2   :  { %v4757_v56 = vadd.f32 %v9337_v15, %v4744_v51  ;;  %v4915_v15 = vld [vmem:[%s9523_s5 + $0xb8] sm:$0xff]  ;;  %v4860_v26 = vadd.f32 %v9357_v6, %v274_v16 }
 0x9c3   :  { %4972 = vmatpush.msra.mxu1 %v4915_v15 }
 0x9c4   :  { %v4865_v10 = vadd.f32 %v4757_v56, %v276_v55  ;;  %v4926_v55 = vld [vmem:[%s9523_s5 + $0x110] sm:$0xff]  ;;  %v4925_v56 = vld [vmem:[%s9523_s5 + $0x108] sm:$0xff] }
 0x9c5   :  { %4973 = vmatpush.msra.mxu1 %v4914_v41 }
 0x9c6   :  { %v4810_v3 = vpop.f32.mrf.mxu1  ;;  %v4868_v24 = vmul.f32 0.5, %v4865_v10 }
 0x9c7   :  { %v4732_v37 = vpop.f32.mrf.mxu3  ;;  %4974 = vmatpush.msra.mxu1 %v4913_v17 }
 0x9c8   :  { %6233 = vtanh.f32 %v4868_v24  ;;  %v184_v37 = vmul.f32 %v9131_v47, %v9309_v39 }
 0x9c9   :  { %v4771_v9 = vpop.f32.mrf.mxu2  ;;  %6235 = vtanh.f32 %v4859_v52  ;;  %4975 = vmatpush.msra.mxu1 %v4912_v25 }
 0x9ca   :  { %v278_v9 = vadd.f32 %v9144_v8, %v184_v37  ;;  %v6100_v8 = vld [vmem:[%s9524_s6] ss:$0 sm:$0xff] }
 0x9cb   :  { %4976 = vmatpush.msra.mxu1 %v4911_v22 }
 0x9cd   :  { %4977 = vmatpush.msra.mxu1 %v4910_v33 }
 0x9ce   :  { %v6234_v21 = vpop.eup %6233 }
 0x9cf   :  { %v4874_v13 = vmul.f32 0.5, %v6234_v21  ;;  %v6236_v18 = vpop.eup %6235  ;;  %4978 = vmatpush.msra.mxu1 %v4909_v19 }
 0x9d1   :  { %v4877_v23 = vadd.f32 0.5, %v4874_v13  ;;  %4979 = vmatpush.msra.mxu1 %v4908_v40 }
 0x9d3   :  { %v4880_v43 = vsub.f32 1.0, %v4877_v23  ;;  %v4886_v58 = vmul.f32 %v4877_v23, %v9092_v42  ;;  %v183_v42 = vmul.f32 %v10510_v32, %v9309_v39  ;;  %v4932_v32 = vld [vmem:[%s9523_s5 + $0x140] sm:$0xff] }
 0x9d4   :  { %4991 = vmatpush.msra.mxu2 %v4932_v32 }
 0x9d5   :  { %v4883_v1 = vmul.f32 %v6236_v18, %v4880_v43  ;;  %v277_v0 = vadd.f32 %v10511_v59, %v183_v42 }
 0x9d6   :  { %4992 = vmatpush.msra.mxu2 %v4931_v2 }
 0x9d7   :  { %v4889_v7 = vadd.f32 %v4886_v58, %v4883_v1 }
 0x9d9   :  { %4960 = vmatmul.f32.vlgmr.msra.gmra.mxu0 %v4889_v7 }
 0x9df   :  { %v4782_v44 = vpop.f32.mrf.mxu3 }
 0x9e0   :  { %v4783_v49 = vadd.f32 %v4782_v44, %v4769_v36  ;;  %v4928_v36 = vld [vmem:[%s9523_s5 + $0x120] sm:$0xff] }
 0x9e1   :  { %v4821_v57 = vpop.f32.mrf.mxu2 }
 0x9e2   :  { %v4796_v50 = vadd.f32 %v9339_v30, %v4783_v49  ;;  %v4930_v30 = vld [vmem:[%s9523_s5 + $0x130] sm:$0xff]  ;;  %v4822_v15 = vadd.f32 %v4821_v57, %v9398_v28 }
 0x9e3   :  { %4993 = vmatpush.msra.mxu2 %v4930_v30 }
 0x9e4   :  { %v4866_v46 = vadd.f32 %v4796_v50, %v277_v0 }
 0x9e5   :  { %4994 = vmatpush.msra.mxu2 %v4929_v34 }
 0x9e6   :  { %v4869_v53 = vmul.f32 0.5, %v4866_v46 }
 0x9e7   :  { %v4784_v59 = vpop.f32.mrf.mxu3  ;;  %4995 = vmatpush.msra.mxu2 %v4928_v36 }
 0x9e8   :  { %6237 = vtanh.f32 %v4869_v53 }
 0x9e9   :  { %v4823_v51 = vpop.f32.mrf.mxu2  ;;  %6239 = vtanh.f32 %v4860_v26  ;;  %4996 = vmatpush.msra.mxu2 %v4927_v27 }
 0x9eb   :  { %4997 = vmatpush.msra.mxu2 %v4926_v55 }
 0x9ed   :  { %4998 = vmatpush.msra.mxu2 %v4925_v56 }
 0x9ee   :  { %v6238_v29 = vpop.eup %6237 }
 0x9ef   :  { %v4875_v35 = vmul.f32 0.5, %v6238_v29  ;;  %v6240_v10 = vpop.eup %6239  ;;  %4999 = vmatpush.msra.mxu2 %v4924_v63 }
 0x9f1   :  { %v4878_v6 = vadd.f32 0.5, %v4875_v35 }
 0x9f3   :  { %v4881_v14 = vsub.f32 1.0, %v4878_v6  ;;  %v4887_v60 = vmul.f32 %v4878_v6, %v9120_v61 }
 0x9f5   :  { %v4884_v3 = vmul.f32 %v6240_v10, %v4881_v14 }
 0x9f7   :  { %v4890_v24 = vadd.f32 %v4887_v60, %v4884_v3 }
 0x9f9   :  { %4980 = vmatmul.f32.vlgmr.msra.gmra.mxu1 %v4890_v24 }
 0x9ff   :  { %v4834_v12 = vpop.f32.mrf.mxu3 }
 0xa00   :  { %v4835_v41 = vadd.f32 %v4834_v12, %v4822_v15 }
 0xa02   :  { %v4867_v52 = vadd.f32 %v4835_v41, %v278_v9 }
 0xa04   :  { %v4870_v17 = vmul.f32 0.5, %v4867_v52 }
 0xa06   :  { %6241 = vtanh.f32 %v4870_v17 }
 0xa07   :  { %v4836_v25 = vpop.f32.mrf.mxu3  ;;  %6243 = vtanh.f32 %v9363_v62 }
 0xa0c   :  { %v6242_v21 = vpop.eup %6241 }
 0xa0d   :  { %v4876_v13 = vmul.f32 0.5, %v6242_v21  ;;  %v6244_v23 = vpop.eup %6243 }
 0xa0f   :  { %v4879_v61 = vadd.f32 0.5, %v4876_v13 }
 0xa11   :  { %v4882_v22 = vsub.f32 1.0, %v4879_v61  ;;  %v4888_v47 = vmul.f32 %v4879_v61, %v9164_v45 }
 0xa13   :  { %v4885_v33 = vmul.f32 %v6244_v23, %v4882_v22 }
 0xa15   :  { %v4891_v39 = vadd.f32 %v4888_v47, %v4885_v33 }
 0xa17   :  { %5000 = vmatmul.f32.vlgmr.msra.gmra.mxu2 %v4891_v39 }
 0xa56   :  { %v4961_v28 = vpop.f32.mrf.mxu0 }
 0xa57   :  { %v4962_v43 = vadd.f32 %v6100_v8, %v4961_v28 }
 0xa76   :  { %v4981_v54 = vpop.f32.mrf.mxu1 }
 0xa77   :  { %v4982_v19 = vadd.f32 %v4981_v54, %v4962_v43 }
 0xa9a   :  { %v5001_v18 = vpop.f32.mrf.mxu2 }
 0xa9b   :  { %v5002_v62 = vadd.f32 %v5001_v18, %v4982_v19 }
 0xa9d   :  { %5005 = vst.msk [vmem:[%s9525_s7] sm:$0xff] %vm5004_vm0, %v5002_v62 }
 0xa9e   :  { %5010 = vsyncpa [#allocation3], 1 }

</bundles_post_ra>
